<compile_context>
chip_gen: v6e
topology: v6e:2x2x1
jax: 0.10.0
libtpu: 0.0.40
codegen_flags: <defaults>
</compile_context>

<pallas_src>
import functools
import math

import jax
import jax.numpy as jnp
from jax import lax
from jax.experimental import pallas as pl
from jax.experimental.pallas import tpu as pltpu

F32 = jnp.float32

# Model hyper-parameters (small, consistent with the module).
PLANES = 64          # Block(3, 64)
CP = 128             # lane-padded channel width used inside Pallas kernels
NUM_CLASSES = 1      # single object tracking
HIDDEN = 128         # featurefusion_network.d_model
NUM_QUERIES = 16     # settings.vector_num (query_embed_dim)
NUM_CHANNELS = 64    # backbone.num_channels (stand-in)
NCP = 128            # lane-padded backbone channel width
PATCH = 8            # patch size of the backbone stand-in


# --------------------------------------------------------------------------
# small helpers (wrapper-side layout plumbing only)
# --------------------------------------------------------------------------
def _round_up(x, m):
    return (x + m - 1) // m * m


def _full(shape):
    nd = len(shape)
    return pl.BlockSpec(shape, lambda *_, nd=nd: (0,) * nd)


def _split_rows(x, rows):
    outs, off = [], 0
    for r in rows:
        outs.append(x[off:off + r])
        off += r
    return outs


def _extract_patches(x, kh, kw, stride, pad):
    """im2col: NHWC -> [B, Ho, Wo, kh*kw*C] (tap-major, channel-minor)."""
    B, H, W, C = x.shape
    xp = jnp.pad(x, ((0, 0), (pad, pad), (pad, pad), (0, 0)))
    Ho = (H + 2 * pad - kh) // stride + 1
    Wo = (W + 2 * pad - kw) // stride + 1
    cols = [xp[:, dy:dy + stride * Ho:stride, dx:dx + stride * Wo:stride, :]
            for dy in range(kh) for dx in range(kw)]
    pat = jnp.stack(cols, axis=3)                      # [B, Ho, Wo, T, C]
    return pat.reshape(B, Ho, Wo, kh * kw * C), Ho, Wo


def _extract_pool_taps(x, k, stride, pad):
    """maxpool taps: NHWC -> [k*k, B*Ho*Wo, C] (spatial padding = -inf)."""
    B, H, W, C = x.shape
    xp = jnp.pad(x, ((0, 0), (pad, pad), (pad, pad), (0, 0)),
                 constant_values=-jnp.inf)
    Ho = (H + 2 * pad - k) // stride + 1
    Wo = (W + 2 * pad - k) // stride + 1
    taps = jnp.stack(
        [xp[:, dy:dy + stride * Ho:stride, dx:dx + stride * Wo:stride, :]
         for dy in range(k) for dx in range(k)], axis=0)
    return taps.reshape(k * k, B * Ho * Wo, C), Ho, Wo


# --------------------------------------------------------------------------
# Kernel 1: branch-stacked (im2col) matmul + per-channel affine (folded BN) + act
# --------------------------------------------------------------------------
def _mm_affine_kernel(x_ref, w_ref, s_ref, b_ref, o_ref, *, act):
    y = jnp.dot(x_ref[0], w_ref[0], preferred_element_type=jnp.float32)
    y = y * s_ref[0] + b_ref[0]
    if act == "relu":
        y = jnp.maximum(y, 0.0)
    o_ref[0] = y


def mm_affine_stacked(x, w, scale, bias, act="none", tile_r=1024):
    """y[g] = act((x[g] @ w[g]) * scale[g] + bias[g]).

    x: [G, R, K], w: [G, K, C], scale/bias: [G, C] -> [G, R, C].
    Grid = (branch, row-tile); K zero-padded to a 128 multiple for lane-dense
    loads, C is expected to already be a 128 multiple (lane-dense stores).
    """
    G, R, K = x.shape
    C = w.shape[2]
    Kp = _round_up(K, 128)
    if Kp != K:
        x = jnp.pad(x, ((0, 0), (0, 0), (0, Kp - K)))
        w = jnp.pad(w, ((0, 0), (0, Kp - K), (0, 0)))
    Rp = _round_up(R, 8)
    tr = Rp if Rp <= tile_r else tile_r
    Rp = _round_up(Rp, tr)
    if Rp != R:
        x = jnp.pad(x, ((0, 0), (0, Rp - R), (0, 0)))
    out = pl.pallas_call(
        functools.partial(_mm_affine_kernel, act=act),
        grid=(G, Rp // tr),
        in_specs=[pl.BlockSpec((1, tr, Kp), lambda g, i: (g, i, 0)),
                  pl.BlockSpec((1, Kp, C), lambda g, i: (g, 0, 0)),
                  pl.BlockSpec((1, 1, C), lambda g, i: (g, 0, 0)),
                  pl.BlockSpec((1, 1, C), lambda g, i: (g, 0, 0))],
        out_specs=pl.BlockSpec((1, tr, C), lambda g, i: (g, i, 0)),
        out_shape=jax.ShapeDtypeStruct((G, Rp, C), F32),
        compiler_params=pltpu.CompilerParams(
            dimension_semantics=("parallel", "parallel")),
        cost_estimate=pl.CostEstimate(
            flops=2 * G * Rp * Kp * C,
            transcendentals=0,
            bytes_accessed=4 * G * (Rp * Kp + Kp * C + 2 * C + Rp * C)),
    )(x, w, scale.reshape(G, 1, C), bias.reshape(G, 1, C))
    return out[:, :R]


# --------------------------------------------------------------------------
# Kernel 2: 9-tap max (MaxPool2d 3x3 / stride 2 / pad 1), row-tiled
# --------------------------------------------------------------------------
def _max9_kernel(t_ref, o_ref):
    acc = t_ref[0]
    for i in range(1, t_ref.shape[0]):
        acc = jnp.maximum(acc, t_ref[i])
    o_ref[...] = acc


def maxpool_taps(taps, tile_r=512):
    T, R, C = taps.shape
    Rp = _round_up(R, 8)
    tr = Rp if Rp <= tile_r else tile_r
    Rp = _round_up(Rp, tr)
    if Rp != R:
        taps = jnp.pad(taps, ((0, 0), (0, Rp - R), (0, 0)),
                       constant_values=-jnp.inf)
    out = pl.pallas_call(
        _max9_kernel,
        grid=(Rp // tr,),
        in_specs=[pl.BlockSpec((T, tr, C), lambda i: (0, i, 0))],
        out_specs=pl.BlockSpec((tr, C), lambda i: (i, 0)),
        out_shape=jax.ShapeDtypeStruct((Rp, C), F32),
        compiler_params=pltpu.CompilerParams(
            dimension_semantics=("parallel",)),
    )(taps)
    return out[:R]


# --------------------------------------------------------------------------
# Kernel 3: GAP + SE head (1x1 convs) + sigmoid gate + early fusion rgb + r*d
# --------------------------------------------------------------------------
def _se_fuse_kernel(rf_ref, df_ref, w1_ref, b1_ref, w2_ref, b2_ref,
                    rgb_ref, d_ref, fused_ref, r_ref):
    gr = jnp.mean(rf_ref[...], axis=1)                 # GAP rgb   [B, CP]
    gd = jnp.mean(df_ref[...], axis=1)                 # GAP depth [B, CP]
    C = gr.shape[1]
    w1 = w1_ref[...]                                   # [2*CP, 8]
    h = (jnp.dot(gr, w1[:C, :], preferred_element_type=jnp.float32)
         + jnp.dot(gd, w1[C:, :], preferred_element_type=jnp.float32)
         + b1_ref[...])
    h = jnp.maximum(h, 0.0)                            # [B, 8]
    r = jax.nn.sigmoid(jnp.sum(h * w2_ref[...], axis=-1, keepdims=True)
                       + b2_ref[...])                  # [B, 1]
    r_ref[...] = r
    fused_ref[...] = rgb_ref[...] + r * d_ref[...]     # early fusion


def _se_fuse_call(rf, df, rgb2d, d2d, se_p):
    B, S2, C = rf.shape
    N = rgb2d.shape[1]
    fused, r = pl.pallas_call(
        _se_fuse_kernel,
        grid=(1,),
        in_specs=[_full((B, S2, C)), _full((B, S2, C)),
                  _full((2 * C, 8)), _full((1, 8)), _full((1, 8)), _full((1, 1)),
                  _full((B, N)), _full((B, N))],
        out_specs=(_full((B, N)), _full((B, 1))),
        out_shape=(jax.ShapeDtypeStruct((B, N), F32),
                   jax.ShapeDtypeStruct((B, 1), F32)),
    )(rf, df, se_p['w1'], se_p['b1'], se_p['w2row'], se_p['b2'], rgb2d, d2d)
    return fused, r


# --------------------------------------------------------------------------
# Kernel 4: fused backbone patch-embed (+ReLU) + input_proj (two matmuls)
# --------------------------------------------------------------------------
def _embed_proj_kernel(x_ref, w1_ref, b1_ref, w2_ref, b2_ref, o_ref):
    h = jnp.dot(x_ref[...], w1_ref[...],
                preferred_element_type=jnp.float32) + b1_ref[...]
    h = jnp.maximum(h, 0.0)
    o_ref[...] = (jnp.dot(h, w2_ref[...], preferred_element_type=jnp.float32)
                  + b2_ref[...])


def embed_proj(x, w1, b1, w2, b2, tile_r=1024):
    R, K = x.shape
    C1 = w1.shape[1]
    C2 = w2.shape[1]
    Kp = _round_up(K, 128)
    if Kp != K:
        x = jnp.pad(x, ((0, 0), (0, Kp - K)))
        w1 = jnp.pad(w1, ((0, Kp - K), (0, 0)))
    Rp = _round_up(R, 8)
    tr = Rp if Rp <= tile_r else tile_r
    Rp = _round_up(Rp, tr)
    if Rp != R:
        x = jnp.pad(x, ((0, Rp - R), (0, 0)))
    out = pl.pallas_call(
        _embed_proj_kernel,
        grid=(Rp // tr,),
        in_specs=[pl.BlockSpec((tr, Kp), lambda i: (i, 0)),
                  pl.BlockSpec((Kp, C1), lambda i: (0, 0)),
                  pl.BlockSpec((1, C1), lambda i: (0, 0)),
                  pl.BlockSpec((C1, C2), lambda i: (0, 0)),
                  pl.BlockSpec((1, C2), lambda i: (0, 0))],
        out_specs=pl.BlockSpec((tr, C2), lambda i: (i, 0)),
        out_shape=jax.ShapeDtypeStruct((Rp, C2), F32),
        compiler_params=pltpu.CompilerParams(
            dimension_semantics=("parallel",)),
        cost_estimate=pl.CostEstimate(
            flops=2 * Rp * (Kp * C1 + C1 * C2),
            transcendentals=0,
            bytes_accessed=4 * (Rp * Kp + Kp * C1 + C1 * C2
                                + C1 + C2 + Rp * C2)),
    )(x, w1, b1.reshape(1, C1), w2, b2.reshape(1, C2))
    return out[:R]


# --------------------------------------------------------------------------
# Kernel 5: cross-attention (featurefusion_network stand-in)
# --------------------------------------------------------------------------
def _xattn_kernel(q_ref, kv_ref, pos_ref, o_ref, *, scale):
    q = q_ref[...]                                     # [Q, D]
    kv = kv_ref[0]                                     # [S, D]
    k = kv + pos_ref[0]
    s = jnp.einsum('qd,kd->qk', q, k,
                   preferred_element_type=jnp.float32) * scale
    s = s - jnp.max(s, axis=-1, keepdims=True)
    p = jnp.exp(s)
    p = p / jnp.sum(p, axis=-1, keepdims=True)
    o_ref[0] = jnp.einsum('qk,kd->qd', p, kv,
                          preferred_element_type=jnp.float32)


def _feature_fusion(proj_t, pos_t, proj_s, pos_s, queries):
    # TODO(synk): the real featurefusion_network (transformer variant) is an
    # injected module not defined in the spec; one cross-attention layer from
    # the query embeddings to template+search features is used as a stand-in.
    B, _, D = proj_t.shape
    kv = jnp.concatenate([proj_t, proj_s], axis=1)     # [B, S, D]
    pos = jnp.concatenate([pos_t, pos_s], axis=1)
    S = kv.shape[1]
    Q = queries.shape[0]
    hs = pl.pallas_call(
        functools.partial(_xattn_kernel, scale=1.0 / math.sqrt(D)),
        grid=(B,),
        in_specs=[pl.BlockSpec((Q, D), lambda b: (0, 0)),
                  pl.BlockSpec((1, S, D), lambda b: (b, 0, 0)),
                  pl.BlockSpec((1, S, D), lambda b: (b, 0, 0))],
        out_specs=pl.BlockSpec((1, Q, D), lambda b: (b, 0, 0)),
        out_shape=jax.ShapeDtypeStruct((B, Q, D), F32),
        compiler_params=pltpu.CompilerParams(
            dimension_semantics=("parallel",)),
    )(queries, kv, pos)
    return hs[None]                                    # [num_layers=1, B, Q, D]


# --------------------------------------------------------------------------
# Kernel 6: fused prediction heads (class_embed + bbox_embed, 3-layer MLPs)
# --------------------------------------------------------------------------
def _heads_kernel(x_ref, wc1, bc1, wc2, bc2, wc3, bc3,
                  wb1, bb1, wb2, bb2, wb3, bb3, logit_ref, box_ref):
    x = x_ref[...]

    def lin(v, w, b):
        return jnp.dot(v, w[...], preferred_element_type=jnp.float32) + b[...]

    h = jnp.maximum(lin(x, wc1, bc1), 0.0)
    h = jnp.maximum(lin(h, wc2, bc2), 0.0)
    logit_ref[...] = lin(h, wc3, bc3)

    g = jnp.maximum(lin(x, wb1, bb1), 0.0)
    g = jnp.maximum(lin(g, wb2, bb2), 0.0)
    box_ref[...] = jax.nn.sigmoid(lin(g, wb3, bb3))


def _prediction_heads(hs_last, p):
    B, Q, D = hs_last.shape
    x = hs_last.reshape(B * Q, D)
    nc = p['wc3'].shape[1]
    logits, boxes = pl.pallas_call(
        _heads_kernel,
        grid=(1,),
        in_specs=[_full((B * Q, D)),
                  _full((D, D)), _full((1, D)), _full((D, D)), _full((1, D)),
                  _full((D, nc)), _full((1, nc)),
                  _full((D, D)), _full((1, D)), _full((D, D)), _full((1, D)),
                  _full((D, 4)), _full((1, 4))],
        out_specs=(_full((B * Q, nc)), _full((B * Q, 4))),
        out_shape=(jax.ShapeDtypeStruct((B * Q, nc), F32),
                   jax.ShapeDtypeStruct((B * Q, 4), F32)),
        cost_estimate=pl.CostEstimate(
            flops=2 * B * Q * D * (4 * D + nc + 4),
            transcendentals=B * Q * 4,
            bytes_accessed=4 * (B * Q * D + 4 * D * D + D * (nc + 4))),
    )(x,
      p['wc1'], p['bc1'].reshape(1, D), p['wc2'], p['bc2'].reshape(1, D),
      p['wc3'], p['bc3'].reshape(1, nc),
      p['wb1'], p['bb1'].reshape(1, D), p['wb2'], p['bb2'].reshape(1, D),
      p['wb3'], p['bb3'].reshape(1, 4))
    return logits.reshape(B, Q, nc), boxes.reshape(B, Q, 4)


# --------------------------------------------------------------------------
# Param re-packing (canonical -> lane-padded Pallas form). All pads are zeros,
# so padded channels carry exact zeros through conv/pool/GAP/SE.
# --------------------------------------------------------------------------
def _prep_block(bp):
    c = PLANES
    w1 = jnp.pad(bp['conv1_w'].reshape(-1, c), ((0, 0), (0, CP - c)))
    s1 = jnp.pad(bp['bn1_scale'], (0, CP - c))
    b1 = jnp.pad(bp['bn1_bias'], (0, CP - c))
    w2 = jnp.pad(bp['conv2_w'],
                 ((0, 0), (0, 0), (0, CP - c), (0, CP - c))).reshape(-1, CP)
    s2 = jnp.pad(bp['bn2_scale'], (0, CP - c))
    b2 = jnp.pad(bp['bn2_bias'], (0, CP - c))
    return dict(w1=w1, s1=s1, b1=b1, w2=w2, s2=s2, b2=b2)


def _prep_se(se):
    w1 = se['w1']                                         # [2*PLANES, 8]
    w1_p = jnp.zeros((2 * CP, 8), F32)
    w1_p = w1_p.at[:PLANES].set(w1[:PLANES])
    w1_p = w1_p.at[CP:CP + PLANES].set(w1[PLANES:])
    return dict(w1=w1_p, b1=se['b1'], w2row=se['w2row'], b2=se['b2'])


def _prep_backbone_proj(bp, proj_w, proj_b):
    w_emb = jnp.pad(bp['w'], ((0, 0), (0, NCP - NUM_CHANNELS)))   # [K, 128]
    b_emb = jnp.pad(bp['b'], (0, NCP - NUM_CHANNELS))
    w_proj = jnp.pad(proj_w, ((0, NCP - NUM_CHANNELS), (0, 0)))   # [128, 128]
    return w_emb, b_emb, w_proj, proj_b


# --------------------------------------------------------------------------
# Block / FusionBlock / backbone wrappers
# --------------------------------------------------------------------------
def _fusion_blocks(rgb_list, d_list, prgb, pdep):
    """Block(rgb) and Block(depth) for all images with branch-stacked weights.

    Returns (rgb_feats, d_feats): per-image [B, Hp*Wp, CP] conv2 feature maps
    (GAP is fused into the SE kernel downstream).
    """
    # ---- conv1 7x7/s2 + BN + ReLU (one branch-stacked pallas_call) ----
    r_pats, d_pats, rows1, meta1 = [], [], [], []
    for rgb, d in zip(rgb_list, d_list):
        pr, Ho, Wo = _extract_patches(rgb, 7, 7, 2, 3)
        pd, _, _ = _extract_patches(d, 7, 7, 2, 3)
        Bb = rgb.shape[0]
        r_pats.append(pr.reshape(Bb * Ho * Wo, -1))
        d_pats.append(pd.reshape(Bb * Ho * Wo, -1))
        rows1.append(Bb * Ho * Wo)
        meta1.append((Bb, Ho, Wo))
    x1 = jnp.stack([jnp.concatenate(r_pats, 0), jnp.concatenate(d_pats, 0)], 0)
    w1 = jnp.stack([prgb['w1'], pdep['w1']], 0)
    s1 = jnp.stack([prgb['s1'], pdep['s1']], 0)
    b1 = jnp.stack([prgb['b1'], pdep['b1']], 0)
    y1 = mm_affine_stacked(x1, w1, s1, b1, act="relu")            # [2, R1, CP]

    # ---- maxpool 3x3/s2 (all branches & images in one pallas_call) ----
    taps_all, rows2, meta2 = [], [], []
    for br in range(2):
        for f, (Bb, Ho, Wo) in zip(_split_rows(y1[br], rows1), meta1):
            taps, Hp, Wp = _extract_pool_taps(f.reshape(Bb, Ho, Wo, CP), 3, 2, 1)
            taps_all.append(taps)
            if br == 0:
                rows2.append(taps.shape[1])
                meta2.append((Bb, Hp, Wp))
    pooled = maxpool_taps(jnp.concatenate(taps_all, axis=1))
    per = _split_rows(pooled, rows2 + rows2)
    rgb_pool, d_pool = per[:len(rgb_list)], per[len(rgb_list):]

    # ---- conv2 3x3/s1 + BN (one branch-stacked pallas_call) ----
    def _im2col3(pool_list):
        cols = []
        for f, (Bb, Hp, Wp) in zip(pool_list, meta2):
            pat, _, _ = _extract_patches(f.reshape(Bb, Hp, Wp, CP), 3, 3, 1, 1)
            cols.append(pat.reshape(Bb * Hp * Wp, -1))
        return cols

    r2, d2 = _im2col3(rgb_pool), _im2col3(d_pool)
    rows3 = [q.shape[0] for q in r2]
    x2 = jnp.stack([jnp.concatenate(r2, 0), jnp.concatenate(d2, 0)], 0)
    w2 = jnp.stack([prgb['w2'], pdep['w2']], 0)
    s2 = jnp.stack([prgb['s2'], pdep['s2']], 0)
    b2 = jnp.stack([prgb['b2'], pdep['b2']], 0)
    y2 = mm_affine_stacked(x2, w2, s2, b2, act="none")            # [2, R3, CP]

    rgb_feats = [f.reshape(Bb, Hp * Wp, CP)
                 for f, (Bb, Hp, Wp) in zip(_split_rows(y2[0], rows3), meta2)]
    d_feats = [f.reshape(Bb, Hp * Wp, CP)
               for f, (Bb, Hp, Wp) in zip(_split_rows(y2[1], rows3), meta2)]
    return rgb_feats, d_feats


def _fusion_block_and_early_fusion(rgb_list, d_list, prgb, pdep, pse):
    """FusionBlock(rgb, d) -> r, plus HCAT early fusion rgb + r*d per image."""
    rgb_feats, d_feats = _fusion_blocks(rgb_list, d_list, prgb, pdep)
    fused_imgs, rs = [], []
    for rgb, d, rf, df in zip(rgb_list, d_list, rgb_feats, d_feats):
        Bb, H, W, _ = rgb.shape
        f2d, r = _se_fuse_call(rf, df, rgb.reshape(Bb, -1), d.reshape(Bb, -1),
                               pse)
        fused_imgs.append(f2d.reshape(Bb, H, W, 3))
        rs.append(r)
    return fused_imgs, rs


def _sine_pos_embed(Hf, Wf, d):
    yy, xx = jnp.meshgrid(jnp.arange(Hf, dtype=F32),
                          jnp.arange(Wf, dtype=F32), indexing='ij')
    pos = jnp.stack([yy.reshape(-1), xx.reshape(-1)], axis=-1)      # [S, 2]
    dh = d // 2
    omega = 1.0 / (10000.0 ** (2.0 * (jnp.arange(dh, dtype=F32) // 2) / dh))
    ang_y = pos[:, 0:1] * omega[None]
    ang_x = pos[:, 1:2] * omega[None]
    even = (jnp.arange(dh) % 2) == 0
    emb_y = jnp.where(even, jnp.sin(ang_y), jnp.cos(ang_y))
    emb_x = jnp.where(even, jnp.sin(ang_x), jnp.cos(ang_x))
    return jnp.concatenate([emb_y, emb_x], axis=-1)                 # [S, d]


def _backbone_proj(fused_list, w_emb, b_emb, w_proj, b_proj):
    # TODO(synk): the real backbone (ResNet-style CNN + position embedding) is
    # an injected module not defined in the spec; a patch-embedding stand-in
    # + sinusoidal positions is used.  The 1x1 input_proj is fused into the
    # same kernel so the 64-wide intermediate never touches HBM.
    pats, metas = [], []
    for f in fused_list:
        Bb, H, W, Cin = f.shape
        Hf, Wf = H // PATCH, W // PATCH
        pat = (f.reshape(Bb, Hf, PATCH, Wf, PATCH, Cin)
                .transpose(0, 1, 3, 2, 4, 5)
                .reshape(Bb * Hf * Wf, PATCH * PATCH * Cin))
        pats.append(pat)
        metas.append((Bb, Hf, Wf))
    rows = [q.shape[0] for q in pats]
    proj_all = embed_proj(jnp.concatenate(pats, 0), w_emb, b_emb, w_proj, b_proj)
    projs, poss = [], []
    for chunk, (Bb, Hf, Wf) in zip(_split_rows(proj_all, rows), metas):
        projs.append(chunk.reshape(Bb, Hf * Wf, HIDDEN))
        pos = _sine_pos_embed(Hf, Wf, HIDDEN)
        poss.append(jnp.broadcast_to(pos[None], (Bb, Hf * Wf, HIDDEN)))
    return projs, poss


# --------------------------------------------------------------------------
# HCAT forward (Pallas)
# --------------------------------------------------------------------------
def hcat_forward(search, template, params):
    """Pallas version of HCAT.forward(search, template) -> (out, info)."""
    B = search.shape[0]
    s_rgb = jnp.transpose(search[:, :3], (0, 2, 3, 1))
    s_d = jnp.transpose(search[:, 3:], (0, 2, 3, 1))
    t_rgb = jnp.transpose(template[:, :3], (0, 2, 3, 1))
    t_d = jnp.transpose(template[:, 3:], (0, 2, 3, 1))

    fp = params['fusion']
    prgb, pdep, pse = _prep_block(fp['rgb']), _prep_block(fp['depth']), \
        _prep_se(fp['se'])

    (t_fused, s_fused), (r_t, r_s) = _fusion_block_and_early_fusion(
        [t_rgb, s_rgb], [t_d, s_d], prgb, pdep, pse)

    w_emb, b_emb, w_proj, b_proj = _prep_backbone_proj(
        params['backbone'], params['proj_w'], params['proj_b'])
    (proj_t, proj_s), (t_pos, s_pos) = _backbone_proj(
        [t_fused, s_fused], w_emb, b_emb, w_proj, b_proj)

    hs = _feature_fusion(proj_t, t_pos, proj_s, s_pos,
                         params['query_embed_dim'])
    logits, boxes = _prediction_heads(hs[-1], params['heads'])

    out = {'pred_logits': logits, 'pred_boxes': boxes}
    info = {'search': r_s.reshape(B, 1, 1, 1),
            'template': r_t.reshape(B, 1, 1, 1),
            'scale': 0}
    return out, info


# --------------------------------------------------------------------------
# Pure-JAX reference (mirrors the PyTorch forward) for verification
# --------------------------------------------------------------------------
def _conv_ref(x, w_hwio, stride, pad):
    return lax.conv_general_dilated(
        x, w_hwio, (stride, stride), [(pad, pad), (pad, pad)],
        dimension_numbers=('NHWC', 'HWIO', 'NHWC'))


def _block_ref(x, p):
    y = _conv_ref(x, p['conv1_w'], 2, 3) * p['bn1_scale'] + p['bn1_bias']
    y = jnp.maximum(y, 0.0)
    y = lax.reduce_window(y, -jnp.inf, lax.max, (1, 3, 3, 1), (1, 2, 2, 1),
                          [(0, 0), (1, 1), (1, 1), (0, 0)])
    y = _conv_ref(y, p['conv2_w'], 1, 1) * p['bn2_scale'] + p['bn2_bias']
    return jnp.mean(y, axis=(1, 2))                                 # GAP


def _fusionblock_ref(rgb, d, p):
    x = jnp.concatenate([_block_ref(rgb, p['rgb']),
                         _block_ref(d, p['depth'])], axis=-1)       # [B, 128]
    h = jnp.maximum(x @ p['se']['w1'] + p['se']['b1'], 0.0)
    return jax.nn.sigmoid(h @ p['se']['w2row'].T + p['se']['b2'])   # [B, 1]


def _backbone_ref(fused, p):
    Bb, H, W, Cin = fused.shape
    Hf, Wf = H // PATCH, W // PATCH
    pat = (fused.reshape(Bb, Hf, PATCH, Wf, PATCH, Cin)
                .transpose(0, 1, 3, 2, 4, 5)
                .reshape(Bb, Hf * Wf, PATCH * PATCH * Cin))
    feat = jnp.maximum(pat @ p['w'] + p['b'], 0.0)
    pos = jnp.broadcast_to(_sine_pos_embed(Hf, Wf, HIDDEN)[None],
                           (Bb, Hf * Wf, HIDDEN))
    return feat, pos


def hcat_forward_ref(search, template, params):
    B = search.shape[0]
    s_rgb = jnp.transpose(search[:, :3], (0, 2, 3, 1))
    s_d = jnp.transpose(search[:, 3:], (0, 2, 3, 1))
    t_rgb = jnp.transpose(template[:, :3], (0, 2, 3, 1))
    t_d = jnp.transpose(template[:, 3:], (0, 2, 3, 1))

    fp = params['fusion']
    r_t = _fusionblock_ref(t_rgb, t_d, fp)
    r_s = _fusionblock_ref(s_rgb, s_d, fp)
    t_fused = t_rgb + r_t.reshape(B, 1, 1, 1) * t_d
    s_fused = s_rgb + r_s.reshape(B, 1, 1, 1) * s_d

    t_feat, t_pos = _backbone_ref(t_fused, params['backbone'])
    s_feat, s_pos = _backbone_ref(s_fused, params['backbone'])
    proj_t = t_feat @ params['proj_w'] + params['proj_b']
    proj_s = s_feat @ params['proj_w'] + params['proj_b']

    kv = jnp.concatenate([proj_t, proj_s], axis=1)
    pos = jnp.concatenate([t_pos, s_pos], axis=1)
    q = params['query_embed_dim']
    att = jax.nn.softmax(
        jnp.einsum('qd,bsd->bqs', q, kv + pos) / math.sqrt(HIDDEN), axis=-1)
    hs = jnp.einsum('bqs,bsd->bqd', att, kv)

    hp = params['heads']
    h = jnp.maximum(hs @ hp['wc1'] + hp['bc1'], 0.0)
    h = jnp.maximum(h @ hp['wc2'] + hp['bc2'], 0.0)
    logits = h @ hp['wc3'] + hp['bc3']
    g = jnp.maximum(hs @ hp['wb1'] + hp['bb1'], 0.0)
    g = jnp.maximum(g @ hp['wb2'] + hp['bb2'], 0.0)
    boxes = jax.nn.sigmoid(g @ hp['wb3'] + hp['bb3'])

    out = {'pred_logits': logits, 'pred_boxes': boxes}
    info = {'search': r_s.reshape(B, 1, 1, 1),
            'template': r_t.reshape(B, 1, 1, 1),
            'scale': 0}
    return out, info


# --------------------------------------------------------------------------
# Parameters (canonical, PyTorch-like; Pallas padding is derived inside fwd)
# --------------------------------------------------------------------------
def init_params(key):
    ks = iter(jax.random.split(key, 48))

    def nrm(shape, s):
        return s * jax.random.normal(next(ks), shape, F32)

    def bn_fold(c):
        gamma = 1.0 + 0.1 * jax.random.normal(next(ks), (c,), F32)
        beta = 0.1 * jax.random.normal(next(ks), (c,), F32)
        mean = 0.1 * jax.random.normal(next(ks), (c,), F32)
        var = 1.0 + 0.1 * jnp.abs(jax.random.normal(next(ks), (c,), F32))
        scale = gamma / jnp.sqrt(var + 1e-5)
        return scale, beta - mean * scale

    def block(c):
        w1 = nrm((7, 7, 3, c), 1.0 / math.sqrt(7 * 7 * 3))
        s1, b1 = bn_fold(c)
        w2 = nrm((3, 3, c, c), 1.0 / math.sqrt(3 * 3 * c))
        s2, b2 = bn_fold(c)
        return {'conv1_w': w1, 'bn1_scale': s1, 'bn1_bias': b1,
                'conv2_w': w2, 'bn2_scale': s2, 'bn2_bias': b2}

    se = {'w1': nrm((2 * PLANES, 8), 1.0 / math.sqrt(2 * PLANES)),
          'b1': nrm((1, 8), 0.1),
          'w2row': nrm((1, 8), 1.0 / math.sqrt(8)),
          'b2': nrm((1, 1), 0.1)}

    fusion = {'rgb': block(PLANES), 'depth': block(PLANES), 'se': se}

    backbone = {'w': nrm((PATCH * PATCH * 3, NUM_CHANNELS),
                         1.0 / math.sqrt(PATCH * PATCH * 3)),
                'b': nrm((NUM_CHANNELS,), 0.1)}

    def lin(i, o):
        return nrm((i, o), 1.0 / math.sqrt(i)), nrm((o,), 0.1)

    wc1, bc1 = lin(HIDDEN, HIDDEN)
    wc2, bc2 = lin(HIDDEN, HIDDEN)
    wc3, bc3 = lin(HIDDEN, NUM_CLASSES + 1)
    wb1, bb1 = lin(HIDDEN, HIDDEN)
    wb2, bb2 = lin(HIDDEN, HIDDEN)
    wb3, bb3 = lin(HIDDEN, 4)

    return {'fusion': fusion,
            'backbone': backbone,
            'proj_w': nrm((NUM_CHANNELS, HIDDEN), 1.0 / math.sqrt(NUM_CHANNELS)),
            'proj_b': nrm((HIDDEN,), 0.1),
            'query_embed_dim': nrm((NUM_QUERIES, HIDDEN), 1.0),
            'heads': dict(wc1=wc1, bc1=bc1, wc2=wc2, bc2=bc2, wc3=wc3, bc3=bc3,
                          wb1=wb1, bb1=bb1, wb2=wb2, bb2=bb2, wb3=wb3, bb3=bb3)}


def _max_rel_err(a, b):
    return float(jnp.max(jnp.abs(a - b)) / (jnp.max(jnp.abs(b)) + 1e-6))


if __name__ == "__main__":
    key = jax.random.PRNGKey(0)
    kp, ksr, ktm = jax.random.split(key, 3)
    B = 2
    search = jax.random.uniform(ksr, (B, 6, 32, 32), F32)    # RGB(3) + depth(3)
    template = jax.random.uniform(ktm, (B, 6, 16, 16), F32)
    params = init_params(kp)

    fwd = jax.jit(hcat_forward)
    out, info = fwd(search, template, params)
    jax.block_until_ready((out['pred_logits'], out['pred_boxes'],
                           info['search'], info['template']))

    ref_out, ref_info = hcat_forward_ref(search, template, params)

    assert out['pred_logits'].shape == (B, NUM_QUERIES, NUM_CLASSES + 1)
    assert out['pred_boxes'].shape == (B, NUM_QUERIES, 4)

    # Loose tolerance: both paths run their matmuls/convs with the TPU default
    # (reduced-precision) MXU passes and different summation orders.
    TOL = 0.1
    for name, a, b in (('pred_logits', out['pred_logits'], ref_out['pred_logits']),
                       ('pred_boxes', out['pred_boxes'], ref_out['pred_boxes']),
                       ('r_search', info['search'], ref_info['search']),
                       ('r_template', info['template'], ref_info['template'])):
        err = _max_rel_err(a, b)
        assert err < TOL, (name, err)

    print("KERNEL_OK")
</pallas_src>

<mosaic_0001>
module attributes {stable_mosaic.version = 11 : i64} {
  func.func @_mm_affine_kernel(%arg0: i32, %arg1: i32, %arg2: memref<1x640x256xf32, #tpu.memory_space<vmem>>, %arg3: memref<1x256x128xf32, #tpu.memory_space<vmem>>, %arg4: memref<1x1x128xf32, #tpu.memory_space<vmem>>, %arg5: memref<1x1x128xf32, #tpu.memory_space<vmem>>, %arg6: memref<1x640x128xf32, #tpu.memory_space<vmem>>) attributes {dimension_semantics = [#tpu.dimension_semantics<parallel>, #tpu.dimension_semantics<parallel>], iteration_bounds = array<i64: 2, 1>, scalar_prefetch = 0 : i64, scratch_operands = 0 : i64, tpu.core_type = #tpu.core_type<tc>, window_params = [{transform_indices = @transform_0, window_bounds = array<i64: 1, 640, 256>}, {transform_indices = @transform_1, window_bounds = array<i64: 1, 256, 128>}, {transform_indices = @transform_2, window_bounds = array<i64: 1, 1, 128>}, {transform_indices = @transform_3, window_bounds = array<i64: 1, 1, 128>}, {transform_indices = @transform_4, window_bounds = array<i64: 1, 640, 128>}]} {
    %c0 = arith.constant 0 : index
    %c0_0 = arith.constant 0 : index
    %c0_1 = arith.constant 0 : index
    %0 = vector.load %arg2[%c0, %c0_0, %c0_1] : memref<1x640x256xf32, #tpu.memory_space<vmem>>, vector<1x640x256xf32>
    %1 = vector.shape_cast %0 : vector<1x640x256xf32> to vector<640x256xf32>
    %c0_2 = arith.constant 0 : index
    %c0_3 = arith.constant 0 : index
    %c0_4 = arith.constant 0 : index
    %2 = vector.load %arg3[%c0_2, %c0_3, %c0_4] : memref<1x256x128xf32, #tpu.memory_space<vmem>>, vector<1x256x128xf32>
    %3 = vector.shape_cast %2 : vector<1x256x128xf32> to vector<256x128xf32>
    %cst = arith.constant dense<0.000000e+00> : vector<640x128xf32>
    %4 = tpu.matmul %1, %3, %cst {dimension_numbers = #tpu.dot_dimension_numbers<[1], [0], [0], [1], [0, 0, 1, 1], [], []>} : vector<640x256xf32>, vector<256x128xf32>, vector<640x128xf32> -> vector<640x128xf32>
    %c0_5 = arith.constant 0 : index
    %c0_6 = arith.constant 0 : index
    %c0_7 = arith.constant 0 : index
    %5 = vector.load %arg4[%c0_5, %c0_6, %c0_7] : memref<1x1x128xf32, #tpu.memory_space<vmem>>, vector<1x1x128xf32>
    %6 = vector.shape_cast %5 : vector<1x1x128xf32> to vector<1x128xf32>
    %7 = vector.broadcast %6 : vector<1x128xf32> to vector<640x128xf32>
    %8 = arith.mulf %4, %7 : vector<640x128xf32>
    %c0_8 = arith.constant 0 : index
    %c0_9 = arith.constant 0 : index
    %c0_10 = arith.constant 0 : index
    %9 = vector.load %arg5[%c0_8, %c0_9, %c0_10] : memref<1x1x128xf32, #tpu.memory_space<vmem>>, vector<1x1x128xf32>
    %10 = vector.shape_cast %9 : vector<1x1x128xf32> to vector<1x128xf32>
    %11 = vector.broadcast %10 : vector<1x128xf32> to vector<640x128xf32>
    %12 = arith.addf %8, %11 : vector<640x128xf32>
    %cst_11 = arith.constant 0.000000e+00 : f32
    %13 = vector.broadcast %cst_11 : f32 to vector<640x128xf32>
    %14 = arith.maximumf %12, %13 : vector<640x128xf32>
    %c0_12 = arith.constant 0 : index
    %c0_13 = arith.constant 0 : index
    %c0_14 = arith.constant 0 : index
    %15 = vector.load %arg6[%c0_12, %c0_13, %c0_14] : memref<1x640x128xf32, #tpu.memory_space<vmem>>, vector<1x640x128xf32>
    %16 = vector.shape_cast %15 : vector<1x640x128xf32> to vector<640x128xf32>
    %17 = vector.shape_cast %14 : vector<640x128xf32> to vector<1x640x128xf32>
    tpu.vector_store %arg6[%c0_12, %c0_13, %c0_14], %17 {strides = array<i32>} : memref<1x640x128xf32, #tpu.memory_space<vmem>>, vector<1x640x128xf32>,
    return
  }
  func.func @transform_0(%arg0: i32, %arg1: i32) -> (i32, i32, i32) {
    %c0_i32 = arith.constant 0 : i32
    %c0_i32_0 = arith.constant 0 : i32
    return %arg0, %arg1, %c0_i32 : i32, i32, i32
  }
  func.func @transform_1(%arg0: i32, %arg1: i32) -> (i32, i32, i32) {
    %c0_i32 = arith.constant 0 : i32
    %c0_i32_0 = arith.constant 0 : i32
    %c0_i32_1 = arith.constant 0 : i32
    return %arg0, %c0_i32, %c0_i32_0 : i32, i32, i32
  }
  func.func @transform_2(%arg0: i32, %arg1: i32) -> (i32, i32, i32) {
    %c0_i32 = arith.constant 0 : i32
    %c0_i32_0 = arith.constant 0 : i32
    %c0_i32_1 = arith.constant 0 : i32
    return %arg0, %c0_i32, %c0_i32_0 : i32, i32, i32
  }
  func.func @transform_3(%arg0: i32, %arg1: i32) -> (i32, i32, i32) {
    %c0_i32 = arith.constant 0 : i32
    %c0_i32_0 = arith.constant 0 : i32
    %c0_i32_1 = arith.constant 0 : i32
    return %arg0, %c0_i32, %c0_i32_0 : i32, i32, i32
  }
  func.func @transform_4(%arg0: i32, %arg1: i32) -> (i32, i32, i32) {
    %c0_i32 = arith.constant 0 : i32
    %c0_i32_0 = arith.constant 0 : i32
    return %arg0, %arg1, %c0_i32 : i32, i32, i32
  }
}

module attributes {stable_mosaic.version = 11 : i64} {
  func.func @_max9_kernel(%arg0: i32, %arg1: memref<9x320x128xf32, #tpu.memory_space<vmem>>, %arg2: memref<320x128xf32, #tpu.memory_space<vmem>>) attributes {dimension_semantics = [#tpu.dimension_semantics<parallel>], iteration_bounds = array<i64: 1>, scalar_prefetch = 0 : i64, scratch_operands = 0 : i64, tpu.core_type = #tpu.core_type<tc>, window_params = [{transform_indices = @transform_0, window_bounds = array<i64: 9, 320, 128>}, {transform_indices = @transform_1, window_bounds = array<i64: 320, 128>}]} {
    %c0 = arith.constant 0 : index
    %c0_0 = arith.constant 0 : index
    %c0_1 = arith.constant 0 : index
    %0 = vector.load %arg1[%c0, %c0_0, %c0_1] : memref<9x320x128xf32, #tpu.memory_space<vmem>>, vector<1x320x128xf32>
    %1 = vector.shape_cast %0 : vector<1x320x128xf32> to vector<320x128xf32>
    %c1 = arith.constant 1 : index
    %c0_2 = arith.constant 0 : index
    %c0_3 = arith.constant 0 : index
    %2 = vector.load %arg1[%c1, %c0_2, %c0_3] : memref<9x320x128xf32, #tpu.memory_space<vmem>>, vector<1x320x128xf32>
    %3 = vector.shape_cast %2 : vector<1x320x128xf32> to vector<320x128xf32>
    %4 = arith.maximumf %1, %3 : vector<320x128xf32>
    %c2 = arith.constant 2 : index
    %c0_4 = arith.constant 0 : index
    %c0_5 = arith.constant 0 : index
    %5 = vector.load %arg1[%c2, %c0_4, %c0_5] : memref<9x320x128xf32, #tpu.memory_space<vmem>>, vector<1x320x128xf32>
    %6 = vector.shape_cast %5 : vector<1x320x128xf32> to vector<320x128xf32>
    %7 = arith.maximumf %4, %6 : vector<320x128xf32>
    %c3 = arith.constant 3 : index
    %c0_6 = arith.constant 0 : index
    %c0_7 = arith.constant 0 : index
    %8 = vector.load %arg1[%c3, %c0_6, %c0_7] : memref<9x320x128xf32, #tpu.memory_space<vmem>>, vector<1x320x128xf32>
    %9 = vector.shape_cast %8 : vector<1x320x128xf32> to vector<320x128xf32>
    %10 = arith.maximumf %7, %9 : vector<320x128xf32>
    %c4 = arith.constant 4 : index
    %c0_8 = arith.constant 0 : index
    %c0_9 = arith.constant 0 : index
    %11 = vector.load %arg1[%c4, %c0_8, %c0_9] : memref<9x320x128xf32, #tpu.memory_space<vmem>>, vector<1x320x128xf32>
    %12 = vector.shape_cast %11 : vector<1x320x128xf32> to vector<320x128xf32>
    %13 = arith.maximumf %10, %12 : vector<320x128xf32>
    %c5 = arith.constant 5 : index
    %c0_10 = arith.constant 0 : index
    %c0_11 = arith.constant 0 : index
    %14 = vector.load %arg1[%c5, %c0_10, %c0_11] : memref<9x320x128xf32, #tpu.memory_space<vmem>>, vector<1x320x128xf32>
    %15 = vector.shape_cast %14 : vector<1x320x128xf32> to vector<320x128xf32>
    %16 = arith.maximumf %13, %15 : vector<320x128xf32>
    %c6 = arith.constant 6 : index
    %c0_12 = arith.constant 0 : index
    %c0_13 = arith.constant 0 : index
    %17 = vector.load %arg1[%c6, %c0_12, %c0_13] : memref<9x320x128xf32, #tpu.memory_space<vmem>>, vector<1x320x128xf32>
    %18 = vector.shape_cast %17 : vector<1x320x128xf32> to vector<320x128xf32>
    %19 = arith.maximumf %16, %18 : vector<320x128xf32>
    %c7 = arith.constant 7 : index
    %c0_14 = arith.constant 0 : index
    %c0_15 = arith.constant 0 : index
    %20 = vector.load %arg1[%c7, %c0_14, %c0_15] : memref<9x320x128xf32, #tpu.memory_space<vmem>>, vector<1x320x128xf32>
    %21 = vector.shape_cast %20 : vector<1x320x128xf32> to vector<320x128xf32>
    %22 = arith.maximumf %19, %21 : vector<320x128xf32>
    %c8 = arith.constant 8 : index
    %c0_16 = arith.constant 0 : index
    %c0_17 = arith.constant 0 : index
    %23 = vector.load %arg1[%c8, %c0_16, %c0_17] : memref<9x320x128xf32, #tpu.memory_space<vmem>>, vector<1x320x128xf32>
    %24 = vector.shape_cast %23 : vector<1x320x128xf32> to vector<320x128xf32>
    %25 = arith.maximumf %22, %24 : vector<320x128xf32>
    %c0_18 = arith.constant 0 : index
    %c0_19 = arith.constant 0 : index
    %26 = vector.load %arg2[%c0_18, %c0_19] : memref<320x128xf32, #tpu.memory_space<vmem>>, vector<320x128xf32>
    tpu.vector_store %arg2[%c0_18, %c0_19], %25 {strides = array<i32>} : memref<320x128xf32, #tpu.memory_space<vmem>>, vector<320x128xf32>,
    return
  }
  func.func @transform_0(%arg0: i32) -> (i32, i32, i32) {
    %c0_i32 = arith.constant 0 : i32
    %c0_i32_0 = arith.constant 0 : i32
    %c0_i32_1 = arith.constant 0 : i32
    return %c0_i32, %arg0, %c0_i32_0 : i32, i32, i32
  }
  func.func @transform_1(%arg0: i32) -> (i32, i32) {
    %c0_i32 = arith.constant 0 : i32
    %c0_i32_0 = arith.constant 0 : i32
    return %arg0, %c0_i32 : i32, i32
  }
}

module attributes {stable_mosaic.version = 11 : i64} {
  func.func @_mm_affine_kernel(%arg0: i32, %arg1: i32, %arg2: memref<1x160x1152xf32, #tpu.memory_space<vmem>>, %arg3: memref<1x1152x128xf32, #tpu.memory_space<vmem>>, %arg4: memref<1x1x128xf32, #tpu.memory_space<vmem>>, %arg5: memref<1x1x128xf32, #tpu.memory_space<vmem>>, %arg6: memref<1x160x128xf32, #tpu.memory_space<vmem>>) attributes {dimension_semantics = [#tpu.dimension_semantics<parallel>, #tpu.dimension_semantics<parallel>], iteration_bounds = array<i64: 2, 1>, scalar_prefetch = 0 : i64, scratch_operands = 0 : i64, tpu.core_type = #tpu.core_type<tc>, window_params = [{transform_indices = @transform_0, window_bounds = array<i64: 1, 160, 1152>}, {transform_indices = @transform_1, window_bounds = array<i64: 1, 1152, 128>}, {transform_indices = @transform_2, window_bounds = array<i64: 1, 1, 128>}, {transform_indices = @transform_3, window_bounds = array<i64: 1, 1, 128>}, {transform_indices = @transform_4, window_bounds = array<i64: 1, 160, 128>}]} {
    %c0 = arith.constant 0 : index
    %c0_0 = arith.constant 0 : index
    %c0_1 = arith.constant 0 : index
    %0 = vector.load %arg2[%c0, %c0_0, %c0_1] : memref<1x160x1152xf32, #tpu.memory_space<vmem>>, vector<1x160x1152xf32>
    %1 = vector.shape_cast %0 : vector<1x160x1152xf32> to vector<160x1152xf32>
    %c0_2 = arith.constant 0 : index
    %c0_3 = arith.constant 0 : index
    %c0_4 = arith.constant 0 : index
    %2 = vector.load %arg3[%c0_2, %c0_3, %c0_4] : memref<1x1152x128xf32, #tpu.memory_space<vmem>>, vector<1x1152x128xf32>
    %3 = vector.shape_cast %2 : vector<1x1152x128xf32> to vector<1152x128xf32>
    %cst = arith.constant dense<0.000000e+00> : vector<160x128xf32>
    %4 = tpu.matmul %1, %3, %cst {dimension_numbers = #tpu.dot_dimension_numbers<[1], [0], [0], [1], [0, 0, 1, 1], [], []>} : vector<160x1152xf32>, vector<1152x128xf32>, vector<160x128xf32> -> vector<160x128xf32>
    %c0_5 = arith.constant 0 : index
    %c0_6 = arith.constant 0 : index
    %c0_7 = arith.constant 0 : index
    %5 = vector.load %arg4[%c0_5, %c0_6, %c0_7] : memref<1x1x128xf32, #tpu.memory_space<vmem>>, vector<1x1x128xf32>
    %6 = vector.shape_cast %5 : vector<1x1x128xf32> to vector<1x128xf32>
    %7 = vector.broadcast %6 : vector<1x128xf32> to vector<160x128xf32>
    %8 = arith.mulf %4, %7 : vector<160x128xf32>
    %c0_8 = arith.constant 0 : index
    %c0_9 = arith.constant 0 : index
    %c0_10 = arith.constant 0 : index
    %9 = vector.load %arg5[%c0_8, %c0_9, %c0_10] : memref<1x1x128xf32, #tpu.memory_space<vmem>>, vector<1x1x128xf32>
    %10 = vector.shape_cast %9 : vector<1x1x128xf32> to vector<1x128xf32>
    %11 = vector.broadcast %10 : vector<1x128xf32> to vector<160x128xf32>
    %12 = arith.addf %8, %11 : vector<160x128xf32>
    %c0_11 = arith.constant 0 : index
    %c0_12 = arith.constant 0 : index
    %c0_13 = arith.constant 0 : index
    %13 = vector.load %arg6[%c0_11, %c0_12, %c0_13] : memref<1x160x128xf32, #tpu.memory_space<vmem>>, vector<1x160x128xf32>
    %14 = vector.shape_cast %13 : vector<1x160x128xf32> to vector<160x128xf32>
    %15 = vector.shape_cast %12 : vector<160x128xf32> to vector<1x160x128xf32>
    tpu.vector_store %arg6[%c0_11, %c0_12, %c0_13], %15 {strides = array<i32>} : memref<1x160x128xf32, #tpu.memory_space<vmem>>, vector<1x160x128xf32>,
    return
  }
  func.func @transform_0(%arg0: i32, %arg1: i32) -> (i32, i32, i32) {
    %c0_i32 = arith.constant 0 : i32
    %c0_i32_0 = arith.constant 0 : i32
    return %arg0, %arg1, %c0_i32 : i32, i32, i32
  }
  func.func @transform_1(%arg0: i32, %arg1: i32) -> (i32, i32, i32) {
    %c0_i32 = arith.constant 0 : i32
    %c0_i32_0 = arith.constant 0 : i32
    %c0_i32_1 = arith.constant 0 : i32
    return %arg0, %c0_i32, %c0_i32_0 : i32, i32, i32
  }
  func.func @transform_2(%arg0: i32, %arg1: i32) -> (i32, i32, i32) {
    %c0_i32 = arith.constant 0 : i32
    %c0_i32_0 = arith.constant 0 : i32
    %c0_i32_1 = arith.constant 0 : i32
    return %arg0, %c0_i32, %c0_i32_0 : i32, i32, i32
  }
  func.func @transform_3(%arg0: i32, %arg1: i32) -> (i32, i32, i32) {
    %c0_i32 = arith.constant 0 : i32
    %c0_i32_0 = arith.constant 0 : i32
    %c0_i32_1 = arith.constant 0 : i32
    return %arg0, %c0_i32, %c0_i32_0 : i32, i32, i32
  }
  func.func @transform_4(%arg0: i32, %arg1: i32) -> (i32, i32, i32) {
    %c0_i32 = arith.constant 0 : i32
    %c0_i32_0 = arith.constant 0 : i32
    return %arg0, %arg1, %c0_i32 : i32, i32, i32
  }
}

module attributes {stable_mosaic.version = 11 : i64} {
  func.func @_se_fuse_kernel(%arg0: i32, %arg1: memref<2x16x128xf32, #tpu.memory_space<vmem>>, %arg2: memref<2x16x128xf32, #tpu.memory_space<vmem>>, %arg3: memref<256x8xf32, #tpu.memory_space<vmem>>, %arg4: memref<1x8xf32, #tpu.memory_space<vmem>>, %arg5: memref<1x8xf32, #tpu.memory_space<vmem>>, %arg6: memref<1x1xf32, #tpu.memory_space<vmem>>, %arg7: memref<2x768xf32, #tpu.memory_space<vmem>>, %arg8: memref<2x768xf32, #tpu.memory_space<vmem>>, %arg9: memref<2x768xf32, #tpu.memory_space<vmem>>, %arg10: memref<2x1xf32, #tpu.memory_space<vmem>>) attributes {dimension_semantics = [#tpu.dimension_semantics<arbitrary>], iteration_bounds = array<i64: 1>, scalar_prefetch = 0 : i64, scratch_operands = 0 : i64, tpu.core_type = #tpu.core_type<tc>, window_params = [{pipeline_mode = #tpu.pipeline_mode<synchronous>, transform_indices = @transform_0, window_bounds = array<i64: 2, 16, 128>}, {pipeline_mode = #tpu.pipeline_mode<synchronous>, transform_indices = @transform_1, window_bounds = array<i64: 2, 16, 128>}, {pipeline_mode = #tpu.pipeline_mode<synchronous>, transform_indices = @transform_2, window_bounds = array<i64: 256, 8>}, {pipeline_mode = #tpu.pipeline_mode<synchronous>, transform_indices = @transform_3, window_bounds = array<i64: 1, 8>}, {pipeline_mode = #tpu.pipeline_mode<synchronous>, transform_indices = @transform_4, window_bounds = array<i64: 1, 8>}, {pipeline_mode = #tpu.pipeline_mode<synchronous>, transform_indices = @transform_5, window_bounds = array<i64: 1, 1>}, {pipeline_mode = #tpu.pipeline_mode<synchronous>, transform_indices = @transform_6, window_bounds = array<i64: 2, 768>}, {pipeline_mode = #tpu.pipeline_mode<synchronous>, transform_indices = @transform_7, window_bounds = array<i64: 2, 768>}, {pipeline_mode = #tpu.pipeline_mode<synchronous>, transform_indices = @transform_8, window_bounds = array<i64: 2, 768>}, {pipeline_mode = #tpu.pipeline_mode<synchronous>, transform_indices = @transform_9, window_bounds = array<i64: 2, 1>}]} {
    %c0 = arith.constant 0 : index
    %c0_0 = arith.constant 0 : index
    %c0_1 = arith.constant 0 : index
    %0 = vector.load %arg1[%c0, %c0_0, %c0_1] : memref<2x16x128xf32, #tpu.memory_space<vmem>>, vector<2x16x128xf32>
    %cst = arith.constant dense<0.000000e+00> : vector<2x128xf32>
    %1 = vector.multi_reduction <add>, %0, %cst [1] : vector<2x16x128xf32> to vector<2x128xf32>
    %cst_2 = arith.constant 1.600000e+01 : f32
    %2 = vector.broadcast %cst_2 : f32 to vector<2x128xf32>
    %3 = arith.divf %1, %2 : vector<2x128xf32>
    %c0_3 = arith.constant 0 : index
    %c0_4 = arith.constant 0 : index
    %c0_5 = arith.constant 0 : index
    %4 = vector.load %arg2[%c0_3, %c0_4, %c0_5] : memref<2x16x128xf32, #tpu.memory_space<vmem>>, vector<2x16x128xf32>
    %cst_6 = arith.constant dense<0.000000e+00> : vector<2x128xf32>
    %5 = vector.multi_reduction <add>, %4, %cst_6 [1] : vector<2x16x128xf32> to vector<2x128xf32>
    %cst_7 = arith.constant 1.600000e+01 : f32
    %6 = vector.broadcast %cst_7 : f32 to vector<2x128xf32>
    %7 = arith.divf %5, %6 : vector<2x128xf32>
    %c0_8 = arith.constant 0 : index
    %c0_9 = arith.constant 0 : index
    %8 = vector.load %arg3[%c0_8, %c0_9] : memref<256x8xf32, #tpu.memory_space<vmem>>, vector<256x8xf32>
    %9 = vector.extract_strided_slice %8 {offsets = [0, 0], sizes = [128, 8], strides = [1, 1]} : vector<256x8xf32> to vector<128x8xf32>
    %cst_10 = arith.constant dense<0.000000e+00> : vector<2x8xf32>
    %10 = tpu.matmul %3, %9, %cst_10 {dimension_numbers = #tpu.dot_dimension_numbers<[1], [0], [0], [1], [0, 0, 1, 1], [], []>} : vector<2x128xf32>, vector<128x8xf32>, vector<2x8xf32> -> vector<2x8xf32>
    %11 = vector.extract_strided_slice %8 {offsets = [128, 0], sizes = [128, 8], strides = [1, 1]} : vector<256x8xf32> to vector<128x8xf32>
    %cst_11 = arith.constant dense<0.000000e+00> : vector<2x8xf32>
    %12 = tpu.matmul %7, %11, %cst_11 {dimension_numbers = #tpu.dot_dimension_numbers<[1], [0], [0], [1], [0, 0, 1, 1], [], []>} : vector<2x128xf32>, vector<128x8xf32>, vector<2x8xf32> -> vector<2x8xf32>
    %13 = arith.addf %10, %12 : vector<2x8xf32>
    %c0_12 = arith.constant 0 : index
    %c0_13 = arith.constant 0 : index
    %14 = vector.load %arg4[%c0_12, %c0_13] : memref<1x8xf32, #tpu.memory_space<vmem>>, vector<1x8xf32>
    %15 = vector.broadcast %14 : vector<1x8xf32> to vector<2x8xf32>
    %16 = arith.addf %13, %15 : vector<2x8xf32>
    %cst_14 = arith.constant 0.000000e+00 : f32
    %17 = vector.broadcast %cst_14 : f32 to vector<2x8xf32>
    %18 = arith.maximumf %16, %17 : vector<2x8xf32>
    %c0_15 = arith.constant 0 : index
    %c0_16 = arith.constant 0 : index
    %19 = vector.load %arg5[%c0_15, %c0_16] : memref<1x8xf32, #tpu.memory_space<vmem>>, vector<1x8xf32>
    %20 = vector.broadcast %19 : vector<1x8xf32> to vector<2x8xf32>
    %21 = arith.mulf %18, %20 : vector<2x8xf32>
    %cst_17 = arith.constant dense<0.000000e+00> : vector<2xf32>
    %22 = vector.multi_reduction <add>, %21, %cst_17 [1] : vector<2x8xf32> to vector<2xf32>
    %23 = vector.shape_cast %22 : vector<2xf32> to vector<2x1xf32>
    %c0_18 = arith.constant 0 : index
    %c0_19 = arith.constant 0 : index
    %24 = vector.load %arg6[%c0_18, %c0_19] : memref<1x1xf32, #tpu.memory_space<vmem>>, vector<1x1xf32>
    %25 = vector.broadcast %24 : vector<1x1xf32> to vector<2x1xf32>
    %26 = arith.addf %23, %25 : vector<2x1xf32>
    %27 = arith.negf %26 : vector<2x1xf32>
    %28 = math.exp %27 : vector<2x1xf32>
    %cst_20 = arith.constant 1.000000e+00 : f32
    %29 = vector.broadcast %cst_20 : f32 to vector<2x1xf32>
    %30 = arith.addf %29, %28 : vector<2x1xf32>
    %31 = arith.divf %29, %30 : vector<2x1xf32>
    %c0_21 = arith.constant 0 : index
    %c0_22 = arith.constant 0 : index
    %32 = vector.load %arg10[%c0_21, %c0_22] : memref<2x1xf32, #tpu.memory_space<vmem>>, vector<2x1xf32>
    tpu.vector_store %arg10[%c0_21, %c0_22], %31 {strides = array<i32>} : memref<2x1xf32, #tpu.memory_space<vmem>>, vector<2x1xf32>,
    %c0_23 = arith.constant 0 : index
    %c0_24 = arith.constant 0 : index
    %33 = vector.load %arg7[%c0_23, %c0_24] : memref<2x768xf32, #tpu.memory_space<vmem>>, vector<2x768xf32>
    %c0_25 = arith.constant 0 : index
    %c0_26 = arith.constant 0 : index
    %34 = vector.load %arg8[%c0_25, %c0_26] : memref<2x768xf32, #tpu.memory_space<vmem>>, vector<2x768xf32>
    %35 = vector.broadcast %31 : vector<2x1xf32> to vector<2x768xf32>
    %36 = arith.mulf %35, %34 : vector<2x768xf32>
    %37 = arith.addf %33, %36 : vector<2x768xf32>
    %c0_27 = arith.constant 0 : index
    %c0_28 = arith.constant 0 : index
    %38 = vector.load %arg9[%c0_27, %c0_28] : memref<2x768xf32, #tpu.memory_space<vmem>>, vector<2x768xf32>
    tpu.vector_store %arg9[%c0_27, %c0_28], %37 {strides = array<i32>} : memref<2x768xf32, #tpu.memory_space<vmem>>, vector<2x768xf32>,
    return
  }
  func.func @transform_0(%arg0: i32) -> (i32, i32, i32) {
    %c0_i32 = arith.constant 0 : i32
    %c0_i32_0 = arith.constant 0 : i32
    %c0_i32_1 = arith.constant 0 : i32
    %c0_i32_2 = arith.constant 0 : i32
    return %c0_i32, %c0_i32_0, %c0_i32_1 : i32, i32, i32
  }
  func.func @transform_1(%arg0: i32) -> (i32, i32, i32) {
    %c0_i32 = arith.constant 0 : i32
    %c0_i32_0 = arith.constant 0 : i32
    %c0_i32_1 = arith.constant 0 : i32
    %c0_i32_2 = arith.constant 0 : i32
    return %c0_i32, %c0_i32_0, %c0_i32_1 : i32, i32, i32
  }
  func.func @transform_2(%arg0: i32) -> (i32, i32) {
    %c0_i32 = arith.constant 0 : i32
    %c0_i32_0 = arith.constant 0 : i32
    %c0_i32_1 = arith.constant 0 : i32
    return %c0_i32, %c0_i32_0 : i32, i32
  }
  func.func @transform_3(%arg0: i32) -> (i32, i32) {
    %c0_i32 = arith.constant 0 : i32
    %c0_i32_0 = arith.constant 0 : i32
    %c0_i32_1 = arith.constant 0 : i32
    return %c0_i32, %c0_i32_0 : i32, i32
  }
  func.func @transform_4(%arg0: i32) -> (i32, i32) {
    %c0_i32 = arith.constant 0 : i32
    %c0_i32_0 = arith.constant 0 : i32
    %c0_i32_1 = arith.constant 0 : i32
    return %c0_i32, %c0_i32_0 : i32, i32
  }
  func.func @transform_5(%arg0: i32) -> (i32, i32) {
    %c0_i32 = arith.constant 0 : i32
    %c0_i32_0 = arith.constant 0 : i32
    %c0_i32_1 = arith.constant 0 : i32
    return %c0_i32, %c0_i32_0 : i32, i32
  }
  func.func @transform_6(%arg0: i32) -> (i32, i32) {
    %c0_i32 = arith.constant 0 : i32
    %c0_i32_0 = arith.constant 0 : i32
    %c0_i32_1 = arith.constant 0 : i32
    return %c0_i32, %c0_i32_0 : i32, i32
  }
  func.func @transform_7(%arg0: i32) -> (i32, i32) {
    %c0_i32 = arith.constant 0 : i32
    %c0_i32_0 = arith.constant 0 : i32
    %c0_i32_1 = arith.constant 0 : i32
    return %c0_i32, %c0_i32_0 : i32, i32
  }
  func.func @transform_8(%arg0: i32) -> (i32, i32) {
    %c0_i32 = arith.constant 0 : i32
    %c0_i32_0 = arith.constant 0 : i32
    %c0_i32_1 = arith.constant 0 : i32
    return %c0_i32, %c0_i32_0 : i32, i32
  }
  func.func @transform_9(%arg0: i32) -> (i32, i32) {
    %c0_i32 = arith.constant 0 : i32
    %c0_i32_0 = arith.constant 0 : i32
    %c0_i32_1 = arith.constant 0 : i32
    return %c0_i32, %c0_i32_0 : i32, i32
  }
}

module attributes {stable_mosaic.version = 11 : i64} {
  func.func @_se_fuse_kernel(%arg0: i32, %arg1: memref<2x64x128xf32, #tpu.memory_space<vmem>>, %arg2: memref<2x64x128xf32, #tpu.memory_space<vmem>>, %arg3: memref<256x8xf32, #tpu.memory_space<vmem>>, %arg4: memref<1x8xf32, #tpu.memory_space<vmem>>, %arg5: memref<1x8xf32, #tpu.memory_space<vmem>>, %arg6: memref<1x1xf32, #tpu.memory_space<vmem>>, %arg7: memref<2x3072xf32, #tpu.memory_space<vmem>>, %arg8: memref<2x3072xf32, #tpu.memory_space<vmem>>, %arg9: memref<2x3072xf32, #tpu.memory_space<vmem>>, %arg10: memref<2x1xf32, #tpu.memory_space<vmem>>) attributes {dimension_semantics = [#tpu.dimension_semantics<arbitrary>], iteration_bounds = array<i64: 1>, scalar_prefetch = 0 : i64, scratch_operands = 0 : i64, tpu.core_type = #tpu.core_type<tc>, window_params = [{pipeline_mode = #tpu.pipeline_mode<synchronous>, transform_indices = @transform_0, window_bounds = array<i64: 2, 64, 128>}, {pipeline_mode = #tpu.pipeline_mode<synchronous>, transform_indices = @transform_1, window_bounds = array<i64: 2, 64, 128>}, {pipeline_mode = #tpu.pipeline_mode<synchronous>, transform_indices = @transform_2, window_bounds = array<i64: 256, 8>}, {pipeline_mode = #tpu.pipeline_mode<synchronous>, transform_indices = @transform_3, window_bounds = array<i64: 1, 8>}, {pipeline_mode = #tpu.pipeline_mode<synchronous>, transform_indices = @transform_4, window_bounds = array<i64: 1, 8>}, {pipeline_mode = #tpu.pipeline_mode<synchronous>, transform_indices = @transform_5, window_bounds = array<i64: 1, 1>}, {pipeline_mode = #tpu.pipeline_mode<synchronous>, transform_indices = @transform_6, window_bounds = array<i64: 2, 3072>}, {pipeline_mode = #tpu.pipeline_mode<synchronous>, transform_indices = @transform_7, window_bounds = array<i64: 2, 3072>}, {pipeline_mode = #tpu.pipeline_mode<synchronous>, transform_indices = @transform_8, window_bounds = array<i64: 2, 3072>}, {pipeline_mode = #tpu.pipeline_mode<synchronous>, transform_indices = @transform_9, window_bounds = array<i64: 2, 1>}]} {
    %c0 = arith.constant 0 : index
    %c0_0 = arith.constant 0 : index
    %c0_1 = arith.constant 0 : index
    %0 = vector.load %arg1[%c0, %c0_0, %c0_1] : memref<2x64x128xf32, #tpu.memory_space<vmem>>, vector<2x64x128xf32>
    %cst = arith.constant dense<0.000000e+00> : vector<2x128xf32>
    %1 = vector.multi_reduction <add>, %0, %cst [1] : vector<2x64x128xf32> to vector<2x128xf32>
    %cst_2 = arith.constant 6.400000e+01 : f32
    %2 = vector.broadcast %cst_2 : f32 to vector<2x128xf32>
    %3 = arith.divf %1, %2 : vector<2x128xf32>
    %c0_3 = arith.constant 0 : index
    %c0_4 = arith.constant 0 : index
    %c0_5 = arith.constant 0 : index
    %4 = vector.load %arg2[%c0_3, %c0_4, %c0_5] : memref<2x64x128xf32, #tpu.memory_space<vmem>>, vector<2x64x128xf32>
    %cst_6 = arith.constant dense<0.000000e+00> : vector<2x128xf32>
    %5 = vector.multi_reduction <add>, %4, %cst_6 [1] : vector<2x64x128xf32> to vector<2x128xf32>
    %cst_7 = arith.constant 6.400000e+01 : f32
    %6 = vector.broadcast %cst_7 : f32 to vector<2x128xf32>
    %7 = arith.divf %5, %6 : vector<2x128xf32>
    %c0_8 = arith.constant 0 : index
    %c0_9 = arith.constant 0 : index
    %8 = vector.load %arg3[%c0_8, %c0_9] : memref<256x8xf32, #tpu.memory_space<vmem>>, vector<256x8xf32>
    %9 = vector.extract_strided_slice %8 {offsets = [0, 0], sizes = [128, 8], strides = [1, 1]} : vector<256x8xf32> to vector<128x8xf32>
    %cst_10 = arith.constant dense<0.000000e+00> : vector<2x8xf32>
    %10 = tpu.matmul %3, %9, %cst_10 {dimension_numbers = #tpu.dot_dimension_numbers<[1], [0], [0], [1], [0, 0, 1, 1], [], []>} : vector<2x128xf32>, vector<128x8xf32>, vector<2x8xf32> -> vector<2x8xf32>
    %11 = vector.extract_strided_slice %8 {offsets = [128, 0], sizes = [128, 8], strides = [1, 1]} : vector<256x8xf32> to vector<128x8xf32>
    %cst_11 = arith.constant dense<0.000000e+00> : vector<2x8xf32>
    %12 = tpu.matmul %7, %11, %cst_11 {dimension_numbers = #tpu.dot_dimension_numbers<[1], [0], [0], [1], [0, 0, 1, 1], [], []>} : vector<2x128xf32>, vector<128x8xf32>, vector<2x8xf32> -> vector<2x8xf32>
    %13 = arith.addf %10, %12 : vector<2x8xf32>
    %c0_12 = arith.constant 0 : index
    %c0_13 = arith.constant 0 : index
    %14 = vector.load %arg4[%c0_12, %c0_13] : memref<1x8xf32, #tpu.memory_space<vmem>>, vector<1x8xf32>
    %15 = vector.broadcast %14 : vector<1x8xf32> to vector<2x8xf32>
    %16 = arith.addf %13, %15 : vector<2x8xf32>
    %cst_14 = arith.constant 0.000000e+00 : f32
    %17 = vector.broadcast %cst_14 : f32 to vector<2x8xf32>
    %18 = arith.maximumf %16, %17 : vector<2x8xf32>
    %c0_15 = arith.constant 0 : index
    %c0_16 = arith.constant 0 : index
    %19 = vector.load %arg5[%c0_15, %c0_16] : memref<1x8xf32, #tpu.memory_space<vmem>>, vector<1x8xf32>
    %20 = vector.broadcast %19 : vector<1x8xf32> to vector<2x8xf32>
    %21 = arith.mulf %18, %20 : vector<2x8xf32>
    %cst_17 = arith.constant dense<0.000000e+00> : vector<2xf32>
    %22 = vector.multi_reduction <add>, %21, %cst_17 [1] : vector<2x8xf32> to vector<2xf32>
    %23 = vector.shape_cast %22 : vector<2xf32> to vector<2x1xf32>
    %c0_18 = arith.constant 0 : index
    %c0_19 = arith.constant 0 : index
    %24 = vector.load %arg6[%c0_18, %c0_19] : memref<1x1xf32, #tpu.memory_space<vmem>>, vector<1x1xf32>
    %25 = vector.broadcast %24 : vector<1x1xf32> to vector<2x1xf32>
    %26 = arith.addf %23, %25 : vector<2x1xf32>
    %27 = arith.negf %26 : vector<2x1xf32>
    %28 = math.exp %27 : vector<2x1xf32>
    %cst_20 = arith.constant 1.000000e+00 : f32
    %29 = vector.broadcast %cst_20 : f32 to vector<2x1xf32>
    %30 = arith.addf %29, %28 : vector<2x1xf32>
    %31 = arith.divf %29, %30 : vector<2x1xf32>
    %c0_21 = arith.constant 0 : index
    %c0_22 = arith.constant 0 : index
    %32 = vector.load %arg10[%c0_21, %c0_22] : memref<2x1xf32, #tpu.memory_space<vmem>>, vector<2x1xf32>
    tpu.vector_store %arg10[%c0_21, %c0_22], %31 {strides = array<i32>} : memref<2x1xf32, #tpu.memory_space<vmem>>, vector<2x1xf32>,
    %c0_23 = arith.constant 0 : index
    %c0_24 = arith.constant 0 : index
    %33 = vector.load %arg7[%c0_23, %c0_24] : memref<2x3072xf32, #tpu.memory_space<vmem>>, vector<2x3072xf32>
    %c0_25 = arith.constant 0 : index
    %c0_26 = arith.constant 0 : index
    %34 = vector.load %arg8[%c0_25, %c0_26] : memref<2x3072xf32, #tpu.memory_space<vmem>>, vector<2x3072xf32>
    %35 = vector.broadcast %31 : vector<2x1xf32> to vector<2x3072xf32>
    %36 = arith.mulf %35, %34 : vector<2x3072xf32>
    %37 = arith.addf %33, %36 : vector<2x3072xf32>
    %c0_27 = arith.constant 0 : index
    %c0_28 = arith.constant 0 : index
    %38 = vector.load %arg9[%c0_27, %c0_28] : memref<2x3072xf32, #tpu.memory_space<vmem>>, vector<2x3072xf32>
    tpu.vector_store %arg9[%c0_27, %c0_28], %37 {strides = array<i32>} : memref<2x3072xf32, #tpu.memory_space<vmem>>, vector<2x3072xf32>,
    return
  }
  func.func @transform_0(%arg0: i32) -> (i32, i32, i32) {
    %c0_i32 = arith.constant 0 : i32
    %c0_i32_0 = arith.constant 0 : i32
    %c0_i32_1 = arith.constant 0 : i32
    %c0_i32_2 = arith.constant 0 : i32
    return %c0_i32, %c0_i32_0, %c0_i32_1 : i32, i32, i32
  }
  func.func @transform_1(%arg0: i32) -> (i32, i32, i32) {
    %c0_i32 = arith.constant 0 : i32
    %c0_i32_0 = arith.constant 0 : i32
    %c0_i32_1 = arith.constant 0 : i32
    %c0_i32_2 = arith.constant 0 : i32
    return %c0_i32, %c0_i32_0, %c0_i32_1 : i32, i32, i32
  }
  func.func @transform_2(%arg0: i32) -> (i32, i32) {
    %c0_i32 = arith.constant 0 : i32
    %c0_i32_0 = arith.constant 0 : i32
    %c0_i32_1 = arith.constant 0 : i32
    return %c0_i32, %c0_i32_0 : i32, i32
  }
  func.func @transform_3(%arg0: i32) -> (i32, i32) {
    %c0_i32 = arith.constant 0 : i32
    %c0_i32_0 = arith.constant 0 : i32
    %c0_i32_1 = arith.constant 0 : i32
    return %c0_i32, %c0_i32_0 : i32, i32
  }
  func.func @transform_4(%arg0: i32) -> (i32, i32) {
    %c0_i32 = arith.constant 0 : i32
    %c0_i32_0 = arith.constant 0 : i32
    %c0_i32_1 = arith.constant 0 : i32
    return %c0_i32, %c0_i32_0 : i32, i32
  }
  func.func @transform_5(%arg0: i32) -> (i32, i32) {
    %c0_i32 = arith.constant 0 : i32
    %c0_i32_0 = arith.constant 0 : i32
    %c0_i32_1 = arith.constant 0 : i32
    return %c0_i32, %c0_i32_0 : i32, i32
  }
  func.func @transform_6(%arg0: i32) -> (i32, i32) {
    %c0_i32 = arith.constant 0 : i32
    %c0_i32_0 = arith.constant 0 : i32
    %c0_i32_1 = arith.constant 0 : i32
    return %c0_i32, %c0_i32_0 : i32, i32
  }
  func.func @transform_7(%arg0: i32) -> (i32, i32) {
    %c0_i32 = arith.constant 0 : i32
    %c0_i32_0 = arith.constant 0 : i32
    %c0_i32_1 = arith.constant 0 : i32
    return %c0_i32, %c0_i32_0 : i32, i32
  }
  func.func @transform_8(%arg0: i32) -> (i32, i32) {
    %c0_i32 = arith.constant 0 : i32
    %c0_i32_0 = arith.constant 0 : i32
    %c0_i32_1 = arith.constant 0 : i32
    return %c0_i32, %c0_i32_0 : i32, i32
  }
  func.func @transform_9(%arg0: i32) -> (i32, i32) {
    %c0_i32 = arith.constant 0 : i32
    %c0_i32_0 = arith.constant 0 : i32
    %c0_i32_1 = arith.constant 0 : i32
    return %c0_i32, %c0_i32_0 : i32, i32
  }
}

module attributes {stable_mosaic.version = 11 : i64} {
  func.func @_embed_proj_kernel(%arg0: i32, %arg1: memref<40x256xf32, #tpu.memory_space<vmem>>, %arg2: memref<256x128xf32, #tpu.memory_space<vmem>>, %arg3: memref<1x128xf32, #tpu.memory_space<vmem>>, %arg4: memref<128x128xf32, #tpu.memory_space<vmem>>, %arg5: memref<1x128xf32, #tpu.memory_space<vmem>>, %arg6: memref<40x128xf32, #tpu.memory_space<vmem>>) attributes {dimension_semantics = [#tpu.dimension_semantics<parallel>], iteration_bounds = array<i64: 1>, scalar_prefetch = 0 : i64, scratch_operands = 0 : i64, tpu.core_type = #tpu.core_type<tc>, window_params = [{transform_indices = @transform_0, window_bounds = array<i64: 40, 256>}, {pipeline_mode = #tpu.pipeline_mode<synchronous>, transform_indices = @transform_1, window_bounds = array<i64: 256, 128>}, {pipeline_mode = #tpu.pipeline_mode<synchronous>, transform_indices = @transform_2, window_bounds = array<i64: 1, 128>}, {pipeline_mode = #tpu.pipeline_mode<synchronous>, transform_indices = @transform_3, window_bounds = array<i64: 128, 128>}, {pipeline_mode = #tpu.pipeline_mode<synchronous>, transform_indices = @transform_4, window_bounds = array<i64: 1, 128>}, {transform_indices = @transform_5, window_bounds = array<i64: 40, 128>}]} {
    %c0 = arith.constant 0 : index
    %c0_0 = arith.constant 0 : index
    %0 = vector.load %arg1[%c0, %c0_0] : memref<40x256xf32, #tpu.memory_space<vmem>>, vector<40x256xf32>
    %c0_1 = arith.constant 0 : index
    %c0_2 = arith.constant 0 : index
    %1 = vector.load %arg2[%c0_1, %c0_2] : memref<256x128xf32, #tpu.memory_space<vmem>>, vector<256x128xf32>
    %cst = arith.constant dense<0.000000e+00> : vector<40x128xf32>
    %2 = tpu.matmul %0, %1, %cst {dimension_numbers = #tpu.dot_dimension_numbers<[1], [0], [0], [1], [0, 0, 1, 1], [], []>} : vector<40x256xf32>, vector<256x128xf32>, vector<40x128xf32> -> vector<40x128xf32>
    %c0_3 = arith.constant 0 : index
    %c0_4 = arith.constant 0 : index
    %3 = vector.load %arg3[%c0_3, %c0_4] : memref<1x128xf32, #tpu.memory_space<vmem>>, vector<1x128xf32>
    %4 = vector.broadcast %3 : vector<1x128xf32> to vector<40x128xf32>
    %5 = arith.addf %2, %4 : vector<40x128xf32>
    %cst_5 = arith.constant 0.000000e+00 : f32
    %6 = vector.broadcast %cst_5 : f32 to vector<40x128xf32>
    %7 = arith.maximumf %5, %6 : vector<40x128xf32>
    %c0_6 = arith.constant 0 : index
    %c0_7 = arith.constant 0 : index
    %8 = vector.load %arg4[%c0_6, %c0_7] : memref<128x128xf32, #tpu.memory_space<vmem>>, vector<128x128xf32>
    %cst_8 = arith.constant dense<0.000000e+00> : vector<40x128xf32>
    %9 = tpu.matmul %7, %8, %cst_8 {dimension_numbers = #tpu.dot_dimension_numbers<[1], [0], [0], [1], [0, 0, 1, 1], [], []>} : vector<40x128xf32>, vector<128x128xf32>, vector<40x128xf32> -> vector<40x128xf32>
    %c0_9 = arith.constant 0 : index
    %c0_10 = arith.constant 0 : index
    %10 = vector.load %arg5[%c0_9, %c0_10] : memref<1x128xf32, #tpu.memory_space<vmem>>, vector<1x128xf32>
    %11 = vector.broadcast %10 : vector<1x128xf32> to vector<40x128xf32>
    %12 = arith.addf %9, %11 : vector<40x128xf32>
    %c0_11 = arith.constant 0 : index
    %c0_12 = arith.constant 0 : index
    %13 = vector.load %arg6[%c0_11, %c0_12] : memref<40x128xf32, #tpu.memory_space<vmem>>, vector<40x128xf32>
    tpu.vector_store %arg6[%c0_11, %c0_12], %12 {strides = array<i32>} : memref<40x128xf32, #tpu.memory_space<vmem>>, vector<40x128xf32>,
    return
  }
  func.func @transform_0(%arg0: i32) -> (i32, i32) {
    %c0_i32 = arith.constant 0 : i32
    %c0_i32_0 = arith.constant 0 : i32
    return %arg0, %c0_i32 : i32, i32
  }
  func.func @transform_1(%arg0: i32) -> (i32, i32) {
    %c0_i32 = arith.constant 0 : i32
    %c0_i32_0 = arith.constant 0 : i32
    %c0_i32_1 = arith.constant 0 : i32
    return %c0_i32, %c0_i32_0 : i32, i32
  }
  func.func @transform_2(%arg0: i32) -> (i32, i32) {
    %c0_i32 = arith.constant 0 : i32
    %c0_i32_0 = arith.constant 0 : i32
    %c0_i32_1 = arith.constant 0 : i32
    return %c0_i32, %c0_i32_0 : i32, i32
  }
  func.func @transform_3(%arg0: i32) -> (i32, i32) {
    %c0_i32 = arith.constant 0 : i32
    %c0_i32_0 = arith.constant 0 : i32
    %c0_i32_1 = arith.constant 0 : i32
    return %c0_i32, %c0_i32_0 : i32, i32
  }
  func.func @transform_4(%arg0: i32) -> (i32, i32) {
    %c0_i32 = arith.constant 0 : i32
    %c0_i32_0 = arith.constant 0 : i32
    %c0_i32_1 = arith.constant 0 : i32
    return %c0_i32, %c0_i32_0 : i32, i32
  }
  func.func @transform_5(%arg0: i32) -> (i32, i32) {
    %c0_i32 = arith.constant 0 : i32
    %c0_i32_0 = arith.constant 0 : i32
    return %arg0, %c0_i32 : i32, i32
  }
}

module attributes {stable_mosaic.version = 11 : i64} {
  func.func @_xattn_kernel(%arg0: i32, %arg1: memref<16x128xf32, #tpu.memory_space<vmem>>, %arg2: memref<1x20x128xf32, #tpu.memory_space<vmem>>, %arg3: memref<1x20x128xf32, #tpu.memory_space<vmem>>, %arg4: memref<1x16x128xf32, #tpu.memory_space<vmem>>) attributes {dimension_semantics = [#tpu.dimension_semantics<parallel>], iteration_bounds = array<i64: 2>, scalar_prefetch = 0 : i64, scratch_operands = 0 : i64, tpu.core_type = #tpu.core_type<tc>, window_params = [{pipeline_mode = #tpu.pipeline_mode<synchronous>, transform_indices = @transform_0, window_bounds = array<i64: 16, 128>}, {transform_indices = @transform_1, window_bounds = array<i64: 1, 20, 128>}, {transform_indices = @transform_2, window_bounds = array<i64: 1, 20, 128>}, {transform_indices = @transform_3, window_bounds = array<i64: 1, 16, 128>}]} {
    %c0 = arith.constant 0 : index
    %c0_0 = arith.constant 0 : index
    %0 = vector.load %arg1[%c0, %c0_0] : memref<16x128xf32, #tpu.memory_space<vmem>>, vector<16x128xf32>
    %c0_1 = arith.constant 0 : index
    %c0_2 = arith.constant 0 : index
    %c0_3 = arith.constant 0 : index
    %1 = vector.load %arg2[%c0_1, %c0_2, %c0_3] : memref<1x20x128xf32, #tpu.memory_space<vmem>>, vector<1x20x128xf32>
    %2 = vector.shape_cast %1 : vector<1x20x128xf32> to vector<20x128xf32>
    %c0_4 = arith.constant 0 : index
    %c0_5 = arith.constant 0 : index
    %c0_6 = arith.constant 0 : index
    %3 = vector.load %arg3[%c0_4, %c0_5, %c0_6] : memref<1x20x128xf32, #tpu.memory_space<vmem>>, vector<1x20x128xf32>
    %4 = vector.shape_cast %3 : vector<1x20x128xf32> to vector<20x128xf32>
    %5 = arith.addf %2, %4 : vector<20x128xf32>
    "tpu.trace_start"() <{level = 10 : i32, message = "qd,kd->qk"}> : () -> ()
    %cst = arith.constant dense<0.000000e+00> : vector<16x20xf32>
    %6 = tpu.matmul %0, %5, %cst {dimension_numbers = #tpu.dot_dimension_numbers<[1], [1], [0], [0], [0, 0, 1, 0], [], []>} : vector<16x128xf32>, vector<20x128xf32>, vector<16x20xf32> -> vector<16x20xf32>
    "tpu.trace_stop"() : () -> ()
    %cst_7 = arith.constant 0.0883883461 : f32
    %7 = vector.broadcast %cst_7 : f32 to vector<16x20xf32>
    %8 = arith.mulf %6, %7 : vector<16x20xf32>
    %cst_8 = arith.constant dense<0xFF800000> : vector<16xf32>
    %9 = vector.multi_reduction <maximumf>, %8, %cst_8 [1] : vector<16x20xf32> to vector<16xf32>
    %10 = vector.shape_cast %9 : vector<16xf32> to vector<16x1xf32>
    %11 = vector.broadcast %10 : vector<16x1xf32> to vector<16x20xf32>
    %12 = arith.subf %8, %11 : vector<16x20xf32>
    %13 = math.exp %12 : vector<16x20xf32>
    %cst_9 = arith.constant dense<0.000000e+00> : vector<16xf32>
    %14 = vector.multi_reduction <add>, %13, %cst_9 [1] : vector<16x20xf32> to vector<16xf32>
    %15 = vector.shape_cast %14 : vector<16xf32> to vector<16x1xf32>
    %16 = vector.broadcast %15 : vector<16x1xf32> to vector<16x20xf32>
    %17 = arith.divf %13, %16 : vector<16x20xf32>
    "tpu.trace_start"() <{level = 10 : i32, message = "qk,kd->qd"}> : () -> ()
    %cst_10 = arith.constant dense<0.000000e+00> : vector<16x128xf32>
    %18 = tpu.matmul %17, %2, %cst_10 {dimension_numbers = #tpu.dot_dimension_numbers<[1], [0], [0], [1], [0, 0, 1, 1], [], []>} : vector<16x20xf32>, vector<20x128xf32>, vector<16x128xf32> -> vector<16x128xf32>
    "tpu.trace_stop"() : () -> ()
    %c0_11 = arith.constant 0 : index
    %c0_12 = arith.constant 0 : index
    %c0_13 = arith.constant 0 : index
    %19 = vector.load %arg4[%c0_11, %c0_12, %c0_13] : memref<1x16x128xf32, #tpu.memory_space<vmem>>, vector<1x16x128xf32>
    %20 = vector.shape_cast %19 : vector<1x16x128xf32> to vector<16x128xf32>
    %21 = vector.shape_cast %18 : vector<16x128xf32> to vector<1x16x128xf32>
    tpu.vector_store %arg4[%c0_11, %c0_12, %c0_13], %21 {strides = array<i32>} : memref<1x16x128xf32, #tpu.memory_space<vmem>>, vector<1x16x128xf32>,
    return
  }
  func.func @transform_0(%arg0: i32) -> (i32, i32) {
    %c0_i32 = arith.constant 0 : i32
    %c0_i32_0 = arith.constant 0 : i32
    %c0_i32_1 = arith.constant 0 : i32
    return %c0_i32, %c0_i32_0 : i32, i32
  }
  func.func @transform_1(%arg0: i32) -> (i32, i32, i32) {
    %c0_i32 = arith.constant 0 : i32
    %c0_i32_0 = arith.constant 0 : i32
    %c0_i32_1 = arith.constant 0 : i32
    return %arg0, %c0_i32, %c0_i32_0 : i32, i32, i32
  }
  func.func @transform_2(%arg0: i32) -> (i32, i32, i32) {
    %c0_i32 = arith.constant 0 : i32
    %c0_i32_0 = arith.constant 0 : i32
    %c0_i32_1 = arith.constant 0 : i32
    return %arg0, %c0_i32, %c0_i32_0 : i32, i32, i32
  }
  func.func @transform_3(%arg0: i32) -> (i32, i32, i32) {
    %c0_i32 = arith.constant 0 : i32
    %c0_i32_0 = arith.constant 0 : i32
    %c0_i32_1 = arith.constant 0 : i32
    return %arg0, %c0_i32, %c0_i32_0 : i32, i32, i32
  }
}

module attributes {stable_mosaic.version = 11 : i64} {
  func.func @_heads_kernel(%arg0: i32, %arg1: memref<32x128xf32, #tpu.memory_space<vmem>>, %arg2: memref<128x128xf32, #tpu.memory_space<vmem>>, %arg3: memref<1x128xf32, #tpu.memory_space<vmem>>, %arg4: memref<128x128xf32, #tpu.memory_space<vmem>>, %arg5: memref<1x128xf32, #tpu.memory_space<vmem>>, %arg6: memref<128x2xf32, #tpu.memory_space<vmem>>, %arg7: memref<1x2xf32, #tpu.memory_space<vmem>>, %arg8: memref<128x128xf32, #tpu.memory_space<vmem>>, %arg9: memref<1x128xf32, #tpu.memory_space<vmem>>, %arg10: memref<128x128xf32, #tpu.memory_space<vmem>>, %arg11: memref<1x128xf32, #tpu.memory_space<vmem>>, %arg12: memref<128x4xf32, #tpu.memory_space<vmem>>, %arg13: memref<1x4xf32, #tpu.memory_space<vmem>>, %arg14: memref<32x2xf32, #tpu.memory_space<vmem>>, %arg15: memref<32x4xf32, #tpu.memory_space<vmem>>) attributes {dimension_semantics = [#tpu.dimension_semantics<arbitrary>], iteration_bounds = array<i64: 1>, scalar_prefetch = 0 : i64, scratch_operands = 0 : i64, tpu.core_type = #tpu.core_type<tc>, window_params = [{pipeline_mode = #tpu.pipeline_mode<synchronous>, transform_indices = @transform_0, window_bounds = array<i64: 32, 128>}, {pipeline_mode = #tpu.pipeline_mode<synchronous>, transform_indices = @transform_1, window_bounds = array<i64: 128, 128>}, {pipeline_mode = #tpu.pipeline_mode<synchronous>, transform_indices = @transform_2, window_bounds = array<i64: 1, 128>}, {pipeline_mode = #tpu.pipeline_mode<synchronous>, transform_indices = @transform_3, window_bounds = array<i64: 128, 128>}, {pipeline_mode = #tpu.pipeline_mode<synchronous>, transform_indices = @transform_4, window_bounds = array<i64: 1, 128>}, {pipeline_mode = #tpu.pipeline_mode<synchronous>, transform_indices = @transform_5, window_bounds = array<i64: 128, 2>}, {pipeline_mode = #tpu.pipeline_mode<synchronous>, transform_indices = @transform_6, window_bounds = array<i64: 1, 2>}, {pipeline_mode = #tpu.pipeline_mode<synchronous>, transform_indices = @transform_7, window_bounds = array<i64: 128, 128>}, {pipeline_mode = #tpu.pipeline_mode<synchronous>, transform_indices = @transform_8, window_bounds = array<i64: 1, 128>}, {pipeline_mode = #tpu.pipeline_mode<synchronous>, transform_indices = @transform_9, window_bounds = array<i64: 128, 128>}, {pipeline_mode = #tpu.pipeline_mode<synchronous>, transform_indices = @transform_10, window_bounds = array<i64: 1, 128>}, {pipeline_mode = #tpu.pipeline_mode<synchronous>, transform_indices = @transform_11, window_bounds = array<i64: 128, 4>}, {pipeline_mode = #tpu.pipeline_mode<synchronous>, transform_indices = @transform_12, window_bounds = array<i64: 1, 4>}, {pipeline_mode = #tpu.pipeline_mode<synchronous>, transform_indices = @transform_13, window_bounds = array<i64: 32, 2>}, {pipeline_mode = #tpu.pipeline_mode<synchronous>, transform_indices = @transform_14, window_bounds = array<i64: 32, 4>}]} {
    %c0 = arith.constant 0 : index
    %c0_0 = arith.constant 0 : index
    %0 = vector.load %arg1[%c0, %c0_0] : memref<32x128xf32, #tpu.memory_space<vmem>>, vector<32x128xf32>
    %c0_1 = arith.constant 0 : index
    %c0_2 = arith.constant 0 : index
    %1 = vector.load %arg2[%c0_1, %c0_2] : memref<128x128xf32, #tpu.memory_space<vmem>>, vector<128x128xf32>
    %cst = arith.constant dense<0.000000e+00> : vector<32x128xf32>
    %2 = tpu.matmul %0, %1, %cst {dimension_numbers = #tpu.dot_dimension_numbers<[1], [0], [0], [1], [0, 0, 1, 1], [], []>} : vector<32x128xf32>, vector<128x128xf32>, vector<32x128xf32> -> vector<32x128xf32>
    %c0_3 = arith.constant 0 : index
    %c0_4 = arith.constant 0 : index
    %3 = vector.load %arg3[%c0_3, %c0_4] : memref<1x128xf32, #tpu.memory_space<vmem>>, vector<1x128xf32>
    %4 = vector.broadcast %3 : vector<1x128xf32> to vector<32x128xf32>
    %5 = arith.addf %2, %4 : vector<32x128xf32>
    %cst_5 = arith.constant 0.000000e+00 : f32
    %6 = vector.broadcast %cst_5 : f32 to vector<32x128xf32>
    %7 = arith.maximumf %5, %6 : vector<32x128xf32>
    %c0_6 = arith.constant 0 : index
    %c0_7 = arith.constant 0 : index
    %8 = vector.load %arg4[%c0_6, %c0_7] : memref<128x128xf32, #tpu.memory_space<vmem>>, vector<128x128xf32>
    %cst_8 = arith.constant dense<0.000000e+00> : vector<32x128xf32>
    %9 = tpu.matmul %7, %8, %cst_8 {dimension_numbers = #tpu.dot_dimension_numbers<[1], [0], [0], [1], [0, 0, 1, 1], [], []>} : vector<32x128xf32>, vector<128x128xf32>, vector<32x128xf32> -> vector<32x128xf32>
    %c0_9 = arith.constant 0 : index
    %c0_10 = arith.constant 0 : index
    %10 = vector.load %arg5[%c0_9, %c0_10] : memref<1x128xf32, #tpu.memory_space<vmem>>, vector<1x128xf32>
    %11 = vector.broadcast %10 : vector<1x128xf32> to vector<32x128xf32>
    %12 = arith.addf %9, %11 : vector<32x128xf32>
    %cst_11 = arith.constant 0.000000e+00 : f32
    %13 = vector.broadcast %cst_11 : f32 to vector<32x128xf32>
    %14 = arith.maximumf %12, %13 : vector<32x128xf32>
    %c0_12 = arith.constant 0 : index
    %c0_13 = arith.constant 0 : index
    %15 = vector.load %arg6[%c0_12, %c0_13] : memref<128x2xf32, #tpu.memory_space<vmem>>, vector<128x2xf32>
    %cst_14 = arith.constant dense<0.000000e+00> : vector<32x2xf32>
    %16 = tpu.matmul %14, %15, %cst_14 {dimension_numbers = #tpu.dot_dimension_numbers<[1], [0], [0], [1], [0, 0, 1, 1], [], []>} : vector<32x128xf32>, vector<128x2xf32>, vector<32x2xf32> -> vector<32x2xf32>
    %c0_15 = arith.constant 0 : index
    %c0_16 = arith.constant 0 : index
    %17 = vector.load %arg7[%c0_15, %c0_16] : memref<1x2xf32, #tpu.memory_space<vmem>>, vector<1x2xf32>
    %18 = vector.broadcast %17 : vector<1x2xf32> to vector<32x2xf32>
    %19 = arith.addf %16, %18 : vector<32x2xf32>
    %c0_17 = arith.constant 0 : index
    %c0_18 = arith.constant 0 : index
    %20 = vector.load %arg14[%c0_17, %c0_18] : memref<32x2xf32, #tpu.memory_space<vmem>>, vector<32x2xf32>
    tpu.vector_store %arg14[%c0_17, %c0_18], %19 {strides = array<i32>} : memref<32x2xf32, #tpu.memory_space<vmem>>, vector<32x2xf32>,
    %c0_19 = arith.constant 0 : index
    %c0_20 = arith.constant 0 : index
    %21 = vector.load %arg8[%c0_19, %c0_20] : memref<128x128xf32, #tpu.memory_space<vmem>>, vector<128x128xf32>
    %cst_21 = arith.constant dense<0.000000e+00> : vector<32x128xf32>
    %22 = tpu.matmul %0, %21, %cst_21 {dimension_numbers = #tpu.dot_dimension_numbers<[1], [0], [0], [1], [0, 0, 1, 1], [], []>} : vector<32x128xf32>, vector<128x128xf32>, vector<32x128xf32> -> vector<32x128xf32>
    %c0_22 = arith.constant 0 : index
    %c0_23 = arith.constant 0 : index
    %23 = vector.load %arg9[%c0_22, %c0_23] : memref<1x128xf32, #tpu.memory_space<vmem>>, vector<1x128xf32>
    %24 = vector.broadcast %23 : vector<1x128xf32> to vector<32x128xf32>
    %25 = arith.addf %22, %24 : vector<32x128xf32>
    %cst_24 = arith.constant 0.000000e+00 : f32
    %26 = vector.broadcast %cst_24 : f32 to vector<32x128xf32>
    %27 = arith.maximumf %25, %26 : vector<32x128xf32>
    %c0_25 = arith.constant 0 : index
    %c0_26 = arith.constant 0 : index
    %28 = vector.load %arg10[%c0_25, %c0_26] : memref<128x128xf32, #tpu.memory_space<vmem>>, vector<128x128xf32>
    %cst_27 = arith.constant dense<0.000000e+00> : vector<32x128xf32>
    %29 = tpu.matmul %27, %28, %cst_27 {dimension_numbers = #tpu.dot_dimension_numbers<[1], [0], [0], [1], [0, 0, 1, 1], [], []>} : vector<32x128xf32>, vector<128x128xf32>, vector<32x128xf32> -> vector<32x128xf32>
    %c0_28 = arith.constant 0 : index
    %c0_29 = arith.constant 0 : index
    %30 = vector.load %arg11[%c0_28, %c0_29] : memref<1x128xf32, #tpu.memory_space<vmem>>, vector<1x128xf32>
    %31 = vector.broadcast %30 : vector<1x128xf32> to vector<32x128xf32>
    %32 = arith.addf %29, %31 : vector<32x128xf32>
    %cst_30 = arith.constant 0.000000e+00 : f32
    %33 = vector.broadcast %cst_30 : f32 to vector<32x128xf32>
    %34 = arith.maximumf %32, %33 : vector<32x128xf32>
    %c0_31 = arith.constant 0 : index
    %c0_32 = arith.constant 0 : index
    %35 = vector.load %arg12[%c0_31, %c0_32] : memref<128x4xf32, #tpu.memory_space<vmem>>, vector<128x4xf32>
    %cst_33 = arith.constant dense<0.000000e+00> : vector<32x4xf32>
    %36 = tpu.matmul %34, %35, %cst_33 {dimension_numbers = #tpu.dot_dimension_numbers<[1], [0], [0], [1], [0, 0, 1, 1], [], []>} : vector<32x128xf32>, vector<128x4xf32>, vector<32x4xf32> -> vector<32x4xf32>
    %c0_34 = arith.constant 0 : index
    %c0_35 = arith.constant 0 : index
    %37 = vector.load %arg13[%c0_34, %c0_35] : memref<1x4xf32, #tpu.memory_space<vmem>>, vector<1x4xf32>
    %38 = vector.broadcast %37 : vector<1x4xf32> to vector<32x4xf32>
    %39 = arith.addf %36, %38 : vector<32x4xf32>
    %40 = arith.negf %39 : vector<32x4xf32>
    %41 = math.exp %40 : vector<32x4xf32>
    %cst_36 = arith.constant 1.000000e+00 : f32
    %42 = vector.broadcast %cst_36 : f32 to vector<32x4xf32>
    %43 = arith.addf %42, %41 : vector<32x4xf32>
    %44 = arith.divf %42, %43 : vector<32x4xf32>
    %c0_37 = arith.constant 0 : index
    %c0_38 = arith.constant 0 : index
    %45 = vector.load %arg15[%c0_37, %c0_38] : memref<32x4xf32, #tpu.memory_space<vmem>>, vector<32x4xf32>
    tpu.vector_store %arg15[%c0_37, %c0_38], %44 {strides = array<i32>} : memref<32x4xf32, #tpu.memory_space<vmem>>, vector<32x4xf32>,
    return
  }
  func.func @transform_0(%arg0: i32) -> (i32, i32) {
    %c0_i32 = arith.constant 0 : i32
    %c0_i32_0 = arith.constant 0 : i32
    %c0_i32_1 = arith.constant 0 : i32
    return %c0_i32, %c0_i32_0 : i32, i32
  }
  func.func @transform_1(%arg0: i32) -> (i32, i32) {
    %c0_i32 = arith.constant 0 : i32
    %c0_i32_0 = arith.constant 0 : i32
    %c0_i32_1 = arith.constant 0 : i32
    return %c0_i32, %c0_i32_0 : i32, i32
  }
  func.func @transform_2(%arg0: i32) -> (i32, i32) {
    %c0_i32 = arith.constant 0 : i32
    %c0_i32_0 = arith.constant 0 : i32
    %c0_i32_1 = arith.constant 0 : i32
    return %c0_i32, %c0_i32_0 : i32, i32
  }
  func.func @transform_3(%arg0: i32) -> (i32, i32) {
    %c0_i32 = arith.constant 0 : i32
    %c0_i32_0 = arith.constant 0 : i32
    %c0_i32_1 = arith.constant 0 : i32
    return %c0_i32, %c0_i32_0 : i32, i32
  }
  func.func @transform_4(%arg0: i32) -> (i32, i32) {
    %c0_i32 = arith.constant 0 : i32
    %c0_i32_0 = arith.constant 0 : i32
    %c0_i32_1 = arith.constant 0 : i32
    return %c0_i32, %c0_i32_0 : i32, i32
  }
  func.func @transform_5(%arg0: i32) -> (i32, i32) {
    %c0_i32 = arith.constant 0 : i32
    %c0_i32_0 = arith.constant 0 : i32
    %c0_i32_1 = arith.constant 0 : i32
    return %c0_i32, %c0_i32_0 : i32, i32
  }
  func.func @transform_6(%arg0: i32) -> (i32, i32) {
    %c0_i32 = arith.constant 0 : i32
    %c0_i32_0 = arith.constant 0 : i32
    %c0_i32_1 = arith.constant 0 : i32
    return %c0_i32, %c0_i32_0 : i32, i32
  }
  func.func @transform_7(%arg0: i32) -> (i32, i32) {
    %c0_i32 = arith.constant 0 : i32
    %c0_i32_0 = arith.constant 0 : i32
    %c0_i32_1 = arith.constant 0 : i32
    return %c0_i32, %c0_i32_0 : i32, i32
  }
  func.func @transform_8(%arg0: i32) -> (i32, i32) {
    %c0_i32 = arith.constant 0 : i32
    %c0_i32_0 = arith.constant 0 : i32
    %c0_i32_1 = arith.constant 0 : i32
    return %c0_i32, %c0_i32_0 : i32, i32
  }
  func.func @transform_9(%arg0: i32) -> (i32, i32) {
    %c0_i32 = arith.constant 0 : i32
    %c0_i32_0 = arith.constant 0 : i32
    %c0_i32_1 = arith.constant 0 : i32
    return %c0_i32, %c0_i32_0 : i32, i32
  }
  func.func @transform_10(%arg0: i32) -> (i32, i32) {
    %c0_i32 = arith.constant 0 : i32
    %c0_i32_0 = arith.constant 0 : i32
    %c0_i32_1 = arith.constant 0 : i32
    return %c0_i32, %c0_i32_0 : i32, i32
  }
  func.func @transform_11(%arg0: i32) -> (i32, i32) {
    %c0_i32 = arith.constant 0 : i32
    %c0_i32_0 = arith.constant 0 : i32
    %c0_i32_1 = arith.constant 0 : i32
    return %c0_i32, %c0_i32_0 : i32, i32
  }
  func.func @transform_12(%arg0: i32) -> (i32, i32) {
    %c0_i32 = arith.constant 0 : i32
    %c0_i32_0 = arith.constant 0 : i32
    %c0_i32_1 = arith.constant 0 : i32
    return %c0_i32, %c0_i32_0 : i32, i32
  }
  func.func @transform_13(%arg0: i32) -> (i32, i32) {
    %c0_i32 = arith.constant 0 : i32
    %c0_i32_0 = arith.constant 0 : i32
    %c0_i32_1 = arith.constant 0 : i32
    return %c0_i32, %c0_i32_0 : i32, i32
  }
  func.func @transform_14(%arg0: i32) -> (i32, i32) {
    %c0_i32 = arith.constant 0 : i32
    %c0_i32_0 = arith.constant 0 : i32
    %c0_i32_1 = arith.constant 0 : i32
    return %c0_i32, %c0_i32_0 : i32, i32
  }
}

</mosaic_0001>

<bundles_post_ra>
// kernel: hcat_forward.8
= control target key start
LH: loop header
LB: loop body
LE: loop exit
PB: predicated region body
PF: predicated region fallthrough
CT: control target
= control target key end

     0   :  { %s1554_s15 = smov 0   ;;  %s1556_s16 = smov 0   ;;  %s2109_s0 = inlined_call_operand.vmem [shape: f32[2,640,256], index: 0, kind: input, shape index: {}]   ;;  %s2110_s1 = inlined_call_operand.vmem [shape: f32[2,256,128], index: 1, kind: input, shape index: {}]   ;;  %s2111_s2 = inlined_call_operand.vmem [shape: f32[2,1,128], index: 2, kind: input, shape index: {}]   ;;  %s2112_s3 = inlined_call_operand.vmem [shape: f32[2,1,128], index: 3, kind: input, shape index: {}]   ;;  %s2113_s4 = inlined_call_operand.vmem [shape: f32[2,640,128], index: 4, kind: output, shape index: {}]  }
   0x1   :  { %s1558_s17 = smov 0  }
   0x2 LB: > { %s26_s18 = sadd.s32 1, %s1522_s16  ;;  %p1403_p0 = scmp.ge.s32.totalorder %s1526_s17, 1  ;;  %s1526_s17 = sphi %s1558_s17, %s14_s17   ;;  %s1522_s16 = sphi %s1556_s16, %s2115_s16   ;;  %s1518_s15 = sphi %s1554_s15, %s2114_s15  }
   0x3   : > { %p28_p1 = scmp.ge.s32.totalorder %s26_s18, 2  ;;  %p210_p2 = scmp.lt.s32.totalorder %s1526_s17, 3 }
   0x5   : > { %s2117_s18 = smov (%p28_p1, %s26_s18), 0  ;;  %p211_p3 = pnand %p1403_p0, %p210_p2 }
   0x6   : > { %p257_p4 = scmp.lt.s32.totalorder (!%p211_p3), %s1518_s15, 1 }
   0x7   : > { %214 = sbr.rel (%p211_p3) target bundleno = 436 (0x1b4), region = 36 }
   0xc   : > { %v1528_v0 = vmov 0.0   ;;  %s2119_s15 = smov (!%p257_p4, %s1518_s15), 1 }
   0xd   : > { %480 = vmatprep.subr.mxu0 %v1528_v0  ;;  %1413 = vmatprep.subr.mxu1 %v1528_v0  ;;  %s1412_s19 = sshll.u32 %s2119_s15, 8  ;;  %s1477_s23 = smul.u32 1280, %s2119_s15 }
   0xe   : > { %s1580_s22 = scalar_lea.vmem %s2110_s1, %s1412_s19  ;;  %s274_s29 = scalar_lea.vmem %s2111_s2, %s2119_s15 }
   0xf   : > { %v463_v1 = vld [vmem:[%s1580_s22 + $0x78] sm:$0xff]  ;;  %v462_v2 = vld [vmem:[%s1580_s22 + $0x70] sm:$0xff]  ;;  %v461_v3 = vld [vmem:[%s1580_s22 + $0x68] sm:$0xff]  ;;  %s1675_s26 = scalar_lea.vmem %s2109_s0, %s1477_s23  ;;  %s277_s6 = scalar_lea.vmem %s2112_s3, %s2119_s15 }
  0x10   : > { %481 = vmatpush1.msra.mxu0 %v463_v1  ;;  %1445 = vmatpush1.msra.mxu1 %v463_v1  ;;  %v460_v4 = vld [vmem:[%s1580_s22 + $0x60] sm:$0xff]  ;;  %v459_v5 = vld [vmem:[%s1580_s22 + $0x58] sm:$0xff]  ;;  %v458_v6 = vld [vmem:[%s1580_s22 + $0x50] sm:$0xff]  ;;  %s1478_s7 = smul.u32 640, %s2119_s15 }
  0x11   : > { %482 = vmatprep.subr.mxu0 %v1528_v0  ;;  %1414 = vmatprep.subr.mxu1 %v1528_v0  ;;  %v457_v7 = vld [vmem:[%s1580_s22 + $0x48] sm:$0xff]  ;;  %v456_v8 = vld [vmem:[%s1580_s22 + $0x40] sm:$0xff]  ;;  %v455_v9 = vld [vmem:[%s1580_s22 + $0x38] sm:$0xff] }
  0x12   : > { %483 = vmatpush1.msra.mxu0 %v462_v2  ;;  %1446 = vmatpush1.msra.mxu1 %v462_v2  ;;  %v454_v10 = vld [vmem:[%s1580_s22 + $0x30] sm:$0xff]  ;;  %v453_v11 = vld [vmem:[%s1580_s22 + $0x28] sm:$0xff]  ;;  %v452_v12 = vld [vmem:[%s1580_s22 + $0x20] sm:$0xff]  ;;  %s1862_s10 = scalar_lea.vmem %s2113_s4, %s1478_s7 }
  0x13   : > { %484 = vmatprep.subr.mxu0 %v1528_v0  ;;  %1415 = vmatprep.subr.mxu1 %v1528_v0  ;;  %v451_v13 = vld [vmem:[%s1580_s22 + $0x18] sm:$0xff]  ;;  %v450_v14 = vld [vmem:[%s1580_s22 + $0x10] sm:$0xff]  ;;  %v449_v15 = vld [vmem:[%s1580_s22 + $0x8] sm:$0xff] }
  0x14   : > { %485 = vmatpush1.msra.mxu0 %v461_v3  ;;  %1447 = vmatpush1.msra.mxu1 %v461_v3  ;;  %v448_v16 = vld [vmem:[%s1580_s22] sm:$0xff]  ;;  %v479_v17 = vld [vmem:[%s1580_s22 + $0xf8] sm:$0xff]  ;;  %v478_v18 = vld [vmem:[%s1580_s22 + $0xf0] sm:$0xff] }
  0x15   : > { %486 = vmatprep.subr.mxu0 %v1528_v0  ;;  %1416 = vmatprep.subr.mxu1 %v1528_v0  ;;  %v477_v19 = vld [vmem:[%s1580_s22 + $0xe8] sm:$0xff]  ;;  %v476_v20 = vld [vmem:[%s1580_s22 + $0xe0] sm:$0xff]  ;;  %v475_v21 = vld [vmem:[%s1580_s22 + $0xd8] sm:$0xff] }
  0x16   : > { %487 = vmatpush1.msra.mxu0 %v460_v4  ;;  %1448 = vmatpush1.msra.mxu1 %v460_v4  ;;  %v474_v22 = vld [vmem:[%s1580_s22 + $0xd0] sm:$0xff]  ;;  %v473_v23 = vld [vmem:[%s1580_s22 + $0xc8] sm:$0xff]  ;;  %v472_v24 = vld [vmem:[%s1580_s22 + $0xc0] sm:$0xff] }
  0x17   : > { %488 = vmatprep.subr.mxu0 %v1528_v0  ;;  %1417 = vmatprep.subr.mxu1 %v1528_v0  ;;  %v471_v25 = vld [vmem:[%s1580_s22 + $0xb8] sm:$0xff]  ;;  %v470_v26 = vld [vmem:[%s1580_s22 + $0xb0] sm:$0xff]  ;;  %v469_v27 = vld [vmem:[%s1580_s22 + $0xa8] sm:$0xff] }
  0x18   : > { %489 = vmatpush1.msra.mxu0 %v459_v5  ;;  %1449 = vmatpush1.msra.mxu1 %v459_v5  ;;  %v468_v28 = vld [vmem:[%s1580_s22 + $0xa0] sm:$0xff]  ;;  %v467_v29 = vld [vmem:[%s1580_s22 + $0x98] sm:$0xff]  ;;  %v466_v30 = vld [vmem:[%s1580_s22 + $0x90] sm:$0xff] }
  0x19   : > { %490 = vmatprep.subr.mxu0 %v1528_v0  ;;  %1418 = vmatprep.subr.mxu1 %v1528_v0  ;;  %v465_v31 = vld [vmem:[%s1580_s22 + $0x88] sm:$0xff]  ;;  %v464_v32 = vld [vmem:[%s1580_s22 + $0x80] sm:$0xff]  ;;  %v291_v37 = vld [vmem:[%s1675_s26 + $0x18] sm:$0xff] }
  0x1a   : > { %491 = vmatpush1.msra.mxu0 %v458_v6  ;;  %1450 = vmatpush1.msra.mxu1 %v458_v6  ;;  %v289_v33 = vld [vmem:[%s1675_s26 + $0x8] sm:$0xff]  ;;  %v288_v35 = vld [vmem:[%s1675_s26] sm:$0xff]  ;;  %v371_v38 = vld [vmem:[%s1675_s26 + $0x298] sm:$0xff] }
  0x1b   : > { %492 = vmatprep.subr.mxu0 %v1528_v0  ;;  %1419 = vmatprep.subr.mxu1 %v1528_v0  ;;  %v369_v34 = vld [vmem:[%s1675_s26 + $0x288] sm:$0xff]  ;;  %v368_v36 = vld [vmem:[%s1675_s26 + $0x280] sm:$0xff]  ;;  %v290_v39 = vld [vmem:[%s1675_s26 + $0x10] sm:$0xff] }
  0x1c   : > { %493 = vmatpush1.msra.mxu0 %v457_v7  ;;  %1451 = vmatpush1.msra.mxu1 %v457_v7  ;;  %v370_v40 = vld [vmem:[%s1675_s26 + $0x290] sm:$0xff]  ;;  %v293_v41 = vld [vmem:[%s1675_s26 + $0x28] sm:$0xff]  ;;  %v292_v43 = vld [vmem:[%s1675_s26 + $0x20] sm:$0xff] }
  0x1d   : > { %494 = vmatprep.subr.mxu0 %v1528_v0  ;;  %1420 = vmatprep.subr.mxu1 %v1528_v0  ;;  %v373_v42 = vld [vmem:[%s1675_s26 + $0x2a8] sm:$0xff]  ;;  %v372_v44 = vld [vmem:[%s1675_s26 + $0x2a0] sm:$0xff]  ;;  %v295_v45 = vld [vmem:[%s1675_s26 + $0x38] sm:$0xff] }
  0x1e   : > { %495 = vmatpush1.msra.mxu0 %v456_v8  ;;  %1452 = vmatpush1.msra.mxu1 %v456_v8  ;;  %v375_v46 = vld [vmem:[%s1675_s26 + $0x2b8] sm:$0xff]  ;;  %v294_v47 = vld [vmem:[%s1675_s26 + $0x30] sm:$0xff]  ;;  %v297_v49 = vld [vmem:[%s1675_s26 + $0x48] sm:$0xff] }
  0x1f   : > { %496 = vmatprep.subr.mxu0 %v1528_v0  ;;  %1421 = vmatprep.subr.mxu1 %v1528_v0  ;;  %v374_v48 = vld [vmem:[%s1675_s26 + $0x2b0] sm:$0xff]  ;;  %v377_v50 = vld [vmem:[%s1675_s26 + $0x2c8] sm:$0xff]  ;;  %v296_v51 = vld [vmem:[%s1675_s26 + $0x40] sm:$0xff] }
  0x20   : > { %497 = vmatpush1.msra.mxu0 %v455_v9  ;;  %1453 = vmatpush1.msra.mxu1 %v455_v9  ;;  %v376_v52 = vld [vmem:[%s1675_s26 + $0x2c0] sm:$0xff]  ;;  %v299_v53 = vld [vmem:[%s1675_s26 + $0x58] sm:$0xff]  ;;  %v298_v55 = vld [vmem:[%s1675_s26 + $0x50] sm:$0xff] }
  0x21   : > { %498 = vmatprep.subr.mxu0 %v1528_v0  ;;  %1422 = vmatprep.subr.mxu1 %v1528_v0  ;;  %v379_v54 = vld [vmem:[%s1675_s26 + $0x2d8] sm:$0xff]  ;;  %v378_v56 = vld [vmem:[%s1675_s26 + $0x2d0] sm:$0xff]  ;;  %v301_v57 = vld [vmem:[%s1675_s26 + $0x68] sm:$0xff] }
  0x22   : > { %499 = vmatpush1.msra.mxu0 %v454_v10  ;;  %1454 = vmatpush1.msra.mxu1 %v454_v10  ;;  %v381_v58 = vld [vmem:[%s1675_s26 + $0x2e8] sm:$0xff]  ;;  %v300_v59 = vld [vmem:[%s1675_s26 + $0x60] sm:$0xff]  ;;  %v303_v61 = vld [vmem:[%s1675_s26 + $0x78] sm:$0xff] }
  0x23   : > { %500 = vmatprep.subr.mxu0 %v1528_v0  ;;  %1423 = vmatprep.subr.mxu1 %v1528_v0  ;;  %v380_v60 = vld [vmem:[%s1675_s26 + $0x2e0] sm:$0xff]  ;;  %v383_v62 = vld [vmem:[%s1675_s26 + $0x2f8] sm:$0xff]  ;;  %v302_v63 = vld [vmem:[%s1675_s26 + $0x70] sm:$0xff] }
  0x24   : > { %501 = vmatpush1.msra.mxu0 %v453_v11  ;;  %1455 = vmatpush1.msra.mxu1 %v453_v11  ;;  %v305_v1 = vld [vmem:[%s1675_s26 + $0x88] sm:$0xff]  ;;  %v304_v3 = vld [vmem:[%s1675_s26 + $0x80] sm:$0xff]  ;;  %v307_v5 = vld [vmem:[%s1675_s26 + $0x98] sm:$0xff] }
  0x25   : > { %502 = vmatprep.subr.mxu0 %v1528_v0  ;;  %1424 = vmatprep.subr.mxu1 %v1528_v0  ;;  %v385_v2 = vld [vmem:[%s1675_s26 + $0x308] sm:$0xff]  ;;  %v384_v4 = vld [vmem:[%s1675_s26 + $0x300] sm:$0xff]  ;;  %v387_v6 = vld [vmem:[%s1675_s26 + $0x318] sm:$0xff] }
  0x26   : > { %503 = vmatpush1.msra.mxu0 %v452_v12  ;;  %1456 = vmatpush1.msra.mxu1 %v452_v12  ;;  %v306_v7 = vld [vmem:[%s1675_s26 + $0x90] sm:$0xff]  ;;  %v309_v9 = vld [vmem:[%s1675_s26 + $0xa8] sm:$0xff]  ;;  %v308_v11 = vld [vmem:[%s1675_s26 + $0xa0] sm:$0xff] }
  0x27   : > { %504 = vmatprep.subr.mxu0 %v1528_v0  ;;  %1425 = vmatprep.subr.mxu1 %v1528_v0  ;;  %v386_v8 = vld [vmem:[%s1675_s26 + $0x310] sm:$0xff]  ;;  %v389_v10 = vld [vmem:[%s1675_s26 + $0x328] sm:$0xff]  ;;  %v388_v12 = vld [vmem:[%s1675_s26 + $0x320] sm:$0xff] }
  0x28   : > { %505 = vmatpush1.msra.mxu0 %v451_v13  ;;  %1457 = vmatpush1.msra.mxu1 %v451_v13  ;;  %v311_v13 = vld [vmem:[%s1675_s26 + $0xb8] sm:$0xff] }
  0x29   : > { %506 = vmatprep.subr.mxu0 %v1528_v0  ;;  %1426 = vmatprep.subr.mxu1 %v1528_v0 }
  0x2a   : > { %507 = vmatpush1.msra.mxu0 %v450_v14  ;;  %1458 = vmatpush1.msra.mxu1 %v450_v14  ;;  %v391_v14 = vld [vmem:[%s1675_s26 + $0x338] sm:$0xff] }
  0x2b   : > { %508 = vmatprep.subr.mxu0 %v1528_v0  ;;  %1427 = vmatprep.subr.mxu1 %v1528_v0 }
  0x2c   : > { %509 = vmatpush1.msra.mxu0 %v449_v15  ;;  %1459 = vmatpush1.msra.mxu1 %v449_v15  ;;  %v310_v15 = vld [vmem:[%s1675_s26 + $0xb0] sm:$0xff] }
  0x2d   : > { %510 = vmatprep.subr.mxu0 %v1528_v0  ;;  %1428 = vmatprep.subr.mxu1 %v1528_v0 }
  0x2e   : > { %511 = vmatpush1.msra.mxu0 %v448_v16  ;;  %1460 = vmatpush1.msra.mxu1 %v448_v16  ;;  %v390_v16 = vld [vmem:[%s1675_s26 + $0x330] sm:$0xff] }
  0x2f   : > { %512 = vmatprep.subr.mxu0 %v1528_v0  ;;  %1429 = vmatprep.subr.mxu1 %v1528_v0 }
  0x30   : > { %513 = vmatpush2.msra.mxu0 %v479_v17  ;;  %1461 = vmatpush2.msra.mxu1 %v479_v17  ;;  %v313_v17 = vld [vmem:[%s1675_s26 + $0xc8] sm:$0xff] }
  0x31   : > { %514 = vmatprep.subr.mxu0 %v1528_v0  ;;  %1430 = vmatprep.subr.mxu1 %v1528_v0 }
  0x32   : > { %515 = vmatpush2.msra.mxu0 %v478_v18  ;;  %1462 = vmatpush2.msra.mxu1 %v478_v18  ;;  %v393_v18 = vld [vmem:[%s1675_s26 + $0x348] sm:$0xff] }
  0x33   : > { %516 = vmatprep.subr.mxu0 %v1528_v0  ;;  %1431 = vmatprep.subr.mxu1 %v1528_v0 }
  0x34   : > { %517 = vmatpush2.msra.mxu0 %v477_v19  ;;  %1463 = vmatpush2.msra.mxu1 %v477_v19  ;;  %v312_v19 = vld [vmem:[%s1675_s26 + $0xc0] sm:$0xff] }
  0x35   : > { %518 = vmatprep.subr.mxu0 %v1528_v0  ;;  %1432 = vmatprep.subr.mxu1 %v1528_v0 }
  0x36   : > { %519 = vmatpush2.msra.mxu0 %v476_v20  ;;  %1464 = vmatpush2.msra.mxu1 %v476_v20  ;;  %v392_v20 = vld [vmem:[%s1675_s26 + $0x340] sm:$0xff] }
  0x37   : > { %520 = vmatprep.subr.mxu0 %v1528_v0  ;;  %1433 = vmatprep.subr.mxu1 %v1528_v0 }
  0x38   : > { %521 = vmatpush2.msra.mxu0 %v475_v21  ;;  %1465 = vmatpush2.msra.mxu1 %v475_v21  ;;  %v315_v21 = vld [vmem:[%s1675_s26 + $0xd8] sm:$0xff] }
  0x39   : > { %522 = vmatprep.subr.mxu0 %v1528_v0  ;;  %1434 = vmatprep.subr.mxu1 %v1528_v0 }
  0x3a   : > { %523 = vmatpush2.msra.mxu0 %v474_v22  ;;  %1466 = vmatpush2.msra.mxu1 %v474_v22  ;;  %v395_v22 = vld [vmem:[%s1675_s26 + $0x358] sm:$0xff] }
  0x3b   : > { %524 = vmatprep.subr.mxu0 %v1528_v0  ;;  %1435 = vmatprep.subr.mxu1 %v1528_v0 }
  0x3c   : > { %525 = vmatpush2.msra.mxu0 %v473_v23  ;;  %1467 = vmatpush2.msra.mxu1 %v473_v23  ;;  %v314_v23 = vld [vmem:[%s1675_s26 + $0xd0] sm:$0xff] }
  0x3d   : > { %526 = vmatprep.subr.mxu0 %v1528_v0  ;;  %1436 = vmatprep.subr.mxu1 %v1528_v0 }
  0x3e   : > { %527 = vmatpush2.msra.mxu0 %v472_v24  ;;  %1468 = vmatpush2.msra.mxu1 %v472_v24  ;;  %v394_v24 = vld [vmem:[%s1675_s26 + $0x350] sm:$0xff] }
  0x3f   : > { %528 = vmatprep.subr.mxu0 %v1528_v0  ;;  %1437 = vmatprep.subr.mxu1 %v1528_v0 }
  0x40   : > { %529 = vmatpush2.msra.mxu0 %v471_v25  ;;  %1469 = vmatpush2.msra.mxu1 %v471_v25  ;;  %v317_v25 = vld [vmem:[%s1675_s26 + $0xe8] sm:$0xff] }
  0x41   : > { %530 = vmatprep.subr.mxu0 %v1528_v0  ;;  %1438 = vmatprep.subr.mxu1 %v1528_v0 }
  0x42   : > { %531 = vmatpush2.msra.mxu0 %v470_v26  ;;  %1470 = vmatpush2.msra.mxu1 %v470_v26  ;;  %v397_v26 = vld [vmem:[%s1675_s26 + $0x368] sm:$0xff] }
  0x43   : > { %532 = vmatprep.subr.mxu0 %v1528_v0  ;;  %1439 = vmatprep.subr.mxu1 %v1528_v0 }
  0x44   : > { %533 = vmatpush2.msra.mxu0 %v469_v27  ;;  %1471 = vmatpush2.msra.mxu1 %v469_v27  ;;  %v316_v27 = vld [vmem:[%s1675_s26 + $0xe0] sm:$0xff] }
  0x45   : > { %534 = vmatprep.subr.mxu0 %v1528_v0  ;;  %1440 = vmatprep.subr.mxu1 %v1528_v0 }
  0x46   : > { %535 = vmatpush2.msra.mxu0 %v468_v28  ;;  %1472 = vmatpush2.msra.mxu1 %v468_v28  ;;  %v396_v28 = vld [vmem:[%s1675_s26 + $0x360] sm:$0xff] }
  0x47   : > { %536 = vmatprep.subr.mxu0 %v1528_v0  ;;  %1441 = vmatprep.subr.mxu1 %v1528_v0 }
  0x48   : > { %537 = vmatpush2.msra.mxu0 %v467_v29  ;;  %1473 = vmatpush2.msra.mxu1 %v467_v29  ;;  %v319_v29 = vld [vmem:[%s1675_s26 + $0xf8] sm:$0xff] }
  0x49   : > { %538 = vmatprep.subr.mxu0 %v1528_v0  ;;  %1442 = vmatprep.subr.mxu1 %v1528_v0 }
  0x4a   : > { %539 = vmatpush2.msra.mxu0 %v466_v30  ;;  %1474 = vmatpush2.msra.mxu1 %v466_v30  ;;  %v399_v30 = vld [vmem:[%s1675_s26 + $0x378] sm:$0xff] }
  0x4b   : > { %540 = vmatprep.subr.mxu0 %v1528_v0  ;;  %1443 = vmatprep.subr.mxu1 %v1528_v0 }
  0x4c   : > { %541 = vmatpush2.msra.mxu0 %v465_v31  ;;  %1475 = vmatpush2.msra.mxu1 %v465_v31  ;;  %v318_v31 = vld [vmem:[%s1675_s26 + $0xf0] sm:$0xff] }
  0x4d   : > { %542 = vmatprep.subr.mxu0 %v1528_v0  ;;  %1444 = vmatprep.subr.mxu1 %v1528_v0  ;;  %v382_v0 = vld [vmem:[%s1675_s26 + $0x2f0] sm:$0xff] }
  0x4e   : > { %543 = vmatpush2.msra.mxu0 %v464_v32  ;;  %1476 = vmatpush2.msra.mxu1 %v464_v32  ;;  %v398_v32 = vld [vmem:[%s1675_s26 + $0x370] sm:$0xff] }
  0x4f   : > { %544 = vmatprep.mubr.f32.mxu0 %v289_v33  ;;  %744 = vmatprep.mubr.f32.mxu1 %v369_v34  ;;  %v321_v33 = vld [vmem:[%s1675_s26 + $0x108] sm:$0xff] }
  0x50   : > { %545 = vmatmul.mubr.f32.vlgmr.msra.gmra.mxu0 %v288_v35  ;;  %745 = vmatmul.mubr.f32.vlgmr.msra.gmra.mxu1 %v368_v36  ;;  %v401_v34 = vld [vmem:[%s1675_s26 + $0x388] sm:$0xff]  ;;  %v320_v35 = vld [vmem:[%s1675_s26 + $0x100] sm:$0xff] }
  0x51   : > { %549 = vmatprep.mubr.f32.mxu0 %v291_v37  ;;  %749 = vmatprep.mubr.f32.mxu1 %v371_v38  ;;  %v400_v36 = vld [vmem:[%s1675_s26 + $0x380] sm:$0xff]  ;;  %v323_v37 = vld [vmem:[%s1675_s26 + $0x118] sm:$0xff] }
  0x52   : > { %v403_v38 = vld [vmem:[%s1675_s26 + $0x398] sm:$0xff] }
  0x54   : > { %550 = vmatmul.mubr.f32.gmra.mxu0 %v290_v39  ;;  %750 = vmatmul.mubr.f32.gmra.mxu1 %v370_v40  ;;  %v322_v39 = vld [vmem:[%s1675_s26 + $0x110] sm:$0xff] }
  0x55   : > { %554 = vmatprep.mubr.f32.mxu0 %v293_v41  ;;  %754 = vmatprep.mubr.f32.mxu1 %v373_v42  ;;  %v402_v40 = vld [vmem:[%s1675_s26 + $0x390] sm:$0xff]  ;;  %v325_v41 = vld [vmem:[%s1675_s26 + $0x128] sm:$0xff] }
  0x56   : > { %v405_v42 = vld [vmem:[%s1675_s26 + $0x3a8] sm:$0xff] }
  0x58   : > { %555 = vmatmul.mubr.f32.gmra.mxu0 %v292_v43  ;;  %755 = vmatmul.mubr.f32.gmra.mxu1 %v372_v44  ;;  %v324_v43 = vld [vmem:[%s1675_s26 + $0x120] sm:$0xff] }
  0x59   : > { %559 = vmatprep.mubr.f32.mxu0 %v295_v45  ;;  %759 = vmatprep.mubr.f32.mxu1 %v375_v46  ;;  %v404_v44 = vld [vmem:[%s1675_s26 + $0x3a0] sm:$0xff]  ;;  %v327_v45 = vld [vmem:[%s1675_s26 + $0x138] sm:$0xff] }
  0x5a   : > { %v407_v46 = vld [vmem:[%s1675_s26 + $0x3b8] sm:$0xff] }
  0x5c   : > { %560 = vmatmul.mubr.f32.gmra.mxu0 %v294_v47  ;;  %760 = vmatmul.mubr.f32.gmra.mxu1 %v374_v48  ;;  %v326_v47 = vld [vmem:[%s1675_s26 + $0x130] sm:$0xff] }
  0x5d   : > { %564 = vmatprep.mubr.f32.mxu0 %v297_v49  ;;  %764 = vmatprep.mubr.f32.mxu1 %v377_v50  ;;  %v406_v48 = vld [vmem:[%s1675_s26 + $0x3b0] sm:$0xff]  ;;  %v329_v49 = vld [vmem:[%s1675_s26 + $0x148] sm:$0xff] }
  0x5e   : > { %v409_v50 = vld [vmem:[%s1675_s26 + $0x3c8] sm:$0xff] }
  0x60   : > { %565 = vmatmul.mubr.f32.gmra.mxu0 %v296_v51  ;;  %765 = vmatmul.mubr.f32.gmra.mxu1 %v376_v52  ;;  %v328_v51 = vld [vmem:[%s1675_s26 + $0x140] sm:$0xff] }
  0x61   : > { %569 = vmatprep.mubr.f32.mxu0 %v299_v53  ;;  %769 = vmatprep.mubr.f32.mxu1 %v379_v54  ;;  %v408_v52 = vld [vmem:[%s1675_s26 + $0x3c0] sm:$0xff]  ;;  %v331_v53 = vld [vmem:[%s1675_s26 + $0x158] sm:$0xff] }
  0x62   : > { %v411_v54 = vld [vmem:[%s1675_s26 + $0x3d8] sm:$0xff] }
  0x64   : > { %570 = vmatmul.mubr.f32.gmra.mxu0 %v298_v55  ;;  %770 = vmatmul.mubr.f32.gmra.mxu1 %v378_v56  ;;  %v330_v55 = vld [vmem:[%s1675_s26 + $0x150] sm:$0xff] }
  0x65   : > { %574 = vmatprep.mubr.f32.mxu0 %v301_v57  ;;  %774 = vmatprep.mubr.f32.mxu1 %v381_v58  ;;  %v410_v56 = vld [vmem:[%s1675_s26 + $0x3d0] sm:$0xff]  ;;  %v333_v57 = vld [vmem:[%s1675_s26 + $0x168] sm:$0xff] }
  0x66   : > { %v413_v58 = vld [vmem:[%s1675_s26 + $0x3e8] sm:$0xff] }
  0x68   : > { %575 = vmatmul.mubr.f32.gmra.mxu0 %v300_v59  ;;  %775 = vmatmul.mubr.f32.gmra.mxu1 %v380_v60  ;;  %v332_v59 = vld [vmem:[%s1675_s26 + $0x160] sm:$0xff] }
  0x69   : > { %579 = vmatprep.mubr.f32.mxu0 %v303_v61  ;;  %779 = vmatprep.mubr.f32.mxu1 %v383_v62  ;;  %v412_v60 = vld [vmem:[%s1675_s26 + $0x3e0] sm:$0xff]  ;;  %v335_v61 = vld [vmem:[%s1675_s26 + $0x178] sm:$0xff] }
  0x6a   : > { %v415_v62 = vld [vmem:[%s1675_s26 + $0x3f8] sm:$0xff] }
  0x6c   : > { %580 = vmatmul.mubr.f32.gmra.mxu0 %v302_v63  ;;  %780 = vmatmul.mubr.f32.gmra.mxu1 %v382_v0  ;;  %v334_v63 = vld [vmem:[%s1675_s26 + $0x170] sm:$0xff] }
  0x6d   : > { %584 = vmatprep.mubr.f32.mxu0 %v305_v1  ;;  %784 = vmatprep.mubr.f32.mxu1 %v385_v2  ;;  %v414_v0 = vld [vmem:[%s1675_s26 + $0x3f0] sm:$0xff]  ;;  %v337_v1 = vld [vmem:[%s1675_s26 + $0x188] sm:$0xff] }
  0x6e   : > { %v417_v2 = vld [vmem:[%s1675_s26 + $0x408] sm:$0xff] }
  0x70   : > { %585 = vmatmul.mubr.f32.gmra.mxu0 %v304_v3  ;;  %785 = vmatmul.mubr.f32.gmra.mxu1 %v384_v4  ;;  %v336_v3 = vld [vmem:[%s1675_s26 + $0x180] sm:$0xff] }
  0x71   : > { %589 = vmatprep.mubr.f32.mxu0 %v307_v5  ;;  %789 = vmatprep.mubr.f32.mxu1 %v387_v6  ;;  %v416_v4 = vld [vmem:[%s1675_s26 + $0x400] sm:$0xff]  ;;  %v339_v5 = vld [vmem:[%s1675_s26 + $0x198] sm:$0xff] }
  0x72   : > { %v419_v6 = vld [vmem:[%s1675_s26 + $0x418] sm:$0xff] }
  0x74   : > { %590 = vmatmul.mubr.f32.gmra.mxu0 %v306_v7  ;;  %790 = vmatmul.mubr.f32.gmra.mxu1 %v386_v8  ;;  %v338_v7 = vld [vmem:[%s1675_s26 + $0x190] sm:$0xff] }
  0x75   : > { %594 = vmatprep.mubr.f32.mxu0 %v309_v9  ;;  %794 = vmatprep.mubr.f32.mxu1 %v389_v10  ;;  %v418_v8 = vld [vmem:[%s1675_s26 + $0x410] sm:$0xff]  ;;  %v341_v9 = vld [vmem:[%s1675_s26 + $0x1a8] sm:$0xff] }
  0x76   : > { %v421_v10 = vld [vmem:[%s1675_s26 + $0x428] sm:$0xff] }
  0x78   : > { %595 = vmatmul.mubr.f32.gmra.mxu0 %v308_v11  ;;  %795 = vmatmul.mubr.f32.gmra.mxu1 %v388_v12  ;;  %v340_v11 = vld [vmem:[%s1675_s26 + $0x1a0] sm:$0xff] }
  0x79   : > { %599 = vmatprep.mubr.f32.mxu0 %v311_v13  ;;  %799 = vmatprep.mubr.f32.mxu1 %v391_v14  ;;  %v420_v12 = vld [vmem:[%s1675_s26 + $0x420] sm:$0xff]  ;;  %v343_v13 = vld [vmem:[%s1675_s26 + $0x1b8] sm:$0xff] }
  0x7a   : > { %v423_v14 = vld [vmem:[%s1675_s26 + $0x438] sm:$0xff] }
  0x7c   : > { %600 = vmatmul.mubr.f32.gmra.mxu0 %v310_v15  ;;  %800 = vmatmul.mubr.f32.gmra.mxu1 %v390_v16  ;;  %v342_v15 = vld [vmem:[%s1675_s26 + $0x1b0] sm:$0xff] }
  0x7d   : > { %604 = vmatprep.mubr.f32.mxu0 %v313_v17  ;;  %804 = vmatprep.mubr.f32.mxu1 %v393_v18  ;;  %v422_v16 = vld [vmem:[%s1675_s26 + $0x430] sm:$0xff]  ;;  %v345_v17 = vld [vmem:[%s1675_s26 + $0x1c8] sm:$0xff] }
  0x7e   : > { %v425_v18 = vld [vmem:[%s1675_s26 + $0x448] sm:$0xff] }
  0x80   : > { %605 = vmatmul.mubr.f32.gmra.mxu0 %v312_v19  ;;  %805 = vmatmul.mubr.f32.gmra.mxu1 %v392_v20  ;;  %v344_v19 = vld [vmem:[%s1675_s26 + $0x1c0] sm:$0xff] }
  0x81   : > { %609 = vmatprep.mubr.f32.mxu0 %v315_v21  ;;  %809 = vmatprep.mubr.f32.mxu1 %v395_v22  ;;  %v424_v20 = vld [vmem:[%s1675_s26 + $0x440] sm:$0xff]  ;;  %v347_v21 = vld [vmem:[%s1675_s26 + $0x1d8] sm:$0xff] }
  0x82   : > { %v427_v22 = vld [vmem:[%s1675_s26 + $0x458] sm:$0xff] }
  0x84   : > { %610 = vmatmul.mubr.f32.gmra.mxu0 %v314_v23  ;;  %810 = vmatmul.mubr.f32.gmra.mxu1 %v394_v24  ;;  %v346_v23 = vld [vmem:[%s1675_s26 + $0x1d0] sm:$0xff] }
  0x85   : > { %614 = vmatprep.mubr.f32.mxu0 %v317_v25  ;;  %814 = vmatprep.mubr.f32.mxu1 %v397_v26  ;;  %v426_v24 = vld [vmem:[%s1675_s26 + $0x450] sm:$0xff]  ;;  %v349_v25 = vld [vmem:[%s1675_s26 + $0x1e8] sm:$0xff] }
  0x86   : > { %v429_v26 = vld [vmem:[%s1675_s26 + $0x468] sm:$0xff] }
  0x88   : > { %615 = vmatmul.mubr.f32.gmra.mxu0 %v316_v27  ;;  %815 = vmatmul.mubr.f32.gmra.mxu1 %v396_v28  ;;  %v348_v27 = vld [vmem:[%s1675_s26 + $0x1e0] sm:$0xff] }
  0x89   : > { %619 = vmatprep.mubr.f32.mxu0 %v319_v29  ;;  %819 = vmatprep.mubr.f32.mxu1 %v399_v30  ;;  %v428_v28 = vld [vmem:[%s1675_s26 + $0x460] sm:$0xff]  ;;  %v351_v29 = vld [vmem:[%s1675_s26 + $0x1f8] sm:$0xff] }
  0x8a   : > { %v431_v30 = vld [vmem:[%s1675_s26 + $0x478] sm:$0xff] }
  0x8c   : > { %620 = vmatmul.mubr.f32.gmra.mxu0 %v318_v31  ;;  %820 = vmatmul.mubr.f32.gmra.mxu1 %v398_v32  ;;  %v350_v31 = vld [vmem:[%s1675_s26 + $0x1f0] sm:$0xff] }
  0x8d   : > { %624 = vmatprep.mubr.f32.mxu0 %v321_v33  ;;  %824 = vmatprep.mubr.f32.mxu1 %v401_v34  ;;  %v430_v32 = vld [vmem:[%s1675_s26 + $0x470] sm:$0xff]  ;;  %v353_v33 = vld [vmem:[%s1675_s26 + $0x208] sm:$0xff] }
  0x8e   : > { %v433_v34 = vld [vmem:[%s1675_s26 + $0x488] sm:$0xff] }
  0x90   : > { %625 = vmatmul.mubr.f32.gmra.mxu0 %v320_v35  ;;  %825 = vmatmul.mubr.f32.gmra.mxu1 %v400_v36  ;;  %v352_v35 = vld [vmem:[%s1675_s26 + $0x200] sm:$0xff] }
  0x91   : > { %629 = vmatprep.mubr.f32.mxu0 %v323_v37  ;;  %829 = vmatprep.mubr.f32.mxu1 %v403_v38  ;;  %v432_v36 = vld [vmem:[%s1675_s26 + $0x480] sm:$0xff]  ;;  %v355_v37 = vld [vmem:[%s1675_s26 + $0x218] sm:$0xff] }
  0x92   : > { %v435_v38 = vld [vmem:[%s1675_s26 + $0x498] sm:$0xff] }
  0x94   : > { %630 = vmatmul.mubr.f32.gmra.mxu0 %v322_v39  ;;  %830 = vmatmul.mubr.f32.gmra.mxu1 %v402_v40  ;;  %v354_v39 = vld [vmem:[%s1675_s26 + $0x210] sm:$0xff] }
  0x95   : > { %634 = vmatprep.mubr.f32.mxu0 %v325_v41  ;;  %834 = vmatprep.mubr.f32.mxu1 %v405_v42  ;;  %v434_v40 = vld [vmem:[%s1675_s26 + $0x490] sm:$0xff]  ;;  %v357_v41 = vld [vmem:[%s1675_s26 + $0x228] sm:$0xff] }
  0x96   : > { %v437_v42 = vld [vmem:[%s1675_s26 + $0x4a8] sm:$0xff] }
  0x98   : > { %635 = vmatmul.mubr.f32.gmra.mxu0 %v324_v43  ;;  %835 = vmatmul.mubr.f32.gmra.mxu1 %v404_v44  ;;  %v356_v43 = vld [vmem:[%s1675_s26 + $0x220] sm:$0xff] }
  0x99   : > { %639 = vmatprep.mubr.f32.mxu0 %v327_v45  ;;  %839 = vmatprep.mubr.f32.mxu1 %v407_v46  ;;  %v436_v44 = vld [vmem:[%s1675_s26 + $0x4a0] sm:$0xff]  ;;  %v359_v45 = vld [vmem:[%s1675_s26 + $0x238] sm:$0xff] }
  0x9a   : > { %v439_v46 = vld [vmem:[%s1675_s26 + $0x4b8] sm:$0xff] }
  0x9c   : > { %640 = vmatmul.mubr.f32.gmra.mxu0 %v326_v47  ;;  %840 = vmatmul.mubr.f32.gmra.mxu1 %v406_v48  ;;  %v358_v47 = vld [vmem:[%s1675_s26 + $0x230] sm:$0xff] }
  0x9d   : > { %644 = vmatprep.mubr.f32.mxu0 %v329_v49  ;;  %844 = vmatprep.mubr.f32.mxu1 %v409_v50  ;;  %v438_v48 = vld [vmem:[%s1675_s26 + $0x4b0] sm:$0xff]  ;;  %v361_v49 = vld [vmem:[%s1675_s26 + $0x248] sm:$0xff] }
  0x9e   : > { %v441_v50 = vld [vmem:[%s1675_s26 + $0x4c8] sm:$0xff] }
  0xa0   : > { %645 = vmatmul.mubr.f32.gmra.mxu0 %v328_v51  ;;  %845 = vmatmul.mubr.f32.gmra.mxu1 %v408_v52  ;;  %v360_v51 = vld [vmem:[%s1675_s26 + $0x240] sm:$0xff] }
  0xa1   : > { %649 = vmatprep.mubr.f32.mxu0 %v331_v53  ;;  %849 = vmatprep.mubr.f32.mxu1 %v411_v54  ;;  %v440_v52 = vld [vmem:[%s1675_s26 + $0x4c0] sm:$0xff]  ;;  %v363_v53 = vld [vmem:[%s1675_s26 + $0x258] sm:$0xff] }
  0xa2   : > { %v443_v54 = vld [vmem:[%s1675_s26 + $0x4d8] sm:$0xff] }
  0xa4   : > { %650 = vmatmul.mubr.f32.gmra.mxu0 %v330_v55  ;;  %850 = vmatmul.mubr.f32.gmra.mxu1 %v410_v56  ;;  %v362_v55 = vld [vmem:[%s1675_s26 + $0x250] sm:$0xff] }
  0xa5   : > { %654 = vmatprep.mubr.f32.mxu0 %v333_v57  ;;  %854 = vmatprep.mubr.f32.mxu1 %v413_v58  ;;  %v442_v56 = vld [vmem:[%s1675_s26 + $0x4d0] sm:$0xff]  ;;  %v365_v57 = vld [vmem:[%s1675_s26 + $0x268] sm:$0xff] }
  0xa6   : > { %v445_v58 = vld [vmem:[%s1675_s26 + $0x4e8] sm:$0xff] }
  0xa8   : > { %655 = vmatmul.mubr.f32.gmra.mxu0 %v332_v59  ;;  %855 = vmatmul.mubr.f32.gmra.mxu1 %v412_v60  ;;  %v364_v59 = vld [vmem:[%s1675_s26 + $0x260] sm:$0xff] }
  0xa9   : > { %659 = vmatprep.mubr.f32.mxu0 %v335_v61  ;;  %859 = vmatprep.mubr.f32.mxu1 %v415_v62  ;;  %v444_v60 = vld [vmem:[%s1675_s26 + $0x4e0] sm:$0xff]  ;;  %v367_v61 = vld [vmem:[%s1675_s26 + $0x278] sm:$0xff] }
  0xaa   : > { %v447_v62 = vld [vmem:[%s1675_s26 + $0x4f8] sm:$0xff] }
  0xac   : > { %660 = vmatmul.mubr.f32.gmra.mxu0 %v334_v63  ;;  %860 = vmatmul.mubr.f32.gmra.mxu1 %v414_v0  ;;  %v366_v63 = vld [vmem:[%s1675_s26 + $0x270] sm:$0xff] }
  0xad   : > { %664 = vmatprep.mubr.f32.mxu0 %v337_v1  ;;  %864 = vmatprep.mubr.f32.mxu1 %v417_v2  ;;  %v446_v0 = vld [vmem:[%s1675_s26 + $0x4f0] sm:$0xff]  ;;  %v1850_v1 = vld [vmem:[%s274_s29] ss:$0 sm:$0xff] }
  0xb0   : > { %665 = vmatmul.mubr.f32.gmra.mxu0 %v336_v3  ;;  %865 = vmatmul.mubr.f32.gmra.mxu1 %v416_v4  ;;  %v1853_v3 = vld [vmem:[%s277_s6] ss:$0 sm:$0xff] }
  0xb1   : > { %669 = vmatprep.mubr.f32.mxu0 %v339_v5  ;;  %869 = vmatprep.mubr.f32.mxu1 %v419_v6 }
  0xb4   : > { %670 = vmatmul.mubr.f32.gmra.mxu0 %v338_v7  ;;  %870 = vmatmul.mubr.f32.gmra.mxu1 %v418_v8 }
  0xb5   : > { %674 = vmatprep.mubr.f32.mxu0 %v341_v9  ;;  %874 = vmatprep.mubr.f32.mxu1 %v421_v10 }
  0xb8   : > { %675 = vmatmul.mubr.f32.gmra.mxu0 %v340_v11  ;;  %875 = vmatmul.mubr.f32.gmra.mxu1 %v420_v12 }
  0xb9   : > { %679 = vmatprep.mubr.f32.mxu0 %v343_v13  ;;  %879 = vmatprep.mubr.f32.mxu1 %v423_v14 }
  0xbc   : > { %680 = vmatmul.mubr.f32.gmra.mxu0 %v342_v15  ;;  %880 = vmatmul.mubr.f32.gmra.mxu1 %v422_v16 }
  0xbd   : > { %684 = vmatprep.mubr.f32.mxu0 %v345_v17  ;;  %884 = vmatprep.mubr.f32.mxu1 %v425_v18 }
  0xc0   : > { %685 = vmatmul.mubr.f32.gmra.mxu0 %v344_v19  ;;  %885 = vmatmul.mubr.f32.gmra.mxu1 %v424_v20 }
  0xc1   : > { %689 = vmatprep.mubr.f32.mxu0 %v347_v21  ;;  %889 = vmatprep.mubr.f32.mxu1 %v427_v22 }
  0xc4   : > { %690 = vmatmul.mubr.f32.gmra.mxu0 %v346_v23  ;;  %890 = vmatmul.mubr.f32.gmra.mxu1 %v426_v24 }
  0xc5   : > { %694 = vmatprep.mubr.f32.mxu0 %v349_v25  ;;  %894 = vmatprep.mubr.f32.mxu1 %v429_v26 }
  0xc8   : > { %695 = vmatmul.mubr.f32.gmra.mxu0 %v348_v27  ;;  %895 = vmatmul.mubr.f32.gmra.mxu1 %v428_v28 }
  0xc9   : > { %699 = vmatprep.mubr.f32.mxu0 %v351_v29  ;;  %899 = vmatprep.mubr.f32.mxu1 %v431_v30 }
  0xcc   : > { %700 = vmatmul.mubr.f32.gmra.mxu0 %v350_v31  ;;  %900 = vmatmul.mubr.f32.gmra.mxu1 %v430_v32 }
  0xcd   : > { %704 = vmatprep.mubr.f32.mxu0 %v353_v33  ;;  %904 = vmatprep.mubr.f32.mxu1 %v433_v34 }
  0xd0   : > { %705 = vmatmul.mubr.f32.gmra.mxu0 %v352_v35  ;;  %905 = vmatmul.mubr.f32.gmra.mxu1 %v432_v36 }
  0xd1   : > { %709 = vmatprep.mubr.f32.mxu0 %v355_v37  ;;  %909 = vmatprep.mubr.f32.mxu1 %v435_v38 }
  0xd4   : > { %710 = vmatmul.mubr.f32.gmra.mxu0 %v354_v39  ;;  %910 = vmatmul.mubr.f32.gmra.mxu1 %v434_v40 }
  0xd5   : > { %714 = vmatprep.mubr.f32.mxu0 %v357_v41  ;;  %914 = vmatprep.mubr.f32.mxu1 %v437_v42 }
  0xd8   : > { %715 = vmatmul.mubr.f32.gmra.mxu0 %v356_v43  ;;  %915 = vmatmul.mubr.f32.gmra.mxu1 %v436_v44 }
  0xd9   : > { %719 = vmatprep.mubr.f32.mxu0 %v359_v45  ;;  %919 = vmatprep.mubr.f32.mxu1 %v439_v46 }
  0xdc   : > { %720 = vmatmul.mubr.f32.gmra.mxu0 %v358_v47  ;;  %920 = vmatmul.mubr.f32.gmra.mxu1 %v438_v48 }
  0xdd   : > { %724 = vmatprep.mubr.f32.mxu0 %v361_v49  ;;  %924 = vmatprep.mubr.f32.mxu1 %v441_v50 }
  0xe0   : > { %725 = vmatmul.mubr.f32.gmra.mxu0 %v360_v51  ;;  %925 = vmatmul.mubr.f32.gmra.mxu1 %v440_v52 }
  0xe1   : > { %729 = vmatprep.mubr.f32.mxu0 %v363_v53  ;;  %929 = vmatprep.mubr.f32.mxu1 %v443_v54 }
  0xe4   : > { %730 = vmatmul.mubr.f32.gmra.mxu0 %v362_v55  ;;  %930 = vmatmul.mubr.f32.gmra.mxu1 %v442_v56 }
  0xe5   : > { %734 = vmatprep.mubr.f32.mxu0 %v365_v57  ;;  %934 = vmatprep.mubr.f32.mxu1 %v445_v58 }
  0xe8   : > { %735 = vmatmul.mubr.f32.gmra.mxu0 %v364_v59  ;;  %935 = vmatmul.mubr.f32.gmra.mxu1 %v444_v60 }
  0xe9   : > { %739 = vmatprep.mubr.f32.mxu0 %v367_v61  ;;  %939 = vmatprep.mubr.f32.mxu1 %v447_v62 }
  0xec   : > { %740 = vmatmul.mubr.f32.gmra.mxu0 %v366_v63  ;;  %940 = vmatmul.mubr.f32.gmra.mxu1 %v446_v0 }
 0x110   : > { %v546_v2 = vpop.f32.mrf.mxu0  ;;  %v746_v4 = vpop.f32.mrf.mxu1 }
 0x111   : > { %v952_v5 = vmul.f32 %v1850_v1, %v546_v2  ;;  %v992_v6 = vmul.f32 %v1850_v1, %v746_v4 }
 0x112   : > { %v548_v7 = vpop.f32.mrf.mxu0  ;;  %v748_v8 = vpop.f32.mrf.mxu1 }
 0x113   : > { %v1039_v9 = vadd.f32 %v1853_v3, %v952_v5  ;;  %v1079_v10 = vadd.f32 %v1853_v3, %v992_v6 }
 0x114   : > { %v551_v11 = vpop.f32.mrf.mxu0  ;;  %v751_v12 = vpop.f32.mrf.mxu1 }
 0x115   : > { %v1119_v13 = vmax.f32 %v1039_v9, 0.0  ;;  %v1159_v14 = vmax.f32 %v1079_v10, 0.0  ;;  %v953_v15 = vmul.f32 %v1850_v1, %v551_v11  ;;  %v993_v16 = vmul.f32 %v1850_v1, %v751_v12 }
 0x116   : > { %v553_v17 = vpop.f32.mrf.mxu0  ;;  %v753_v18 = vpop.f32.mrf.mxu1 }
 0x117   : > { %1199 = vst [vmem:[%s1862_s10] sm:$0xff] %v1119_v13  ;;  %1239 = vst [vmem:[%s1862_s10 + $0x140] sm:$0xff] %v1159_v14  ;;  %v1040_v19 = vadd.f32 %v1853_v3, %v953_v15  ;;  %v1080_v20 = vadd.f32 %v1853_v3, %v993_v16 }
 0x118   : > { %v556_v21 = vpop.f32.mrf.mxu0  ;;  %v756_v22 = vpop.f32.mrf.mxu1 }
 0x119   : > { %v1120_v23 = vmax.f32 %v1040_v19, 0.0  ;;  %v1160_v24 = vmax.f32 %v1080_v20, 0.0  ;;  %v954_v25 = vmul.f32 %v1850_v1, %v556_v21  ;;  %v994_v26 = vmul.f32 %v1850_v1, %v756_v22 }
 0x11a   : > { %v558_v27 = vpop.f32.mrf.mxu0  ;;  %v758_v28 = vpop.f32.mrf.mxu1 }
 0x11b   : > { %1200 = vst [vmem:[%s1862_s10 + $0x8] sm:$0xff] %v1120_v23  ;;  %1240 = vst [vmem:[%s1862_s10 + $0x148] sm:$0xff] %v1160_v24  ;;  %v1041_v29 = vadd.f32 %v1853_v3, %v954_v25  ;;  %v1081_v30 = vadd.f32 %v1853_v3, %v994_v26 }
 0x11c   : > { %v561_v31 = vpop.f32.mrf.mxu0  ;;  %v761_v32 = vpop.f32.mrf.mxu1 }
 0x11d   : > { %v1121_v33 = vmax.f32 %v1041_v29, 0.0  ;;  %v1161_v34 = vmax.f32 %v1081_v30, 0.0  ;;  %v955_v35 = vmul.f32 %v1850_v1, %v561_v31  ;;  %v995_v36 = vmul.f32 %v1850_v1, %v761_v32 }
 0x11e   : > { %v563_v37 = vpop.f32.mrf.mxu0  ;;  %v763_v38 = vpop.f32.mrf.mxu1 }
 0x11f   : > { %1201 = vst [vmem:[%s1862_s10 + $0x10] sm:$0xff] %v1121_v33  ;;  %1241 = vst [vmem:[%s1862_s10 + $0x150] sm:$0xff] %v1161_v34  ;;  %v1042_v39 = vadd.f32 %v1853_v3, %v955_v35  ;;  %v1082_v40 = vadd.f32 %v1853_v3, %v995_v36 }
 0x120   : > { %v566_v41 = vpop.f32.mrf.mxu0  ;;  %v766_v42 = vpop.f32.mrf.mxu1 }
 0x121   : > { %v1122_v43 = vmax.f32 %v1042_v39, 0.0  ;;  %v1162_v44 = vmax.f32 %v1082_v40, 0.0  ;;  %v956_v45 = vmul.f32 %v1850_v1, %v566_v41  ;;  %v996_v46 = vmul.f32 %v1850_v1, %v766_v42 }
 0x122   : > { %v568_v47 = vpop.f32.mrf.mxu0  ;;  %v768_v48 = vpop.f32.mrf.mxu1 }
 0x123   : > { %1202 = vst [vmem:[%s1862_s10 + $0x18] sm:$0xff] %v1122_v43  ;;  %1242 = vst [vmem:[%s1862_s10 + $0x158] sm:$0xff] %v1162_v44  ;;  %v1043_v49 = vadd.f32 %v1853_v3, %v956_v45  ;;  %v1083_v50 = vadd.f32 %v1853_v3, %v996_v46 }
 0x124   : > { %v571_v51 = vpop.f32.mrf.mxu0  ;;  %v771_v52 = vpop.f32.mrf.mxu1 }
 0x125   : > { %v1123_v53 = vmax.f32 %v1043_v49, 0.0  ;;  %v1163_v54 = vmax.f32 %v1083_v50, 0.0  ;;  %v957_v55 = vmul.f32 %v1850_v1, %v571_v51  ;;  %v997_v56 = vmul.f32 %v1850_v1, %v771_v52 }
 0x126   : > { %v573_v57 = vpop.f32.mrf.mxu0  ;;  %v773_v58 = vpop.f32.mrf.mxu1 }
 0x127   : > { %1203 = vst [vmem:[%s1862_s10 + $0x20] sm:$0xff] %v1123_v53  ;;  %1243 = vst [vmem:[%s1862_s10 + $0x160] sm:$0xff] %v1163_v54  ;;  %v1044_v59 = vadd.f32 %v1853_v3, %v957_v55  ;;  %v1084_v60 = vadd.f32 %v1853_v3, %v997_v56 }
 0x128   : > { %v576_v61 = vpop.f32.mrf.mxu0  ;;  %v776_v62 = vpop.f32.mrf.mxu1 }
 0x129   : > { %v1124_v63 = vmax.f32 %v1044_v59, 0.0  ;;  %v1164_v0 = vmax.f32 %v1084_v60, 0.0  ;;  %v958_v2 = vmul.f32 %v1850_v1, %v576_v61  ;;  %v998_v4 = vmul.f32 %v1850_v1, %v776_v62 }
 0x12a   : > { %v578_v5 = vpop.f32.mrf.mxu0  ;;  %v778_v6 = vpop.f32.mrf.mxu1 }
 0x12b   : > { %1204 = vst [vmem:[%s1862_s10 + $0x28] sm:$0xff] %v1124_v63  ;;  %1244 = vst [vmem:[%s1862_s10 + $0x168] sm:$0xff] %v1164_v0  ;;  %v1045_v7 = vadd.f32 %v1853_v3, %v958_v2  ;;  %v1085_v8 = vadd.f32 %v1853_v3, %v998_v4 }
 0x12c   : > { %v581_v9 = vpop.f32.mrf.mxu0  ;;  %v781_v10 = vpop.f32.mrf.mxu1 }
 0x12d   : > { %v1125_v11 = vmax.f32 %v1045_v7, 0.0  ;;  %v1165_v12 = vmax.f32 %v1085_v8, 0.0  ;;  %v959_v13 = vmul.f32 %v1850_v1, %v581_v9  ;;  %v999_v14 = vmul.f32 %v1850_v1, %v781_v10 }
 0x12e   : > { %v583_v15 = vpop.f32.mrf.mxu0  ;;  %v783_v16 = vpop.f32.mrf.mxu1 }
 0x12f   : > { %1205 = vst [vmem:[%s1862_s10 + $0x30] sm:$0xff] %v1125_v11  ;;  %1245 = vst [vmem:[%s1862_s10 + $0x170] sm:$0xff] %v1165_v12  ;;  %v1046_v17 = vadd.f32 %v1853_v3, %v959_v13  ;;  %v1086_v18 = vadd.f32 %v1853_v3, %v999_v14 }
 0x130   : > { %v586_v19 = vpop.f32.mrf.mxu0  ;;  %v786_v20 = vpop.f32.mrf.mxu1 }
 0x131   : > { %v1126_v21 = vmax.f32 %v1046_v17, 0.0  ;;  %v1166_v22 = vmax.f32 %v1086_v18, 0.0  ;;  %v960_v23 = vmul.f32 %v1850_v1, %v586_v19  ;;  %v1000_v24 = vmul.f32 %v1850_v1, %v786_v20 }
 0x132   : > { %v588_v25 = vpop.f32.mrf.mxu0  ;;  %v788_v26 = vpop.f32.mrf.mxu1 }
 0x133   : > { %1206 = vst [vmem:[%s1862_s10 + $0x38] sm:$0xff] %v1126_v21  ;;  %1246 = vst [vmem:[%s1862_s10 + $0x178] sm:$0xff] %v1166_v22  ;;  %v1047_v27 = vadd.f32 %v1853_v3, %v960_v23  ;;  %v1087_v28 = vadd.f32 %v1853_v3, %v1000_v24 }
 0x134   : > { %v591_v29 = vpop.f32.mrf.mxu0  ;;  %v791_v30 = vpop.f32.mrf.mxu1 }
 0x135   : > { %v1127_v31 = vmax.f32 %v1047_v27, 0.0  ;;  %v1167_v32 = vmax.f32 %v1087_v28, 0.0  ;;  %v961_v33 = vmul.f32 %v1850_v1, %v591_v29  ;;  %v1001_v34 = vmul.f32 %v1850_v1, %v791_v30 }
 0x136   : > { %v593_v35 = vpop.f32.mrf.mxu0  ;;  %v793_v36 = vpop.f32.mrf.mxu1 }
 0x137   : > { %1207 = vst [vmem:[%s1862_s10 + $0x40] sm:$0xff] %v1127_v31  ;;  %1247 = vst [vmem:[%s1862_s10 + $0x180] sm:$0xff] %v1167_v32  ;;  %v1048_v37 = vadd.f32 %v1853_v3, %v961_v33  ;;  %v1088_v38 = vadd.f32 %v1853_v3, %v1001_v34 }
 0x138   : > { %v596_v39 = vpop.f32.mrf.mxu0  ;;  %v796_v40 = vpop.f32.mrf.mxu1 }
 0x139   : > { %v1128_v41 = vmax.f32 %v1048_v37, 0.0  ;;  %v1168_v42 = vmax.f32 %v1088_v38, 0.0  ;;  %v962_v43 = vmul.f32 %v1850_v1, %v596_v39  ;;  %v1002_v44 = vmul.f32 %v1850_v1, %v796_v40 }
 0x13a   : > { %v598_v45 = vpop.f32.mrf.mxu0  ;;  %v798_v46 = vpop.f32.mrf.mxu1 }
 0x13b   : > { %1208 = vst [vmem:[%s1862_s10 + $0x48] sm:$0xff] %v1128_v41  ;;  %1248 = vst [vmem:[%s1862_s10 + $0x188] sm:$0xff] %v1168_v42  ;;  %v1049_v47 = vadd.f32 %v1853_v3, %v962_v43  ;;  %v1089_v48 = vadd.f32 %v1853_v3, %v1002_v44 }
 0x13c   : > { %v601_v49 = vpop.f32.mrf.mxu0  ;;  %v801_v50 = vpop.f32.mrf.mxu1 }
 0x13d   : > { %v1129_v51 = vmax.f32 %v1049_v47, 0.0  ;;  %v1169_v52 = vmax.f32 %v1089_v48, 0.0  ;;  %v963_v53 = vmul.f32 %v1850_v1, %v601_v49  ;;  %v1003_v54 = vmul.f32 %v1850_v1, %v801_v50 }
 0x13e   : > { %v603_v55 = vpop.f32.mrf.mxu0  ;;  %v803_v56 = vpop.f32.mrf.mxu1 }
 0x13f   : > { %1209 = vst [vmem:[%s1862_s10 + $0x50] sm:$0xff] %v1129_v51  ;;  %1249 = vst [vmem:[%s1862_s10 + $0x190] sm:$0xff] %v1169_v52  ;;  %v1050_v57 = vadd.f32 %v1853_v3, %v963_v53  ;;  %v1090_v58 = vadd.f32 %v1853_v3, %v1003_v54 }
 0x140   : > { %v606_v59 = vpop.f32.mrf.mxu0  ;;  %v806_v60 = vpop.f32.mrf.mxu1 }
 0x141   : > { %v1130_v61 = vmax.f32 %v1050_v57, 0.0  ;;  %v1170_v62 = vmax.f32 %v1090_v58, 0.0  ;;  %v964_v63 = vmul.f32 %v1850_v1, %v606_v59  ;;  %v1004_v0 = vmul.f32 %v1850_v1, %v806_v60 }
 0x142   : > { %v608_v2 = vpop.f32.mrf.mxu0  ;;  %v808_v4 = vpop.f32.mrf.mxu1 }
 0x143   : > { %1210 = vst [vmem:[%s1862_s10 + $0x58] sm:$0xff] %v1130_v61  ;;  %1250 = vst [vmem:[%s1862_s10 + $0x198] sm:$0xff] %v1170_v62  ;;  %v1051_v5 = vadd.f32 %v1853_v3, %v964_v63  ;;  %v1091_v6 = vadd.f32 %v1853_v3, %v1004_v0 }
 0x144   : > { %v611_v7 = vpop.f32.mrf.mxu0  ;;  %v811_v8 = vpop.f32.mrf.mxu1 }
 0x145   : > { %v1131_v9 = vmax.f32 %v1051_v5, 0.0  ;;  %v1171_v10 = vmax.f32 %v1091_v6, 0.0  ;;  %v965_v11 = vmul.f32 %v1850_v1, %v611_v7  ;;  %v1005_v12 = vmul.f32 %v1850_v1, %v811_v8 }
 0x146   : > { %v613_v13 = vpop.f32.mrf.mxu0  ;;  %v813_v14 = vpop.f32.mrf.mxu1 }
 0x147   : > { %1211 = vst [vmem:[%s1862_s10 + $0x60] sm:$0xff] %v1131_v9  ;;  %1251 = vst [vmem:[%s1862_s10 + $0x1a0] sm:$0xff] %v1171_v10  ;;  %v1052_v15 = vadd.f32 %v1853_v3, %v965_v11  ;;  %v1092_v16 = vadd.f32 %v1853_v3, %v1005_v12 }
 0x148   : > { %v616_v17 = vpop.f32.mrf.mxu0  ;;  %v816_v18 = vpop.f32.mrf.mxu1 }
 0x149   : > { %v1132_v19 = vmax.f32 %v1052_v15, 0.0  ;;  %v1172_v20 = vmax.f32 %v1092_v16, 0.0  ;;  %v966_v21 = vmul.f32 %v1850_v1, %v616_v17  ;;  %v1006_v22 = vmul.f32 %v1850_v1, %v816_v18 }
 0x14a   : > { %v618_v23 = vpop.f32.mrf.mxu0  ;;  %v818_v24 = vpop.f32.mrf.mxu1 }
 0x14b   : > { %1212 = vst [vmem:[%s1862_s10 + $0x68] sm:$0xff] %v1132_v19  ;;  %1252 = vst [vmem:[%s1862_s10 + $0x1a8] sm:$0xff] %v1172_v20  ;;  %v1053_v25 = vadd.f32 %v1853_v3, %v966_v21  ;;  %v1093_v26 = vadd.f32 %v1853_v3, %v1006_v22 }
 0x14c   : > { %v621_v27 = vpop.f32.mrf.mxu0  ;;  %v821_v28 = vpop.f32.mrf.mxu1 }
 0x14d   : > { %v1133_v29 = vmax.f32 %v1053_v25, 0.0  ;;  %v1173_v30 = vmax.f32 %v1093_v26, 0.0  ;;  %v967_v31 = vmul.f32 %v1850_v1, %v621_v27  ;;  %v1007_v32 = vmul.f32 %v1850_v1, %v821_v28 }
 0x14e   : > { %v623_v33 = vpop.f32.mrf.mxu0  ;;  %v823_v34 = vpop.f32.mrf.mxu1 }
 0x14f   : > { %1213 = vst [vmem:[%s1862_s10 + $0x70] sm:$0xff] %v1133_v29  ;;  %1253 = vst [vmem:[%s1862_s10 + $0x1b0] sm:$0xff] %v1173_v30  ;;  %v1054_v35 = vadd.f32 %v1853_v3, %v967_v31  ;;  %v1094_v36 = vadd.f32 %v1853_v3, %v1007_v32 }
 0x150   : > { %v626_v37 = vpop.f32.mrf.mxu0  ;;  %v826_v38 = vpop.f32.mrf.mxu1 }
 0x151   : > { %v1134_v39 = vmax.f32 %v1054_v35, 0.0  ;;  %v1174_v40 = vmax.f32 %v1094_v36, 0.0  ;;  %v968_v41 = vmul.f32 %v1850_v1, %v626_v37  ;;  %v1008_v42 = vmul.f32 %v1850_v1, %v826_v38 }
 0x152   : > { %v628_v43 = vpop.f32.mrf.mxu0  ;;  %v828_v44 = vpop.f32.mrf.mxu1 }
 0x153   : > { %1214 = vst [vmem:[%s1862_s10 + $0x78] sm:$0xff] %v1134_v39  ;;  %1254 = vst [vmem:[%s1862_s10 + $0x1b8] sm:$0xff] %v1174_v40  ;;  %v1055_v45 = vadd.f32 %v1853_v3, %v968_v41  ;;  %v1095_v46 = vadd.f32 %v1853_v3, %v1008_v42 }
 0x154   : > { %v631_v47 = vpop.f32.mrf.mxu0  ;;  %v831_v48 = vpop.f32.mrf.mxu1 }
 0x155   : > { %v1135_v49 = vmax.f32 %v1055_v45, 0.0  ;;  %v1175_v50 = vmax.f32 %v1095_v46, 0.0  ;;  %v969_v51 = vmul.f32 %v1850_v1, %v631_v47  ;;  %v1009_v52 = vmul.f32 %v1850_v1, %v831_v48 }
 0x156   : > { %v633_v53 = vpop.f32.mrf.mxu0  ;;  %v833_v54 = vpop.f32.mrf.mxu1 }
 0x157   : > { %1215 = vst [vmem:[%s1862_s10 + $0x80] sm:$0xff] %v1135_v49  ;;  %1255 = vst [vmem:[%s1862_s10 + $0x1c0] sm:$0xff] %v1175_v50  ;;  %v1056_v55 = vadd.f32 %v1853_v3, %v969_v51  ;;  %v1096_v56 = vadd.f32 %v1853_v3, %v1009_v52 }
 0x158   : > { %v636_v57 = vpop.f32.mrf.mxu0  ;;  %v836_v58 = vpop.f32.mrf.mxu1 }
 0x159   : > { %v1136_v59 = vmax.f32 %v1056_v55, 0.0  ;;  %v1176_v60 = vmax.f32 %v1096_v56, 0.0  ;;  %v970_v61 = vmul.f32 %v1850_v1, %v636_v57  ;;  %v1010_v62 = vmul.f32 %v1850_v1, %v836_v58 }
 0x15a   : > { %v638_v63 = vpop.f32.mrf.mxu0  ;;  %v838_v0 = vpop.f32.mrf.mxu1 }
 0x15b   : > { %1216 = vst [vmem:[%s1862_s10 + $0x88] sm:$0xff] %v1136_v59  ;;  %1256 = vst [vmem:[%s1862_s10 + $0x1c8] sm:$0xff] %v1176_v60  ;;  %v1057_v2 = vadd.f32 %v1853_v3, %v970_v61  ;;  %v1097_v4 = vadd.f32 %v1853_v3, %v1010_v62 }
 0x15c   : > { %v641_v5 = vpop.f32.mrf.mxu0  ;;  %v841_v6 = vpop.f32.mrf.mxu1 }
 0x15d   : > { %v1137_v7 = vmax.f32 %v1057_v2, 0.0  ;;  %v1177_v8 = vmax.f32 %v1097_v4, 0.0  ;;  %v971_v9 = vmul.f32 %v1850_v1, %v641_v5  ;;  %v1011_v10 = vmul.f32 %v1850_v1, %v841_v6 }
 0x15e   : > { %v643_v11 = vpop.f32.mrf.mxu0  ;;  %v843_v12 = vpop.f32.mrf.mxu1 }
 0x15f   : > { %1217 = vst [vmem:[%s1862_s10 + $0x90] sm:$0xff] %v1137_v7  ;;  %1257 = vst [vmem:[%s1862_s10 + $0x1d0] sm:$0xff] %v1177_v8  ;;  %v1058_v13 = vadd.f32 %v1853_v3, %v971_v9  ;;  %v1098_v14 = vadd.f32 %v1853_v3, %v1011_v10 }
 0x160   : > { %v646_v15 = vpop.f32.mrf.mxu0  ;;  %v846_v16 = vpop.f32.mrf.mxu1 }
 0x161   : > { %v1138_v17 = vmax.f32 %v1058_v13, 0.0  ;;  %v1178_v18 = vmax.f32 %v1098_v14, 0.0  ;;  %v972_v19 = vmul.f32 %v1850_v1, %v646_v15  ;;  %v1012_v20 = vmul.f32 %v1850_v1, %v846_v16 }
 0x162   : > { %v648_v21 = vpop.f32.mrf.mxu0  ;;  %v848_v22 = vpop.f32.mrf.mxu1 }
 0x163   : > { %1218 = vst [vmem:[%s1862_s10 + $0x98] sm:$0xff] %v1138_v17  ;;  %1258 = vst [vmem:[%s1862_s10 + $0x1d8] sm:$0xff] %v1178_v18  ;;  %v1059_v23 = vadd.f32 %v1853_v3, %v972_v19  ;;  %v1099_v24 = vadd.f32 %v1853_v3, %v1012_v20 }
 0x164   : > { %v651_v25 = vpop.f32.mrf.mxu0  ;;  %v851_v26 = vpop.f32.mrf.mxu1 }
 0x165   : > { %v1139_v27 = vmax.f32 %v1059_v23, 0.0  ;;  %v1179_v28 = vmax.f32 %v1099_v24, 0.0  ;;  %v973_v29 = vmul.f32 %v1850_v1, %v651_v25  ;;  %v1013_v30 = vmul.f32 %v1850_v1, %v851_v26 }
 0x166   : > { %v653_v31 = vpop.f32.mrf.mxu0  ;;  %v853_v32 = vpop.f32.mrf.mxu1 }
 0x167   : > { %1219 = vst [vmem:[%s1862_s10 + $0xa0] sm:$0xff] %v1139_v27  ;;  %1259 = vst [vmem:[%s1862_s10 + $0x1e0] sm:$0xff] %v1179_v28  ;;  %v1060_v33 = vadd.f32 %v1853_v3, %v973_v29  ;;  %v1100_v34 = vadd.f32 %v1853_v3, %v1013_v30 }
 0x168   : > { %v656_v35 = vpop.f32.mrf.mxu0  ;;  %v856_v36 = vpop.f32.mrf.mxu1 }
 0x169   : > { %v1140_v37 = vmax.f32 %v1060_v33, 0.0  ;;  %v1180_v38 = vmax.f32 %v1100_v34, 0.0  ;;  %v974_v39 = vmul.f32 %v1850_v1, %v656_v35  ;;  %v1014_v40 = vmul.f32 %v1850_v1, %v856_v36 }
 0x16a   : > { %v658_v41 = vpop.f32.mrf.mxu0  ;;  %v858_v42 = vpop.f32.mrf.mxu1 }
 0x16b   : > { %1220 = vst [vmem:[%s1862_s10 + $0xa8] sm:$0xff] %v1140_v37  ;;  %1260 = vst [vmem:[%s1862_s10 + $0x1e8] sm:$0xff] %v1180_v38  ;;  %v1061_v43 = vadd.f32 %v1853_v3, %v974_v39  ;;  %v1101_v44 = vadd.f32 %v1853_v3, %v1014_v40 }
 0x16c   : > { %v661_v45 = vpop.f32.mrf.mxu0  ;;  %v861_v46 = vpop.f32.mrf.mxu1 }
 0x16d   : > { %v1141_v47 = vmax.f32 %v1061_v43, 0.0  ;;  %v1181_v48 = vmax.f32 %v1101_v44, 0.0  ;;  %v975_v49 = vmul.f32 %v1850_v1, %v661_v45  ;;  %v1015_v50 = vmul.f32 %v1850_v1, %v861_v46 }
 0x16e   : > { %v663_v51 = vpop.f32.mrf.mxu0  ;;  %v863_v52 = vpop.f32.mrf.mxu1 }
 0x16f   : > { %1221 = vst [vmem:[%s1862_s10 + $0xb0] sm:$0xff] %v1141_v47  ;;  %1261 = vst [vmem:[%s1862_s10 + $0x1f0] sm:$0xff] %v1181_v48  ;;  %v1062_v53 = vadd.f32 %v1853_v3, %v975_v49  ;;  %v1102_v54 = vadd.f32 %v1853_v3, %v1015_v50 }
 0x170   : > { %v666_v55 = vpop.f32.mrf.mxu0  ;;  %v866_v56 = vpop.f32.mrf.mxu1 }
 0x171   : > { %v1142_v57 = vmax.f32 %v1062_v53, 0.0  ;;  %v1182_v58 = vmax.f32 %v1102_v54, 0.0  ;;  %v976_v59 = vmul.f32 %v1850_v1, %v666_v55  ;;  %v1016_v60 = vmul.f32 %v1850_v1, %v866_v56 }
 0x172   : > { %v668_v61 = vpop.f32.mrf.mxu0  ;;  %v868_v62 = vpop.f32.mrf.mxu1 }
 0x173   : > { %1222 = vst [vmem:[%s1862_s10 + $0xb8] sm:$0xff] %v1142_v57  ;;  %1262 = vst [vmem:[%s1862_s10 + $0x1f8] sm:$0xff] %v1182_v58  ;;  %v1063_v63 = vadd.f32 %v1853_v3, %v976_v59  ;;  %v1103_v0 = vadd.f32 %v1853_v3, %v1016_v60 }
 0x174   : > { %v671_v2 = vpop.f32.mrf.mxu0  ;;  %v871_v4 = vpop.f32.mrf.mxu1 }
 0x175   : > { %v1143_v5 = vmax.f32 %v1063_v63, 0.0  ;;  %v1183_v6 = vmax.f32 %v1103_v0, 0.0  ;;  %v977_v7 = vmul.f32 %v1850_v1, %v671_v2  ;;  %v1017_v8 = vmul.f32 %v1850_v1, %v871_v4 }
 0x176   : > { %v673_v9 = vpop.f32.mrf.mxu0  ;;  %v873_v10 = vpop.f32.mrf.mxu1 }
 0x177   : > { %1223 = vst [vmem:[%s1862_s10 + $0xc0] sm:$0xff] %v1143_v5  ;;  %1263 = vst [vmem:[%s1862_s10 + $0x200] sm:$0xff] %v1183_v6  ;;  %v1064_v11 = vadd.f32 %v1853_v3, %v977_v7  ;;  %v1104_v12 = vadd.f32 %v1853_v3, %v1017_v8 }
 0x178   : > { %v676_v13 = vpop.f32.mrf.mxu0  ;;  %v876_v14 = vpop.f32.mrf.mxu1 }
 0x179   : > { %v1144_v15 = vmax.f32 %v1064_v11, 0.0  ;;  %v1184_v16 = vmax.f32 %v1104_v12, 0.0  ;;  %v978_v17 = vmul.f32 %v1850_v1, %v676_v13  ;;  %v1018_v18 = vmul.f32 %v1850_v1, %v876_v14 }
 0x17a   : > { %v678_v19 = vpop.f32.mrf.mxu0  ;;  %v878_v20 = vpop.f32.mrf.mxu1 }
 0x17b   : > { %1224 = vst [vmem:[%s1862_s10 + $0xc8] sm:$0xff] %v1144_v15  ;;  %1264 = vst [vmem:[%s1862_s10 + $0x208] sm:$0xff] %v1184_v16  ;;  %v1065_v21 = vadd.f32 %v1853_v3, %v978_v17  ;;  %v1105_v22 = vadd.f32 %v1853_v3, %v1018_v18 }
 0x17c   : > { %v681_v23 = vpop.f32.mrf.mxu0  ;;  %v881_v24 = vpop.f32.mrf.mxu1 }
 0x17d   : > { %v1145_v25 = vmax.f32 %v1065_v21, 0.0  ;;  %v1185_v26 = vmax.f32 %v1105_v22, 0.0  ;;  %v979_v27 = vmul.f32 %v1850_v1, %v681_v23  ;;  %v1019_v28 = vmul.f32 %v1850_v1, %v881_v24 }
 0x17e   : > { %v683_v29 = vpop.f32.mrf.mxu0  ;;  %v883_v30 = vpop.f32.mrf.mxu1 }
 0x17f   : > { %1225 = vst [vmem:[%s1862_s10 + $0xd0] sm:$0xff] %v1145_v25  ;;  %1265 = vst [vmem:[%s1862_s10 + $0x210] sm:$0xff] %v1185_v26  ;;  %v1066_v31 = vadd.f32 %v1853_v3, %v979_v27  ;;  %v1106_v32 = vadd.f32 %v1853_v3, %v1019_v28 }
 0x180   : > { %v686_v33 = vpop.f32.mrf.mxu0  ;;  %v886_v34 = vpop.f32.mrf.mxu1 }
 0x181   : > { %v1146_v35 = vmax.f32 %v1066_v31, 0.0  ;;  %v1186_v36 = vmax.f32 %v1106_v32, 0.0  ;;  %v980_v37 = vmul.f32 %v1850_v1, %v686_v33  ;;  %v1020_v38 = vmul.f32 %v1850_v1, %v886_v34 }
 0x182   : > { %v688_v39 = vpop.f32.mrf.mxu0  ;;  %v888_v40 = vpop.f32.mrf.mxu1 }
 0x183   : > { %1226 = vst [vmem:[%s1862_s10 + $0xd8] sm:$0xff] %v1146_v35  ;;  %1266 = vst [vmem:[%s1862_s10 + $0x218] sm:$0xff] %v1186_v36  ;;  %v1067_v41 = vadd.f32 %v1853_v3, %v980_v37  ;;  %v1107_v42 = vadd.f32 %v1853_v3, %v1020_v38 }
 0x184   : > { %v691_v43 = vpop.f32.mrf.mxu0  ;;  %v891_v44 = vpop.f32.mrf.mxu1 }
 0x185   : > { %v1147_v45 = vmax.f32 %v1067_v41, 0.0  ;;  %v1187_v46 = vmax.f32 %v1107_v42, 0.0  ;;  %v981_v47 = vmul.f32 %v1850_v1, %v691_v43  ;;  %v1021_v48 = vmul.f32 %v1850_v1, %v891_v44 }
 0x186   : > { %v693_v49 = vpop.f32.mrf.mxu0  ;;  %v893_v50 = vpop.f32.mrf.mxu1 }
 0x187   : > { %1227 = vst [vmem:[%s1862_s10 + $0xe0] sm:$0xff] %v1147_v45  ;;  %1267 = vst [vmem:[%s1862_s10 + $0x220] sm:$0xff] %v1187_v46  ;;  %v1068_v51 = vadd.f32 %v1853_v3, %v981_v47  ;;  %v1108_v52 = vadd.f32 %v1853_v3, %v1021_v48 }
 0x188   : > { %v696_v53 = vpop.f32.mrf.mxu0  ;;  %v896_v54 = vpop.f32.mrf.mxu1 }
 0x189   : > { %v1148_v55 = vmax.f32 %v1068_v51, 0.0  ;;  %v1188_v56 = vmax.f32 %v1108_v52, 0.0  ;;  %v982_v57 = vmul.f32 %v1850_v1, %v696_v53  ;;  %v1022_v58 = vmul.f32 %v1850_v1, %v896_v54 }
 0x18a   : > { %v698_v59 = vpop.f32.mrf.mxu0  ;;  %v898_v60 = vpop.f32.mrf.mxu1 }
 0x18b   : > { %1228 = vst [vmem:[%s1862_s10 + $0xe8] sm:$0xff] %v1148_v55  ;;  %1268 = vst [vmem:[%s1862_s10 + $0x228] sm:$0xff] %v1188_v56  ;;  %v1069_v61 = vadd.f32 %v1853_v3, %v982_v57  ;;  %v1109_v62 = vadd.f32 %v1853_v3, %v1022_v58 }
 0x18c   : > { %v701_v63 = vpop.f32.mrf.mxu0  ;;  %v901_v0 = vpop.f32.mrf.mxu1 }
 0x18d   : > { %v1149_v2 = vmax.f32 %v1069_v61, 0.0  ;;  %v1189_v4 = vmax.f32 %v1109_v62, 0.0  ;;  %v983_v5 = vmul.f32 %v1850_v1, %v701_v63  ;;  %v1023_v6 = vmul.f32 %v1850_v1, %v901_v0 }
 0x18e   : > { %v703_v7 = vpop.f32.mrf.mxu0  ;;  %v903_v8 = vpop.f32.mrf.mxu1 }
 0x18f   : > { %1229 = vst [vmem:[%s1862_s10 + $0xf0] sm:$0xff] %v1149_v2  ;;  %1269 = vst [vmem:[%s1862_s10 + $0x230] sm:$0xff] %v1189_v4  ;;  %v1070_v9 = vadd.f32 %v1853_v3, %v983_v5  ;;  %v1110_v10 = vadd.f32 %v1853_v3, %v1023_v6 }
 0x190   : > { %v706_v11 = vpop.f32.mrf.mxu0  ;;  %v906_v12 = vpop.f32.mrf.mxu1 }
 0x191   : > { %v1150_v13 = vmax.f32 %v1070_v9, 0.0  ;;  %v1190_v14 = vmax.f32 %v1110_v10, 0.0  ;;  %v984_v15 = vmul.f32 %v1850_v1, %v706_v11  ;;  %v1024_v16 = vmul.f32 %v1850_v1, %v906_v12 }
 0x192   : > { %v708_v17 = vpop.f32.mrf.mxu0  ;;  %v908_v18 = vpop.f32.mrf.mxu1 }
 0x193   : > { %1230 = vst [vmem:[%s1862_s10 + $0xf8] sm:$0xff] %v1150_v13  ;;  %1270 = vst [vmem:[%s1862_s10 + $0x238] sm:$0xff] %v1190_v14  ;;  %v1071_v19 = vadd.f32 %v1853_v3, %v984_v15  ;;  %v1111_v20 = vadd.f32 %v1853_v3, %v1024_v16 }
 0x194   : > { %v711_v21 = vpop.f32.mrf.mxu0  ;;  %v911_v22 = vpop.f32.mrf.mxu1 }
 0x195   : > { %v1151_v23 = vmax.f32 %v1071_v19, 0.0  ;;  %v1191_v24 = vmax.f32 %v1111_v20, 0.0  ;;  %v985_v25 = vmul.f32 %v1850_v1, %v711_v21  ;;  %v1025_v26 = vmul.f32 %v1850_v1, %v911_v22 }
 0x196   : > { %v713_v27 = vpop.f32.mrf.mxu0  ;;  %v913_v28 = vpop.f32.mrf.mxu1 }
 0x197   : > { %1231 = vst [vmem:[%s1862_s10 + $0x100] sm:$0xff] %v1151_v23  ;;  %1271 = vst [vmem:[%s1862_s10 + $0x240] sm:$0xff] %v1191_v24  ;;  %v1072_v29 = vadd.f32 %v1853_v3, %v985_v25  ;;  %v1112_v30 = vadd.f32 %v1853_v3, %v1025_v26 }
 0x198   : > { %v716_v31 = vpop.f32.mrf.mxu0  ;;  %v916_v32 = vpop.f32.mrf.mxu1 }
 0x199   : > { %v1152_v33 = vmax.f32 %v1072_v29, 0.0  ;;  %v1192_v34 = vmax.f32 %v1112_v30, 0.0  ;;  %v986_v35 = vmul.f32 %v1850_v1, %v716_v31  ;;  %v1026_v36 = vmul.f32 %v1850_v1, %v916_v32 }
 0x19a   : > { %v718_v37 = vpop.f32.mrf.mxu0  ;;  %v918_v38 = vpop.f32.mrf.mxu1 }
 0x19b   : > { %1232 = vst [vmem:[%s1862_s10 + $0x108] sm:$0xff] %v1152_v33  ;;  %1272 = vst [vmem:[%s1862_s10 + $0x248] sm:$0xff] %v1192_v34  ;;  %v1073_v39 = vadd.f32 %v1853_v3, %v986_v35  ;;  %v1113_v40 = vadd.f32 %v1853_v3, %v1026_v36 }
 0x19c   : > { %v721_v41 = vpop.f32.mrf.mxu0  ;;  %v921_v42 = vpop.f32.mrf.mxu1 }
 0x19d   : > { %v1153_v43 = vmax.f32 %v1073_v39, 0.0  ;;  %v1193_v44 = vmax.f32 %v1113_v40, 0.0  ;;  %v987_v45 = vmul.f32 %v1850_v1, %v721_v41  ;;  %v1027_v46 = vmul.f32 %v1850_v1, %v921_v42 }
 0x19e   : > { %v723_v47 = vpop.f32.mrf.mxu0  ;;  %v923_v48 = vpop.f32.mrf.mxu1 }
 0x19f   : > { %1233 = vst [vmem:[%s1862_s10 + $0x110] sm:$0xff] %v1153_v43  ;;  %1273 = vst [vmem:[%s1862_s10 + $0x250] sm:$0xff] %v1193_v44  ;;  %v1074_v49 = vadd.f32 %v1853_v3, %v987_v45  ;;  %v1114_v50 = vadd.f32 %v1853_v3, %v1027_v46 }
 0x1a0   : > { %v726_v51 = vpop.f32.mrf.mxu0  ;;  %v926_v52 = vpop.f32.mrf.mxu1 }
 0x1a1   : > { %v1154_v53 = vmax.f32 %v1074_v49, 0.0  ;;  %v1194_v54 = vmax.f32 %v1114_v50, 0.0  ;;  %v988_v55 = vmul.f32 %v1850_v1, %v726_v51  ;;  %v1028_v56 = vmul.f32 %v1850_v1, %v926_v52 }
 0x1a2   : > { %v728_v57 = vpop.f32.mrf.mxu0  ;;  %v928_v58 = vpop.f32.mrf.mxu1 }
 0x1a3   : > { %1234 = vst [vmem:[%s1862_s10 + $0x118] sm:$0xff] %v1154_v53  ;;  %1274 = vst [vmem:[%s1862_s10 + $0x258] sm:$0xff] %v1194_v54  ;;  %v1075_v59 = vadd.f32 %v1853_v3, %v988_v55  ;;  %v1115_v60 = vadd.f32 %v1853_v3, %v1028_v56 }
 0x1a4   : > { %v731_v61 = vpop.f32.mrf.mxu0  ;;  %v931_v62 = vpop.f32.mrf.mxu1 }
 0x1a5   : > { %v1155_v63 = vmax.f32 %v1075_v59, 0.0  ;;  %v1195_v0 = vmax.f32 %v1115_v60, 0.0  ;;  %v989_v2 = vmul.f32 %v1850_v1, %v731_v61  ;;  %v1029_v4 = vmul.f32 %v1850_v1, %v931_v62 }
 0x1a6   : > { %v733_v5 = vpop.f32.mrf.mxu0  ;;  %v933_v6 = vpop.f32.mrf.mxu1 }
 0x1a7   : > { %1235 = vst [vmem:[%s1862_s10 + $0x120] sm:$0xff] %v1155_v63  ;;  %1275 = vst [vmem:[%s1862_s10 + $0x260] sm:$0xff] %v1195_v0  ;;  %v1076_v7 = vadd.f32 %v1853_v3, %v989_v2  ;;  %v1116_v8 = vadd.f32 %v1853_v3, %v1029_v4 }
 0x1a8   : > { %v736_v9 = vpop.f32.mrf.mxu0  ;;  %v936_v10 = vpop.f32.mrf.mxu1 }
 0x1a9   : > { %v1156_v11 = vmax.f32 %v1076_v7, 0.0  ;;  %v1196_v12 = vmax.f32 %v1116_v8, 0.0  ;;  %v990_v13 = vmul.f32 %v1850_v1, %v736_v9  ;;  %v1030_v14 = vmul.f32 %v1850_v1, %v936_v10 }
 0x1aa   : > { %v738_v15 = vpop.f32.mrf.mxu0  ;;  %v938_v16 = vpop.f32.mrf.mxu1 }
 0x1ab   : > { %1236 = vst [vmem:[%s1862_s10 + $0x128] sm:$0xff] %v1156_v11  ;;  %1276 = vst [vmem:[%s1862_s10 + $0x268] sm:$0xff] %v1196_v12  ;;  %v1077_v17 = vadd.f32 %v1853_v3, %v990_v13  ;;  %v1117_v18 = vadd.f32 %v1853_v3, %v1030_v14 }
 0x1ac   : > { %v741_v19 = vpop.f32.mrf.mxu0  ;;  %v941_v20 = vpop.f32.mrf.mxu1 }
 0x1ad   : > { %v1157_v21 = vmax.f32 %v1077_v17, 0.0  ;;  %v1197_v22 = vmax.f32 %v1117_v18, 0.0  ;;  %v991_v23 = vmul.f32 %v1850_v1, %v741_v19  ;;  %v1031_v24 = vmul.f32 %v1850_v1, %v941_v20 }
 0x1ae   : > { %v743_v25 = vpop.f32.mrf.mxu0  ;;  %v943_v26 = vpop.f32.mrf.mxu1 }
 0x1af   : > { %1237 = vst [vmem:[%s1862_s10 + $0x130] sm:$0xff] %v1157_v21  ;;  %1277 = vst [vmem:[%s1862_s10 + $0x270] sm:$0xff] %v1197_v22  ;;  %v1078_v27 = vadd.f32 %v1853_v3, %v991_v23  ;;  %v1118_v28 = vadd.f32 %v1853_v3, %v1031_v24 }
 0x1b1   : > { %v1158_v29 = vmax.f32 %v1078_v27, 0.0  ;;  %v1198_v30 = vmax.f32 %v1118_v28, 0.0 }
 0x1b3   : > { %1238 = vst [vmem:[%s1862_s10 + $0x138] sm:$0xff] %v1158_v29  ;;  %1278 = vst [vmem:[%s1862_s10 + $0x278] sm:$0xff] %v1198_v30 }
 0x1b4 PF: > { %s14_s17 = sadd.s32 1, %s1526_s17   ;;  %s2114_s15 = smov %s1522_s16 }
 0x1b5   : > { %p11_p5 = scmp.ge.s32.totalorder %s14_s17, 4   ;;  %s2115_s16 = smov %s2117_s18 }
 0x1b7   :  { %13 = sbr.rel (!%p11_p5) target bundleno = 2 (0x2), region = 75 }

// kernel: hcat_forward.9
= control target key start
LH: loop header
LB: loop body
LE: loop exit
PB: predicated region body
PF: predicated region fallthrough
CT: control target
= control target key end

     0   :  { %s2270_s0 = inlined_call_operand.vmem [shape: f32[9,320,128], index: 0, kind: input, shape index: {}]   ;;  %s2271_s1 = inlined_call_operand.vmem [shape: f32[320,128], index: 1, kind: output, shape index: {}]  }
   0x1   :  { %v8_v0 = vld [vmem:[%s2270_s0] sm:$0xff]  ;;  %v9_v6 = vld [vmem:[%s2270_s0 + $0x8] sm:$0xff]  ;;  %v10_v15 = vld [vmem:[%s2270_s0 + $0x10] sm:$0xff] }
   0x2   :  { %v740_v1 = vld [vmem:[%s2270_s0 + $0x140] sm:$0xff]  ;;  %v741_v7 = vld [vmem:[%s2270_s0 + $0x148] sm:$0xff]  ;;  %v742_v16 = vld [vmem:[%s2270_s0 + $0x150] sm:$0xff] }
   0x3   :  { %v780_v2 = vld [vmem:[%s2270_s0 + $0x280] sm:$0xff]  ;;  %v89_v3 = vmax.f32 %v8_v0, %v740_v1  ;;  %v781_v8 = vld [vmem:[%s2270_s0 + $0x288] sm:$0xff]  ;;  %v90_v10 = vmax.f32 %v9_v6, %v741_v7  ;;  %v782_v17 = vld [vmem:[%s2270_s0 + $0x290] sm:$0xff]  ;;  %v91_v20 = vmax.f32 %v10_v15, %v742_v16 }
   0x4   :  { %v820_v4 = vld [vmem:[%s2270_s0 + $0x3c0] sm:$0xff]  ;;  %v821_v13 = vld [vmem:[%s2270_s0 + $0x3c8] sm:$0xff]  ;;  %v822_v24 = vld [vmem:[%s2270_s0 + $0x3d0] sm:$0xff] }
   0x5   :  { %v170_v5 = vmax.f32 %v89_v3, %v780_v2  ;;  %v860_v9 = vld [vmem:[%s2270_s0 + $0x500] sm:$0xff]  ;;  %v171_v14 = vmax.f32 %v90_v10, %v781_v8  ;;  %v861_v19 = vld [vmem:[%s2270_s0 + $0x508] sm:$0xff]  ;;  %v172_v26 = vmax.f32 %v91_v20, %v782_v17  ;;  %v11_v27 = vld [vmem:[%s2270_s0 + $0x18] sm:$0xff] }
   0x6   :  { %v900_v12 = vld [vmem:[%s2270_s0 + $0x640] sm:$0xff]  ;;  %v901_v23 = vld [vmem:[%s2270_s0 + $0x648] sm:$0xff]  ;;  %v743_v28 = vld [vmem:[%s2270_s0 + $0x158] sm:$0xff] }
   0x7   :  { %v251_v11 = vmax.f32 %v170_v5, %v820_v4  ;;  %v940_v21 = vld [vmem:[%s2270_s0 + $0x780] sm:$0xff]  ;;  %v252_v22 = vmax.f32 %v171_v14, %v821_v13  ;;  %v783_v29 = vld [vmem:[%s2270_s0 + $0x298] sm:$0xff]  ;;  %v862_v33 = vld [vmem:[%s2270_s0 + $0x510] sm:$0xff]  ;;  %v92_v34 = vmax.f32 %v11_v27, %v743_v28  ;;  %v253_v37 = vmax.f32 %v172_v26, %v822_v24 }
   0x8   :  { %v980_v30 = vld [vmem:[%s2270_s0 + $0x8c0] sm:$0xff]  ;;  %v941_v36 = vld [vmem:[%s2270_s0 + $0x788] sm:$0xff]  ;;  %v902_v38 = vld [vmem:[%s2270_s0 + $0x650] sm:$0xff] }
   0x9   :  { %v332_v18 = vmax.f32 %v251_v11, %v860_v9  ;;  %v1020_v31 = vld [vmem:[%s2270_s0 + $0xa00] sm:$0xff]  ;;  %v333_v32 = vmax.f32 %v252_v22, %v861_v19  ;;  %v823_v39 = vld [vmem:[%s2270_s0 + $0x3d8] sm:$0xff]  ;;  %v173_v41 = vmax.f32 %v92_v34, %v783_v29  ;;  %v981_v46 = vld [vmem:[%s2270_s0 + $0x8c8] sm:$0xff]  ;;  %v334_v48 = vmax.f32 %v253_v37, %v862_v33 }
   0xa   :  { %v12_v42 = vld [vmem:[%s2270_s0 + $0x20] sm:$0xff]  ;;  %v1021_v47 = vld [vmem:[%s2270_s0 + $0xa08] sm:$0xff]  ;;  %v863_v49 = vld [vmem:[%s2270_s0 + $0x518] sm:$0xff] }
   0xb   :  { %v413_v25 = vmax.f32 %v332_v18, %v900_v12  ;;  %v414_v40 = vmax.f32 %v333_v32, %v901_v23  ;;  %v744_v43 = vld [vmem:[%s2270_s0 + $0x160] sm:$0xff]  ;;  %v942_v52 = vld [vmem:[%s2270_s0 + $0x790] sm:$0xff]  ;;  %v254_v53 = vmax.f32 %v173_v41, %v823_v39  ;;  %v903_v54 = vld [vmem:[%s2270_s0 + $0x658] sm:$0xff]  ;;  %v415_v57 = vmax.f32 %v334_v48, %v902_v38 }
   0xc   :  { %v784_v44 = vld [vmem:[%s2270_s0 + $0x2a0] sm:$0xff]  ;;  %v93_v50 = vmax.f32 %v12_v42, %v744_v43  ;;  %v13_v59 = vld [vmem:[%s2270_s0 + $0x28] sm:$0xff]  ;;  %v982_v63 = vld [vmem:[%s2270_s0 + $0x8d0] sm:$0xff] }
   0xd   :  { %v494_v35 = vmax.f32 %v413_v25, %v940_v21  ;;  %v495_v51 = vmax.f32 %v414_v40, %v941_v36  ;;  %v824_v55 = vld [vmem:[%s2270_s0 + $0x3e0] sm:$0xff]  ;;  %v745_v60 = vld [vmem:[%s2270_s0 + $0x168] sm:$0xff]  ;;  %v1022_v0 = vld [vmem:[%s2270_s0 + $0xa10] sm:$0xff]  ;;  %v335_v1 = vmax.f32 %v254_v53, %v863_v49  ;;  %v496_v4 = vmax.f32 %v415_v57, %v942_v52 }
   0xe   :  { %v174_v58 = vmax.f32 %v93_v50, %v784_v44  ;;  %v785_v61 = vld [vmem:[%s2270_s0 + $0x2a8] sm:$0xff]  ;;  %v864_v2 = vld [vmem:[%s2270_s0 + $0x520] sm:$0xff]  ;;  %v94_v3 = vmax.f32 %v13_v59, %v745_v60  ;;  %v943_v5 = vld [vmem:[%s2270_s0 + $0x798] sm:$0xff] }
   0xf   :  { %v575_v45 = vmax.f32 %v494_v35, %v980_v30  ;;  %v576_v62 = vmax.f32 %v495_v51, %v981_v46  ;;  %v904_v7 = vld [vmem:[%s2270_s0 + $0x660] sm:$0xff]  ;;  %v825_v8 = vld [vmem:[%s2270_s0 + $0x3e8] sm:$0xff]  ;;  %v416_v10 = vmax.f32 %v335_v1, %v903_v54  ;;  %v14_v12 = vld [vmem:[%s2270_s0 + $0x30] sm:$0xff]  ;;  %v577_v15 = vmax.f32 %v496_v4, %v982_v63 }
  0x10   :  { %v255_v6 = vmax.f32 %v174_v58, %v824_v55  ;;  %v175_v11 = vmax.f32 %v94_v3, %v785_v61  ;;  %v746_v13 = vld [vmem:[%s2270_s0 + $0x170] sm:$0xff]  ;;  %v983_v16 = vld [vmem:[%s2270_s0 + $0x8d8] sm:$0xff]  ;;  %v865_v19 = vld [vmem:[%s2270_s0 + $0x528] sm:$0xff] }
  0x11   :  { %v656_v56 = vmax.f32 %v575_v45, %v1020_v31  ;;  %v657_v9 = vmax.f32 %v576_v62, %v1021_v47  ;;  %v786_v14 = vld [vmem:[%s2270_s0 + $0x2b0] sm:$0xff]  ;;  %v1023_v17 = vld [vmem:[%s2270_s0 + $0xa18] sm:$0xff]  ;;  %v95_v20 = vmax.f32 %v14_v12, %v746_v13  ;;  %v497_v21 = vmax.f32 %v416_v10, %v943_v5  ;;  %v944_v22 = vld [vmem:[%s2270_s0 + $0x7a0] sm:$0xff] }
  0x12   :  { %v336_v18 = vmax.f32 %v255_v6, %v864_v2  ;;  %v256_v23 = vmax.f32 %v175_v11, %v825_v8  ;;  %v905_v24 = vld [vmem:[%s2270_s0 + $0x668] sm:$0xff]  ;;  %v826_v25 = vld [vmem:[%s2270_s0 + $0x3f0] sm:$0xff]  ;;  %v658_v26 = vmax.f32 %v577_v15, %v1022_v0  ;;  %v15_v29 = vld [vmem:[%s2270_s0 + $0x38] sm:$0xff] }
  0x13   :  { %696 = vst [vmem:[%s2271_s1] sm:$0xff] %v656_v56  ;;  %697 = vst [vmem:[%s2271_s1 + $0x8] sm:$0xff] %v657_v9  ;;  %v176_v28 = vmax.f32 %v95_v20, %v786_v14  ;;  %v747_v30 = vld [vmem:[%s2270_s0 + $0x178] sm:$0xff]  ;;  %v578_v32 = vmax.f32 %v497_v21, %v983_v16  ;;  %v984_v33 = vld [vmem:[%s2270_s0 + $0x8e0] sm:$0xff] }
  0x14   :  { %v417_v27 = vmax.f32 %v336_v18, %v904_v7  ;;  %v787_v31 = vld [vmem:[%s2270_s0 + $0x2b8] sm:$0xff]  ;;  %v1024_v34 = vld [vmem:[%s2270_s0 + $0xa20] sm:$0xff]  ;;  %v337_v35 = vmax.f32 %v256_v23, %v865_v19  ;;  %v866_v36 = vld [vmem:[%s2270_s0 + $0x530] sm:$0xff]  ;;  %v96_v37 = vmax.f32 %v15_v29, %v747_v30  ;;  %698 = vst [vmem:[%s2271_s1 + $0x10] sm:$0xff] %v658_v26 }
  0x15   :  { %v945_v39 = vld [vmem:[%s2270_s0 + $0x7a8] sm:$0xff]  ;;  %v257_v40 = vmax.f32 %v176_v28, %v826_v25  ;;  %v906_v41 = vld [vmem:[%s2270_s0 + $0x670] sm:$0xff]  ;;  %v827_v42 = vld [vmem:[%s2270_s0 + $0x3f8] sm:$0xff]  ;;  %v659_v43 = vmax.f32 %v578_v32, %v1023_v17 }
  0x16   :  { %v498_v38 = vmax.f32 %v417_v27, %v944_v22  ;;  %v418_v44 = vmax.f32 %v337_v35, %v905_v24  ;;  %v177_v45 = vmax.f32 %v96_v37, %v787_v31  ;;  %v16_v46 = vld [vmem:[%s2270_s0 + $0x40] sm:$0xff]  ;;  %v985_v50 = vld [vmem:[%s2270_s0 + $0x8e8] sm:$0xff]  ;;  %v867_v53 = vld [vmem:[%s2270_s0 + $0x538] sm:$0xff] }
  0x17   :  { %v748_v47 = vld [vmem:[%s2270_s0 + $0x180] sm:$0xff]  ;;  %v1025_v51 = vld [vmem:[%s2270_s0 + $0xa28] sm:$0xff]  ;;  %v338_v52 = vmax.f32 %v257_v40, %v866_v36  ;;  %699 = vst [vmem:[%s2271_s1 + $0x18] sm:$0xff] %v659_v43  ;;  %v946_v56 = vld [vmem:[%s2270_s0 + $0x7b0] sm:$0xff] }
  0x18   :  { %v788_v48 = vld [vmem:[%s2270_s0 + $0x2c0] sm:$0xff]  ;;  %v579_v49 = vmax.f32 %v498_v38, %v984_v33  ;;  %v97_v54 = vmax.f32 %v16_v46, %v748_v47  ;;  %v499_v55 = vmax.f32 %v418_v44, %v945_v39  ;;  %v258_v57 = vmax.f32 %v177_v45, %v827_v42  ;;  %v907_v58 = vld [vmem:[%s2270_s0 + $0x678] sm:$0xff]  ;;  %v17_v63 = vld [vmem:[%s2270_s0 + $0x48] sm:$0xff] }
  0x19   :  { %v828_v59 = vld [vmem:[%s2270_s0 + $0x400] sm:$0xff]  ;;  %v419_v61 = vmax.f32 %v338_v52, %v906_v41  ;;  %v749_v0 = vld [vmem:[%s2270_s0 + $0x188] sm:$0xff]  ;;  %v986_v3 = vld [vmem:[%s2270_s0 + $0x8f0] sm:$0xff] }
  0x1a   :  { %v660_v60 = vmax.f32 %v579_v49, %v1024_v34  ;;  %v178_v62 = vmax.f32 %v97_v54, %v788_v48  ;;  %v789_v1 = vld [vmem:[%s2270_s0 + $0x2c8] sm:$0xff]  ;;  %v580_v2 = vmax.f32 %v499_v55, %v985_v50  ;;  %v1026_v4 = vld [vmem:[%s2270_s0 + $0xa30] sm:$0xff]  ;;  %v339_v5 = vmax.f32 %v258_v57, %v867_v53  ;;  %v868_v6 = vld [vmem:[%s2270_s0 + $0x540] sm:$0xff] }
  0x1b   :  { %v98_v7 = vmax.f32 %v17_v63, %v749_v0  ;;  %v500_v8 = vmax.f32 %v419_v61, %v946_v56  ;;  %v947_v9 = vld [vmem:[%s2270_s0 + $0x7b8] sm:$0xff]  ;;  %v908_v11 = vld [vmem:[%s2270_s0 + $0x680] sm:$0xff]  ;;  %v829_v12 = vld [vmem:[%s2270_s0 + $0x408] sm:$0xff] }
  0x1c   :  { %700 = vst [vmem:[%s2271_s1 + $0x20] sm:$0xff] %v660_v60  ;;  %v259_v10 = vmax.f32 %v178_v62, %v828_v59  ;;  %v661_v13 = vmax.f32 %v580_v2, %v1025_v51  ;;  %v420_v14 = vmax.f32 %v339_v5, %v907_v58  ;;  %v18_v16 = vld [vmem:[%s2270_s0 + $0x50] sm:$0xff]  ;;  %v987_v20 = vld [vmem:[%s2270_s0 + $0x8f8] sm:$0xff]  ;;  %v869_v23 = vld [vmem:[%s2270_s0 + $0x548] sm:$0xff] }
  0x1d   :  { %v179_v15 = vmax.f32 %v98_v7, %v789_v1  ;;  %v750_v17 = vld [vmem:[%s2270_s0 + $0x190] sm:$0xff]  ;;  %v581_v19 = vmax.f32 %v500_v8, %v986_v3  ;;  %v1027_v21 = vld [vmem:[%s2270_s0 + $0xa38] sm:$0xff]  ;;  %v948_v26 = vld [vmem:[%s2270_s0 + $0x7c0] sm:$0xff] }
  0x1e   :  { %v790_v18 = vld [vmem:[%s2270_s0 + $0x2d0] sm:$0xff]  ;;  %v340_v22 = vmax.f32 %v259_v10, %v868_v6  ;;  %v99_v24 = vmax.f32 %v18_v16, %v750_v17  ;;  %701 = vst [vmem:[%s2271_s1 + $0x28] sm:$0xff] %v661_v13  ;;  %v501_v25 = vmax.f32 %v420_v14, %v947_v9  ;;  %v909_v28 = vld [vmem:[%s2270_s0 + $0x688] sm:$0xff]  ;;  %v19_v33 = vld [vmem:[%s2270_s0 + $0x58] sm:$0xff] }
  0x1f   :  { %v260_v27 = vmax.f32 %v179_v15, %v829_v12  ;;  %v830_v29 = vld [vmem:[%s2270_s0 + $0x410] sm:$0xff]  ;;  %v662_v30 = vmax.f32 %v581_v19, %v1026_v4  ;;  %v751_v34 = vld [vmem:[%s2270_s0 + $0x198] sm:$0xff]  ;;  %v988_v37 = vld [vmem:[%s2270_s0 + $0x900] sm:$0xff] }
  0x20   :  { %v421_v31 = vmax.f32 %v340_v22, %v908_v11  ;;  %v180_v32 = vmax.f32 %v99_v24, %v790_v18  ;;  %v791_v35 = vld [vmem:[%s2270_s0 + $0x2d8] sm:$0xff]  ;;  %v582_v36 = vmax.f32 %v501_v25, %v987_v20  ;;  %v1028_v38 = vld [vmem:[%s2270_s0 + $0xa40] sm:$0xff]  ;;  %v870_v40 = vld [vmem:[%s2270_s0 + $0x550] sm:$0xff]  ;;  %v100_v41 = vmax.f32 %v19_v33, %v751_v34 }
  0x21   :  { %v341_v39 = vmax.f32 %v260_v27, %v869_v23  ;;  %702 = vst [vmem:[%s2271_s1 + $0x30] sm:$0xff] %v662_v30  ;;  %v949_v43 = vld [vmem:[%s2270_s0 + $0x7c8] sm:$0xff]  ;;  %v910_v45 = vld [vmem:[%s2270_s0 + $0x690] sm:$0xff]  ;;  %v831_v46 = vld [vmem:[%s2270_s0 + $0x418] sm:$0xff] }
  0x22   :  { %v502_v42 = vmax.f32 %v421_v31, %v948_v26  ;;  %v261_v44 = vmax.f32 %v180_v32, %v830_v29  ;;  %v663_v47 = vmax.f32 %v582_v36, %v1027_v21  ;;  %v181_v49 = vmax.f32 %v100_v41, %v791_v35  ;;  %v20_v50 = vld [vmem:[%s2270_s0 + $0x60] sm:$0xff]  ;;  %v989_v54 = vld [vmem:[%s2270_s0 + $0x908] sm:$0xff]  ;;  %v871_v57 = vld [vmem:[%s2270_s0 + $0x558] sm:$0xff] }
  0x23   :  { %v422_v48 = vmax.f32 %v341_v39, %v909_v28  ;;  %v752_v51 = vld [vmem:[%s2270_s0 + $0x1a0] sm:$0xff]  ;;  %v1029_v55 = vld [vmem:[%s2270_s0 + $0xa48] sm:$0xff]  ;;  %v950_v60 = vld [vmem:[%s2270_s0 + $0x7d0] sm:$0xff] }
  0x24   :  { %v792_v52 = vld [vmem:[%s2270_s0 + $0x2e0] sm:$0xff]  ;;  %v583_v53 = vmax.f32 %v502_v42, %v988_v37  ;;  %v342_v56 = vmax.f32 %v261_v44, %v870_v40  ;;  %v101_v58 = vmax.f32 %v20_v50, %v752_v51  ;;  %703 = vst [vmem:[%s2271_s1 + $0x38] sm:$0xff] %v663_v47  ;;  %v262_v61 = vmax.f32 %v181_v49, %v831_v46  ;;  %v911_v62 = vld [vmem:[%s2270_s0 + $0x698] sm:$0xff]  ;;  %v21_v3 = vld [vmem:[%s2270_s0 + $0x68] sm:$0xff] }
  0x25   :  { %v503_v59 = vmax.f32 %v422_v48, %v949_v43  ;;  %v832_v63 = vld [vmem:[%s2270_s0 + $0x420] sm:$0xff]  ;;  %v753_v4 = vld [vmem:[%s2270_s0 + $0x1a8] sm:$0xff]  ;;  %v990_v7 = vld [vmem:[%s2270_s0 + $0x910] sm:$0xff] }
  0x26   :  { %v664_v0 = vmax.f32 %v583_v53, %v1028_v38  ;;  %v423_v1 = vmax.f32 %v342_v56, %v910_v45  ;;  %v182_v2 = vmax.f32 %v101_v58, %v792_v52  ;;  %v793_v5 = vld [vmem:[%s2270_s0 + $0x2e8] sm:$0xff]  ;;  %v1030_v8 = vld [vmem:[%s2270_s0 + $0xa50] sm:$0xff]  ;;  %v343_v9 = vmax.f32 %v262_v61, %v871_v57  ;;  %v872_v10 = vld [vmem:[%s2270_s0 + $0x560] sm:$0xff] }
  0x27   :  { %v584_v6 = vmax.f32 %v503_v59, %v989_v54  ;;  %v102_v11 = vmax.f32 %v21_v3, %v753_v4  ;;  %v951_v13 = vld [vmem:[%s2270_s0 + $0x7d8] sm:$0xff]  ;;  %v912_v15 = vld [vmem:[%s2270_s0 + $0x6a0] sm:$0xff]  ;;  %v833_v16 = vld [vmem:[%s2270_s0 + $0x428] sm:$0xff] }
  0x28   :  { %704 = vst [vmem:[%s2271_s1 + $0x40] sm:$0xff] %v664_v0  ;;  %v504_v12 = vmax.f32 %v423_v1, %v950_v60  ;;  %v263_v14 = vmax.f32 %v182_v2, %v832_v63  ;;  %v424_v18 = vmax.f32 %v343_v9, %v911_v62  ;;  %v22_v20 = vld [vmem:[%s2270_s0 + $0x70] sm:$0xff]  ;;  %v991_v24 = vld [vmem:[%s2270_s0 + $0x918] sm:$0xff]  ;;  %v873_v27 = vld [vmem:[%s2270_s0 + $0x568] sm:$0xff] }
  0x29   :  { %v665_v17 = vmax.f32 %v584_v6, %v1029_v55  ;;  %v183_v19 = vmax.f32 %v102_v11, %v793_v5  ;;  %v754_v21 = vld [vmem:[%s2270_s0 + $0x1b0] sm:$0xff]  ;;  %v1031_v25 = vld [vmem:[%s2270_s0 + $0xa58] sm:$0xff]  ;;  %v952_v30 = vld [vmem:[%s2270_s0 + $0x7e0] sm:$0xff] }
  0x2a   :  { %v794_v22 = vld [vmem:[%s2270_s0 + $0x2f0] sm:$0xff]  ;;  %v585_v23 = vmax.f32 %v504_v12, %v990_v7  ;;  %v344_v26 = vmax.f32 %v263_v14, %v872_v10  ;;  %v103_v28 = vmax.f32 %v22_v20, %v754_v21  ;;  %v505_v29 = vmax.f32 %v424_v18, %v951_v13  ;;  %v913_v32 = vld [vmem:[%s2270_s0 + $0x6a8] sm:$0xff]  ;;  %v23_v37 = vld [vmem:[%s2270_s0 + $0x78] sm:$0xff] }
  0x2b   :  { %705 = vst [vmem:[%s2271_s1 + $0x48] sm:$0xff] %v665_v17  ;;  %v264_v31 = vmax.f32 %v183_v19, %v833_v16  ;;  %v834_v33 = vld [vmem:[%s2270_s0 + $0x430] sm:$0xff]  ;;  %v755_v38 = vld [vmem:[%s2270_s0 + $0x1b8] sm:$0xff]  ;;  %v992_v41 = vld [vmem:[%s2270_s0 + $0x920] sm:$0xff] }
  0x2c   :  { %v666_v34 = vmax.f32 %v585_v23, %v1030_v8  ;;  %v425_v35 = vmax.f32 %v344_v26, %v912_v15  ;;  %v184_v36 = vmax.f32 %v103_v28, %v794_v22  ;;  %v795_v39 = vld [vmem:[%s2270_s0 + $0x2f8] sm:$0xff]  ;;  %v586_v40 = vmax.f32 %v505_v29, %v991_v24  ;;  %v1032_v42 = vld [vmem:[%s2270_s0 + $0xa60] sm:$0xff]  ;;  %v874_v44 = vld [vmem:[%s2270_s0 + $0x570] sm:$0xff] }
  0x2d   :  { %v345_v43 = vmax.f32 %v264_v31, %v873_v27  ;;  %v104_v45 = vmax.f32 %v23_v37, %v755_v38  ;;  %v953_v47 = vld [vmem:[%s2270_s0 + $0x7e8] sm:$0xff]  ;;  %v914_v49 = vld [vmem:[%s2270_s0 + $0x6b0] sm:$0xff]  ;;  %v835_v50 = vld [vmem:[%s2270_s0 + $0x438] sm:$0xff] }
  0x2e   :  { %706 = vst [vmem:[%s2271_s1 + $0x50] sm:$0xff] %v666_v34  ;;  %v506_v46 = vmax.f32 %v425_v35, %v952_v30  ;;  %v265_v48 = vmax.f32 %v184_v36, %v834_v33  ;;  %v667_v51 = vmax.f32 %v586_v40, %v1031_v25  ;;  %v24_v54 = vld [vmem:[%s2270_s0 + $0x80] sm:$0xff]  ;;  %v993_v58 = vld [vmem:[%s2270_s0 + $0x928] sm:$0xff]  ;;  %v875_v61 = vld [vmem:[%s2270_s0 + $0x578] sm:$0xff] }
  0x2f   :  { %v426_v52 = vmax.f32 %v345_v43, %v913_v32  ;;  %v185_v53 = vmax.f32 %v104_v45, %v795_v39  ;;  %v756_v55 = vld [vmem:[%s2270_s0 + $0x1c0] sm:$0xff]  ;;  %v1033_v59 = vld [vmem:[%s2270_s0 + $0xa68] sm:$0xff]  ;;  %v954_v0 = vld [vmem:[%s2270_s0 + $0x7f0] sm:$0xff] }
  0x30   :  { %v796_v56 = vld [vmem:[%s2270_s0 + $0x300] sm:$0xff]  ;;  %v587_v57 = vmax.f32 %v506_v46, %v992_v41  ;;  %v346_v60 = vmax.f32 %v265_v48, %v874_v44  ;;  %v105_v62 = vmax.f32 %v24_v54, %v756_v55  ;;  %707 = vst [vmem:[%s2271_s1 + $0x58] sm:$0xff] %v667_v51  ;;  %v915_v2 = vld [vmem:[%s2270_s0 + $0x6b8] sm:$0xff]  ;;  %v25_v7 = vld [vmem:[%s2270_s0 + $0x88] sm:$0xff] }
  0x31   :  { %v507_v63 = vmax.f32 %v426_v52, %v953_v47  ;;  %v266_v1 = vmax.f32 %v185_v53, %v835_v50  ;;  %v836_v3 = vld [vmem:[%s2270_s0 + $0x440] sm:$0xff]  ;;  %v757_v8 = vld [vmem:[%s2270_s0 + $0x1c8] sm:$0xff]  ;;  %v994_v11 = vld [vmem:[%s2270_s0 + $0x930] sm:$0xff] }
  0x32   :  { %v668_v4 = vmax.f32 %v587_v57, %v1032_v42  ;;  %v427_v5 = vmax.f32 %v346_v60, %v914_v49  ;;  %v186_v6 = vmax.f32 %v105_v62, %v796_v56  ;;  %v797_v9 = vld [vmem:[%s2270_s0 + $0x308] sm:$0xff]  ;;  %v1034_v12 = vld [vmem:[%s2270_s0 + $0xa70] sm:$0xff]  ;;  %v876_v14 = vld [vmem:[%s2270_s0 + $0x580] sm:$0xff]  ;;  %v106_v15 = vmax.f32 %v25_v7, %v757_v8 }
  0x33   :  { %v588_v10 = vmax.f32 %v507_v63, %v993_v58  ;;  %v347_v13 = vmax.f32 %v266_v1, %v875_v61  ;;  %v955_v17 = vld [vmem:[%s2270_s0 + $0x7f8] sm:$0xff]  ;;  %v916_v19 = vld [vmem:[%s2270_s0 + $0x6c0] sm:$0xff]  ;;  %v837_v20 = vld [vmem:[%s2270_s0 + $0x448] sm:$0xff] }
  0x34   :  { %708 = vst [vmem:[%s2271_s1 + $0x60] sm:$0xff] %v668_v4  ;;  %v508_v16 = vmax.f32 %v427_v5, %v954_v0  ;;  %v267_v18 = vmax.f32 %v186_v6, %v836_v3  ;;  %v187_v23 = vmax.f32 %v106_v15, %v797_v9  ;;  %v26_v24 = vld [vmem:[%s2270_s0 + $0x90] sm:$0xff]  ;;  %v995_v28 = vld [vmem:[%s2270_s0 + $0x938] sm:$0xff]  ;;  %v877_v31 = vld [vmem:[%s2270_s0 + $0x588] sm:$0xff] }
  0x35   :  { %v669_v21 = vmax.f32 %v588_v10, %v1033_v59  ;;  %v428_v22 = vmax.f32 %v347_v13, %v915_v2  ;;  %v758_v25 = vld [vmem:[%s2270_s0 + $0x1d0] sm:$0xff]  ;;  %v1035_v29 = vld [vmem:[%s2270_s0 + $0xa78] sm:$0xff]  ;;  %v956_v34 = vld [vmem:[%s2270_s0 + $0x800] sm:$0xff] }
  0x36   :  { %v798_v26 = vld [vmem:[%s2270_s0 + $0x310] sm:$0xff]  ;;  %v589_v27 = vmax.f32 %v508_v16, %v994_v11  ;;  %v348_v30 = vmax.f32 %v267_v18, %v876_v14  ;;  %v107_v32 = vmax.f32 %v26_v24, %v758_v25  ;;  %v268_v35 = vmax.f32 %v187_v23, %v837_v20  ;;  %v917_v36 = vld [vmem:[%s2270_s0 + $0x6c8] sm:$0xff]  ;;  %v27_v41 = vld [vmem:[%s2270_s0 + $0x98] sm:$0xff] }
  0x37   :  { %709 = vst [vmem:[%s2271_s1 + $0x68] sm:$0xff] %v669_v21  ;;  %v509_v33 = vmax.f32 %v428_v22, %v955_v17  ;;  %v838_v37 = vld [vmem:[%s2270_s0 + $0x450] sm:$0xff]  ;;  %v759_v42 = vld [vmem:[%s2270_s0 + $0x1d8] sm:$0xff]  ;;  %v996_v45 = vld [vmem:[%s2270_s0 + $0x940] sm:$0xff] }
  0x38   :  { %v670_v38 = vmax.f32 %v589_v27, %v1034_v12  ;;  %v429_v39 = vmax.f32 %v348_v30, %v916_v19  ;;  %v188_v40 = vmax.f32 %v107_v32, %v798_v26  ;;  %v799_v43 = vld [vmem:[%s2270_s0 + $0x318] sm:$0xff]  ;;  %v1036_v46 = vld [vmem:[%s2270_s0 + $0xa80] sm:$0xff]  ;;  %v349_v47 = vmax.f32 %v268_v35, %v877_v31  ;;  %v878_v48 = vld [vmem:[%s2270_s0 + $0x590] sm:$0xff] }
  0x39   :  { %v590_v44 = vmax.f32 %v509_v33, %v995_v28  ;;  %v108_v49 = vmax.f32 %v27_v41, %v759_v42  ;;  %v957_v51 = vld [vmem:[%s2270_s0 + $0x808] sm:$0xff]  ;;  %v918_v53 = vld [vmem:[%s2270_s0 + $0x6d0] sm:$0xff]  ;;  %v839_v54 = vld [vmem:[%s2270_s0 + $0x458] sm:$0xff] }
  0x3a   :  { %710 = vst [vmem:[%s2271_s1 + $0x70] sm:$0xff] %v670_v38  ;;  %v510_v50 = vmax.f32 %v429_v39, %v956_v34  ;;  %v269_v52 = vmax.f32 %v188_v40, %v838_v37  ;;  %v430_v56 = vmax.f32 %v349_v47, %v917_v36  ;;  %v28_v58 = vld [vmem:[%s2270_s0 + $0xa0] sm:$0xff]  ;;  %v997_v62 = vld [vmem:[%s2270_s0 + $0x948] sm:$0xff]  ;;  %v879_v1 = vld [vmem:[%s2270_s0 + $0x598] sm:$0xff] }
  0x3b   :  { %v671_v55 = vmax.f32 %v590_v44, %v1035_v29  ;;  %v189_v57 = vmax.f32 %v108_v49, %v799_v43  ;;  %v760_v59 = vld [vmem:[%s2270_s0 + $0x1e0] sm:$0xff]  ;;  %v1037_v63 = vld [vmem:[%s2270_s0 + $0xa88] sm:$0xff]  ;;  %v958_v4 = vld [vmem:[%s2270_s0 + $0x810] sm:$0xff] }
  0x3c   :  { %v800_v60 = vld [vmem:[%s2270_s0 + $0x320] sm:$0xff]  ;;  %v591_v61 = vmax.f32 %v510_v50, %v996_v45  ;;  %v350_v0 = vmax.f32 %v269_v52, %v878_v48  ;;  %v109_v2 = vmax.f32 %v28_v58, %v760_v59  ;;  %v511_v3 = vmax.f32 %v430_v56, %v957_v51  ;;  %v919_v6 = vld [vmem:[%s2270_s0 + $0x6d8] sm:$0xff]  ;;  %v29_v11 = vld [vmem:[%s2270_s0 + $0xa8] sm:$0xff] }
  0x3d   :  { %711 = vst [vmem:[%s2271_s1 + $0x78] sm:$0xff] %v671_v55  ;;  %v270_v5 = vmax.f32 %v189_v57, %v839_v54  ;;  %v840_v7 = vld [vmem:[%s2270_s0 + $0x460] sm:$0xff]  ;;  %v761_v12 = vld [vmem:[%s2270_s0 + $0x1e8] sm:$0xff]  ;;  %v998_v15 = vld [vmem:[%s2270_s0 + $0x950] sm:$0xff] }
  0x3e   :  { %v672_v8 = vmax.f32 %v591_v61, %v1036_v46  ;;  %v431_v9 = vmax.f32 %v350_v0, %v918_v53  ;;  %v190_v10 = vmax.f32 %v109_v2, %v800_v60  ;;  %v801_v13 = vld [vmem:[%s2270_s0 + $0x328] sm:$0xff]  ;;  %v592_v14 = vmax.f32 %v511_v3, %v997_v62  ;;  %v1038_v16 = vld [vmem:[%s2270_s0 + $0xa90] sm:$0xff]  ;;  %v880_v18 = vld [vmem:[%s2270_s0 + $0x5a0] sm:$0xff] }
  0x3f   :  { %v351_v17 = vmax.f32 %v270_v5, %v879_v1  ;;  %v110_v19 = vmax.f32 %v29_v11, %v761_v12  ;;  %v959_v21 = vld [vmem:[%s2270_s0 + $0x818] sm:$0xff]  ;;  %v920_v23 = vld [vmem:[%s2270_s0 + $0x6e0] sm:$0xff]  ;;  %v841_v24 = vld [vmem:[%s2270_s0 + $0x468] sm:$0xff] }
  0x40   :  { %712 = vst [vmem:[%s2271_s1 + $0x80] sm:$0xff] %v672_v8  ;;  %v512_v20 = vmax.f32 %v431_v9, %v958_v4  ;;  %v271_v22 = vmax.f32 %v190_v10, %v840_v7  ;;  %v673_v25 = vmax.f32 %v592_v14, %v1037_v63  ;;  %v30_v28 = vld [vmem:[%s2270_s0 + $0xb0] sm:$0xff]  ;;  %v999_v32 = vld [vmem:[%s2270_s0 + $0x958] sm:$0xff]  ;;  %v881_v35 = vld [vmem:[%s2270_s0 + $0x5a8] sm:$0xff] }
  0x41   :  { %v432_v26 = vmax.f32 %v351_v17, %v919_v6  ;;  %v191_v27 = vmax.f32 %v110_v19, %v801_v13  ;;  %v762_v29 = vld [vmem:[%s2270_s0 + $0x1f0] sm:$0xff]  ;;  %v1039_v33 = vld [vmem:[%s2270_s0 + $0xa98] sm:$0xff]  ;;  %v960_v38 = vld [vmem:[%s2270_s0 + $0x820] sm:$0xff] }
  0x42   :  { %v802_v30 = vld [vmem:[%s2270_s0 + $0x330] sm:$0xff]  ;;  %v593_v31 = vmax.f32 %v512_v20, %v998_v15  ;;  %v352_v34 = vmax.f32 %v271_v22, %v880_v18  ;;  %v111_v36 = vmax.f32 %v30_v28, %v762_v29  ;;  %713 = vst [vmem:[%s2271_s1 + $0x88] sm:$0xff] %v673_v25  ;;  %v921_v40 = vld [vmem:[%s2270_s0 + $0x6e8] sm:$0xff]  ;;  %v31_v45 = vld [vmem:[%s2270_s0 + $0xb8] sm:$0xff] }
  0x43   :  { %v513_v37 = vmax.f32 %v432_v26, %v959_v21  ;;  %v272_v39 = vmax.f32 %v191_v27, %v841_v24  ;;  %v842_v41 = vld [vmem:[%s2270_s0 + $0x470] sm:$0xff]  ;;  %v763_v46 = vld [vmem:[%s2270_s0 + $0x1f8] sm:$0xff]  ;;  %v1000_v49 = vld [vmem:[%s2270_s0 + $0x960] sm:$0xff] }
  0x44   :  { %v674_v42 = vmax.f32 %v593_v31, %v1038_v16  ;;  %v433_v43 = vmax.f32 %v352_v34, %v920_v23  ;;  %v192_v44 = vmax.f32 %v111_v36, %v802_v30  ;;  %v803_v47 = vld [vmem:[%s2270_s0 + $0x338] sm:$0xff]  ;;  %v1040_v50 = vld [vmem:[%s2270_s0 + $0xaa0] sm:$0xff]  ;;  %v882_v52 = vld [vmem:[%s2270_s0 + $0x5b0] sm:$0xff]  ;;  %v112_v53 = vmax.f32 %v31_v45, %v763_v46 }
  0x45   :  { %v594_v48 = vmax.f32 %v513_v37, %v999_v32  ;;  %v353_v51 = vmax.f32 %v272_v39, %v881_v35  ;;  %v961_v55 = vld [vmem:[%s2270_s0 + $0x828] sm:$0xff]  ;;  %v922_v57 = vld [vmem:[%s2270_s0 + $0x6f0] sm:$0xff]  ;;  %v843_v58 = vld [vmem:[%s2270_s0 + $0x478] sm:$0xff] }
  0x46   :  { %714 = vst [vmem:[%s2271_s1 + $0x90] sm:$0xff] %v674_v42  ;;  %v514_v54 = vmax.f32 %v433_v43, %v960_v38  ;;  %v273_v56 = vmax.f32 %v192_v44, %v842_v41  ;;  %v193_v61 = vmax.f32 %v112_v53, %v803_v47  ;;  %v32_v62 = vld [vmem:[%s2270_s0 + $0xc0] sm:$0xff]  ;;  %v1001_v2 = vld [vmem:[%s2270_s0 + $0x968] sm:$0xff]  ;;  %v883_v5 = vld [vmem:[%s2270_s0 + $0x5b8] sm:$0xff] }
  0x47   :  { %v675_v59 = vmax.f32 %v594_v48, %v1039_v33  ;;  %v434_v60 = vmax.f32 %v353_v51, %v921_v40  ;;  %v764_v63 = vld [vmem:[%s2270_s0 + $0x200] sm:$0xff]  ;;  %v1041_v3 = vld [vmem:[%s2270_s0 + $0xaa8] sm:$0xff]  ;;  %v962_v8 = vld [vmem:[%s2270_s0 + $0x830] sm:$0xff] }
  0x48   :  { %v804_v0 = vld [vmem:[%s2270_s0 + $0x340] sm:$0xff]  ;;  %v595_v1 = vmax.f32 %v514_v54, %v1000_v49  ;;  %v354_v4 = vmax.f32 %v273_v56, %v882_v52  ;;  %v113_v6 = vmax.f32 %v32_v62, %v764_v63  ;;  %v274_v9 = vmax.f32 %v193_v61, %v843_v58  ;;  %v923_v10 = vld [vmem:[%s2270_s0 + $0x6f8] sm:$0xff]  ;;  %v33_v15 = vld [vmem:[%s2270_s0 + $0xc8] sm:$0xff] }
  0x49   :  { %715 = vst [vmem:[%s2271_s1 + $0x98] sm:$0xff] %v675_v59  ;;  %v515_v7 = vmax.f32 %v434_v60, %v961_v55  ;;  %v844_v11 = vld [vmem:[%s2270_s0 + $0x480] sm:$0xff]  ;;  %v765_v16 = vld [vmem:[%s2270_s0 + $0x208] sm:$0xff]  ;;  %v1002_v19 = vld [vmem:[%s2270_s0 + $0x970] sm:$0xff] }
  0x4a   :  { %v676_v12 = vmax.f32 %v595_v1, %v1040_v50  ;;  %v435_v13 = vmax.f32 %v354_v4, %v922_v57  ;;  %v194_v14 = vmax.f32 %v113_v6, %v804_v0  ;;  %v805_v17 = vld [vmem:[%s2270_s0 + $0x348] sm:$0xff]  ;;  %v1042_v20 = vld [vmem:[%s2270_s0 + $0xab0] sm:$0xff]  ;;  %v355_v21 = vmax.f32 %v274_v9, %v883_v5  ;;  %v884_v22 = vld [vmem:[%s2270_s0 + $0x5c0] sm:$0xff] }
  0x4b   :  { %v596_v18 = vmax.f32 %v515_v7, %v1001_v2  ;;  %v114_v23 = vmax.f32 %v33_v15, %v765_v16  ;;  %v963_v25 = vld [vmem:[%s2270_s0 + $0x838] sm:$0xff]  ;;  %v924_v27 = vld [vmem:[%s2270_s0 + $0x700] sm:$0xff]  ;;  %v845_v28 = vld [vmem:[%s2270_s0 + $0x488] sm:$0xff] }
  0x4c   :  { %716 = vst [vmem:[%s2271_s1 + $0xa0] sm:$0xff] %v676_v12  ;;  %v516_v24 = vmax.f32 %v435_v13, %v962_v8  ;;  %v275_v26 = vmax.f32 %v194_v14, %v844_v11  ;;  %v436_v30 = vmax.f32 %v355_v21, %v923_v10  ;;  %v34_v32 = vld [vmem:[%s2270_s0 + $0xd0] sm:$0xff]  ;;  %v1003_v36 = vld [vmem:[%s2270_s0 + $0x978] sm:$0xff]  ;;  %v885_v39 = vld [vmem:[%s2270_s0 + $0x5c8] sm:$0xff] }
  0x4d   :  { %v677_v29 = vmax.f32 %v596_v18, %v1041_v3  ;;  %v195_v31 = vmax.f32 %v114_v23, %v805_v17  ;;  %v766_v33 = vld [vmem:[%s2270_s0 + $0x210] sm:$0xff]  ;;  %v1043_v37 = vld [vmem:[%s2270_s0 + $0xab8] sm:$0xff]  ;;  %v964_v42 = vld [vmem:[%s2270_s0 + $0x840] sm:$0xff] }
  0x4e   :  { %v806_v34 = vld [vmem:[%s2270_s0 + $0x350] sm:$0xff]  ;;  %v597_v35 = vmax.f32 %v516_v24, %v1002_v19  ;;  %v356_v38 = vmax.f32 %v275_v26, %v884_v22  ;;  %v115_v40 = vmax.f32 %v34_v32, %v766_v33  ;;  %v517_v41 = vmax.f32 %v436_v30, %v963_v25  ;;  %v925_v44 = vld [vmem:[%s2270_s0 + $0x708] sm:$0xff]  ;;  %v35_v49 = vld [vmem:[%s2270_s0 + $0xd8] sm:$0xff] }
  0x4f   :  { %717 = vst [vmem:[%s2271_s1 + $0xa8] sm:$0xff] %v677_v29  ;;  %v276_v43 = vmax.f32 %v195_v31, %v845_v28  ;;  %v846_v45 = vld [vmem:[%s2270_s0 + $0x490] sm:$0xff]  ;;  %v767_v50 = vld [vmem:[%s2270_s0 + $0x218] sm:$0xff]  ;;  %v1004_v53 = vld [vmem:[%s2270_s0 + $0x980] sm:$0xff] }
  0x50   :  { %v678_v46 = vmax.f32 %v597_v35, %v1042_v20  ;;  %v437_v47 = vmax.f32 %v356_v38, %v924_v27  ;;  %v196_v48 = vmax.f32 %v115_v40, %v806_v34  ;;  %v807_v51 = vld [vmem:[%s2270_s0 + $0x358] sm:$0xff]  ;;  %v598_v52 = vmax.f32 %v517_v41, %v1003_v36  ;;  %v1044_v54 = vld [vmem:[%s2270_s0 + $0xac0] sm:$0xff]  ;;  %v886_v56 = vld [vmem:[%s2270_s0 + $0x5d0] sm:$0xff] }
  0x51   :  { %v357_v55 = vmax.f32 %v276_v43, %v885_v39  ;;  %v116_v57 = vmax.f32 %v35_v49, %v767_v50  ;;  %v965_v59 = vld [vmem:[%s2270_s0 + $0x848] sm:$0xff]  ;;  %v926_v61 = vld [vmem:[%s2270_s0 + $0x710] sm:$0xff]  ;;  %v847_v62 = vld [vmem:[%s2270_s0 + $0x498] sm:$0xff] }
  0x52   :  { %718 = vst [vmem:[%s2271_s1 + $0xb0] sm:$0xff] %v678_v46  ;;  %v518_v58 = vmax.f32 %v437_v47, %v964_v42  ;;  %v277_v60 = vmax.f32 %v196_v48, %v846_v45  ;;  %v679_v63 = vmax.f32 %v598_v52, %v1043_v37  ;;  %v36_v2 = vld [vmem:[%s2270_s0 + $0xe0] sm:$0xff]  ;;  %v1005_v6 = vld [vmem:[%s2270_s0 + $0x988] sm:$0xff]  ;;  %v887_v9 = vld [vmem:[%s2270_s0 + $0x5d8] sm:$0xff] }
  0x53   :  { %v438_v0 = vmax.f32 %v357_v55, %v925_v44  ;;  %v197_v1 = vmax.f32 %v116_v57, %v807_v51  ;;  %v768_v3 = vld [vmem:[%s2270_s0 + $0x220] sm:$0xff]  ;;  %v1045_v7 = vld [vmem:[%s2270_s0 + $0xac8] sm:$0xff]  ;;  %v966_v12 = vld [vmem:[%s2270_s0 + $0x850] sm:$0xff] }
  0x54   :  { %v808_v4 = vld [vmem:[%s2270_s0 + $0x360] sm:$0xff]  ;;  %v599_v5 = vmax.f32 %v518_v58, %v1004_v53  ;;  %v358_v8 = vmax.f32 %v277_v60, %v886_v56  ;;  %v117_v10 = vmax.f32 %v36_v2, %v768_v3  ;;  %719 = vst [vmem:[%s2271_s1 + $0xb8] sm:$0xff] %v679_v63  ;;  %v927_v14 = vld [vmem:[%s2270_s0 + $0x718] sm:$0xff]  ;;  %v37_v19 = vld [vmem:[%s2270_s0 + $0xe8] sm:$0xff] }
  0x55   :  { %v519_v11 = vmax.f32 %v438_v0, %v965_v59  ;;  %v278_v13 = vmax.f32 %v197_v1, %v847_v62  ;;  %v848_v15 = vld [vmem:[%s2270_s0 + $0x4a0] sm:$0xff]  ;;  %v769_v20 = vld [vmem:[%s2270_s0 + $0x228] sm:$0xff]  ;;  %v1006_v23 = vld [vmem:[%s2270_s0 + $0x990] sm:$0xff] }
  0x56   :  { %v680_v16 = vmax.f32 %v599_v5, %v1044_v54  ;;  %v439_v17 = vmax.f32 %v358_v8, %v926_v61  ;;  %v198_v18 = vmax.f32 %v117_v10, %v808_v4  ;;  %v809_v21 = vld [vmem:[%s2270_s0 + $0x368] sm:$0xff]  ;;  %v1046_v24 = vld [vmem:[%s2270_s0 + $0xad0] sm:$0xff]  ;;  %v888_v26 = vld [vmem:[%s2270_s0 + $0x5e0] sm:$0xff]  ;;  %v118_v27 = vmax.f32 %v37_v19, %v769_v20 }
  0x57   :  { %v600_v22 = vmax.f32 %v519_v11, %v1005_v6  ;;  %v359_v25 = vmax.f32 %v278_v13, %v887_v9  ;;  %v967_v29 = vld [vmem:[%s2270_s0 + $0x858] sm:$0xff]  ;;  %v928_v31 = vld [vmem:[%s2270_s0 + $0x720] sm:$0xff]  ;;  %v849_v32 = vld [vmem:[%s2270_s0 + $0x4a8] sm:$0xff] }
  0x58   :  { %720 = vst [vmem:[%s2271_s1 + $0xc0] sm:$0xff] %v680_v16  ;;  %v520_v28 = vmax.f32 %v439_v17, %v966_v12  ;;  %v279_v30 = vmax.f32 %v198_v18, %v848_v15  ;;  %v199_v35 = vmax.f32 %v118_v27, %v809_v21  ;;  %v38_v36 = vld [vmem:[%s2270_s0 + $0xf0] sm:$0xff]  ;;  %v1007_v40 = vld [vmem:[%s2270_s0 + $0x998] sm:$0xff]  ;;  %v889_v43 = vld [vmem:[%s2270_s0 + $0x5e8] sm:$0xff] }
  0x59   :  { %v681_v33 = vmax.f32 %v600_v22, %v1045_v7  ;;  %v440_v34 = vmax.f32 %v359_v25, %v927_v14  ;;  %v770_v37 = vld [vmem:[%s2270_s0 + $0x230] sm:$0xff]  ;;  %v1047_v41 = vld [vmem:[%s2270_s0 + $0xad8] sm:$0xff]  ;;  %v968_v46 = vld [vmem:[%s2270_s0 + $0x860] sm:$0xff] }
  0x5a   :  { %v810_v38 = vld [vmem:[%s2270_s0 + $0x370] sm:$0xff]  ;;  %v601_v39 = vmax.f32 %v520_v28, %v1006_v23  ;;  %v360_v42 = vmax.f32 %v279_v30, %v888_v26  ;;  %v119_v44 = vmax.f32 %v38_v36, %v770_v37  ;;  %v280_v47 = vmax.f32 %v199_v35, %v849_v32  ;;  %v929_v48 = vld [vmem:[%s2270_s0 + $0x728] sm:$0xff]  ;;  %v39_v53 = vld [vmem:[%s2270_s0 + $0xf8] sm:$0xff] }
  0x5b   :  { %721 = vst [vmem:[%s2271_s1 + $0xc8] sm:$0xff] %v681_v33  ;;  %v521_v45 = vmax.f32 %v440_v34, %v967_v29  ;;  %v850_v49 = vld [vmem:[%s2270_s0 + $0x4b0] sm:$0xff]  ;;  %v771_v54 = vld [vmem:[%s2270_s0 + $0x238] sm:$0xff]  ;;  %v1008_v57 = vld [vmem:[%s2270_s0 + $0x9a0] sm:$0xff] }
  0x5c   :  { %v682_v50 = vmax.f32 %v601_v39, %v1046_v24  ;;  %v441_v51 = vmax.f32 %v360_v42, %v928_v31  ;;  %v200_v52 = vmax.f32 %v119_v44, %v810_v38  ;;  %v811_v55 = vld [vmem:[%s2270_s0 + $0x378] sm:$0xff]  ;;  %v1048_v58 = vld [vmem:[%s2270_s0 + $0xae0] sm:$0xff]  ;;  %v361_v59 = vmax.f32 %v280_v47, %v889_v43  ;;  %v890_v60 = vld [vmem:[%s2270_s0 + $0x5f0] sm:$0xff] }
  0x5d   :  { %v602_v56 = vmax.f32 %v521_v45, %v1007_v40  ;;  %v120_v61 = vmax.f32 %v39_v53, %v771_v54  ;;  %v969_v63 = vld [vmem:[%s2270_s0 + $0x868] sm:$0xff]  ;;  %v930_v1 = vld [vmem:[%s2270_s0 + $0x730] sm:$0xff]  ;;  %v851_v2 = vld [vmem:[%s2270_s0 + $0x4b8] sm:$0xff] }
  0x5e   :  { %722 = vst [vmem:[%s2271_s1 + $0xd0] sm:$0xff] %v682_v50  ;;  %v522_v62 = vmax.f32 %v441_v51, %v968_v46  ;;  %v281_v0 = vmax.f32 %v200_v52, %v850_v49  ;;  %v442_v4 = vmax.f32 %v361_v59, %v929_v48  ;;  %v40_v6 = vld [vmem:[%s2270_s0 + $0x100] sm:$0xff]  ;;  %v1009_v10 = vld [vmem:[%s2270_s0 + $0x9a8] sm:$0xff]  ;;  %v891_v13 = vld [vmem:[%s2270_s0 + $0x5f8] sm:$0xff] }
  0x5f   :  { %v683_v3 = vmax.f32 %v602_v56, %v1047_v41  ;;  %v201_v5 = vmax.f32 %v120_v61, %v811_v55  ;;  %v772_v7 = vld [vmem:[%s2270_s0 + $0x240] sm:$0xff]  ;;  %v1049_v11 = vld [vmem:[%s2270_s0 + $0xae8] sm:$0xff]  ;;  %v970_v16 = vld [vmem:[%s2270_s0 + $0x870] sm:$0xff] }
  0x60   :  { %v812_v8 = vld [vmem:[%s2270_s0 + $0x380] sm:$0xff]  ;;  %v603_v9 = vmax.f32 %v522_v62, %v1008_v57  ;;  %v362_v12 = vmax.f32 %v281_v0, %v890_v60  ;;  %v121_v14 = vmax.f32 %v40_v6, %v772_v7  ;;  %v523_v15 = vmax.f32 %v442_v4, %v969_v63  ;;  %v931_v18 = vld [vmem:[%s2270_s0 + $0x738] sm:$0xff]  ;;  %v41_v23 = vld [vmem:[%s2270_s0 + $0x108] sm:$0xff] }
  0x61   :  { %723 = vst [vmem:[%s2271_s1 + $0xd8] sm:$0xff] %v683_v3  ;;  %v282_v17 = vmax.f32 %v201_v5, %v851_v2  ;;  %v852_v19 = vld [vmem:[%s2270_s0 + $0x4c0] sm:$0xff]  ;;  %v773_v24 = vld [vmem:[%s2270_s0 + $0x248] sm:$0xff]  ;;  %v1010_v27 = vld [vmem:[%s2270_s0 + $0x9b0] sm:$0xff] }
  0x62   :  { %v684_v20 = vmax.f32 %v603_v9, %v1048_v58  ;;  %v443_v21 = vmax.f32 %v362_v12, %v930_v1  ;;  %v202_v22 = vmax.f32 %v121_v14, %v812_v8  ;;  %v813_v25 = vld [vmem:[%s2270_s0 + $0x388] sm:$0xff]  ;;  %v604_v26 = vmax.f32 %v523_v15, %v1009_v10  ;;  %v1050_v28 = vld [vmem:[%s2270_s0 + $0xaf0] sm:$0xff]  ;;  %v892_v30 = vld [vmem:[%s2270_s0 + $0x600] sm:$0xff] }
  0x63   :  { %v363_v29 = vmax.f32 %v282_v17, %v891_v13  ;;  %v122_v31 = vmax.f32 %v41_v23, %v773_v24  ;;  %v971_v33 = vld [vmem:[%s2270_s0 + $0x878] sm:$0xff]  ;;  %v932_v35 = vld [vmem:[%s2270_s0 + $0x740] sm:$0xff]  ;;  %v853_v36 = vld [vmem:[%s2270_s0 + $0x4c8] sm:$0xff] }
  0x64   :  { %724 = vst [vmem:[%s2271_s1 + $0xe0] sm:$0xff] %v684_v20  ;;  %v524_v32 = vmax.f32 %v443_v21, %v970_v16  ;;  %v283_v34 = vmax.f32 %v202_v22, %v852_v19  ;;  %v685_v37 = vmax.f32 %v604_v26, %v1049_v11  ;;  %v42_v40 = vld [vmem:[%s2270_s0 + $0x110] sm:$0xff]  ;;  %v1011_v44 = vld [vmem:[%s2270_s0 + $0x9b8] sm:$0xff]  ;;  %v893_v47 = vld [vmem:[%s2270_s0 + $0x608] sm:$0xff] }
  0x65   :  { %v444_v38 = vmax.f32 %v363_v29, %v931_v18  ;;  %v203_v39 = vmax.f32 %v122_v31, %v813_v25  ;;  %v774_v41 = vld [vmem:[%s2270_s0 + $0x250] sm:$0xff]  ;;  %v1051_v45 = vld [vmem:[%s2270_s0 + $0xaf8] sm:$0xff]  ;;  %v972_v50 = vld [vmem:[%s2270_s0 + $0x880] sm:$0xff] }
  0x66   :  { %v814_v42 = vld [vmem:[%s2270_s0 + $0x390] sm:$0xff]  ;;  %v605_v43 = vmax.f32 %v524_v32, %v1010_v27  ;;  %v364_v46 = vmax.f32 %v283_v34, %v892_v30  ;;  %v123_v48 = vmax.f32 %v42_v40, %v774_v41  ;;  %725 = vst [vmem:[%s2271_s1 + $0xe8] sm:$0xff] %v685_v37  ;;  %v933_v52 = vld [vmem:[%s2270_s0 + $0x748] sm:$0xff]  ;;  %v43_v57 = vld [vmem:[%s2270_s0 + $0x118] sm:$0xff] }
  0x67   :  { %v525_v49 = vmax.f32 %v444_v38, %v971_v33  ;;  %v284_v51 = vmax.f32 %v203_v39, %v853_v36  ;;  %v854_v53 = vld [vmem:[%s2270_s0 + $0x4d0] sm:$0xff]  ;;  %v775_v58 = vld [vmem:[%s2270_s0 + $0x258] sm:$0xff]  ;;  %v1012_v61 = vld [vmem:[%s2270_s0 + $0x9c0] sm:$0xff] }
  0x68   :  { %v686_v54 = vmax.f32 %v605_v43, %v1050_v28  ;;  %v445_v55 = vmax.f32 %v364_v46, %v932_v35  ;;  %v204_v56 = vmax.f32 %v123_v48, %v814_v42  ;;  %v815_v59 = vld [vmem:[%s2270_s0 + $0x398] sm:$0xff]  ;;  %v1052_v62 = vld [vmem:[%s2270_s0 + $0xb00] sm:$0xff]  ;;  %v894_v0 = vld [vmem:[%s2270_s0 + $0x610] sm:$0xff]  ;;  %v124_v1 = vmax.f32 %v43_v57, %v775_v58 }
  0x69   :  { %v606_v60 = vmax.f32 %v525_v49, %v1011_v44  ;;  %v365_v63 = vmax.f32 %v284_v51, %v893_v47  ;;  %v973_v3 = vld [vmem:[%s2270_s0 + $0x888] sm:$0xff]  ;;  %v934_v5 = vld [vmem:[%s2270_s0 + $0x750] sm:$0xff]  ;;  %v855_v6 = vld [vmem:[%s2270_s0 + $0x4d8] sm:$0xff] }
  0x6a   :  { %726 = vst [vmem:[%s2271_s1 + $0xf0] sm:$0xff] %v686_v54  ;;  %v526_v2 = vmax.f32 %v445_v55, %v972_v50  ;;  %v285_v4 = vmax.f32 %v204_v56, %v854_v53  ;;  %v205_v9 = vmax.f32 %v124_v1, %v815_v59  ;;  %v44_v10 = vld [vmem:[%s2270_s0 + $0x120] sm:$0xff]  ;;  %v1013_v14 = vld [vmem:[%s2270_s0 + $0x9c8] sm:$0xff]  ;;  %v895_v17 = vld [vmem:[%s2270_s0 + $0x618] sm:$0xff] }
  0x6b   :  { %v687_v7 = vmax.f32 %v606_v60, %v1051_v45  ;;  %v446_v8 = vmax.f32 %v365_v63, %v933_v52  ;;  %v776_v11 = vld [vmem:[%s2270_s0 + $0x260] sm:$0xff]  ;;  %v1053_v15 = vld [vmem:[%s2270_s0 + $0xb08] sm:$0xff]  ;;  %v974_v20 = vld [vmem:[%s2270_s0 + $0x890] sm:$0xff] }
  0x6c   :  { %v816_v12 = vld [vmem:[%s2270_s0 + $0x3a0] sm:$0xff]  ;;  %v607_v13 = vmax.f32 %v526_v2, %v1012_v61  ;;  %v366_v16 = vmax.f32 %v285_v4, %v894_v0  ;;  %v125_v18 = vmax.f32 %v44_v10, %v776_v11  ;;  %v286_v21 = vmax.f32 %v205_v9, %v855_v6  ;;  %v935_v22 = vld [vmem:[%s2270_s0 + $0x758] sm:$0xff]  ;;  %v45_v27 = vld [vmem:[%s2270_s0 + $0x128] sm:$0xff] }
  0x6d   :  { %727 = vst [vmem:[%s2271_s1 + $0xf8] sm:$0xff] %v687_v7  ;;  %v527_v19 = vmax.f32 %v446_v8, %v973_v3  ;;  %v856_v23 = vld [vmem:[%s2270_s0 + $0x4e0] sm:$0xff]  ;;  %v777_v28 = vld [vmem:[%s2270_s0 + $0x268] sm:$0xff]  ;;  %v1014_v31 = vld [vmem:[%s2270_s0 + $0x9d0] sm:$0xff] }
  0x6e   :  { %v688_v24 = vmax.f32 %v607_v13, %v1052_v62  ;;  %v447_v25 = vmax.f32 %v366_v16, %v934_v5  ;;  %v206_v26 = vmax.f32 %v125_v18, %v816_v12  ;;  %v817_v29 = vld [vmem:[%s2270_s0 + $0x3a8] sm:$0xff]  ;;  %v1054_v32 = vld [vmem:[%s2270_s0 + $0xb10] sm:$0xff]  ;;  %v367_v33 = vmax.f32 %v286_v21, %v895_v17  ;;  %v896_v34 = vld [vmem:[%s2270_s0 + $0x620] sm:$0xff] }
  0x6f   :  { %v608_v30 = vmax.f32 %v527_v19, %v1013_v14  ;;  %v126_v35 = vmax.f32 %v45_v27, %v777_v28  ;;  %v975_v37 = vld [vmem:[%s2270_s0 + $0x898] sm:$0xff]  ;;  %v936_v39 = vld [vmem:[%s2270_s0 + $0x760] sm:$0xff]  ;;  %v857_v40 = vld [vmem:[%s2270_s0 + $0x4e8] sm:$0xff] }
  0x70   :  { %728 = vst [vmem:[%s2271_s1 + $0x100] sm:$0xff] %v688_v24  ;;  %v528_v36 = vmax.f32 %v447_v25, %v974_v20  ;;  %v287_v38 = vmax.f32 %v206_v26, %v856_v23  ;;  %v448_v42 = vmax.f32 %v367_v33, %v935_v22  ;;  %v46_v44 = vld [vmem:[%s2270_s0 + $0x130] sm:$0xff]  ;;  %v1015_v48 = vld [vmem:[%s2270_s0 + $0x9d8] sm:$0xff]  ;;  %v897_v51 = vld [vmem:[%s2270_s0 + $0x628] sm:$0xff] }
  0x71   :  { %v689_v41 = vmax.f32 %v608_v30, %v1053_v15  ;;  %v207_v43 = vmax.f32 %v126_v35, %v817_v29  ;;  %v778_v45 = vld [vmem:[%s2270_s0 + $0x270] sm:$0xff]  ;;  %v1055_v49 = vld [vmem:[%s2270_s0 + $0xb18] sm:$0xff]  ;;  %v976_v54 = vld [vmem:[%s2270_s0 + $0x8a0] sm:$0xff] }
  0x72   :  { %v818_v46 = vld [vmem:[%s2270_s0 + $0x3b0] sm:$0xff]  ;;  %v609_v47 = vmax.f32 %v528_v36, %v1014_v31  ;;  %v368_v50 = vmax.f32 %v287_v38, %v896_v34  ;;  %v127_v52 = vmax.f32 %v46_v44, %v778_v45  ;;  %v529_v53 = vmax.f32 %v448_v42, %v975_v37  ;;  %v937_v56 = vld [vmem:[%s2270_s0 + $0x768] sm:$0xff]  ;;  %v47_v61 = vld [vmem:[%s2270_s0 + $0x138] sm:$0xff] }
  0x73   :  { %729 = vst [vmem:[%s2271_s1 + $0x108] sm:$0xff] %v689_v41  ;;  %v288_v55 = vmax.f32 %v207_v43, %v857_v40  ;;  %v858_v57 = vld [vmem:[%s2270_s0 + $0x4f0] sm:$0xff]  ;;  %v779_v62 = vld [vmem:[%s2270_s0 + $0x278] sm:$0xff]  ;;  %v1016_v1 = vld [vmem:[%s2270_s0 + $0x9e0] sm:$0xff] }
  0x74   :  { %v690_v58 = vmax.f32 %v609_v47, %v1054_v32  ;;  %v449_v59 = vmax.f32 %v368_v50, %v936_v39  ;;  %v208_v60 = vmax.f32 %v127_v52, %v818_v46  ;;  %v819_v63 = vld [vmem:[%s2270_s0 + $0x3b8] sm:$0xff]  ;;  %v610_v0 = vmax.f32 %v529_v53, %v1015_v48  ;;  %v898_v3 = vld [vmem:[%s2270_s0 + $0x630] sm:$0xff]  ;;  %v977_v6 = vld [vmem:[%s2270_s0 + $0x8a8] sm:$0xff] }
  0x75   :  { %v369_v2 = vmax.f32 %v288_v55, %v897_v51  ;;  %v128_v4 = vmax.f32 %v47_v61, %v779_v62  ;;  %v859_v8 = vld [vmem:[%s2270_s0 + $0x4f8] sm:$0xff]  ;;  %v1056_v10 = vld [vmem:[%s2270_s0 + $0xb20] sm:$0xff]  ;;  %v938_v12 = vld [vmem:[%s2270_s0 + $0x770] sm:$0xff] }
  0x76   :  { %730 = vst [vmem:[%s2271_s1 + $0x110] sm:$0xff] %v690_v58  ;;  %v530_v5 = vmax.f32 %v449_v59, %v976_v54  ;;  %v289_v7 = vmax.f32 %v208_v60, %v858_v57  ;;  %v691_v9 = vmax.f32 %v610_v0, %v1055_v49  ;;  %v1017_v15 = vld [vmem:[%s2270_s0 + $0x9e8] sm:$0xff]  ;;  %v899_v17 = vld [vmem:[%s2270_s0 + $0x638] sm:$0xff]  ;;  %v978_v19 = vld [vmem:[%s2270_s0 + $0x8b0] sm:$0xff] }
  0x77   :  { %v450_v11 = vmax.f32 %v369_v2, %v937_v56  ;;  %v209_v13 = vmax.f32 %v128_v4, %v819_v63  ;;  %v1057_v22 = vld [vmem:[%s2270_s0 + $0xb28] sm:$0xff]  ;;  %v939_v24 = vld [vmem:[%s2270_s0 + $0x778] sm:$0xff]  ;;  %v1018_v26 = vld [vmem:[%s2270_s0 + $0x9f0] sm:$0xff] }
  0x78   :  { %v611_v14 = vmax.f32 %v530_v5, %v1016_v1  ;;  %v370_v16 = vmax.f32 %v289_v7, %v898_v3  ;;  %731 = vst [vmem:[%s2271_s1 + $0x118] sm:$0xff] %v691_v9  ;;  %v979_v29 = vld [vmem:[%s2270_s0 + $0x8b8] sm:$0xff]  ;;  %v1058_v31 = vld [vmem:[%s2270_s0 + $0xb30] sm:$0xff] }
  0x79   :  { %v531_v18 = vmax.f32 %v450_v11, %v977_v6  ;;  %v290_v20 = vmax.f32 %v209_v13, %v859_v8  ;;  %v1019_v34 = vld [vmem:[%s2270_s0 + $0x9f8] sm:$0xff] }
  0x7a   :  { %v692_v21 = vmax.f32 %v611_v14, %v1056_v10  ;;  %v451_v23 = vmax.f32 %v370_v16, %v938_v12  ;;  %v1059_v37 = vld [vmem:[%s2270_s0 + $0xb38] sm:$0xff] }
  0x7b   :  { %v612_v25 = vmax.f32 %v531_v18, %v1017_v15  ;;  %v371_v27 = vmax.f32 %v290_v20, %v899_v17 }
  0x7c   :  { %732 = vst [vmem:[%s2271_s1 + $0x120] sm:$0xff] %v692_v21  ;;  %v532_v28 = vmax.f32 %v451_v23, %v978_v19 }
  0x7d   :  { %v693_v30 = vmax.f32 %v612_v25, %v1057_v22  ;;  %v452_v32 = vmax.f32 %v371_v27, %v939_v24 }
  0x7e   :  { %v613_v33 = vmax.f32 %v532_v28, %v1018_v26 }
  0x7f   :  { %733 = vst [vmem:[%s2271_s1 + $0x128] sm:$0xff] %v693_v30  ;;  %v533_v35 = vmax.f32 %v452_v32, %v979_v29 }
  0x80   :  { %v694_v36 = vmax.f32 %v613_v33, %v1058_v31 }
  0x81   :  { %v614_v38 = vmax.f32 %v533_v35, %v1019_v34 }
  0x82   :  { %734 = vst [vmem:[%s2271_s1 + $0x130] sm:$0xff] %v694_v36 }
  0x83   :  { %v695_v39 = vmax.f32 %v614_v38, %v1059_v37 }
  0x85   :  { %735 = vst [vmem:[%s2271_s1 + $0x138] sm:$0xff] %v695_v39 }

// kernel: hcat_forward.10
= control target key start
LH: loop header
LB: loop body
LE: loop exit
PB: predicated region body
PF: predicated region fallthrough
CT: control target
= control target key end

     0   :  { %s1851_s15 = smov 0   ;;  %s1853_s16 = smov 0   ;;  %s2539_s0 = inlined_call_operand.vmem [shape: f32[2,160,1152], index: 0, kind: input, shape index: {}]   ;;  %s2540_s1 = inlined_call_operand.vmem [shape: f32[2,1152,128], index: 1, kind: input, shape index: {}]   ;;  %s2541_s2 = inlined_call_operand.vmem [shape: f32[2,1,128], index: 2, kind: input, shape index: {}]   ;;  %s2542_s3 = inlined_call_operand.vmem [shape: f32[2,1,128], index: 3, kind: input, shape index: {}]   ;;  %s2543_s4 = inlined_call_operand.vmem [shape: f32[2,160,128], index: 4, kind: output, shape index: {}]  }
   0x1   :  { %s1855_s17 = smov 0  }
   0x2 LB: > { %s26_s18 = sadd.s32 1, %s1819_s16  ;;  %p1635_p0 = scmp.ge.s32.totalorder %s1823_s17, 1  ;;  %s1823_s17 = sphi %s1855_s17, %s14_s17   ;;  %s1819_s16 = sphi %s1853_s16, %s2545_s16   ;;  %s1815_s15 = sphi %s1851_s15, %s2544_s15  }
   0x3   : > { %p28_p1 = scmp.ge.s32.totalorder %s26_s18, 2  ;;  %p210_p2 = scmp.lt.s32.totalorder %s1823_s17, 3 }
   0x5   : > { %s2547_s18 = smov (%p28_p1, %s26_s18), 0  ;;  %p211_p3 = pnand %p1635_p0, %p210_p2 }
   0x6   : > { %p257_p4 = scmp.lt.s32.totalorder (!%p211_p3), %s1815_s15, 1 }
   0x7   : > { %214 = sbr.rel (%p211_p3) target bundleno = 484 (0x1e4), region = 36 }
   0xc   : > { %v1825_v0 = vmov 0.0   ;;  %s2549_s15 = smov (!%p257_p4, %s1815_s15), 1 }
   0xd   : > { %612 = vmatprep.subr.mxu0 %v1825_v0  ;;  %777 = vmatprep.subr.mxu1 %v1825_v0  ;;  %s1773_s19 = smul.u32 1440, %s2549_s15  ;;  %s274_s29 = scalar_lea.vmem %s2541_s2, %s2549_s15 }
   0xe   : > { %s1774_s20 = smul.u32 1152, %s2549_s15  ;;  %s277_s6 = scalar_lea.vmem %s2542_s3, %s2549_s15 }
   0xf   : > { %s1878_s23 = scalar_lea.vmem %s2539_s0, %s1773_s19  ;;  %s1775_s7 = smul.u32 160, %s2549_s15 }
  0x10   : > { %s1883_s26 = scalar_lea.vmem %s2540_s1, %s1774_s20  ;;  %v289_v1 = vld [vmem:[%s1878_s23 + $0x8] sm:$0xff]  ;;  %v291_v2 = vld [vmem:[%s1878_s23 + $0x18] sm:$0xff] }
  0x11   : > { %v483_v3 = vld [vmem:[%s1883_s26 + $0x78] sm:$0xff]  ;;  %v482_v5 = vld [vmem:[%s1883_s26 + $0x70] sm:$0xff]  ;;  %676 = vmatprep.mubr.f32.mxu0 %v289_v1  ;;  %841 = vmatprep.mubr.f32.mxu1 %v291_v2  ;;  %v481_v7 = vld [vmem:[%s1883_s26 + $0x68] sm:$0xff]  ;;  %s2449_s10 = scalar_lea.vmem %s2543_s4, %s1775_s7 }
  0x12   : > { %v515_v4 = vld [vmem:[%s1883_s26 + $0x178] sm:$0xff]  ;;  %613 = vmatpush1.msra.mxu0 %v483_v3  ;;  %v514_v6 = vld [vmem:[%s1883_s26 + $0x170] sm:$0xff]  ;;  %v513_v8 = vld [vmem:[%s1883_s26 + $0x168] sm:$0xff] }
  0x13   : > { %778 = vmatpush1.msra.mxu1 %v515_v4  ;;  %614 = vmatprep.subr.mxu0 %v1825_v0  ;;  %v480_v9 = vld [vmem:[%s1883_s26 + $0x60] sm:$0xff]  ;;  %v479_v11 = vld [vmem:[%s1883_s26 + $0x58] sm:$0xff]  ;;  %v478_v13 = vld [vmem:[%s1883_s26 + $0x50] sm:$0xff] }
  0x14   : > { %779 = vmatprep.subr.mxu1 %v1825_v0  ;;  %615 = vmatpush1.msra.mxu0 %v482_v5  ;;  %v512_v10 = vld [vmem:[%s1883_s26 + $0x160] sm:$0xff]  ;;  %v511_v12 = vld [vmem:[%s1883_s26 + $0x158] sm:$0xff]  ;;  %v510_v14 = vld [vmem:[%s1883_s26 + $0x150] sm:$0xff] }
  0x15   : > { %780 = vmatpush1.msra.mxu1 %v514_v6  ;;  %616 = vmatprep.subr.mxu0 %v1825_v0  ;;  %v477_v15 = vld [vmem:[%s1883_s26 + $0x48] sm:$0xff]  ;;  %v476_v17 = vld [vmem:[%s1883_s26 + $0x40] sm:$0xff]  ;;  %v475_v19 = vld [vmem:[%s1883_s26 + $0x38] sm:$0xff] }
  0x16   : > { %781 = vmatprep.subr.mxu1 %v1825_v0  ;;  %617 = vmatpush1.msra.mxu0 %v481_v7  ;;  %v509_v16 = vld [vmem:[%s1883_s26 + $0x148] sm:$0xff]  ;;  %v508_v18 = vld [vmem:[%s1883_s26 + $0x140] sm:$0xff]  ;;  %v507_v20 = vld [vmem:[%s1883_s26 + $0x138] sm:$0xff] }
  0x17   : > { %782 = vmatpush1.msra.mxu1 %v513_v8  ;;  %618 = vmatprep.subr.mxu0 %v1825_v0  ;;  %v474_v21 = vld [vmem:[%s1883_s26 + $0x30] sm:$0xff]  ;;  %v473_v23 = vld [vmem:[%s1883_s26 + $0x28] sm:$0xff]  ;;  %v472_v25 = vld [vmem:[%s1883_s26 + $0x20] sm:$0xff] }
  0x18   : > { %783 = vmatprep.subr.mxu1 %v1825_v0  ;;  %619 = vmatpush1.msra.mxu0 %v480_v9  ;;  %v506_v22 = vld [vmem:[%s1883_s26 + $0x130] sm:$0xff]  ;;  %v505_v24 = vld [vmem:[%s1883_s26 + $0x128] sm:$0xff]  ;;  %v504_v26 = vld [vmem:[%s1883_s26 + $0x120] sm:$0xff] }
  0x19   : > { %784 = vmatpush1.msra.mxu1 %v512_v10  ;;  %620 = vmatprep.subr.mxu0 %v1825_v0  ;;  %v471_v27 = vld [vmem:[%s1883_s26 + $0x18] sm:$0xff]  ;;  %v470_v29 = vld [vmem:[%s1883_s26 + $0x10] sm:$0xff]  ;;  %v469_v31 = vld [vmem:[%s1883_s26 + $0x8] sm:$0xff] }
  0x1a   : > { %785 = vmatprep.subr.mxu1 %v1825_v0  ;;  %621 = vmatpush1.msra.mxu0 %v479_v11  ;;  %v503_v28 = vld [vmem:[%s1883_s26 + $0x118] sm:$0xff]  ;;  %v502_v30 = vld [vmem:[%s1883_s26 + $0x110] sm:$0xff]  ;;  %v501_v32 = vld [vmem:[%s1883_s26 + $0x108] sm:$0xff] }
  0x1b   : > { %786 = vmatpush1.msra.mxu1 %v511_v12  ;;  %622 = vmatprep.subr.mxu0 %v1825_v0  ;;  %v468_v33 = vld [vmem:[%s1883_s26] sm:$0xff]  ;;  %v499_v35 = vld [vmem:[%s1883_s26 + $0xf8] sm:$0xff]  ;;  %v498_v37 = vld [vmem:[%s1883_s26 + $0xf0] sm:$0xff] }
  0x1c   : > { %787 = vmatprep.subr.mxu1 %v1825_v0  ;;  %623 = vmatpush1.msra.mxu0 %v478_v13  ;;  %v500_v34 = vld [vmem:[%s1883_s26 + $0x100] sm:$0xff]  ;;  %v531_v36 = vld [vmem:[%s1883_s26 + $0x1f8] sm:$0xff]  ;;  %v530_v38 = vld [vmem:[%s1883_s26 + $0x1f0] sm:$0xff] }
  0x1d   : > { %788 = vmatpush1.msra.mxu1 %v510_v14  ;;  %624 = vmatprep.subr.mxu0 %v1825_v0  ;;  %v497_v39 = vld [vmem:[%s1883_s26 + $0xe8] sm:$0xff]  ;;  %v496_v41 = vld [vmem:[%s1883_s26 + $0xe0] sm:$0xff]  ;;  %v495_v43 = vld [vmem:[%s1883_s26 + $0xd8] sm:$0xff] }
  0x1e   : > { %789 = vmatprep.subr.mxu1 %v1825_v0  ;;  %625 = vmatpush1.msra.mxu0 %v477_v15  ;;  %v529_v40 = vld [vmem:[%s1883_s26 + $0x1e8] sm:$0xff]  ;;  %v528_v42 = vld [vmem:[%s1883_s26 + $0x1e0] sm:$0xff]  ;;  %v527_v44 = vld [vmem:[%s1883_s26 + $0x1d8] sm:$0xff] }
  0x1f   : > { %790 = vmatpush1.msra.mxu1 %v509_v16  ;;  %626 = vmatprep.subr.mxu0 %v1825_v0  ;;  %v494_v45 = vld [vmem:[%s1883_s26 + $0xd0] sm:$0xff]  ;;  %v493_v47 = vld [vmem:[%s1883_s26 + $0xc8] sm:$0xff]  ;;  %v492_v49 = vld [vmem:[%s1883_s26 + $0xc0] sm:$0xff] }
  0x20   : > { %791 = vmatprep.subr.mxu1 %v1825_v0  ;;  %627 = vmatpush1.msra.mxu0 %v476_v17  ;;  %v526_v46 = vld [vmem:[%s1883_s26 + $0x1d0] sm:$0xff]  ;;  %v525_v48 = vld [vmem:[%s1883_s26 + $0x1c8] sm:$0xff]  ;;  %v524_v50 = vld [vmem:[%s1883_s26 + $0x1c0] sm:$0xff] }
  0x21   : > { %792 = vmatpush1.msra.mxu1 %v508_v18  ;;  %628 = vmatprep.subr.mxu0 %v1825_v0  ;;  %v491_v51 = vld [vmem:[%s1883_s26 + $0xb8] sm:$0xff]  ;;  %v490_v53 = vld [vmem:[%s1883_s26 + $0xb0] sm:$0xff]  ;;  %v489_v55 = vld [vmem:[%s1883_s26 + $0xa8] sm:$0xff] }
  0x22   : > { %793 = vmatprep.subr.mxu1 %v1825_v0  ;;  %629 = vmatpush1.msra.mxu0 %v475_v19  ;;  %v523_v52 = vld [vmem:[%s1883_s26 + $0x1b8] sm:$0xff]  ;;  %v522_v54 = vld [vmem:[%s1883_s26 + $0x1b0] sm:$0xff]  ;;  %v521_v56 = vld [vmem:[%s1883_s26 + $0x1a8] sm:$0xff] }
  0x23   : > { %794 = vmatpush1.msra.mxu1 %v507_v20  ;;  %630 = vmatprep.subr.mxu0 %v1825_v0  ;;  %v488_v57 = vld [vmem:[%s1883_s26 + $0xa0] sm:$0xff]  ;;  %v487_v59 = vld [vmem:[%s1883_s26 + $0x98] sm:$0xff]  ;;  %v486_v61 = vld [vmem:[%s1883_s26 + $0x90] sm:$0xff] }
  0x24   : > { %795 = vmatprep.subr.mxu1 %v1825_v0  ;;  %631 = vmatpush1.msra.mxu0 %v474_v21  ;;  %v520_v58 = vld [vmem:[%s1883_s26 + $0x1a0] sm:$0xff]  ;;  %v519_v60 = vld [vmem:[%s1883_s26 + $0x198] sm:$0xff]  ;;  %v518_v62 = vld [vmem:[%s1883_s26 + $0x190] sm:$0xff] }
  0x25   : > { %796 = vmatpush1.msra.mxu1 %v506_v22  ;;  %632 = vmatprep.subr.mxu0 %v1825_v0  ;;  %v485_v63 = vld [vmem:[%s1883_s26 + $0x88] sm:$0xff]  ;;  %v484_v2 = vld [vmem:[%s1883_s26 + $0x80] sm:$0xff]  ;;  %v290_v5 = vld [vmem:[%s1878_s23 + $0x10] sm:$0xff] }
  0x26   : > { %797 = vmatprep.subr.mxu1 %v1825_v0  ;;  %633 = vmatpush1.msra.mxu0 %v473_v23  ;;  %v517_v1 = vld [vmem:[%s1883_s26 + $0x188] sm:$0xff]  ;;  %v516_v3 = vld [vmem:[%s1883_s26 + $0x180] sm:$0xff]  ;;  %v547_v6 = vld [vmem:[%s1883_s26 + $0x278] sm:$0xff] }
  0x27   : > { %798 = vmatpush1.msra.mxu1 %v505_v24  ;;  %634 = vmatprep.subr.mxu0 %v1825_v0  ;;  %v288_v4 = vld [vmem:[%s1878_s23] sm:$0xff]  ;;  %v579_v7 = vld [vmem:[%s1883_s26 + $0x378] sm:$0xff]  ;;  %v298_v8 = vld [vmem:[%s1878_s23 + $0x50] sm:$0xff] }
  0x28   : > { %799 = vmatprep.subr.mxu1 %v1825_v0  ;;  %635 = vmatpush1.msra.mxu0 %v472_v25  ;;  %v300_v9 = vld [vmem:[%s1878_s23 + $0x60] sm:$0xff]  ;;  %v297_v10 = vld [vmem:[%s1878_s23 + $0x48] sm:$0xff]  ;;  %v299_v11 = vld [vmem:[%s1878_s23 + $0x58] sm:$0xff] }
  0x29   : > { %800 = vmatpush1.msra.mxu1 %v504_v26  ;;  %636 = vmatprep.subr.mxu0 %v1825_v0  ;;  %v546_v12 = vld [vmem:[%s1883_s26 + $0x270] sm:$0xff]  ;;  %v545_v14 = vld [vmem:[%s1883_s26 + $0x268] sm:$0xff]  ;;  %v307_v16 = vld [vmem:[%s1878_s23 + $0x98] sm:$0xff] }
  0x2a   : > { %801 = vmatprep.subr.mxu1 %v1825_v0  ;;  %637 = vmatpush1.msra.mxu0 %v471_v27  ;;  %v578_v13 = vld [vmem:[%s1883_s26 + $0x370] sm:$0xff]  ;;  %v577_v15 = vld [vmem:[%s1883_s26 + $0x368] sm:$0xff]  ;;  %v308_v19 = vld [vmem:[%s1878_s23 + $0xa0] sm:$0xff] }
  0x2b   : > { %802 = vmatpush1.msra.mxu1 %v503_v28  ;;  %638 = vmatprep.subr.mxu0 %v1825_v0  ;;  %v309_v17 = vld [vmem:[%s1878_s23 + $0xa8] sm:$0xff]  ;;  %v306_v18 = vld [vmem:[%s1878_s23 + $0x90] sm:$0xff]  ;;  %v544_v20 = vld [vmem:[%s1883_s26 + $0x260] sm:$0xff] }
  0x2c   : > { %803 = vmatprep.subr.mxu1 %v1825_v0  ;;  %639 = vmatpush1.msra.mxu0 %v470_v29  ;;  %v576_v21 = vld [vmem:[%s1883_s26 + $0x360] sm:$0xff]  ;;  %v318_v23 = vld [vmem:[%s1878_s23 + $0xf0] sm:$0xff]  ;;  %v543_v24 = vld [vmem:[%s1883_s26 + $0x258] sm:$0xff] }
  0x2d   : > { %804 = vmatpush1.msra.mxu1 %v502_v30  ;;  %640 = vmatprep.subr.mxu0 %v1825_v0  ;;  %v316_v22 = vld [vmem:[%s1878_s23 + $0xe0] sm:$0xff]  ;;  %v575_v25 = vld [vmem:[%s1883_s26 + $0x358] sm:$0xff]  ;;  %v317_v27 = vld [vmem:[%s1878_s23 + $0xe8] sm:$0xff] }
  0x2e   : > { %805 = vmatprep.subr.mxu1 %v1825_v0  ;;  %641 = vmatpush1.msra.mxu0 %v469_v31  ;;  %v315_v26 = vld [vmem:[%s1878_s23 + $0xd8] sm:$0xff]  ;;  %v542_v28 = vld [vmem:[%s1883_s26 + $0x250] sm:$0xff]  ;;  %v325_v30 = vld [vmem:[%s1878_s23 + $0x128] sm:$0xff] }
  0x2f   : > { %806 = vmatpush1.msra.mxu1 %v501_v32  ;;  %642 = vmatprep.subr.mxu0 %v1825_v0  ;;  %v574_v29 = vld [vmem:[%s1883_s26 + $0x350] sm:$0xff]  ;;  %v327_v31 = vld [vmem:[%s1878_s23 + $0x138] sm:$0xff]  ;;  %v324_v32 = vld [vmem:[%s1878_s23 + $0x120] sm:$0xff] }
  0x30   : > { %807 = vmatprep.subr.mxu1 %v1825_v0  ;;  %643 = vmatpush1.msra.mxu0 %v468_v33  ;;  %v326_v33 = vld [vmem:[%s1878_s23 + $0x130] sm:$0xff] }
  0x31   : > { %808 = vmatpush1.msra.mxu1 %v500_v34  ;;  %644 = vmatprep.subr.mxu0 %v1825_v0  ;;  %v541_v34 = vld [vmem:[%s1883_s26 + $0x248] sm:$0xff] }
  0x32   : > { %809 = vmatprep.subr.mxu1 %v1825_v0  ;;  %645 = vmatpush2.msra.mxu0 %v499_v35  ;;  %v573_v35 = vld [vmem:[%s1883_s26 + $0x348] sm:$0xff] }
  0x33   : > { %810 = vmatpush2.msra.mxu1 %v531_v36  ;;  %646 = vmatprep.subr.mxu0 %v1825_v0  ;;  %v334_v36 = vld [vmem:[%s1878_s23 + $0x170] sm:$0xff] }
  0x34   : > { %811 = vmatprep.subr.mxu1 %v1825_v0  ;;  %647 = vmatpush2.msra.mxu0 %v498_v37  ;;  %v336_v37 = vld [vmem:[%s1878_s23 + $0x180] sm:$0xff] }
  0x35   : > { %812 = vmatpush2.msra.mxu1 %v530_v38  ;;  %648 = vmatprep.subr.mxu0 %v1825_v0  ;;  %v540_v38 = vld [vmem:[%s1883_s26 + $0x240] sm:$0xff] }
  0x36   : > { %813 = vmatprep.subr.mxu1 %v1825_v0  ;;  %649 = vmatpush2.msra.mxu0 %v497_v39  ;;  %v572_v39 = vld [vmem:[%s1883_s26 + $0x340] sm:$0xff] }
  0x37   : > { %814 = vmatpush2.msra.mxu1 %v529_v40  ;;  %650 = vmatprep.subr.mxu0 %v1825_v0  ;;  %v333_v40 = vld [vmem:[%s1878_s23 + $0x168] sm:$0xff] }
  0x38   : > { %815 = vmatprep.subr.mxu1 %v1825_v0  ;;  %651 = vmatpush2.msra.mxu0 %v496_v41  ;;  %v335_v41 = vld [vmem:[%s1878_s23 + $0x178] sm:$0xff] }
  0x39   : > { %816 = vmatpush2.msra.mxu1 %v528_v42  ;;  %652 = vmatprep.subr.mxu0 %v1825_v0  ;;  %v539_v42 = vld [vmem:[%s1883_s26 + $0x238] sm:$0xff] }
  0x3a   : > { %817 = vmatprep.subr.mxu1 %v1825_v0  ;;  %653 = vmatpush2.msra.mxu0 %v495_v43  ;;  %v571_v43 = vld [vmem:[%s1883_s26 + $0x338] sm:$0xff] }
  0x3b   : > { %818 = vmatpush2.msra.mxu1 %v527_v44  ;;  %654 = vmatprep.subr.mxu0 %v1825_v0  ;;  %v343_v44 = vld [vmem:[%s1878_s23 + $0x1b8] sm:$0xff] }
  0x3c   : > { %819 = vmatprep.subr.mxu1 %v1825_v0  ;;  %655 = vmatpush2.msra.mxu0 %v494_v45  ;;  %v345_v45 = vld [vmem:[%s1878_s23 + $0x1c8] sm:$0xff] }
  0x3d   : > { %820 = vmatpush2.msra.mxu1 %v526_v46  ;;  %656 = vmatprep.subr.mxu0 %v1825_v0  ;;  %v342_v46 = vld [vmem:[%s1878_s23 + $0x1b0] sm:$0xff] }
  0x3e   : > { %821 = vmatprep.subr.mxu1 %v1825_v0  ;;  %657 = vmatpush2.msra.mxu0 %v493_v47  ;;  %v344_v47 = vld [vmem:[%s1878_s23 + $0x1c0] sm:$0xff] }
  0x3f   : > { %822 = vmatpush2.msra.mxu1 %v525_v48  ;;  %658 = vmatprep.subr.mxu0 %v1825_v0  ;;  %v538_v48 = vld [vmem:[%s1883_s26 + $0x230] sm:$0xff] }
  0x40   : > { %823 = vmatprep.subr.mxu1 %v1825_v0  ;;  %659 = vmatpush2.msra.mxu0 %v492_v49  ;;  %v570_v49 = vld [vmem:[%s1883_s26 + $0x330] sm:$0xff] }
  0x41   : > { %824 = vmatpush2.msra.mxu1 %v524_v50  ;;  %660 = vmatprep.subr.mxu0 %v1825_v0  ;;  %v537_v50 = vld [vmem:[%s1883_s26 + $0x228] sm:$0xff] }
  0x42   : > { %825 = vmatprep.subr.mxu1 %v1825_v0  ;;  %661 = vmatpush2.msra.mxu0 %v491_v51  ;;  %v569_v51 = vld [vmem:[%s1883_s26 + $0x328] sm:$0xff] }
  0x43   : > { %826 = vmatpush2.msra.mxu1 %v523_v52  ;;  %662 = vmatprep.subr.mxu0 %v1825_v0  ;;  %v352_v52 = vld [vmem:[%s1878_s23 + $0x200] sm:$0xff] }
  0x44   : > { %827 = vmatprep.subr.mxu1 %v1825_v0  ;;  %663 = vmatpush2.msra.mxu0 %v490_v53  ;;  %v354_v53 = vld [vmem:[%s1878_s23 + $0x210] sm:$0xff] }
  0x45   : > { %828 = vmatpush2.msra.mxu1 %v522_v54  ;;  %664 = vmatprep.subr.mxu0 %v1825_v0  ;;  %v351_v54 = vld [vmem:[%s1878_s23 + $0x1f8] sm:$0xff] }
  0x46   : > { %829 = vmatprep.subr.mxu1 %v1825_v0  ;;  %665 = vmatpush2.msra.mxu0 %v489_v55  ;;  %v353_v55 = vld [vmem:[%s1878_s23 + $0x208] sm:$0xff] }
  0x47   : > { %830 = vmatpush2.msra.mxu1 %v521_v56  ;;  %666 = vmatprep.subr.mxu0 %v1825_v0  ;;  %v536_v56 = vld [vmem:[%s1883_s26 + $0x220] sm:$0xff] }
  0x48   : > { %831 = vmatprep.subr.mxu1 %v1825_v0  ;;  %667 = vmatpush2.msra.mxu0 %v488_v57  ;;  %v568_v57 = vld [vmem:[%s1883_s26 + $0x320] sm:$0xff] }
  0x49   : > { %832 = vmatpush2.msra.mxu1 %v520_v58  ;;  %668 = vmatprep.subr.mxu0 %v1825_v0  ;;  %v361_v58 = vld [vmem:[%s1878_s23 + $0x248] sm:$0xff] }
  0x4a   : > { %833 = vmatprep.subr.mxu1 %v1825_v0  ;;  %669 = vmatpush2.msra.mxu0 %v487_v59  ;;  %v363_v59 = vld [vmem:[%s1878_s23 + $0x258] sm:$0xff] }
  0x4b   : > { %834 = vmatpush2.msra.mxu1 %v519_v60  ;;  %670 = vmatprep.subr.mxu0 %v1825_v0  ;;  %v535_v60 = vld [vmem:[%s1883_s26 + $0x218] sm:$0xff] }
  0x4c   : > { %835 = vmatprep.subr.mxu1 %v1825_v0  ;;  %671 = vmatpush2.msra.mxu0 %v486_v61  ;;  %v567_v61 = vld [vmem:[%s1883_s26 + $0x318] sm:$0xff] }
  0x4d   : > { %836 = vmatpush2.msra.mxu1 %v518_v62  ;;  %672 = vmatprep.subr.mxu0 %v1825_v0  ;;  %v360_v62 = vld [vmem:[%s1878_s23 + $0x240] sm:$0xff] }
  0x4e   : > { %837 = vmatprep.subr.mxu1 %v1825_v0  ;;  %673 = vmatpush2.msra.mxu0 %v485_v63  ;;  %v362_v63 = vld [vmem:[%s1878_s23 + $0x250] sm:$0xff] }
  0x4f   : > { %838 = vmatpush2.msra.mxu1 %v517_v1  ;;  %674 = vmatprep.subr.mxu0 %v1825_v0  ;;  %v534_v1 = vld [vmem:[%s1883_s26 + $0x210] sm:$0xff] }
  0x50   : > { %839 = vmatprep.subr.mxu1 %v1825_v0  ;;  %675 = vmatpush2.msra.mxu0 %v484_v2  ;;  %v566_v2 = vld [vmem:[%s1883_s26 + $0x310] sm:$0xff] }
  0x51   : > { %840 = vmatpush2.msra.mxu1 %v516_v3  ;;  %677 = vmatmul.mubr.f32.vlgmr.msra.gmra.mxu0 %v288_v4  ;;  %v370_v3 = vld [vmem:[%s1878_s23 + $0x290] sm:$0xff]  ;;  %v372_v4 = vld [vmem:[%s1878_s23 + $0x2a0] sm:$0xff] }
  0x52   : > { %842 = vmatmul.mubr.f32.vlgmr.msra.gmra.mxu1 %v290_v5  ;;  %942 = vmatprep.subr.mxu0 %v1825_v0  ;;  %v369_v5 = vld [vmem:[%s1878_s23 + $0x288] sm:$0xff] }
  0x53   : > { %1107 = vmatprep.subr.mxu1 %v1825_v0  ;;  %943 = vmatpush1.msra.mxu0 %v547_v6  ;;  %v371_v6 = vld [vmem:[%s1878_s23 + $0x298] sm:$0xff] }
  0x54   : > { %1108 = vmatpush1.msra.mxu1 %v579_v7  ;;  %681 = vmatprep.mubr.f32.mxu0 %v298_v8  ;;  %v533_v7 = vld [vmem:[%s1883_s26 + $0x208] sm:$0xff] }
  0x55   : > { %846 = vmatprep.mubr.f32.mxu1 %v300_v9  ;;  %944 = vmatprep.subr.mxu0 %v1825_v0  ;;  %v565_v8 = vld [vmem:[%s1883_s26 + $0x308] sm:$0xff]  ;;  %v379_v9 = vld [vmem:[%s1878_s23 + $0x2d8] sm:$0xff] }
  0x56   : > { %1109 = vmatprep.subr.mxu1 %v1825_v0  ;;  %682 = vmatmul.mubr.f32.gmra.mxu0 %v297_v10  ;;  %v381_v10 = vld [vmem:[%s1878_s23 + $0x2e8] sm:$0xff] }
  0x57   : > { %847 = vmatmul.mubr.f32.gmra.mxu1 %v299_v11  ;;  %945 = vmatpush1.msra.mxu0 %v546_v12  ;;  %v532_v11 = vld [vmem:[%s1883_s26 + $0x200] sm:$0xff] }
  0x58   : > { %1110 = vmatpush1.msra.mxu1 %v578_v13  ;;  %946 = vmatprep.subr.mxu0 %v1825_v0  ;;  %v564_v12 = vld [vmem:[%s1883_s26 + $0x300] sm:$0xff]  ;;  %v378_v13 = vld [vmem:[%s1878_s23 + $0x2d0] sm:$0xff] }
  0x59   : > { %1111 = vmatprep.subr.mxu1 %v1825_v0  ;;  %947 = vmatpush1.msra.mxu0 %v545_v14  ;;  %v380_v14 = vld [vmem:[%s1878_s23 + $0x2e0] sm:$0xff] }
  0x5a   : > { %1112 = vmatpush1.msra.mxu1 %v577_v15  ;;  %686 = vmatprep.mubr.f32.mxu0 %v307_v16  ;;  %v563_v15 = vld [vmem:[%s1883_s26 + $0x2f8] sm:$0xff] }
  0x5b   : > { %851 = vmatprep.mubr.f32.mxu1 %v309_v17  ;;  %687 = vmatmul.mubr.f32.gmra.mxu0 %v306_v18  ;;  %v595_v16 = vld [vmem:[%s1883_s26 + $0x3f8] sm:$0xff]  ;;  %v388_v17 = vld [vmem:[%s1878_s23 + $0x320] sm:$0xff]  ;;  %v390_v18 = vld [vmem:[%s1878_s23 + $0x330] sm:$0xff] }
  0x5c   : > { %852 = vmatmul.mubr.f32.gmra.mxu1 %v308_v19  ;;  %948 = vmatprep.subr.mxu0 %v1825_v0  ;;  %v387_v19 = vld [vmem:[%s1878_s23 + $0x318] sm:$0xff] }
  0x5d   : > { %1113 = vmatprep.subr.mxu1 %v1825_v0  ;;  %949 = vmatpush1.msra.mxu0 %v544_v20  ;;  %v389_v20 = vld [vmem:[%s1878_s23 + $0x328] sm:$0xff] }
  0x5e   : > { %1114 = vmatpush1.msra.mxu1 %v576_v21  ;;  %950 = vmatprep.subr.mxu0 %v1825_v0  ;;  %v562_v21 = vld [vmem:[%s1883_s26 + $0x2f0] sm:$0xff] }
  0x5f   : > { %1115 = vmatprep.subr.mxu1 %v1825_v0  ;;  %691 = vmatprep.mubr.f32.mxu0 %v316_v22  ;;  %v594_v22 = vld [vmem:[%s1883_s26 + $0x3f0] sm:$0xff] }
  0x60   : > { %856 = vmatprep.mubr.f32.mxu1 %v318_v23  ;;  %951 = vmatpush1.msra.mxu0 %v543_v24  ;;  %v561_v23 = vld [vmem:[%s1883_s26 + $0x2e8] sm:$0xff] }
  0x61   : > { %1116 = vmatpush1.msra.mxu1 %v575_v25  ;;  %692 = vmatmul.mubr.f32.gmra.mxu0 %v315_v26  ;;  %v593_v24 = vld [vmem:[%s1883_s26 + $0x3e8] sm:$0xff]  ;;  %v399_v26 = vld [vmem:[%s1878_s23 + $0x378] sm:$0xff] }
  0x62   : > { %857 = vmatmul.mubr.f32.gmra.mxu1 %v317_v27  ;;  %952 = vmatprep.subr.mxu0 %v1825_v0  ;;  %v397_v25 = vld [vmem:[%s1878_s23 + $0x368] sm:$0xff]  ;;  %v396_v27 = vld [vmem:[%s1878_s23 + $0x360] sm:$0xff] }
  0x63   : > { %1117 = vmatprep.subr.mxu1 %v1825_v0  ;;  %953 = vmatpush1.msra.mxu0 %v542_v28  ;;  %v398_v28 = vld [vmem:[%s1878_s23 + $0x370] sm:$0xff] }
  0x64   : > { %1118 = vmatpush1.msra.mxu1 %v574_v29  ;;  %696 = vmatprep.mubr.f32.mxu0 %v325_v30  ;;  %v560_v29 = vld [vmem:[%s1883_s26 + $0x2e0] sm:$0xff] }
  0x65   : > { %861 = vmatprep.mubr.f32.mxu1 %v327_v31  ;;  %954 = vmatprep.subr.mxu0 %v1825_v0  ;;  %v592_v30 = vld [vmem:[%s1883_s26 + $0x3e0] sm:$0xff]  ;;  %v406_v31 = vld [vmem:[%s1878_s23 + $0x3b0] sm:$0xff] }
  0x66   : > { %1119 = vmatprep.subr.mxu1 %v1825_v0  ;;  %697 = vmatmul.mubr.f32.gmra.mxu0 %v324_v32  ;;  %v408_v32 = vld [vmem:[%s1878_s23 + $0x3c0] sm:$0xff] }
  0x67   : > { %862 = vmatmul.mubr.f32.gmra.mxu1 %v326_v33  ;;  %955 = vmatpush1.msra.mxu0 %v541_v34  ;;  %v559_v33 = vld [vmem:[%s1883_s26 + $0x2d8] sm:$0xff] }
  0x68   : > { %1120 = vmatpush1.msra.mxu1 %v573_v35  ;;  %956 = vmatprep.subr.mxu0 %v1825_v0  ;;  %v591_v34 = vld [vmem:[%s1883_s26 + $0x3d8] sm:$0xff]  ;;  %v405_v35 = vld [vmem:[%s1878_s23 + $0x3a8] sm:$0xff] }
  0x69   : > { %1121 = vmatprep.subr.mxu1 %v1825_v0  ;;  %701 = vmatprep.mubr.f32.mxu0 %v334_v36  ;;  %v407_v36 = vld [vmem:[%s1878_s23 + $0x3b8] sm:$0xff] }
  0x6a   : > { %866 = vmatprep.mubr.f32.mxu1 %v336_v37  ;;  %957 = vmatpush1.msra.mxu0 %v540_v38  ;;  %v558_v37 = vld [vmem:[%s1883_s26 + $0x2d0] sm:$0xff] }
  0x6b   : > { %1122 = vmatpush1.msra.mxu1 %v572_v39  ;;  %702 = vmatmul.mubr.f32.gmra.mxu0 %v333_v40  ;;  %v590_v38 = vld [vmem:[%s1883_s26 + $0x3d0] sm:$0xff]  ;;  %v415_v39 = vld [vmem:[%s1878_s23 + $0x3f8] sm:$0xff]  ;;  %v417_v40 = vld [vmem:[%s1878_s23 + $0x408] sm:$0xff] }
  0x6c   : > { %867 = vmatmul.mubr.f32.gmra.mxu1 %v335_v41  ;;  %958 = vmatprep.subr.mxu0 %v1825_v0  ;;  %v414_v41 = vld [vmem:[%s1878_s23 + $0x3f0] sm:$0xff] }
  0x6d   : > { %1123 = vmatprep.subr.mxu1 %v1825_v0  ;;  %959 = vmatpush1.msra.mxu0 %v539_v42  ;;  %v416_v42 = vld [vmem:[%s1878_s23 + $0x400] sm:$0xff] }
  0x6e   : > { %1124 = vmatpush1.msra.mxu1 %v571_v43  ;;  %706 = vmatprep.mubr.f32.mxu0 %v343_v44  ;;  %v557_v43 = vld [vmem:[%s1883_s26 + $0x2c8] sm:$0xff] }
  0x6f   : > { %871 = vmatprep.mubr.f32.mxu1 %v345_v45  ;;  %960 = vmatprep.subr.mxu0 %v1825_v0  ;;  %v589_v44 = vld [vmem:[%s1883_s26 + $0x3c8] sm:$0xff]  ;;  %v424_v45 = vld [vmem:[%s1878_s23 + $0x440] sm:$0xff] }
  0x70   : > { %1125 = vmatprep.subr.mxu1 %v1825_v0  ;;  %707 = vmatmul.mubr.f32.gmra.mxu0 %v342_v46  ;;  %v426_v46 = vld [vmem:[%s1878_s23 + $0x450] sm:$0xff] }
  0x71   : > { %872 = vmatmul.mubr.f32.gmra.mxu1 %v344_v47  ;;  %961 = vmatpush1.msra.mxu0 %v538_v48  ;;  %v556_v47 = vld [vmem:[%s1883_s26 + $0x2c0] sm:$0xff] }
  0x72   : > { %1126 = vmatpush1.msra.mxu1 %v570_v49  ;;  %962 = vmatprep.subr.mxu0 %v1825_v0  ;;  %v588_v48 = vld [vmem:[%s1883_s26 + $0x3c0] sm:$0xff]  ;;  %v423_v49 = vld [vmem:[%s1878_s23 + $0x438] sm:$0xff] }
  0x73   : > { %1127 = vmatprep.subr.mxu1 %v1825_v0  ;;  %963 = vmatpush1.msra.mxu0 %v537_v50  ;;  %v425_v50 = vld [vmem:[%s1878_s23 + $0x448] sm:$0xff] }
  0x74   : > { %1128 = vmatpush1.msra.mxu1 %v569_v51  ;;  %711 = vmatprep.mubr.f32.mxu0 %v352_v52  ;;  %v555_v51 = vld [vmem:[%s1883_s26 + $0x2b8] sm:$0xff] }
  0x75   : > { %876 = vmatprep.mubr.f32.mxu1 %v354_v53  ;;  %712 = vmatmul.mubr.f32.gmra.mxu0 %v351_v54  ;;  %v587_v52 = vld [vmem:[%s1883_s26 + $0x3b8] sm:$0xff]  ;;  %v433_v53 = vld [vmem:[%s1878_s23 + $0x488] sm:$0xff] }
  0x76   : > { %877 = vmatmul.mubr.f32.gmra.mxu1 %v353_v55  ;;  %964 = vmatprep.subr.mxu0 %v1825_v0  ;;  %v435_v54 = vld [vmem:[%s1878_s23 + $0x498] sm:$0xff]  ;;  %v432_v55 = vld [vmem:[%s1878_s23 + $0x480] sm:$0xff] }
  0x77   : > { %1129 = vmatprep.subr.mxu1 %v1825_v0  ;;  %965 = vmatpush1.msra.mxu0 %v536_v56  ;;  %v434_v56 = vld [vmem:[%s1878_s23 + $0x490] sm:$0xff] }
  0x78   : > { %1130 = vmatpush1.msra.mxu1 %v568_v57  ;;  %966 = vmatprep.subr.mxu0 %v1825_v0  ;;  %v554_v57 = vld [vmem:[%s1883_s26 + $0x2b0] sm:$0xff] }
  0x79   : > { %1131 = vmatprep.subr.mxu1 %v1825_v0  ;;  %716 = vmatprep.mubr.f32.mxu0 %v361_v58  ;;  %v586_v58 = vld [vmem:[%s1883_s26 + $0x3b0] sm:$0xff] }
  0x7a   : > { %881 = vmatprep.mubr.f32.mxu1 %v363_v59  ;;  %967 = vmatpush1.msra.mxu0 %v535_v60  ;;  %v553_v59 = vld [vmem:[%s1883_s26 + $0x2a8] sm:$0xff] }
  0x7b   : > { %1132 = vmatpush1.msra.mxu1 %v567_v61  ;;  %717 = vmatmul.mubr.f32.gmra.mxu0 %v360_v62  ;;  %v585_v60 = vld [vmem:[%s1883_s26 + $0x3a8] sm:$0xff]  ;;  %v442_v61 = vld [vmem:[%s1878_s23 + $0x4d0] sm:$0xff]  ;;  %v444_v62 = vld [vmem:[%s1878_s23 + $0x4e0] sm:$0xff] }
  0x7c   : > { %882 = vmatmul.mubr.f32.gmra.mxu1 %v362_v63  ;;  %968 = vmatprep.subr.mxu0 %v1825_v0  ;;  %v441_v63 = vld [vmem:[%s1878_s23 + $0x4c8] sm:$0xff] }
  0x7d   : > { %1133 = vmatprep.subr.mxu1 %v1825_v0  ;;  %969 = vmatpush1.msra.mxu0 %v534_v1  ;;  %v443_v1 = vld [vmem:[%s1878_s23 + $0x4d8] sm:$0xff] }
  0x7e   : > { %1134 = vmatpush1.msra.mxu1 %v566_v2  ;;  %721 = vmatprep.mubr.f32.mxu0 %v370_v3  ;;  %v552_v2 = vld [vmem:[%s1883_s26 + $0x2a0] sm:$0xff] }
  0x7f   : > { %886 = vmatprep.mubr.f32.mxu1 %v372_v4  ;;  %970 = vmatprep.subr.mxu0 %v1825_v0  ;;  %v584_v3 = vld [vmem:[%s1883_s26 + $0x3a0] sm:$0xff]  ;;  %v451_v4 = vld [vmem:[%s1878_s23 + $0x518] sm:$0xff] }
  0x80   : > { %1135 = vmatprep.subr.mxu1 %v1825_v0  ;;  %722 = vmatmul.mubr.f32.gmra.mxu0 %v369_v5  ;;  %v453_v5 = vld [vmem:[%s1878_s23 + $0x528] sm:$0xff] }
  0x81   : > { %887 = vmatmul.mubr.f32.gmra.mxu1 %v371_v6  ;;  %971 = vmatpush1.msra.mxu0 %v533_v7  ;;  %v551_v6 = vld [vmem:[%s1883_s26 + $0x298] sm:$0xff] }
  0x82   : > { %1136 = vmatpush1.msra.mxu1 %v565_v8  ;;  %972 = vmatprep.subr.mxu0 %v1825_v0  ;;  %v583_v7 = vld [vmem:[%s1883_s26 + $0x398] sm:$0xff]  ;;  %v450_v8 = vld [vmem:[%s1878_s23 + $0x510] sm:$0xff] }
  0x83   : > { %1137 = vmatprep.subr.mxu1 %v1825_v0  ;;  %726 = vmatprep.mubr.f32.mxu0 %v379_v9  ;;  %v452_v9 = vld [vmem:[%s1878_s23 + $0x520] sm:$0xff] }
  0x84   : > { %891 = vmatprep.mubr.f32.mxu1 %v381_v10  ;;  %973 = vmatpush1.msra.mxu0 %v532_v11  ;;  %v550_v10 = vld [vmem:[%s1883_s26 + $0x290] sm:$0xff] }
  0x85   : > { %1138 = vmatpush1.msra.mxu1 %v564_v12  ;;  %727 = vmatmul.mubr.f32.gmra.mxu0 %v378_v13  ;;  %v582_v11 = vld [vmem:[%s1883_s26 + $0x390] sm:$0xff]  ;;  %v460_v12 = vld [vmem:[%s1878_s23 + $0x560] sm:$0xff] }
  0x86   : > { %892 = vmatmul.mubr.f32.gmra.mxu1 %v380_v14  ;;  %974 = vmatprep.subr.mxu0 %v1825_v0  ;;  %v462_v13 = vld [vmem:[%s1878_s23 + $0x570] sm:$0xff]  ;;  %v459_v14 = vld [vmem:[%s1878_s23 + $0x558] sm:$0xff] }
  0x87   : > { %1139 = vmatprep.subr.mxu1 %v1825_v0  ;;  %975 = vmatpush2.msra.mxu0 %v563_v15  ;;  %v461_v15 = vld [vmem:[%s1878_s23 + $0x568] sm:$0xff] }
  0x88   : > { %1140 = vmatpush2.msra.mxu1 %v595_v16  ;;  %731 = vmatprep.mubr.f32.mxu0 %v388_v17  ;;  %v549_v16 = vld [vmem:[%s1883_s26 + $0x288] sm:$0xff] }
  0x89   : > { %896 = vmatprep.mubr.f32.mxu1 %v390_v18  ;;  %976 = vmatprep.subr.mxu0 %v1825_v0  ;;  %v581_v17 = vld [vmem:[%s1883_s26 + $0x388] sm:$0xff]  ;;  %v548_v18 = vld [vmem:[%s1883_s26 + $0x280] sm:$0xff] }
  0x8a   : > { %1141 = vmatprep.subr.mxu1 %v1825_v0  ;;  %732 = vmatmul.mubr.f32.gmra.mxu0 %v387_v19  ;;  %v293_v19 = vld [vmem:[%s1878_s23 + $0x28] sm:$0xff] }
  0x8b   : > { %897 = vmatmul.mubr.f32.gmra.mxu1 %v389_v20  ;;  %977 = vmatpush2.msra.mxu0 %v562_v21  ;;  %v580_v20 = vld [vmem:[%s1883_s26 + $0x380] sm:$0xff]  ;;  %v295_v21 = vld [vmem:[%s1878_s23 + $0x38] sm:$0xff] }
  0x8c   : > { %1142 = vmatpush2.msra.mxu1 %v594_v22  ;;  %978 = vmatprep.subr.mxu0 %v1825_v0  ;;  %v292_v22 = vld [vmem:[%s1878_s23 + $0x20] sm:$0xff] }
  0x8d   : > { %1143 = vmatprep.subr.mxu1 %v1825_v0  ;;  %979 = vmatpush2.msra.mxu0 %v561_v23  ;;  %v294_v23 = vld [vmem:[%s1878_s23 + $0x30] sm:$0xff] }
  0x8e   : > { %1144 = vmatpush2.msra.mxu1 %v593_v24  ;;  %736 = vmatprep.mubr.f32.mxu0 %v397_v25  ;;  %v611_v24 = vld [vmem:[%s1883_s26 + $0x478] sm:$0xff]  ;;  %v302_v25 = vld [vmem:[%s1878_s23 + $0x70] sm:$0xff] }
  0x8f   : > { %901 = vmatprep.mubr.f32.mxu1 %v399_v26  ;;  %737 = vmatmul.mubr.f32.gmra.mxu0 %v396_v27  ;;  %v304_v26 = vld [vmem:[%s1878_s23 + $0x80] sm:$0xff]  ;;  %v301_v27 = vld [vmem:[%s1878_s23 + $0x68] sm:$0xff] }
  0x90   : > { %902 = vmatmul.mubr.f32.gmra.mxu1 %v398_v28  ;;  %980 = vmatprep.subr.mxu0 %v1825_v0  ;;  %v610_v28 = vld [vmem:[%s1883_s26 + $0x470] sm:$0xff] }
  0x91   : > { %1145 = vmatprep.subr.mxu1 %v1825_v0  ;;  %981 = vmatpush2.msra.mxu0 %v560_v29  ;;  %v311_v29 = vld [vmem:[%s1878_s23 + $0xb8] sm:$0xff] }
  0x92   : > { %1146 = vmatpush2.msra.mxu1 %v592_v30  ;;  %982 = vmatprep.subr.mxu0 %v1825_v0  ;;  %v313_v30 = vld [vmem:[%s1878_s23 + $0xc8] sm:$0xff] }
  0x93   : > { %1147 = vmatprep.subr.mxu1 %v1825_v0  ;;  %741 = vmatprep.mubr.f32.mxu0 %v406_v31  ;;  %v310_v31 = vld [vmem:[%s1878_s23 + $0xb0] sm:$0xff] }
  0x94   : > { %906 = vmatprep.mubr.f32.mxu1 %v408_v32  ;;  %983 = vmatpush2.msra.mxu0 %v559_v33  ;;  %v312_v32 = vld [vmem:[%s1878_s23 + $0xc0] sm:$0xff]  ;;  %v609_v33 = vld [vmem:[%s1883_s26 + $0x468] sm:$0xff] }
  0x95   : > { %1148 = vmatpush2.msra.mxu1 %v591_v34  ;;  %742 = vmatmul.mubr.f32.gmra.mxu0 %v405_v35  ;;  %v320_v34 = vld [vmem:[%s1878_s23 + $0x100] sm:$0xff]  ;;  %v322_v35 = vld [vmem:[%s1878_s23 + $0x110] sm:$0xff] }
  0x96   : > { %907 = vmatmul.mubr.f32.gmra.mxu1 %v407_v36  ;;  %984 = vmatprep.subr.mxu0 %v1825_v0  ;;  %v319_v36 = vld [vmem:[%s1878_s23 + $0xf8] sm:$0xff] }
  0x97   : > { %1149 = vmatprep.subr.mxu1 %v1825_v0  ;;  %985 = vmatpush2.msra.mxu0 %v558_v37  ;;  %v321_v37 = vld [vmem:[%s1878_s23 + $0x108] sm:$0xff] }
  0x98   : > { %1150 = vmatpush2.msra.mxu1 %v590_v38  ;;  %746 = vmatprep.mubr.f32.mxu0 %v415_v39  ;;  %v329_v38 = vld [vmem:[%s1878_s23 + $0x148] sm:$0xff]  ;;  %v331_v39 = vld [vmem:[%s1878_s23 + $0x158] sm:$0xff] }
  0x99   : > { %911 = vmatprep.mubr.f32.mxu1 %v417_v40  ;;  %986 = vmatprep.subr.mxu0 %v1825_v0  ;;  %v608_v40 = vld [vmem:[%s1883_s26 + $0x460] sm:$0xff] }
  0x9a   : > { %1151 = vmatprep.subr.mxu1 %v1825_v0  ;;  %747 = vmatmul.mubr.f32.gmra.mxu0 %v414_v41  ;;  %v328_v41 = vld [vmem:[%s1878_s23 + $0x140] sm:$0xff] }
  0x9b   : > { %912 = vmatmul.mubr.f32.gmra.mxu1 %v416_v42  ;;  %987 = vmatpush2.msra.mxu0 %v557_v43  ;;  %v330_v42 = vld [vmem:[%s1878_s23 + $0x150] sm:$0xff] }
  0x9c   : > { %1152 = vmatpush2.msra.mxu1 %v589_v44  ;;  %988 = vmatprep.subr.mxu0 %v1825_v0  ;;  %v338_v43 = vld [vmem:[%s1878_s23 + $0x190] sm:$0xff]  ;;  %v340_v44 = vld [vmem:[%s1878_s23 + $0x1a0] sm:$0xff] }
  0x9d   : > { %1153 = vmatprep.subr.mxu1 %v1825_v0  ;;  %751 = vmatprep.mubr.f32.mxu0 %v424_v45  ;;  %v607_v45 = vld [vmem:[%s1883_s26 + $0x458] sm:$0xff] }
  0x9e   : > { %916 = vmatprep.mubr.f32.mxu1 %v426_v46  ;;  %989 = vmatpush2.msra.mxu0 %v556_v47  ;;  %v337_v46 = vld [vmem:[%s1878_s23 + $0x188] sm:$0xff]  ;;  %v339_v47 = vld [vmem:[%s1878_s23 + $0x198] sm:$0xff] }
  0x9f   : > { %1154 = vmatpush2.msra.mxu1 %v588_v48  ;;  %752 = vmatmul.mubr.f32.gmra.mxu0 %v423_v49  ;;  %v347_v48 = vld [vmem:[%s1878_s23 + $0x1d8] sm:$0xff]  ;;  %v349_v49 = vld [vmem:[%s1878_s23 + $0x1e8] sm:$0xff] }
  0xa0   : > { %917 = vmatmul.mubr.f32.gmra.mxu1 %v425_v50  ;;  %990 = vmatprep.subr.mxu0 %v1825_v0  ;;  %v606_v50 = vld [vmem:[%s1883_s26 + $0x450] sm:$0xff] }
  0xa1   : > { %1155 = vmatprep.subr.mxu1 %v1825_v0  ;;  %991 = vmatpush2.msra.mxu0 %v555_v51  ;;  %v346_v51 = vld [vmem:[%s1878_s23 + $0x1d0] sm:$0xff] }
  0xa2   : > { %1156 = vmatpush2.msra.mxu1 %v587_v52  ;;  %756 = vmatprep.mubr.f32.mxu0 %v433_v53  ;;  %v348_v52 = vld [vmem:[%s1878_s23 + $0x1e0] sm:$0xff] }
  0xa3   : > { %921 = vmatprep.mubr.f32.mxu1 %v435_v54  ;;  %992 = vmatprep.subr.mxu0 %v1825_v0  ;;  %v356_v53 = vld [vmem:[%s1878_s23 + $0x220] sm:$0xff]  ;;  %v358_v54 = vld [vmem:[%s1878_s23 + $0x230] sm:$0xff] }
  0xa4   : > { %1157 = vmatprep.subr.mxu1 %v1825_v0  ;;  %757 = vmatmul.mubr.f32.gmra.mxu0 %v432_v55  ;;  %v605_v55 = vld [vmem:[%s1883_s26 + $0x448] sm:$0xff] }
  0xa5   : > { %922 = vmatmul.mubr.f32.gmra.mxu1 %v434_v56  ;;  %993 = vmatpush2.msra.mxu0 %v554_v57  ;;  %v355_v56 = vld [vmem:[%s1878_s23 + $0x218] sm:$0xff]  ;;  %v357_v57 = vld [vmem:[%s1878_s23 + $0x228] sm:$0xff] }
  0xa6   : > { %1158 = vmatpush2.msra.mxu1 %v586_v58  ;;  %994 = vmatprep.subr.mxu0 %v1825_v0  ;;  %v365_v58 = vld [vmem:[%s1878_s23 + $0x268] sm:$0xff] }
  0xa7   : > { %1159 = vmatprep.subr.mxu1 %v1825_v0  ;;  %995 = vmatpush2.msra.mxu0 %v553_v59  ;;  %v367_v59 = vld [vmem:[%s1878_s23 + $0x278] sm:$0xff] }
  0xa8   : > { %1160 = vmatpush2.msra.mxu1 %v585_v60  ;;  %761 = vmatprep.mubr.f32.mxu0 %v442_v61  ;;  %v604_v60 = vld [vmem:[%s1883_s26 + $0x440] sm:$0xff] }
  0xa9   : > { %926 = vmatprep.mubr.f32.mxu1 %v444_v62  ;;  %762 = vmatmul.mubr.f32.gmra.mxu0 %v441_v63  ;;  %v364_v61 = vld [vmem:[%s1878_s23 + $0x260] sm:$0xff]  ;;  %v366_v62 = vld [vmem:[%s1878_s23 + $0x270] sm:$0xff] }
  0xaa   : > { %927 = vmatmul.mubr.f32.gmra.mxu1 %v443_v1  ;;  %996 = vmatprep.subr.mxu0 %v1825_v0  ;;  %v374_v63 = vld [vmem:[%s1878_s23 + $0x2b0] sm:$0xff]  ;;  %v376_v1 = vld [vmem:[%s1878_s23 + $0x2c0] sm:$0xff] }
  0xab   : > { %1161 = vmatprep.subr.mxu1 %v1825_v0  ;;  %997 = vmatpush2.msra.mxu0 %v552_v2  ;;  %v603_v2 = vld [vmem:[%s1883_s26 + $0x438] sm:$0xff] }
  0xac   : > { %1162 = vmatpush2.msra.mxu1 %v584_v3  ;;  %998 = vmatprep.subr.mxu0 %v1825_v0  ;;  %v373_v3 = vld [vmem:[%s1878_s23 + $0x2a8] sm:$0xff] }
  0xad   : > { %1163 = vmatprep.subr.mxu1 %v1825_v0  ;;  %766 = vmatprep.mubr.f32.mxu0 %v451_v4  ;;  %v375_v4 = vld [vmem:[%s1878_s23 + $0x2b8] sm:$0xff] }
  0xae   : > { %931 = vmatprep.mubr.f32.mxu1 %v453_v5  ;;  %999 = vmatpush2.msra.mxu0 %v551_v6  ;;  %v383_v5 = vld [vmem:[%s1878_s23 + $0x2f8] sm:$0xff]  ;;  %v385_v6 = vld [vmem:[%s1878_s23 + $0x308] sm:$0xff] }
  0xaf   : > { %1164 = vmatpush2.msra.mxu1 %v583_v7  ;;  %767 = vmatmul.mubr.f32.gmra.mxu0 %v450_v8  ;;  %v602_v7 = vld [vmem:[%s1883_s26 + $0x430] sm:$0xff] }
  0xb0   : > { %932 = vmatmul.mubr.f32.gmra.mxu1 %v452_v9  ;;  %1000 = vmatprep.subr.mxu0 %v1825_v0  ;;  %v382_v8 = vld [vmem:[%s1878_s23 + $0x2f0] sm:$0xff]  ;;  %v384_v9 = vld [vmem:[%s1878_s23 + $0x300] sm:$0xff] }
  0xb1   : > { %1165 = vmatprep.subr.mxu1 %v1825_v0  ;;  %1001 = vmatpush2.msra.mxu0 %v550_v10  ;;  %v392_v10 = vld [vmem:[%s1878_s23 + $0x340] sm:$0xff] }
  0xb2   : > { %1166 = vmatpush2.msra.mxu1 %v582_v11  ;;  %771 = vmatprep.mubr.f32.mxu0 %v460_v12  ;;  %v394_v11 = vld [vmem:[%s1878_s23 + $0x350] sm:$0xff]  ;;  %v601_v12 = vld [vmem:[%s1883_s26 + $0x428] sm:$0xff] }
  0xb3   : > { %936 = vmatprep.mubr.f32.mxu1 %v462_v13  ;;  %1002 = vmatprep.subr.mxu0 %v1825_v0  ;;  %v391_v13 = vld [vmem:[%s1878_s23 + $0x338] sm:$0xff] }
  0xb4   : > { %1167 = vmatprep.subr.mxu1 %v1825_v0  ;;  %772 = vmatmul.mubr.f32.gmra.mxu0 %v459_v14  ;;  %v393_v14 = vld [vmem:[%s1878_s23 + $0x348] sm:$0xff] }
  0xb5   : > { %937 = vmatmul.mubr.f32.gmra.mxu1 %v461_v15  ;;  %1003 = vmatpush2.msra.mxu0 %v549_v16  ;;  %v401_v15 = vld [vmem:[%s1878_s23 + $0x388] sm:$0xff]  ;;  %v403_v16 = vld [vmem:[%s1878_s23 + $0x398] sm:$0xff] }
  0xb6   : > { %1168 = vmatpush2.msra.mxu1 %v581_v17  ;;  %1004 = vmatprep.subr.mxu0 %v1825_v0  ;;  %v600_v17 = vld [vmem:[%s1883_s26 + $0x420] sm:$0xff] }
  0xb7   : > { %1169 = vmatprep.subr.mxu1 %v1825_v0  ;;  %1005 = vmatpush2.msra.mxu0 %v548_v18  ;;  %v303_v0 = vld [vmem:[%s1878_s23 + $0x78] sm:$0xff]  ;;  %v400_v18 = vld [vmem:[%s1878_s23 + $0x380] sm:$0xff] }
  0xb8   : > { %1006 = vmatprep.mubr.f32.mxu0 %v293_v19  ;;  %1170 = vmatpush2.msra.mxu1 %v580_v20  ;;  %v402_v19 = vld [vmem:[%s1878_s23 + $0x390] sm:$0xff] }
  0xb9   : > { %1171 = vmatprep.mubr.f32.mxu1 %v295_v21  ;;  %1007 = vmatmul.mubr.f32.vlgmr.msra.gmra.mxu0 %v292_v22  ;;  %v410_v20 = vld [vmem:[%s1878_s23 + $0x3d0] sm:$0xff]  ;;  %v412_v21 = vld [vmem:[%s1878_s23 + $0x3e0] sm:$0xff]  ;;  %v599_v22 = vld [vmem:[%s1883_s26 + $0x418] sm:$0xff] }
  0xba   : > { %1172 = vmatmul.mubr.f32.vlgmr.msra.gmra.mxu1 %v294_v23  ;;  %1679 = vmatprep.subr.mxu0 %v611_v24  ;;  %v409_v23 = vld [vmem:[%s1878_s23 + $0x3c8] sm:$0xff] }
  0xbb   : > { %1741 = vmatprep.subr.mxu1 %v611_v24  ;;  %1680 = vmatpush3.msra.mxu0 %v611_v24 }
  0xbc   : > { %1757 = vmatpush3.msra.mxu1 %v611_v24  ;;  %1011 = vmatprep.mubr.f32.mxu0 %v302_v25  ;;  %v411_v24 = vld [vmem:[%s1878_s23 + $0x3d8] sm:$0xff] }
  0xbd   : > { %1176 = vmatprep.mubr.f32.mxu1 %v304_v26  ;;  %1012 = vmatmul.mubr.f32.gmra.mxu0 %v301_v27  ;;  %v419_v25 = vld [vmem:[%s1878_s23 + $0x418] sm:$0xff]  ;;  %v421_v26 = vld [vmem:[%s1878_s23 + $0x428] sm:$0xff]  ;;  %v598_v27 = vld [vmem:[%s1883_s26 + $0x410] sm:$0xff] }
  0xbe   : > { %1177 = vmatmul.mubr.f32.gmra.mxu1 %v303_v0  ;;  %1681 = vmatprep.subr.mxu0 %v610_v28  ;;  %v418_v0 = vld [vmem:[%s1878_s23 + $0x410] sm:$0xff] }
  0xbf   : > { %1742 = vmatprep.subr.mxu1 %v610_v28  ;;  %1682 = vmatpush3.msra.mxu0 %v610_v28 }
  0xc0   : > { %1758 = vmatpush3.msra.mxu1 %v610_v28  ;;  %1016 = vmatprep.mubr.f32.mxu0 %v311_v29  ;;  %v420_v28 = vld [vmem:[%s1878_s23 + $0x420] sm:$0xff] }
  0xc1   : > { %1181 = vmatprep.mubr.f32.mxu1 %v313_v30  ;;  %1017 = vmatmul.mubr.f32.gmra.mxu0 %v310_v31  ;;  %v428_v29 = vld [vmem:[%s1878_s23 + $0x460] sm:$0xff]  ;;  %v430_v30 = vld [vmem:[%s1878_s23 + $0x470] sm:$0xff]  ;;  %v597_v31 = vld [vmem:[%s1883_s26 + $0x408] sm:$0xff] }
  0xc2   : > { %1182 = vmatmul.mubr.f32.gmra.mxu1 %v312_v32  ;;  %1683 = vmatprep.subr.mxu0 %v609_v33  ;;  %v427_v32 = vld [vmem:[%s1878_s23 + $0x458] sm:$0xff] }
  0xc3   : > { %1743 = vmatprep.subr.mxu1 %v609_v33  ;;  %1021 = vmatprep.mubr.f32.mxu0 %v320_v34  ;;  %v437_v34 = vld [vmem:[%s1878_s23 + $0x4a8] sm:$0xff] }
  0xc4   : > { %1186 = vmatprep.mubr.f32.mxu1 %v322_v35  ;;  %1684 = vmatpush3.msra.mxu0 %v609_v33  ;;  %v439_v35 = vld [vmem:[%s1878_s23 + $0x4b8] sm:$0xff] }
  0xc5   : > { %1759 = vmatpush3.msra.mxu1 %v609_v33  ;;  %1022 = vmatmul.mubr.f32.gmra.mxu0 %v319_v36  ;;  %v429_v33 = vld [vmem:[%s1878_s23 + $0x468] sm:$0xff]  ;;  %v596_v36 = vld [vmem:[%s1883_s26 + $0x400] sm:$0xff] }
  0xc6   : > { %1187 = vmatmul.mubr.f32.gmra.mxu1 %v321_v37  ;;  %1026 = vmatprep.mubr.f32.mxu0 %v329_v38  ;;  %v436_v37 = vld [vmem:[%s1878_s23 + $0x4a0] sm:$0xff]  ;;  %v438_v38 = vld [vmem:[%s1878_s23 + $0x4b0] sm:$0xff] }
  0xc7   : > { %1191 = vmatprep.mubr.f32.mxu1 %v331_v39  ;;  %1685 = vmatprep.subr.mxu0 %v608_v40  ;;  %v446_v39 = vld [vmem:[%s1878_s23 + $0x4f0] sm:$0xff] }
  0xc8   : > { %1744 = vmatprep.subr.mxu1 %v608_v40  ;;  %1686 = vmatpush3.msra.mxu0 %v608_v40 }
  0xc9   : > { %1760 = vmatpush3.msra.mxu1 %v608_v40  ;;  %1027 = vmatmul.mubr.f32.gmra.mxu0 %v328_v41  ;;  %v448_v40 = vld [vmem:[%s1878_s23 + $0x500] sm:$0xff]  ;;  %v445_v41 = vld [vmem:[%s1878_s23 + $0x4e8] sm:$0xff] }
  0xca   : > { %1192 = vmatmul.mubr.f32.gmra.mxu1 %v330_v42  ;;  %1031 = vmatprep.mubr.f32.mxu0 %v338_v43  ;;  %v447_v42 = vld [vmem:[%s1878_s23 + $0x4f8] sm:$0xff] }
  0xcb   : > { %1196 = vmatprep.mubr.f32.mxu1 %v340_v44  ;;  %1687 = vmatprep.subr.mxu0 %v607_v45  ;;  %v455_v43 = vld [vmem:[%s1878_s23 + $0x538] sm:$0xff]  ;;  %v457_v44 = vld [vmem:[%s1878_s23 + $0x548] sm:$0xff] }
  0xcc   : > { %1745 = vmatprep.subr.mxu1 %v607_v45  ;;  %1688 = vmatpush3.msra.mxu0 %v607_v45 }
  0xcd   : > { %1761 = vmatpush3.msra.mxu1 %v607_v45  ;;  %1032 = vmatmul.mubr.f32.gmra.mxu0 %v337_v46  ;;  %v454_v45 = vld [vmem:[%s1878_s23 + $0x530] sm:$0xff]  ;;  %v456_v46 = vld [vmem:[%s1878_s23 + $0x540] sm:$0xff] }
  0xce   : > { %1197 = vmatmul.mubr.f32.gmra.mxu1 %v339_v47  ;;  %1036 = vmatprep.mubr.f32.mxu0 %v347_v48  ;;  %v464_v47 = vld [vmem:[%s1878_s23 + $0x580] sm:$0xff]  ;;  %v466_v48 = vld [vmem:[%s1878_s23 + $0x590] sm:$0xff] }
  0xcf   : > { %1201 = vmatprep.mubr.f32.mxu1 %v349_v49  ;;  %1689 = vmatprep.subr.mxu0 %v606_v50  ;;  %v463_v49 = vld [vmem:[%s1878_s23 + $0x578] sm:$0xff] }
  0xd0   : > { %1746 = vmatprep.subr.mxu1 %v606_v50  ;;  %1690 = vmatpush3.msra.mxu0 %v606_v50 }
  0xd1   : > { %1762 = vmatpush3.msra.mxu1 %v606_v50  ;;  %1037 = vmatmul.mubr.f32.gmra.mxu0 %v346_v51  ;;  %v465_v50 = vld [vmem:[%s1878_s23 + $0x588] sm:$0xff]  ;;  %v296_v51 = vld [vmem:[%s1878_s23 + $0x40] sm:$0xff] }
  0xd2   : > { %1202 = vmatmul.mubr.f32.gmra.mxu1 %v348_v52  ;;  %1041 = vmatprep.mubr.f32.mxu0 %v356_v53  ;;  %v386_v52 = vld [vmem:[%s1878_s23 + $0x310] sm:$0xff]  ;;  %v305_v53 = vld [vmem:[%s1878_s23 + $0x88] sm:$0xff] }
  0xd3   : > { %1206 = vmatprep.mubr.f32.mxu1 %v358_v54  ;;  %1691 = vmatprep.subr.mxu0 %v605_v55  ;;  %v395_v54 = vld [vmem:[%s1878_s23 + $0x358] sm:$0xff] }
  0xd4   : > { %1747 = vmatprep.subr.mxu1 %v605_v55  ;;  %1692 = vmatpush3.msra.mxu0 %v605_v55 }
  0xd5   : > { %1763 = vmatpush3.msra.mxu1 %v605_v55  ;;  %1042 = vmatmul.mubr.f32.gmra.mxu0 %v355_v56  ;;  %v314_v55 = vld [vmem:[%s1878_s23 + $0xd0] sm:$0xff]  ;;  %v404_v56 = vld [vmem:[%s1878_s23 + $0x3a0] sm:$0xff] }
  0xd6   : > { %1207 = vmatmul.mubr.f32.gmra.mxu1 %v357_v57  ;;  %1046 = vmatprep.mubr.f32.mxu0 %v365_v58  ;;  %v323_v57 = vld [vmem:[%s1878_s23 + $0x118] sm:$0xff]  ;;  %v413_v58 = vld [vmem:[%s1878_s23 + $0x3e8] sm:$0xff] }
  0xd7   : > { %1211 = vmatprep.mubr.f32.mxu1 %v367_v59  ;;  %1693 = vmatprep.subr.mxu0 %v604_v60  ;;  %v332_v59 = vld [vmem:[%s1878_s23 + $0x160] sm:$0xff] }
  0xd8   : > { %1748 = vmatprep.subr.mxu1 %v604_v60  ;;  %1694 = vmatpush3.msra.mxu0 %v604_v60 }
  0xd9   : > { %1764 = vmatpush3.msra.mxu1 %v604_v60  ;;  %1047 = vmatmul.mubr.f32.gmra.mxu0 %v364_v61  ;;  %v422_v60 = vld [vmem:[%s1878_s23 + $0x430] sm:$0xff]  ;;  %v341_v61 = vld [vmem:[%s1878_s23 + $0x1a8] sm:$0xff] }
  0xda   : > { %1212 = vmatmul.mubr.f32.gmra.mxu1 %v366_v62  ;;  %1051 = vmatprep.mubr.f32.mxu0 %v374_v63  ;;  %v431_v62 = vld [vmem:[%s1878_s23 + $0x478] sm:$0xff]  ;;  %v350_v63 = vld [vmem:[%s1878_s23 + $0x1f0] sm:$0xff] }
  0xdb   : > { %1216 = vmatprep.mubr.f32.mxu1 %v376_v1  ;;  %1695 = vmatprep.subr.mxu0 %v603_v2  ;;  %v440_v1 = vld [vmem:[%s1878_s23 + $0x4c0] sm:$0xff] }
  0xdc   : > { %1749 = vmatprep.subr.mxu1 %v603_v2  ;;  %1696 = vmatpush3.msra.mxu0 %v603_v2 }
  0xdd   : > { %1765 = vmatpush3.msra.mxu1 %v603_v2  ;;  %1052 = vmatmul.mubr.f32.gmra.mxu0 %v373_v3 }
  0xde   : > { %1217 = vmatmul.mubr.f32.gmra.mxu1 %v375_v4  ;;  %1056 = vmatprep.mubr.f32.mxu0 %v383_v5  ;;  %v359_v4 = vld [vmem:[%s1878_s23 + $0x238] sm:$0xff]  ;;  %v449_v5 = vld [vmem:[%s1878_s23 + $0x508] sm:$0xff] }
  0xdf   : > { %1221 = vmatprep.mubr.f32.mxu1 %v385_v6  ;;  %1697 = vmatprep.subr.mxu0 %v602_v7 }
  0xe0   : > { %1750 = vmatprep.subr.mxu1 %v602_v7  ;;  %1698 = vmatpush3.msra.mxu0 %v602_v7 }
  0xe1   : > { %1766 = vmatpush3.msra.mxu1 %v602_v7  ;;  %1057 = vmatmul.mubr.f32.gmra.mxu0 %v382_v8  ;;  %v368_v7 = vld [vmem:[%s1878_s23 + $0x280] sm:$0xff]  ;;  %v458_v8 = vld [vmem:[%s1878_s23 + $0x550] sm:$0xff] }
  0xe2   : > { %1222 = vmatmul.mubr.f32.gmra.mxu1 %v384_v9  ;;  %1061 = vmatprep.mubr.f32.mxu0 %v392_v10 }
  0xe3   : > { %1226 = vmatprep.mubr.f32.mxu1 %v394_v11  ;;  %1699 = vmatprep.subr.mxu0 %v601_v12  ;;  %v377_v11 = vld [vmem:[%s1878_s23 + $0x2c8] sm:$0xff] }
  0xe4   : > { %1751 = vmatprep.subr.mxu1 %v601_v12  ;;  %1700 = vmatpush3.msra.mxu0 %v601_v12 }
  0xe5   : > { %1767 = vmatpush3.msra.mxu1 %v601_v12  ;;  %1062 = vmatmul.mubr.f32.gmra.mxu0 %v391_v13  ;;  %v467_v12 = vld [vmem:[%s1878_s23 + $0x598] sm:$0xff] }
  0xe6   : > { %1227 = vmatmul.mubr.f32.gmra.mxu1 %v393_v14  ;;  %1066 = vmatprep.mubr.f32.mxu0 %v401_v15 }
  0xe7   : > { %1231 = vmatprep.mubr.f32.mxu1 %v403_v16  ;;  %1701 = vmatprep.subr.mxu0 %v600_v17 }
  0xe8   : > { %1752 = vmatprep.subr.mxu1 %v600_v17  ;;  %1702 = vmatpush3.msra.mxu0 %v600_v17 }
  0xe9   : > { %1768 = vmatpush3.msra.mxu1 %v600_v17  ;;  %1067 = vmatmul.mubr.f32.gmra.mxu0 %v400_v18 }
  0xea   : > { %1232 = vmatmul.mubr.f32.gmra.mxu1 %v402_v19  ;;  %1071 = vmatprep.mubr.f32.mxu0 %v410_v20 }
  0xeb   : > { %1236 = vmatprep.mubr.f32.mxu1 %v412_v21  ;;  %1703 = vmatprep.subr.mxu0 %v599_v22 }
  0xec   : > { %1753 = vmatprep.subr.mxu1 %v599_v22  ;;  %1704 = vmatpush3.msra.mxu0 %v599_v22 }
  0xed   : > { %1769 = vmatpush3.msra.mxu1 %v599_v22  ;;  %1072 = vmatmul.mubr.f32.gmra.mxu0 %v409_v23 }
  0xee   : > { %1237 = vmatmul.mubr.f32.gmra.mxu1 %v411_v24  ;;  %1076 = vmatprep.mubr.f32.mxu0 %v419_v25 }
  0xef   : > { %1241 = vmatprep.mubr.f32.mxu1 %v421_v26  ;;  %1705 = vmatprep.subr.mxu0 %v598_v27 }
  0xf0   : > { %1754 = vmatprep.subr.mxu1 %v598_v27  ;;  %1706 = vmatpush3.msra.mxu0 %v598_v27 }
  0xf1   : > { %1770 = vmatpush3.msra.mxu1 %v598_v27  ;;  %1077 = vmatmul.mubr.f32.gmra.mxu0 %v418_v0 }
  0xf2   : > { %1242 = vmatmul.mubr.f32.gmra.mxu1 %v420_v28  ;;  %1081 = vmatprep.mubr.f32.mxu0 %v428_v29 }
  0xf3   : > { %1246 = vmatprep.mubr.f32.mxu1 %v430_v30  ;;  %1707 = vmatprep.subr.mxu0 %v597_v31 }
  0xf4   : > { %1755 = vmatprep.subr.mxu1 %v597_v31  ;;  %1708 = vmatpush3.msra.mxu0 %v597_v31 }
  0xf5   : > { %1771 = vmatpush3.msra.mxu1 %v597_v31  ;;  %1082 = vmatmul.mubr.f32.gmra.mxu0 %v427_v32 }
  0xf6   : > { %1247 = vmatmul.mubr.f32.gmra.mxu1 %v429_v33  ;;  %1086 = vmatprep.mubr.f32.mxu0 %v437_v34 }
  0xf7   : > { %1251 = vmatprep.mubr.f32.mxu1 %v439_v35  ;;  %1709 = vmatprep.subr.mxu0 %v596_v36 }
  0xf8   : > { %1756 = vmatprep.subr.mxu1 %v596_v36  ;;  %1710 = vmatpush3.msra.mxu0 %v596_v36 }
  0xf9   : > { %1772 = vmatpush3.msra.mxu1 %v596_v36  ;;  %1087 = vmatmul.mubr.f32.gmra.mxu0 %v436_v37 }
  0xfa   : > { %1252 = vmatmul.mubr.f32.gmra.mxu1 %v438_v38  ;;  %1091 = vmatprep.mubr.f32.mxu0 %v446_v39 }
  0xfb   : > { %1256 = vmatprep.mubr.f32.mxu1 %v448_v40 }
  0xfd   : > { %1092 = vmatmul.mubr.f32.gmra.mxu0 %v445_v41 }
  0xfe   : > { %1257 = vmatmul.mubr.f32.gmra.mxu1 %v447_v42  ;;  %1096 = vmatprep.mubr.f32.mxu0 %v455_v43 }
  0xff   : > { %1261 = vmatprep.mubr.f32.mxu1 %v457_v44 }
 0x101   : > { %1097 = vmatmul.mubr.f32.gmra.mxu0 %v454_v45 }
 0x102   : > { %1262 = vmatmul.mubr.f32.gmra.mxu1 %v456_v46  ;;  %1101 = vmatprep.mubr.f32.mxu0 %v464_v47 }
 0x103   : > { %1266 = vmatprep.mubr.f32.mxu1 %v466_v48 }
 0x105   : > { %1102 = vmatmul.mubr.f32.gmra.mxu0 %v463_v49 }
 0x106   : > { %1267 = vmatmul.mubr.f32.gmra.mxu1 %v465_v50  ;;  %1711 = vmatprep.mubr.f32.mxu0 %v296_v51 }
 0x107   : > { %1726 = vmatprep.mubr.f32.mxu1 %v386_v52 }
 0x109   : > { %1712 = vmatmul.mubr.f32.vlgmr.msra.gmra.mxu0 %v305_v53 }
 0x10a   : > { %1727 = vmatmul.mubr.f32.vlgmr.msra.gmra.mxu1 %v395_v54  ;;  %1714 = vmatprep.mubr.f32.mxu0 %v314_v55 }
 0x10b   : > { %1729 = vmatprep.mubr.f32.mxu1 %v404_v56 }
 0x10d   : > { %1715 = vmatmul.mubr.f32.gmra.mxu0 %v323_v57 }
 0x10e   : > { %1730 = vmatmul.mubr.f32.gmra.mxu1 %v413_v58  ;;  %1717 = vmatprep.mubr.f32.mxu0 %v332_v59 }
 0x10f   : > { %1732 = vmatprep.mubr.f32.mxu1 %v422_v60 }
 0x111   : > { %1718 = vmatmul.mubr.f32.gmra.mxu0 %v341_v61  ;;  %v678_v2 = vpop.f32.mrf.mxu0 }
 0x112   : > { %1733 = vmatmul.mubr.f32.gmra.mxu1 %v431_v62  ;;  %v843_v3 = vpop.f32.mrf.mxu1  ;;  %1720 = vmatprep.mubr.f32.mxu0 %v350_v63 }
 0x113   : > { %1735 = vmatprep.mubr.f32.mxu1 %v440_v1  ;;  %v2331_v6 = vadd.f32 %v843_v3, %v678_v2  ;;  %v680_v9 = vpop.f32.mrf.mxu0 }
 0x114   : > { %v845_v10 = vpop.f32.mrf.mxu1 }
 0x115   : > { %1721 = vmatmul.mubr.f32.gmra.mxu0 %v359_v4 }
 0x116   : > { %1736 = vmatmul.mubr.f32.gmra.mxu1 %v449_v5  ;;  %1723 = vmatprep.mubr.f32.mxu0 %v368_v7  ;;  %v683_v13 = vpop.f32.mrf.mxu0 }
 0x117   : > { %1738 = vmatprep.mubr.f32.mxu1 %v458_v8  ;;  %v848_v14 = vpop.f32.mrf.mxu1 }
 0x118   : > { %v2337_v15 = vadd.f32 %v848_v14, %v683_v13  ;;  %v685_v16 = vpop.f32.mrf.mxu0 }
 0x119   : > { %v850_v17 = vpop.f32.mrf.mxu1  ;;  %1724 = vmatmul.mubr.f32.gmra.mxu0 %v377_v11 }
 0x11a   : > { %1739 = vmatmul.mubr.f32.gmra.mxu1 %v467_v12 }
 0x11b   : > { %v688_v18 = vpop.f32.mrf.mxu0 }
 0x11c   : > { %v853_v19 = vpop.f32.mrf.mxu1 }
 0x11d   : > { %v2339_v20 = vadd.f32 %v853_v19, %v688_v18  ;;  %v690_v21 = vpop.f32.mrf.mxu0 }
 0x11e   : > { %v855_v22 = vpop.f32.mrf.mxu1 }
 0x121   : > { %v693_v23 = vpop.f32.mrf.mxu0 }
 0x122   : > { %v858_v24 = vpop.f32.mrf.mxu1 }
 0x123   : > { %v2341_v25 = vadd.f32 %v858_v24, %v693_v23  ;;  %v695_v26 = vpop.f32.mrf.mxu0 }
 0x124   : > { %v860_v27 = vpop.f32.mrf.mxu1 }
 0x126   : > { %v698_v0 = vpop.f32.mrf.mxu0 }
 0x127   : > { %v863_v28 = vpop.f32.mrf.mxu1 }
 0x128   : > { %v2343_v29 = vadd.f32 %v863_v28, %v698_v0  ;;  %v700_v30 = vpop.f32.mrf.mxu0 }
 0x129   : > { %v865_v31 = vpop.f32.mrf.mxu1 }
 0x12b   : > { %v703_v32 = vpop.f32.mrf.mxu0 }
 0x12c   : > { %v868_v33 = vpop.f32.mrf.mxu1 }
 0x12d   : > { %v2345_v34 = vadd.f32 %v868_v33, %v703_v32  ;;  %v705_v35 = vpop.f32.mrf.mxu0 }
 0x12e   : > { %v870_v36 = vpop.f32.mrf.mxu1 }
 0x130   : > { %v708_v37 = vpop.f32.mrf.mxu0 }
 0x131   : > { %v873_v38 = vpop.f32.mrf.mxu1 }
 0x132   : > { %v2347_v39 = vadd.f32 %v873_v38, %v708_v37  ;;  %v710_v40 = vpop.f32.mrf.mxu0 }
 0x133   : > { %v875_v41 = vpop.f32.mrf.mxu1 }
 0x135   : > { %v713_v42 = vpop.f32.mrf.mxu0 }
 0x136   : > { %v878_v43 = vpop.f32.mrf.mxu1 }
 0x137   : > { %v2349_v44 = vadd.f32 %v878_v43, %v713_v42  ;;  %v715_v45 = vpop.f32.mrf.mxu0 }
 0x138   : > { %v880_v46 = vpop.f32.mrf.mxu1 }
 0x13b   : > { %v718_v47 = vpop.f32.mrf.mxu0 }
 0x13c   : > { %v883_v48 = vpop.f32.mrf.mxu1 }
 0x13d   : > { %v2351_v49 = vadd.f32 %v883_v48, %v718_v47  ;;  %v720_v50 = vpop.f32.mrf.mxu0 }
 0x13e   : > { %v885_v51 = vpop.f32.mrf.mxu1 }
 0x140   : > { %v723_v52 = vpop.f32.mrf.mxu0 }
 0x141   : > { %v888_v53 = vpop.f32.mrf.mxu1 }
 0x142   : > { %v2353_v54 = vadd.f32 %v888_v53, %v723_v52  ;;  %v725_v55 = vpop.f32.mrf.mxu0 }
 0x143   : > { %v890_v56 = vpop.f32.mrf.mxu1 }
 0x145   : > { %v728_v57 = vpop.f32.mrf.mxu0 }
 0x146   : > { %v893_v58 = vpop.f32.mrf.mxu1 }
 0x147   : > { %v2355_v59 = vadd.f32 %v893_v58, %v728_v57  ;;  %v730_v60 = vpop.f32.mrf.mxu0 }
 0x148   : > { %v895_v61 = vpop.f32.mrf.mxu1 }
 0x14a   : > { %v733_v62 = vpop.f32.mrf.mxu0 }
 0x14b   : > { %v898_v63 = vpop.f32.mrf.mxu1 }
 0x14c   : > { %v2357_v1 = vadd.f32 %v898_v63, %v733_v62  ;;  %v735_v2 = vpop.f32.mrf.mxu0 }
 0x14d   : > { %v900_v3 = vpop.f32.mrf.mxu1 }
 0x14f   : > { %v738_v4 = vpop.f32.mrf.mxu0 }
 0x150   : > { %v903_v5 = vpop.f32.mrf.mxu1 }
 0x151   : > { %v2359_v7 = vadd.f32 %v903_v5, %v738_v4  ;;  %v740_v8 = vpop.f32.mrf.mxu0 }
 0x152   : > { %v905_v9 = vpop.f32.mrf.mxu1 }
 0x155   : > { %v743_v10 = vpop.f32.mrf.mxu0 }
 0x156   : > { %v908_v11 = vpop.f32.mrf.mxu1 }
 0x157   : > { %v2361_v12 = vadd.f32 %v908_v11, %v743_v10  ;;  %v745_v13 = vpop.f32.mrf.mxu0 }
 0x158   : > { %v910_v14 = vpop.f32.mrf.mxu1 }
 0x15a   : > { %v748_v16 = vpop.f32.mrf.mxu0 }
 0x15b   : > { %v913_v17 = vpop.f32.mrf.mxu1 }
 0x15c   : > { %v2363_v18 = vadd.f32 %v913_v17, %v748_v16  ;;  %v750_v19 = vpop.f32.mrf.mxu0 }
 0x15d   : > { %v915_v21 = vpop.f32.mrf.mxu1 }
 0x15f   : > { %v753_v22 = vpop.f32.mrf.mxu0 }
 0x160   : > { %v918_v23 = vpop.f32.mrf.mxu1 }
 0x161   : > { %v2365_v24 = vadd.f32 %v918_v23, %v753_v22  ;;  %v755_v26 = vpop.f32.mrf.mxu0 }
 0x162   : > { %v920_v27 = vpop.f32.mrf.mxu1 }
 0x164   : > { %v758_v0 = vpop.f32.mrf.mxu0 }
 0x165   : > { %v923_v28 = vpop.f32.mrf.mxu1 }
 0x166   : > { %v2367_v30 = vadd.f32 %v923_v28, %v758_v0  ;;  %v760_v31 = vpop.f32.mrf.mxu0 }
 0x167   : > { %v925_v32 = vpop.f32.mrf.mxu1 }
 0x169   : > { %v763_v33 = vpop.f32.mrf.mxu0 }
 0x16a   : > { %v928_v35 = vpop.f32.mrf.mxu1 }
 0x16b   : > { %v2369_v36 = vadd.f32 %v928_v35, %v763_v33  ;;  %v765_v37 = vpop.f32.mrf.mxu0 }
 0x16c   : > { %v930_v38 = vpop.f32.mrf.mxu1 }
 0x16f   : > { %v768_v40 = vpop.f32.mrf.mxu0 }
 0x170   : > { %v933_v41 = vpop.f32.mrf.mxu1 }
 0x171   : > { %v2371_v42 = vadd.f32 %v933_v41, %v768_v40  ;;  %v770_v43 = vpop.f32.mrf.mxu0 }
 0x172   : > { %v935_v45 = vpop.f32.mrf.mxu1 }
 0x174   : > { %v773_v46 = vpop.f32.mrf.mxu0 }
 0x175   : > { %v938_v47 = vpop.f32.mrf.mxu1 }
 0x176   : > { %v2373_v48 = vadd.f32 %v938_v47, %v773_v46  ;;  %v775_v50 = vpop.f32.mrf.mxu0 }
 0x177   : > { %v940_v51 = vpop.f32.mrf.mxu1 }
 0x179   : > { %v1008_v52 = vpop.f32.mrf.mxu0 }
 0x17a   : > { %v1173_v53 = vpop.f32.mrf.mxu1  ;;  %v1009_v55 = vadd.f32 %v1008_v52, %v2331_v6 }
 0x17b   : > { %v1010_v56 = vpop.f32.mrf.mxu0 }
 0x17c   : > { %v1175_v57 = vpop.f32.mrf.mxu1  ;;  %v2376_v58 = vadd.f32 %v1173_v53, %v1009_v55 }
 0x17d   : > { %v1013_v60 = vpop.f32.mrf.mxu0 }
 0x17e   : > { %v1178_v61 = vpop.f32.mrf.mxu1  ;;  %v1014_v62 = vadd.f32 %v1013_v60, %v2337_v15 }
 0x17f   : > { %v1015_v63 = vpop.f32.mrf.mxu0 }
 0x180   : > { %v1180_v2 = vpop.f32.mrf.mxu1  ;;  %v2379_v3 = vadd.f32 %v1178_v61, %v1014_v62 }
 0x181   : > { %v1018_v4 = vpop.f32.mrf.mxu0 }
 0x182   : > { %v1183_v5 = vpop.f32.mrf.mxu1  ;;  %v1019_v8 = vadd.f32 %v1018_v4, %v2339_v20 }
 0x183   : > { %v1020_v9 = vpop.f32.mrf.mxu0 }
 0x184   : > { %v1185_v10 = vpop.f32.mrf.mxu1  ;;  %v2382_v11 = vadd.f32 %v1183_v5, %v1019_v8 }
 0x185   : > { %v1023_v6 = vpop.f32.mrf.mxu0 }
 0x186   : > { %v1188_v13 = vpop.f32.mrf.mxu1  ;;  %v1024_v14 = vadd.f32 %v1023_v6, %v2341_v25 }
 0x187   : > { %v1025_v16 = vpop.f32.mrf.mxu0 }
 0x188   : > { %v1190_v17 = vpop.f32.mrf.mxu1  ;;  %v2385_v19 = vadd.f32 %v1188_v13, %v1024_v14 }
 0x189   : > { %v1028_v15 = vpop.f32.mrf.mxu0 }
 0x18a   : > { %v1193_v21 = vpop.f32.mrf.mxu1  ;;  %v1029_v22 = vadd.f32 %v1028_v15, %v2343_v29 }
 0x18b   : > { %v1030_v23 = vpop.f32.mrf.mxu0 }
 0x18c   : > { %v1195_v26 = vpop.f32.mrf.mxu1  ;;  %v2388_v27 = vadd.f32 %v1193_v21, %v1029_v22 }
 0x18d   : > { %v1033_v20 = vpop.f32.mrf.mxu0 }
 0x18e   : > { %v1198_v0 = vpop.f32.mrf.mxu1  ;;  %v1034_v28 = vadd.f32 %v1033_v20, %v2345_v34 }
 0x18f   : > { %v1035_v31 = vpop.f32.mrf.mxu0 }
 0x190   : > { %v1200_v32 = vpop.f32.mrf.mxu1  ;;  %v2391_v33 = vadd.f32 %v1198_v0, %v1034_v28 }
 0x191   : > { %v1038_v25 = vpop.f32.mrf.mxu0 }
 0x192   : > { %v1203_v35 = vpop.f32.mrf.mxu1  ;;  %v1039_v37 = vadd.f32 %v1038_v25, %v2347_v39 }
 0x193   : > { %v1040_v38 = vpop.f32.mrf.mxu0 }
 0x194   : > { %v1205_v40 = vpop.f32.mrf.mxu1  ;;  %v2394_v41 = vadd.f32 %v1203_v35, %v1039_v37 }
 0x195   : > { %v1043_v29 = vpop.f32.mrf.mxu0 }
 0x196   : > { %v2396_v43 = vpop.f32.mrf.mxu1 }
 0x197   : > { %v1045_v45 = vpop.f32.mrf.mxu0 }
 0x198   : > { %v1210_v46 = vpop.f32.mrf.mxu1 }
 0x199   : > { %v1048_v47 = vpop.f32.mrf.mxu0 }
 0x19a   : > { %v1213_v50 = vpop.f32.mrf.mxu1  ;;  %v1049_v34 = vadd.f32 %v1048_v47, %v2351_v49 }
 0x19b   : > { %v1050_v51 = vpop.f32.mrf.mxu0 }
 0x19c   : > { %v1215_v52 = vpop.f32.mrf.mxu1  ;;  %v2399_v53 = vadd.f32 %v1213_v50, %v1049_v34 }
 0x19d   : > { %v2401_v55 = vpop.f32.mrf.mxu0 }
 0x19e   : > { %v2403_v39 = vpop.f32.mrf.mxu1 }
 0x19f   : > { %v1055_v56 = vpop.f32.mrf.mxu0 }
 0x1a0   : > { %v1220_v57 = vpop.f32.mrf.mxu1 }
 0x1a1   : > { %v1058_v60 = vpop.f32.mrf.mxu0 }
 0x1a2   : > { %v1223_v61 = vpop.f32.mrf.mxu1  ;;  %v1059_v57 = vadd.f32 %v1058_v60, %v2355_v59  ;;  %v2434_v60 = vld [vmem:[%s274_s29] ss:$0 sm:$0xff] }
 0x1a3   : > { %v1060_v62 = vpop.f32.mrf.mxu0 }
 0x1a4   : > { %v1225_v63 = vpop.f32.mrf.mxu1  ;;  %v1044_v62 = vadd.f32 %v1043_v29, %v2349_v44 }
 0x1a5   : > { %v1063_v2 = vpop.f32.mrf.mxu0 }
 0x1a6   : > { %v1228_v4 = vpop.f32.mrf.mxu1  ;;  %v1064_v51 = vadd.f32 %v1063_v2, %v2357_v1 }
 0x1a7   : > { %v1065_v5 = vpop.f32.mrf.mxu0 }
 0x1a8   : > { %v1230_v8 = vpop.f32.mrf.mxu1 }
 0x1a9   : > { %v1068_v9 = vpop.f32.mrf.mxu0  ;;  %v1229_v8 = vadd.f32 %v1228_v4, %v1064_v51  ;;  %v2438_v4 = vadd.f32 %v2396_v43, %v1044_v62 }
 0x1aa   : > { %v1233_v49 = vpop.f32.mrf.mxu1  ;;  %v1069_v1 = vadd.f32 %v1068_v9, %v2359_v7 }
 0x1ab   : > { %v1070_v10 = vpop.f32.mrf.mxu0 }
 0x1ac   : > { %v1235_v6 = vpop.f32.mrf.mxu1 }
 0x1ad   : > { %v1073_v13 = vpop.f32.mrf.mxu0 }
 0x1ae   : > { %v1238_v14 = vpop.f32.mrf.mxu1  ;;  %v1074_v2 = vadd.f32 %v1073_v13, %v2361_v12 }
 0x1af   : > { %v1075_v16 = vpop.f32.mrf.mxu0 }
 0x1b0   : > { %v1240_v17 = vpop.f32.mrf.mxu1  ;;  %v1224_v16 = vadd.f32 %v1223_v61, %v1059_v57 }
 0x1b1   : > { %v1078_v15 = vpop.f32.mrf.mxu0  ;;  %v2440_v17 = vld [vmem:[%s277_s6] ss:$0 sm:$0xff] }
 0x1b2   : > { %v2405_v21 = vpop.f32.mrf.mxu1  ;;  %v1079_v61 = vadd.f32 %v1078_v15, %v2363_v18 }
 0x1b3   : > { %v1080_v22 = vpop.f32.mrf.mxu0 }
 0x1b4   : > { %v1245_v23 = vpop.f32.mrf.mxu1 }
 0x1b5   : > { %v1083_v26 = vpop.f32.mrf.mxu0  ;;  %v1234_v23 = vadd.f32 %v1233_v49, %v1069_v1 }
 0x1b6   : > { %v1248_v20 = vpop.f32.mrf.mxu1  ;;  %v1084_v10 = vadd.f32 %v1083_v26, %v2365_v24  ;;  %v1239_v26 = vadd.f32 %v1238_v14, %v1074_v2 }
 0x1b7   : > { %v1085_v0 = vpop.f32.mrf.mxu0 }
 0x1b8   : > { %v1250_v28 = vpop.f32.mrf.mxu1 }
 0x1b9   : > { %v1088_v31 = vpop.f32.mrf.mxu0 }
 0x1ba   : > { %v2407_v32 = vpop.f32.mrf.mxu1  ;;  %v1089_v18 = vadd.f32 %v1088_v31, %v2367_v30  ;;  %v1054_v30 = vadd.f32 %v2401_v55, %v2353_v54 }
 0x1bb   : > { %v1090_v25 = vpop.f32.mrf.mxu0 }
 0x1bc   : > { %v1255_v35 = vpop.f32.mrf.mxu1  ;;  %v1254_v54 = vadd.f32 %v2407_v32, %v1089_v18 }
 0x1bd   : > { %v1093_v37 = vpop.f32.mrf.mxu0 }
 0x1be   : > { %v2409_v38 = vpop.f32.mrf.mxu1  ;;  %v1094_v14 = vadd.f32 %v1093_v37, %v2369_v36  ;;  %v1244_v36 = vadd.f32 %v2405_v21, %v1079_v61 }
 0x1bf   : > { %v1095_v40 = vpop.f32.mrf.mxu0 }
 0x1c0   : > { %v1260_v45 = vpop.f32.mrf.mxu1  ;;  %v1259_v55 = vadd.f32 %v2409_v38, %v1094_v14 }
 0x1c1   : > { %v2411_v46 = vpop.f32.mrf.mxu0 }
 0x1c2   : > { %v2413_v47 = vpop.f32.mrf.mxu1  ;;  %v1099_v32 = vadd.f32 %v2411_v46, %v2371_v42 }
 0x1c3   : > { %v1100_v50 = vpop.f32.mrf.mxu0 }
 0x1c4   : > { %v1265_v34 = vpop.f32.mrf.mxu1  ;;  %v1264_v61 = vadd.f32 %v2413_v47, %v1099_v32 }
 0x1c5   : > { %v2416_v52 = vpop.f32.mrf.mxu0 }
 0x1c6   : > { %v2418_v56 = vpop.f32.mrf.mxu1  ;;  %v1104_v38 = vadd.f32 %v2416_v52, %v2373_v48  ;;  %v1219_v48 = vadd.f32 %v2403_v39, %v1054_v30 }
 0x1c7   : > { %v1105_v63 = vpop.f32.mrf.mxu0 }
 0x1c8   : > { %v1270_v5 = vpop.f32.mrf.mxu1  ;;  %v1269_v39 = vadd.f32 %v2418_v56, %v1104_v38 }
 0x1c9   : > { %v1713_v59 = vpop.f32.mrf.mxu0 }
 0x1ca   : > { %v1728_v6 = vpop.f32.mrf.mxu1  ;;  %v1344_v44 = vadd.f32 %v1713_v59, %v2379_v3  ;;  %v1249_v3 = vadd.f32 %v1248_v20, %v1084_v10 }
 0x1cb   : > { %v1394_v29 = vadd.f32 %v1728_v6, %v1229_v8  ;;  %v1338_v22 = vpop.f32.mrf.mxu0 }
 0x1cc   : > { %v1388_v7 = vpop.f32.mrf.mxu1  ;;  %v1445_v12 = vmul.f32 %v2434_v60, %v1344_v44  ;;  %v1339_v9 = vadd.f32 %v1338_v22, %v2376_v58 }
 0x1cd   : > { %v1455_v24 = vmul.f32 %v2434_v60, %v1394_v29  ;;  %v1389_v13 = vadd.f32 %v1388_v7, %v1224_v16  ;;  %v1716_v43 = vpop.f32.mrf.mxu0 }
 0x1ce   : > { %v1731_v0 = vpop.f32.mrf.mxu1  ;;  %v1472_v28 = vadd.f32 %v2440_v17, %v1445_v12  ;;  %v1444_v58 = vmul.f32 %v2434_v60, %v1339_v9  ;;  %v1354_v15 = vadd.f32 %v1716_v43, %v2385_v19 }
 0x1cf   : > { %v1482_v25 = vadd.f32 %v2440_v17, %v1455_v24  ;;  %v1454_v49 = vmul.f32 %v2434_v60, %v1389_v13  ;;  %v1404_v20 = vadd.f32 %v1731_v0, %v1239_v26  ;;  %v1348_v35 = vpop.f32.mrf.mxu0 }
 0x1d0   : > { %v1398_v40 = vpop.f32.mrf.mxu1  ;;  %1492 = vst [vmem:[%s2449_s10 + $0x8] sm:$0xff] %v1472_v28  ;;  %v1471_v45 = vadd.f32 %v2440_v17, %v1444_v58  ;;  %v1349_v34 = vadd.f32 %v1348_v35, %v2382_v11  ;;  %v1447_v19 = vmul.f32 %v2434_v60, %v1354_v15 }
 0x1d1   : > { %1502 = vst [vmem:[%s2449_s10 + $0x58] sm:$0xff] %v1482_v25  ;;  %v1481_v50 = vadd.f32 %v2440_v17, %v1454_v49  ;;  %v1399_v51 = vadd.f32 %v1398_v40, %v1234_v23  ;;  %v1457_v31 = vmul.f32 %v2434_v60, %v1404_v20  ;;  %v1719_v37 = vpop.f32.mrf.mxu0 }
 0x1d2   : > { %v1734_v57 = vpop.f32.mrf.mxu1  ;;  %1491 = vst [vmem:[%s2449_s10] sm:$0xff] %v1471_v45  ;;  %v1446_v62 = vmul.f32 %v2434_v60, %v1349_v34  ;;  %v1364_v11 = vadd.f32 %v1719_v37, %v2391_v33  ;;  %v1474_v21 = vadd.f32 %v2440_v17, %v1447_v19 }
 0x1d3   : > { %1501 = vst [vmem:[%s2449_s10 + $0x50] sm:$0xff] %v1481_v50  ;;  %v1456_v63 = vmul.f32 %v2434_v60, %v1399_v51  ;;  %v1414_v5 = vadd.f32 %v1734_v57, %v1249_v3  ;;  %v1484_v8 = vadd.f32 %v2440_v17, %v1457_v31  ;;  %v1358_v1 = vpop.f32.mrf.mxu0 }
 0x1d4   : > { %v1408_v2 = vpop.f32.mrf.mxu1  ;;  %v1473_v10 = vadd.f32 %v2440_v17, %v1446_v62  ;;  %v1449_v6 = vmul.f32 %v2434_v60, %v1364_v11  ;;  %1494 = vst [vmem:[%s2449_s10 + $0x18] sm:$0xff] %v1474_v21  ;;  %v1359_v16 = vadd.f32 %v1358_v1, %v2388_v27 }
 0x1d5   : > { %v1483_v59 = vadd.f32 %v2440_v17, %v1456_v63  ;;  %v1459_v33 = vmul.f32 %v2434_v60, %v1414_v5  ;;  %1504 = vst [vmem:[%s2449_s10 + $0x68] sm:$0xff] %v1484_v8  ;;  %v1409_v44 = vadd.f32 %v1408_v2, %v1244_v36  ;;  %v1722_v29 = vpop.f32.mrf.mxu0 }
 0x1d6   : > { %v1737_v22 = vpop.f32.mrf.mxu1  ;;  %1493 = vst [vmem:[%s2449_s10 + $0x10] sm:$0xff] %v1473_v10  ;;  %v1476_v7 = vadd.f32 %v2440_v17, %v1449_v6  ;;  %v1374_v42 = vadd.f32 %v1722_v29, %v2438_v4  ;;  %v1448_v52 = vmul.f32 %v2434_v60, %v1359_v16 }
 0x1d7   : > { %1503 = vst [vmem:[%s2449_s10 + $0x60] sm:$0xff] %v1483_v59  ;;  %v1486_v12 = vadd.f32 %v2440_v17, %v1459_v33  ;;  %v1424_v46 = vadd.f32 %v1737_v22, %v1259_v55  ;;  %v1458_v24 = vmul.f32 %v2434_v60, %v1409_v44  ;;  %v1368_v27 = vpop.f32.mrf.mxu0 }
 0x1d8   : > { %v1418_v9 = vpop.f32.mrf.mxu1  ;;  %1496 = vst [vmem:[%s2449_s10 + $0x28] sm:$0xff] %v1476_v7  ;;  %v1451_v13 = vmul.f32 %v2434_v60, %v1374_v42  ;;  %v1369_v26 = vadd.f32 %v1368_v27, %v2394_v41  ;;  %v1475_v3 = vadd.f32 %v2440_v17, %v1448_v52 }
 0x1d9   : > { %1506 = vst [vmem:[%s2449_s10 + $0x78] sm:$0xff] %v1486_v12  ;;  %v1461_v23 = vmul.f32 %v2434_v60, %v1424_v46  ;;  %v1419_v4 = vadd.f32 %v1418_v9, %v1254_v54  ;;  %v1485_v43 = vadd.f32 %v2440_v17, %v1458_v24  ;;  %v1725_v0 = vpop.f32.mrf.mxu0 }
 0x1da   : > { %v1740_v28 = vpop.f32.mrf.mxu1  ;;  %v1478_v25 = vadd.f32 %v2440_v17, %v1451_v13  ;;  %v1450_v49 = vmul.f32 %v2434_v60, %v1369_v26  ;;  %1495 = vst [vmem:[%s2449_s10 + $0x20] sm:$0xff] %v1475_v3  ;;  %v1384_v47 = vadd.f32 %v1725_v0, %v1219_v48 }
 0x1db   : > { %v1488_v58 = vadd.f32 %v2440_v17, %v1461_v23  ;;  %v1460_v41 = vmul.f32 %v2434_v60, %v1419_v4  ;;  %1505 = vst [vmem:[%s2449_s10 + $0x70] sm:$0xff] %v1485_v43  ;;  %v1434_v56 = vadd.f32 %v1740_v28, %v1269_v39  ;;  %v1378_v18 = vpop.f32.mrf.mxu0 }
 0x1dc   : > { %v1428_v14 = vpop.f32.mrf.mxu1  ;;  %1498 = vst [vmem:[%s2449_s10 + $0x38] sm:$0xff] %v1478_v25  ;;  %v1477_v15 = vadd.f32 %v2440_v17, %v1450_v49  ;;  %v1379_v35 = vadd.f32 %v1378_v18, %v2399_v53  ;;  %v1453_v45 = vmul.f32 %v2434_v60, %v1384_v47 }
 0x1dd   : > { %1508 = vst [vmem:[%s2449_s10 + $0x88] sm:$0xff] %v1488_v58  ;;  %v1487_v20 = vadd.f32 %v2440_v17, %v1460_v41  ;;  %v1429_v40 = vadd.f32 %v1428_v14, %v1264_v61  ;;  %v1463_v50 = vmul.f32 %v2434_v60, %v1434_v56 }
 0x1de   : > { %1497 = vst [vmem:[%s2449_s10 + $0x30] sm:$0xff] %v1477_v15  ;;  %v1452_v34 = vmul.f32 %v2434_v60, %v1379_v35  ;;  %v1480_v30 = vadd.f32 %v2440_v17, %v1453_v45 }
 0x1df   : > { %1507 = vst [vmem:[%s2449_s10 + $0x80] sm:$0xff] %v1487_v20  ;;  %v1462_v51 = vmul.f32 %v2434_v60, %v1429_v40  ;;  %v1490_v36 = vadd.f32 %v2440_v17, %v1463_v50 }
 0x1e0   : > { %v1479_v19 = vadd.f32 %v2440_v17, %v1452_v34  ;;  %1500 = vst [vmem:[%s2449_s10 + $0x48] sm:$0xff] %v1480_v30 }
 0x1e1   : > { %v1489_v31 = vadd.f32 %v2440_v17, %v1462_v51  ;;  %1510 = vst [vmem:[%s2449_s10 + $0x98] sm:$0xff] %v1490_v36 }
 0x1e2   : > { %1499 = vst [vmem:[%s2449_s10 + $0x40] sm:$0xff] %v1479_v19 }
 0x1e3   : > { %1509 = vst [vmem:[%s2449_s10 + $0x90] sm:$0xff] %v1489_v31 }
 0x1e4 PF: > { %s14_s17 = sadd.s32 1, %s1823_s17   ;;  %s2544_s15 = smov %s1819_s16 }
 0x1e5   : > { %p11_p5 = scmp.ge.s32.totalorder %s14_s17, 4   ;;  %s2545_s16 = smov %s2547_s18 }
 0x1e7   :  { %13 = sbr.rel (!%p11_p5) target bundleno = 2 (0x2), region = 75 }

// kernel: hcat_forward.11
= control target key start
LH: loop header
LB: loop body
LE: loop exit
PB: predicated region body
PF: predicated region fallthrough
CT: control target
= control target key end

     0   :  { %v504_v0 = vmov 0.0   ;;  %vm108_vm0 = vcmask 1041409   ;;  %vm505_vm1 = vmmov 0   ;;  %vm272_vm2 = vcmask 58368   ;;  %s742_s2 = inlined_call_operand.vmem [shape: f32[256,8], index: 2, kind: input, shape index: {}]   ;;  %s743_s1 = inlined_call_operand.vmem [shape: f32[2,16,128], index: 1, kind: input, shape index: {}]   ;;  %s744_s0 = inlined_call_operand.vmem [shape: f32[2,16,128], index: 0, kind: input, shape index: {}]   ;;  %s745_s5 = inlined_call_operand.<no memory space> [shape: f32[1,1], index: 5, kind: input, shape index: {}]   ;;  %s746_s3 = inlined_call_operand.vmem [shape: f32[1,8], index: 3, kind: input, shape index: {}]   ;;  %s747_s4 = inlined_call_operand.vmem [shape: f32[1,8], index: 4, kind: input, shape index: {}]   ;;  %s748_s9 = inlined_call_operand.vmem [shape: f32[2,1], index: 9, kind: output, shape index: {1}]   ;;  %s749_s7 = inlined_call_operand.vmem [shape: f32[2,768], index: 7, kind: input, shape index: {}]   ;;  %s750_s6 = inlined_call_operand.vmem [shape: f32[2,768], index: 6, kind: input, shape index: {}]   ;;  %s751_s8 = inlined_call_operand.vmem [shape: f32[2,768], index: 8, kind: output, shape index: {0}]  }
   0x1   :  { %424 = vmatprep.subr.mxu0 %v504_v0  ;;  %459 = vmatprep.subr.mxu1 %v504_v0  ;;  %v105_v1 = vld [vmem:[%s742_s2 + $0xf8] sm:$0xff]  ;;  %v104_v3 = vld [vmem:[%s742_s2 + $0xf0] sm:$0xff]  ;;  %v103_v5 = vld [vmem:[%s742_s2 + $0xe8] sm:$0xff]  ;;  %vm290_vm3 = vcmask 1024  }
   0x2   :  { %v89_v2 = vld [vmem:[%s742_s2 + $0x78] sm:$0xff]  ;;  %425 = vmatpush3.msra.mxu0 %v105_v1  ;;  %v88_v4 = vld [vmem:[%s742_s2 + $0x70] sm:$0xff]  ;;  %v87_v6 = vld [vmem:[%s742_s2 + $0x68] sm:$0xff]  ;;  %456 = vmatprep.mubr.msk.f32.mxu0 %vm505_vm1, %v504_v0 }
   0x3   :  { %460 = vmatpush3.msra.mxu1 %v89_v2  ;;  %426 = vmatprep.subr.mxu0 %v504_v0  ;;  %v102_v7 = vld [vmem:[%s742_s2 + $0xe0] sm:$0xff]  ;;  %v101_v9 = vld [vmem:[%s742_s2 + $0xd8] sm:$0xff]  ;;  %v100_v11 = vld [vmem:[%s742_s2 + $0xd0] sm:$0xff] }
   0x4   :  { %461 = vmatprep.subr.mxu1 %v504_v0  ;;  %427 = vmatpush3.msra.mxu0 %v104_v3  ;;  %v86_v8 = vld [vmem:[%s742_s2 + $0x60] sm:$0xff]  ;;  %v85_v10 = vld [vmem:[%s742_s2 + $0x58] sm:$0xff]  ;;  %v84_v12 = vld [vmem:[%s742_s2 + $0x50] sm:$0xff] }
   0x5   :  { %462 = vmatpush3.msra.mxu1 %v88_v4  ;;  %428 = vmatprep.subr.mxu0 %v504_v0  ;;  %v99_v13 = vld [vmem:[%s742_s2 + $0xc8] sm:$0xff]  ;;  %v98_v15 = vld [vmem:[%s742_s2 + $0xc0] sm:$0xff]  ;;  %v56_v19 = vld [vmem:[%s743_s1 + $0x10] sm:$0xff] }
   0x6   :  { %463 = vmatprep.subr.mxu1 %v504_v0  ;;  %429 = vmatpush3.msra.mxu0 %v103_v5  ;;  %v83_v14 = vld [vmem:[%s742_s2 + $0x48] sm:$0xff]  ;;  %v82_v16 = vld [vmem:[%s742_s2 + $0x40] sm:$0xff]  ;;  %v57_v20 = vld [vmem:[%s743_s1 + $0x18] sm:$0xff] }
   0x7   :  { %464 = vmatpush3.msra.mxu1 %v87_v6  ;;  %430 = vmatprep.subr.mxu0 %v504_v0  ;;  %v54_v17 = vld [vmem:[%s743_s1] sm:$0xff]  ;;  %v55_v18 = vld [vmem:[%s743_s1 + $0x8] sm:$0xff]  ;;  %v65_v22 = vadd.f32 %v57_v20, %v56_v19  ;;  %v35_v25 = vld [vmem:[%s744_s0 + $0x10] sm:$0xff] }
   0x8   :  { %465 = vmatprep.subr.mxu1 %v504_v0  ;;  %431 = vmatpush3.msra.mxu0 %v102_v7  ;;  %v58_v21 = vadd.f32 %v55_v18, %v54_v17  ;;  %v33_v23 = vld [vmem:[%s744_s0] sm:$0xff]  ;;  %v34_v24 = vld [vmem:[%s744_s0 + $0x8] sm:$0xff]  ;;  %v36_v26 = vld [vmem:[%s744_s0 + $0x18] sm:$0xff] }
   0x9   :  { %466 = vmatpush3.msra.mxu1 %v86_v8  ;;  %432 = vmatprep.subr.mxu0 %v504_v0  ;;  %v37_v27 = vadd.f32 %v34_v24, %v33_v23  ;;  %v97_v28 = vld [vmem:[%s742_s2 + $0xb8] sm:$0xff]  ;;  %v66_v31 = vrot.slane %v65_v22, 4  ;;  %v44_v32 = vadd.f32 %v36_v26, %v35_v25  ;;  %v96_v34 = vld [vmem:[%s742_s2 + $0xb0] sm:$0xff]  ;;  %v95_v40 = vld [vmem:[%s742_s2 + $0xa8] sm:$0xff]  ;;  %v506_v23 = vmov 0  }
   0xa   :  { %467 = vmatprep.subr.mxu1 %v504_v0  ;;  %433 = vmatpush3.msra.mxu0 %v101_v9  ;;  %v81_v29 = vld [vmem:[%s742_s2 + $0x38] sm:$0xff]  ;;  %v59_v30 = vrot.slane %v58_v21, 4  ;;  %v80_v35 = vld [vmem:[%s742_s2 + $0x30] sm:$0xff]  ;;  %v79_v41 = vld [vmem:[%s742_s2 + $0x28] sm:$0xff] }
   0xb   :  { %468 = vmatpush3.msra.mxu1 %v85_v10  ;;  %434 = vmatprep.subr.mxu0 %v504_v0  ;;  %v38_v33 = vrot.slane %v37_v27, 4  ;;  %v67_v37 = vadd.f32 %v66_v31, %v65_v22  ;;  %v45_v38 = vrot.slane %v44_v32, 4  ;;  %v94_v46 = vld [vmem:[%s742_s2 + $0xa0] sm:$0xff]  ;;  %v93_v52 = vld [vmem:[%s742_s2 + $0x98] sm:$0xff]  ;;  %v92_v58 = vld [vmem:[%s742_s2 + $0x90] sm:$0xff] }
   0xc   :  { %469 = vmatprep.subr.mxu1 %v504_v0  ;;  %435 = vmatpush3.msra.mxu0 %v100_v11  ;;  %v60_v36 = vadd.f32 %v59_v30, %v58_v21  ;;  %v78_v47 = vld [vmem:[%s742_s2 + $0x20] sm:$0xff]  ;;  %v77_v53 = vld [vmem:[%s742_s2 + $0x18] sm:$0xff]  ;;  %v76_v59 = vld [vmem:[%s742_s2 + $0x10] sm:$0xff]  ;;  %v507_v31 = vmov 1983009808  }
   0xd   :  { %470 = vmatpush3.msra.mxu1 %v84_v12  ;;  %436 = vmatprep.subr.mxu0 %v504_v0  ;;  %v39_v39 = vadd.f32 %v38_v33, %v37_v27  ;;  %v68_v43 = vrot.slane %v67_v37, 2  ;;  %v46_v44 = vadd.f32 %v45_v38, %v44_v32  ;;  %v91_v1 = vld [vmem:[%s742_s2 + $0x88] sm:$0xff]  ;;  %v90_v7 = vld [vmem:[%s742_s2 + $0x80] sm:$0xff]  ;;  %v15_v12 = vstv %s745_s5 }
   0xe   :  { %471 = vmatprep.subr.mxu1 %v504_v0  ;;  %437 = vmatpush3.msra.mxu0 %v99_v13  ;;  %v61_v42 = vrot.slane %v60_v36, 2  ;;  %v75_v2 = vld [vmem:[%s742_s2 + $0x8] sm:$0xff]  ;;  %v74_v9 = vld [vmem:[%s742_s2] sm:$0xff]  ;;  %16 = vst [vmem:[#allocation2] sm:$0x1] %v15_v12  ;;  %v305_v32 = vunpack.c.l.s4 %v507_v31  ;;  %v307_v33 = vlaneseq }
   0xf   :  { %472 = vmatpush3.msra.mxu1 %v83_v14  ;;  %438 = vmatprep.subr.mxu0 %v504_v0  ;;  %v40_v45 = vrot.slane %v39_v39, 2  ;;  %v69_v49 = vadd.f32 %v68_v43, %v67_v37  ;;  %v47_v50 = vrot.slane %v46_v44, 2 }
  0x10   :  { %473 = vmatprep.subr.mxu1 %v504_v0  ;;  %439 = vmatpush3.msra.mxu0 %v98_v15  ;;  %v62_v48 = vadd.f32 %v61_v42, %v60_v36  ;;  %v385_v15 = vld [vmem:[%s746_s3] ss:$0 sm:$0xff] }
  0x11   :  { %474 = vmatpush3.msra.mxu1 %v82_v16  ;;  %440 = vmatprep.subr.mxu0 %v504_v0  ;;  %v41_v51 = vadd.f32 %v40_v45, %v39_v39  ;;  %v70_v55 = vrot.slane %v69_v49, 1  ;;  %v48_v56 = vadd.f32 %v47_v50, %v46_v44  ;;  %v294_v36 = vld [vmem:[%s749_s7] sm:$0xff] }
  0x12   :  { %475 = vmatprep.subr.mxu1 %v504_v0  ;;  %441 = vmatpush3.msra.mxu0 %v97_v28  ;;  %v63_v54 = vrot.slane %v62_v48, 1  ;;  %v303_v37 = vcombine.high %v294_v36, %v294_v36 }
  0x13   :  { %476 = vmatpush3.msra.mxu1 %v81_v29  ;;  %442 = vmatprep.subr.mxu0 %v504_v0  ;;  %v42_v57 = vrot.slane %v41_v51, 1  ;;  %v71_v61 = vadd.f32 %v70_v55, %v69_v49  ;;  %v49_v62 = vrot.slane %v48_v56, 1  ;;  %v293_v55 = vld [vmem:[%s750_s6 + $0x8] sm:$0xf] }
  0x14   :  { %477 = vmatprep.subr.mxu1 %v504_v0  ;;  %443 = vmatpush3.msra.mxu0 %v96_v34  ;;  %v64_v60 = vadd.f32 %v63_v54, %v62_v48  ;;  %v306_v34 = vunpack.c.0.s8 %v305_v32 }
  0x15   :  { %478 = vmatpush3.msra.mxu1 %v80_v35  ;;  %444 = vmatprep.subr.mxu0 %v504_v0  ;;  %v43_v63 = vadd.f32 %v42_v57, %v41_v51  ;;  %v73_v4 = vmul.f32 0.0625, %v71_v61  ;;  %v50_v5 = vadd.f32 %v49_v62, %v48_v56  ;;  %v387_v24 = vld [vmem:[#allocation2] ss:$0 sm:$0xff]  ;;  %v308_v35 = vshrl.u32 %v307_v33, 7 }
  0x16   :  { %479 = vmatprep.subr.mxu1 %v504_v0  ;;  %445 = vmatpush3.msra.mxu0 %v95_v40  ;;  %v72_v3 = vmul.f32 0.0625, %v64_v60 }
  0x17   :  { %480 = vmatpush3.msra.mxu1 %v79_v41  ;;  %446 = vmatprep.subr.mxu0 %v504_v0  ;;  %v52_v6 = vmul.f32 0.0625, %v43_v63  ;;  %v53_v8 = vmul.f32 0.0625, %v50_v5  ;;  %v309_v38 = vsub.s32 %v306_v34, %v308_v35  ;;  %v389_v41 = vld.sshfl [vmem:[%s749_s7 + $0x8] sm:$0x33 pattern:$0x76325410] }
  0x18   :  { %481 = vmatprep.subr.mxu1 %v504_v0  ;;  %447 = vmatpush3.msra.mxu0 %v94_v46  ;;  %v109_v10 = vsel %vm108_vm0, %v73_v4, %v72_v3  ;;  %v327_v44 = vcombine.high %v389_v41, %v389_v41 }
  0x19   :  { %482 = vmatpush3.msra.mxu1 %v78_v47  ;;  %448 = vmatprep.subr.mxu0 %v504_v0  ;;  %v183_v11 = vsel %vm108_vm0, %v53_v8, %v52_v6  ;;  %v310_v39 = vrot.slane %v294_v36, %v309_v38  ;;  %v317_v40 = vrot.slane %v303_v37, %v309_v38 }
  0x1a   :  { %483 = vmatprep.subr.mxu1 %v504_v0  ;;  %449 = vmatpush3.msra.mxu0 %v93_v52 }
  0x1b   :  { %484 = vmatpush3.msra.mxu1 %v77_v53  ;;  %450 = vmatprep.subr.mxu0 %v504_v0  ;;  %v318_v42 = vcombine.high %v310_v39, %v310_v39  ;;  %v319_v43 = vcombine.high %v317_v40, %v317_v40 }
  0x1c   :  { %485 = vmatprep.subr.mxu1 %v504_v0  ;;  %451 = vmatpush3.msra.mxu0 %v92_v58  ;;  %v292_v58 = vld [vmem:[%s750_s6] sm:$0xff] }
  0x1d   :  { %486 = vmatpush3.msra.mxu1 %v76_v59  ;;  %452 = vmatprep.subr.mxu0 %v504_v0 }
  0x1e   :  { %487 = vmatprep.subr.mxu1 %v504_v0  ;;  %453 = vmatpush3.msra.mxu0 %v91_v1 }
  0x1f   :  { %488 = vmatpush3.msra.mxu1 %v75_v2  ;;  %454 = vmatprep.subr.mxu0 %v504_v0 }
  0x20   :  { %489 = vmatprep.subr.mxu1 %v504_v0  ;;  %455 = vmatpush3.msra.mxu0 %v90_v7 }
  0x21   :  { %490 = vmatpush3.msra.mxu1 %v74_v9  ;;  %491 = vmatprep.mubr.msk.f32.mxu1 %vm505_vm1, %v504_v0  ;;  %v386_v0 = vld [vmem:[%s747_s4] ss:$0 sm:$0xff] }
  0x22   :  { %457 = vmatmul.mubr.f32.vlgmr.msra.gmra.mxu0 %v109_v10  ;;  %492 = vmatmul.mubr.f32.vlgmr.msra.gmra.mxu1 %v183_v11 }
  0x23   :  { %498 = vset.pattern.permute.xlu0 %v506_v23 }
  0xe2   :  { %v177_v13 = vpop.f32.mrf.mxu0  ;;  %v251_v14 = vpop.f32.mrf.mxu1 }
  0xe3   :  { %v252_v16 = vadd.f32 %v251_v14, %v177_v13 }
  0xe4   :  { %v458_v17 = vpop.f32.mrf.mxu0  ;;  %v493_v18 = vpop.f32.mrf.mxu1 }
  0xe5   :  { %v262_v19 = vadd.f32 %v385_v15, %v252_v16 }
  0xe7   :  { %v263_v20 = vmax.f32 %v262_v19, 0.0 }
  0xe9   :  { %v271_v21 = vmul.f32 %v386_v0, %v263_v20 }
  0xeb   :  { %v273_v22 = vsel %vm272_vm2, %v271_v21, 0.0 }
  0xec   :  { %274 = vadd.xlane.f32.xlu0 %v273_v22 }
 0x175   :  { %v275_v25 = vpop.xlane.xlu0 %274 }
 0x176   :  { %v283_v26 = vadd.f32 %v387_v24, %v275_v25 }
 0x178   :  { %v388_v27 = vmul.f32 -1.442695, %v283_v26 }
 0x17a   :  { %500 = vpow2.f32 %v388_v27 }
 0x187   :  { %v501_v28 = vpop.eup %500 }
 0x188   :  { %v287_v29 = vadd.f32 1.0, %v501_v28 }
 0x18a   :  { %502 = vrcp.f32 %v287_v29 }
 0x197   :  { %v503_v30 = vpop.eup %502 }
 0x198   :  { %291 = vst.msk [vmem:[%s748_s9] sm:$0x3] %vm290_vm3, %v503_v30  ;;  %298 = vperm.xlu0 %498, %v503_v30  }
 0x213   :  { %v299_v45 = vpop.permute.xlu0 %298 }
 0x214   :  { %v334_v46 = vmul.f32 %v310_v39, %v299_v45  ;;  %v335_v47 = vmul.f32 %v318_v42, %v299_v45  ;;  %v336_v48 = vmul.f32 %v317_v40, %v299_v45  ;;  %v337_v49 = vmul.f32 %v319_v43, %v299_v45 }
 0x215   :  { %v338_v50 = vmul.f32 %v389_v41, %v299_v45  ;;  %v339_v51 = vmul.f32 %v327_v44, %v299_v45 }
 0x216   :  { %v346_v52 = vcombine.low %v334_v46, %v335_v47  ;;  %v347_v53 = vcombine.low %v336_v48, %v337_v49 }
 0x217   :  { %v363_v54 = vcombine.low %v338_v50, %v339_v51 }
 0x218   :  { %v354_v56 = vrot.slane %v346_v52, %v309_v38  ;;  %v361_v57 = vrot.slane %v347_v53, %v309_v38 }
 0x219   :  { %v370_v59 = vrot.slane %v363_v54, %v309_v38 }
 0x21a   :  { %v362_v60 = vcombine.low %v354_v56, %v361_v57 }
 0x21b   :  { %v374_v61 = vadd.f32 %v370_v59, %v293_v55 }
 0x21c   :  { %v373_v62 = vadd.f32 %v362_v60, %v292_v58 }
 0x21d   :  { %376 = vst [vmem:[%s751_s8 + $0x8] sm:$0xf] %v374_v61 }
 0x21e   :  { %375 = vst [vmem:[%s751_s8] sm:$0xff] %v373_v62 }

// kernel: hcat_forward.12
= control target key start
LH: loop header
LB: loop body
LE: loop exit
PB: predicated region body
PF: predicated region fallthrough
CT: control target
= control target key end

     0   :  { %v788_v0 = vmov 0.0   ;;  %vm789_vm0 = vmmov 0   ;;  %vm156_vm1 = vcmask 1041409   ;;  %vm320_vm2 = vcmask 58368   ;;  %s1160_s2 = inlined_call_operand.vmem [shape: f32[256,8], index: 2, kind: input, shape index: {}]   ;;  %s1161_s1 = inlined_call_operand.vmem [shape: f32[2,64,128], index: 1, kind: input, shape index: {}]   ;;  %s1162_s0 = inlined_call_operand.vmem [shape: f32[2,64,128], index: 0, kind: input, shape index: {}]   ;;  %s1163_s5 = inlined_call_operand.<no memory space> [shape: f32[1,1], index: 5, kind: input, shape index: {}]   ;;  %s1164_s3 = inlined_call_operand.vmem [shape: f32[1,8], index: 3, kind: input, shape index: {}]   ;;  %s1165_s4 = inlined_call_operand.vmem [shape: f32[1,8], index: 4, kind: input, shape index: {}]   ;;  %s1166_s9 = inlined_call_operand.vmem [shape: f32[2,1], index: 9, kind: output, shape index: {1}]   ;;  %s1167_s7 = inlined_call_operand.vmem [shape: f32[2,3072], index: 7, kind: input, shape index: {}]   ;;  %s1168_s6 = inlined_call_operand.vmem [shape: f32[2,3072], index: 6, kind: input, shape index: {}]   ;;  %s1169_s8 = inlined_call_operand.vmem [shape: f32[2,3072], index: 8, kind: output, shape index: {0}]  }
   0x1   :  { %703 = vmatprep.subr.mxu0 %v788_v0  ;;  %738 = vmatprep.subr.mxu1 %v788_v0  ;;  %v153_v1 = vld [vmem:[%s1160_s2 + $0xf8] sm:$0xff]  ;;  %v152_v3 = vld [vmem:[%s1160_s2 + $0xf0] sm:$0xff]  ;;  %v151_v5 = vld [vmem:[%s1160_s2 + $0xe8] sm:$0xff]  ;;  %vm338_vm3 = vcmask 1024  }
   0x2   :  { %v137_v2 = vld [vmem:[%s1160_s2 + $0x78] sm:$0xff]  ;;  %704 = vmatpush3.msra.mxu0 %v153_v1  ;;  %v136_v4 = vld [vmem:[%s1160_s2 + $0x70] sm:$0xff]  ;;  %v135_v6 = vld [vmem:[%s1160_s2 + $0x68] sm:$0xff]  ;;  %735 = vmatprep.mubr.msk.f32.mxu0 %vm789_vm0, %v788_v0 }
   0x3   :  { %739 = vmatpush3.msra.mxu1 %v137_v2  ;;  %705 = vmatprep.subr.mxu0 %v788_v0  ;;  %v150_v7 = vld [vmem:[%s1160_s2 + $0xe0] sm:$0xff]  ;;  %v149_v9 = vld [vmem:[%s1160_s2 + $0xd8] sm:$0xff]  ;;  %v148_v11 = vld [vmem:[%s1160_s2 + $0xd0] sm:$0xff] }
   0x4   :  { %740 = vmatprep.subr.mxu1 %v788_v0  ;;  %706 = vmatpush3.msra.mxu0 %v152_v3  ;;  %v134_v8 = vld [vmem:[%s1160_s2 + $0x60] sm:$0xff]  ;;  %v133_v10 = vld [vmem:[%s1160_s2 + $0x58] sm:$0xff]  ;;  %v132_v12 = vld [vmem:[%s1160_s2 + $0x50] sm:$0xff] }
   0x5   :  { %741 = vmatpush3.msra.mxu1 %v136_v4  ;;  %707 = vmatprep.subr.mxu0 %v788_v0  ;;  %v147_v13 = vld [vmem:[%s1160_s2 + $0xc8] sm:$0xff]  ;;  %v78_v15 = vld [vmem:[%s1161_s1] sm:$0xff]  ;;  %v80_v17 = vld [vmem:[%s1161_s1 + $0x10] sm:$0xff] }
   0x6   :  { %742 = vmatprep.subr.mxu1 %v788_v0  ;;  %708 = vmatpush3.msra.mxu0 %v151_v5  ;;  %v131_v14 = vld [vmem:[%s1160_s2 + $0x48] sm:$0xff]  ;;  %v146_v18 = vld [vmem:[%s1160_s2 + $0xc0] sm:$0xff]  ;;  %v145_v20 = vld [vmem:[%s1160_s2 + $0xb8] sm:$0xff] }
   0x7   :  { %743 = vmatpush3.msra.mxu1 %v135_v6  ;;  %709 = vmatprep.subr.mxu0 %v788_v0  ;;  %v79_v16 = vld [vmem:[%s1161_s1 + $0x8] sm:$0xff]  ;;  %v130_v19 = vld [vmem:[%s1160_s2 + $0x40] sm:$0xff]  ;;  %v81_v22 = vld [vmem:[%s1161_s1 + $0x18] sm:$0xff] }
   0x8   :  { %744 = vmatprep.subr.mxu1 %v788_v0  ;;  %710 = vmatpush3.msra.mxu0 %v150_v7  ;;  %v94_v21 = vadd.f32 %v79_v16, %v78_v15  ;;  %v86_v23 = vld [vmem:[%s1161_s1 + $0x40] sm:$0xff]  ;;  %v87_v24 = vld [vmem:[%s1161_s1 + $0x48] sm:$0xff]  ;;  %v129_v25 = vld [vmem:[%s1160_s2 + $0x38] sm:$0xff] }
   0x9   :  { %745 = vmatpush3.msra.mxu1 %v134_v8  ;;  %711 = vmatprep.subr.mxu0 %v788_v0  ;;  %v144_v26 = vld [vmem:[%s1160_s2 + $0xb0] sm:$0xff]  ;;  %v107_v29 = vadd.f32 %v87_v24, %v86_v23  ;;  %v82_v31 = vld [vmem:[%s1161_s1 + $0x20] sm:$0xff]  ;;  %v89_v32 = vld [vmem:[%s1161_s1 + $0x58] sm:$0xff] }
   0xa   :  { %746 = vmatprep.subr.mxu1 %v788_v0  ;;  %712 = vmatpush3.msra.mxu0 %v149_v9  ;;  %v88_v27 = vld [vmem:[%s1161_s1 + $0x50] sm:$0xff]  ;;  %v95_v28 = vadd.f32 %v94_v21, %v80_v17  ;;  %v143_v33 = vld [vmem:[%s1160_s2 + $0xa8] sm:$0xff]  ;;  %v33_v36 = vld [vmem:[%s1162_s0] sm:$0xff] }
   0xb   :  { %747 = vmatpush3.msra.mxu1 %v133_v10  ;;  %713 = vmatprep.subr.mxu0 %v788_v0  ;;  %v128_v30 = vld [vmem:[%s1160_s2 + $0x30] sm:$0xff]  ;;  %v108_v35 = vadd.f32 %v107_v29, %v88_v27  ;;  %v34_v37 = vld [vmem:[%s1162_s0 + $0x8] sm:$0xff]  ;;  %v90_v41 = vld [vmem:[%s1161_s1 + $0x60] sm:$0xff] }
   0xc   :  { %748 = vmatprep.subr.mxu1 %v788_v0  ;;  %714 = vmatpush3.msra.mxu0 %v148_v11  ;;  %v96_v34 = vadd.f32 %v95_v28, %v81_v22  ;;  %v35_v38 = vld [vmem:[%s1162_s0 + $0x10] sm:$0xff]  ;;  %v127_v39 = vld [vmem:[%s1160_s2 + $0x28] sm:$0xff]  ;;  %v49_v42 = vadd.f32 %v34_v37, %v33_v36  ;;  %v36_v46 = vld [vmem:[%s1162_s0 + $0x18] sm:$0xff] }
   0xd   :  { %749 = vmatpush3.msra.mxu1 %v132_v12  ;;  %715 = vmatprep.subr.mxu0 %v788_v0  ;;  %v83_v40 = vld [vmem:[%s1161_s1 + $0x28] sm:$0xff]  ;;  %v84_v43 = vld [vmem:[%s1161_s1 + $0x30] sm:$0xff]  ;;  %v109_v45 = vadd.f32 %v108_v35, %v89_v32  ;;  %v41_v47 = vld [vmem:[%s1162_s0 + $0x40] sm:$0xff] }
   0xe   :  { %750 = vmatprep.subr.mxu1 %v788_v0  ;;  %716 = vmatpush3.msra.mxu0 %v147_v13  ;;  %v97_v44 = vadd.f32 %v96_v34, %v82_v31  ;;  %v91_v48 = vld [vmem:[%s1161_s1 + $0x68] sm:$0xff]  ;;  %v43_v50 = vld [vmem:[%s1162_s0 + $0x50] sm:$0xff]  ;;  %v50_v51 = vadd.f32 %v49_v42, %v35_v38  ;;  %v142_v52 = vld [vmem:[%s1160_s2 + $0xa0] sm:$0xff] }
   0xf   :  { %751 = vmatpush3.msra.mxu1 %v131_v14  ;;  %717 = vmatprep.subr.mxu0 %v788_v0  ;;  %v42_v49 = vld [vmem:[%s1162_s0 + $0x48] sm:$0xff]  ;;  %v126_v53 = vld [vmem:[%s1160_s2 + $0x20] sm:$0xff]  ;;  %v110_v55 = vadd.f32 %v109_v45, %v90_v41  ;;  %v85_v58 = vld [vmem:[%s1161_s1 + $0x38] sm:$0xff] }
  0x10   :  { %752 = vmatprep.subr.mxu1 %v788_v0  ;;  %718 = vmatpush3.msra.mxu0 %v146_v18  ;;  %v98_v54 = vadd.f32 %v97_v44, %v83_v40  ;;  %v37_v56 = vld [vmem:[%s1162_s0 + $0x20] sm:$0xff]  ;;  %v62_v57 = vadd.f32 %v42_v49, %v41_v47  ;;  %v92_v59 = vld [vmem:[%s1161_s1 + $0x70] sm:$0xff]  ;;  %v44_v60 = vld [vmem:[%s1162_s0 + $0x58] sm:$0xff]  ;;  %v51_v61 = vadd.f32 %v50_v51, %v36_v46 }
  0x11   :  { %753 = vmatpush3.msra.mxu1 %v130_v19  ;;  %719 = vmatprep.subr.mxu0 %v788_v0  ;;  %v141_v62 = vld [vmem:[%s1160_s2 + $0x98] sm:$0xff]  ;;  %v111_v2 = vadd.f32 %v110_v55, %v91_v48  ;;  %v38_v3 = vld [vmem:[%s1162_s0 + $0x28] sm:$0xff]  ;;  %v45_v6 = vld [vmem:[%s1162_s0 + $0x60] sm:$0xff] }
  0x12   :  { %754 = vmatprep.subr.mxu1 %v788_v0  ;;  %720 = vmatpush3.msra.mxu0 %v145_v20  ;;  %v125_v63 = vld [vmem:[%s1160_s2 + $0x18] sm:$0xff]  ;;  %v99_v1 = vadd.f32 %v98_v54, %v84_v43  ;;  %v63_v4 = vadd.f32 %v62_v57, %v43_v50  ;;  %v52_v7 = vadd.f32 %v51_v61, %v37_v56  ;;  %v140_v8 = vld [vmem:[%s1160_s2 + $0x90] sm:$0xff]  ;;  %v46_v14 = vld [vmem:[%s1162_s0 + $0x68] sm:$0xff] }
  0x13   :  { %755 = vmatpush3.msra.mxu1 %v129_v25  ;;  %721 = vmatprep.subr.mxu0 %v788_v0  ;;  %v93_v5 = vld [vmem:[%s1161_s1 + $0x78] sm:$0xff]  ;;  %v124_v9 = vld [vmem:[%s1160_s2 + $0x10] sm:$0xff]  ;;  %v112_v11 = vadd.f32 %v111_v2, %v92_v59  ;;  %v139_v16 = vld [vmem:[%s1160_s2 + $0x88] sm:$0xff]  ;;  %v15_v59 = vstv %s1163_s5 }
  0x14   :  { %756 = vmatprep.subr.mxu1 %v788_v0  ;;  %722 = vmatpush3.msra.mxu0 %v144_v26  ;;  %v100_v10 = vadd.f32 %v99_v1, %v85_v58  ;;  %v39_v12 = vld [vmem:[%s1162_s0 + $0x30] sm:$0xff]  ;;  %v64_v13 = vadd.f32 %v63_v4, %v44_v60  ;;  %v53_v15 = vadd.f32 %v52_v7, %v38_v3  ;;  %v123_v17 = vld [vmem:[%s1160_s2 + $0x8] sm:$0xff]  ;;  %v40_v20 = vld [vmem:[%s1162_s0 + $0x38] sm:$0xff] }
  0x15   :  { %757 = vmatpush3.msra.mxu1 %v128_v30  ;;  %723 = vmatprep.subr.mxu0 %v788_v0  ;;  %v113_v19 = vadd.f32 %v112_v11, %v93_v5  ;;  %v47_v22 = vld [vmem:[%s1162_s0 + $0x70] sm:$0xff]  ;;  %v138_v24 = vld [vmem:[%s1160_s2 + $0x80] sm:$0xff]  ;;  %v48_v29 = vld [vmem:[%s1162_s0 + $0x78] sm:$0xff]  ;;  %16 = vst [vmem:[#allocation2] sm:$0x1] %v15_v59 }
  0x16   :  { %758 = vmatprep.subr.mxu1 %v788_v0  ;;  %724 = vmatpush3.msra.mxu0 %v143_v33  ;;  %v101_v18 = vrot.slane %v100_v10, 4  ;;  %v65_v21 = vadd.f32 %v64_v13, %v45_v6  ;;  %v54_v23 = vadd.f32 %v53_v15, %v39_v12  ;;  %v122_v28 = vld [vmem:[%s1160_s2] sm:$0xff] }
  0x17   :  { %759 = vmatpush3.msra.mxu1 %v127_v39  ;;  %725 = vmatprep.subr.mxu0 %v788_v0  ;;  %v114_v26 = vrot.slane %v113_v19, 4  ;;  %v666_v4 = vld [vmem:[%s1165_s4] ss:$0 sm:$0xff] }
  0x18   :  { %760 = vmatprep.subr.mxu1 %v788_v0  ;;  %726 = vmatpush3.msra.mxu0 %v142_v52  ;;  %v102_v25 = vadd.f32 %v101_v18, %v100_v10  ;;  %v66_v27 = vadd.f32 %v65_v21, %v46_v14  ;;  %v55_v30 = vadd.f32 %v54_v23, %v40_v20  ;;  %v367_v18 = vlaneseq  ;;  %v346_v21 = vld [vmem:[%s1167_s7] sm:$0xff]  ;;  %v348_v23 = vld [vmem:[%s1167_s7 + $0x10] sm:$0xff] }
  0x19   :  { %761 = vmatpush3.msra.mxu1 %v126_v53  ;;  %727 = vmatprep.subr.mxu0 %v788_v0  ;;  %v115_v32 = vadd.f32 %v114_v26, %v113_v19  ;;  %v351_v26 = vld [vmem:[%s1167_s7 + $0x28] sm:$0xff] }
  0x1a   :  { %762 = vmatprep.subr.mxu1 %v788_v0  ;;  %728 = vmatpush3.msra.mxu0 %v141_v62  ;;  %v103_v31 = vrot.slane %v102_v25, 2  ;;  %v67_v33 = vadd.f32 %v66_v27, %v47_v22  ;;  %v56_v34 = vrot.slane %v55_v30, 4  ;;  %v368_v20 = vshrl.u32 %v367_v18, 7  ;;  %v347_v22 = vld [vmem:[%s1167_s7 + $0x8] sm:$0xff] }
  0x1b   :  { %763 = vmatpush3.msra.mxu1 %v125_v63  ;;  %729 = vmatprep.subr.mxu0 %v788_v0  ;;  %v116_v36 = vrot.slane %v115_v32, 2  ;;  %v665_v63 = vld [vmem:[%s1164_s3] ss:$0 sm:$0xff]  ;;  %v363_v27 = vcombine.high %v346_v21, %v346_v21 }
  0x1c   :  { %764 = vmatprep.subr.mxu1 %v788_v0  ;;  %730 = vmatpush3.msra.mxu0 %v140_v8  ;;  %v104_v35 = vadd.f32 %v103_v31, %v102_v25  ;;  %v68_v37 = vadd.f32 %v67_v33, %v48_v29  ;;  %v57_v38 = vadd.f32 %v56_v34, %v55_v30  ;;  %v790_v8 = vmov 0   ;;  %v350_v25 = vld [vmem:[%s1167_s7 + $0x20] sm:$0xff] }
  0x1d   :  { %765 = vmatpush3.msra.mxu1 %v124_v9  ;;  %731 = vmatprep.subr.mxu0 %v788_v0  ;;  %v117_v40 = vadd.f32 %v116_v36, %v115_v32  ;;  %v667_v9 = vld [vmem:[#allocation2] ss:$0 sm:$0xff]  ;;  %v380_v29 = vcombine.high %v347_v22, %v347_v22  ;;  %v397_v30 = vcombine.high %v348_v23, %v348_v23 }
  0x1e   :  { %766 = vmatprep.subr.mxu1 %v788_v0  ;;  %732 = vmatpush3.msra.mxu0 %v139_v16  ;;  %v105_v39 = vrot.slane %v104_v35, 1  ;;  %v69_v41 = vrot.slane %v68_v37, 4  ;;  %v58_v42 = vrot.slane %v57_v38, 2  ;;  %v791_v16 = vmov 1983009808  }
  0x1f   :  { %767 = vmatpush3.msra.mxu1 %v123_v17  ;;  %733 = vmatprep.subr.mxu0 %v788_v0  ;;  %v118_v44 = vrot.slane %v117_v40, 1  ;;  %v365_v17 = vunpack.c.l.s4 %v791_v16  ;;  %v431_v32 = vcombine.high %v350_v25, %v350_v25  ;;  %v448_v33 = vcombine.high %v351_v26, %v351_v26 }
  0x20   :  { %768 = vmatprep.subr.mxu1 %v788_v0  ;;  %734 = vmatpush3.msra.mxu0 %v138_v24  ;;  %v106_v43 = vadd.f32 %v105_v39, %v104_v35  ;;  %v70_v45 = vadd.f32 %v69_v41, %v68_v37  ;;  %v59_v46 = vadd.f32 %v58_v42, %v57_v38  ;;  %v349_v24 = vld [vmem:[%s1167_s7 + $0x18] sm:$0xff] }
  0x21   :  { %769 = vmatpush3.msra.mxu1 %v122_v28  ;;  %770 = vmatprep.mubr.msk.f32.mxu1 %vm789_vm0, %v788_v0  ;;  %v119_v47 = vadd.f32 %v118_v44, %v117_v40  ;;  %v366_v19 = vunpack.c.0.s8 %v365_v17  ;;  %v414_v31 = vcombine.high %v349_v24, %v349_v24 }
  0x22   :  { %v120_v48 = vmul.f32 0.015625, %v106_v43  ;;  %v71_v49 = vrot.slane %v70_v45, 2  ;;  %v60_v50 = vrot.slane %v59_v46, 1  ;;  %777 = vset.pattern.permute.xlu0 %v790_v8 }
  0x23   :  { %v121_v51 = vmul.f32 0.015625, %v119_v47  ;;  %v1098_v28 = vsub.s32 %v366_v19, %v368_v20 }
  0x24   :  { %v72_v52 = vadd.f32 %v71_v49, %v70_v45  ;;  %v61_v0 = vadd.f32 %v60_v50, %v59_v46 }
  0x25   :  { %v157_v53 = vsel %vm156_vm1, %v121_v51, %v120_v48  ;;  %v370_v34 = vrot.slane %v346_v21, %v1098_v28  ;;  %v377_v35 = vrot.slane %v363_v27, %v1098_v28  ;;  %v387_v36 = vrot.slane %v347_v22, %v1098_v28 }
  0x26   :  { %v73_v54 = vrot.slane %v72_v52, 1  ;;  %736 = vmatmul.mubr.f32.vlgmr.msra.gmra.mxu0 %v157_v53  ;;  %v76_v56 = vmul.f32 0.015625, %v61_v0  ;;  %v394_v37 = vrot.slane %v380_v29, %v1098_v28  ;;  %v404_v38 = vrot.slane %v348_v23, %v1098_v28 }
  0x27   :  { %v411_v39 = vrot.slane %v397_v30, %v1098_v28  ;;  %v421_v40 = vrot.slane %v349_v24, %v1098_v28  ;;  %v428_v41 = vrot.slane %v414_v31, %v1098_v28  ;;  %v438_v42 = vrot.slane %v350_v25, %v1098_v28 }
  0x28   :  { %v74_v55 = vadd.f32 %v73_v54, %v72_v52  ;;  %v445_v43 = vrot.slane %v431_v32, %v1098_v28  ;;  %v455_v44 = vrot.slane %v351_v26, %v1098_v28  ;;  %v462_v45 = vrot.slane %v448_v33, %v1098_v28  ;;  %v340_v32 = vld [vmem:[%s1168_s6] sm:$0xff]  ;;  %v341_v33 = vld [vmem:[%s1168_s6 + $0x8] sm:$0xff] }
  0x29   :  { %v378_v46 = vcombine.high %v370_v34, %v370_v34  ;;  %v379_v47 = vcombine.high %v377_v35, %v377_v35  ;;  %v395_v48 = vcombine.high %v387_v36, %v387_v36  ;;  %v396_v49 = vcombine.high %v394_v37, %v394_v37 }
  0x2a   :  { %v77_v57 = vmul.f32 0.015625, %v74_v55  ;;  %v412_v50 = vcombine.high %v404_v38, %v404_v38  ;;  %v413_v51 = vcombine.high %v411_v39, %v411_v39  ;;  %v429_v52 = vcombine.high %v421_v40, %v421_v40 }
  0x2b   :  { %v430_v0 = vcombine.high %v428_v41, %v428_v41  ;;  %v446_v53 = vcombine.high %v438_v42, %v438_v42  ;;  %v447_v54 = vcombine.high %v445_v43, %v445_v43  ;;  %v463_v55 = vcombine.high %v455_v44, %v455_v44 }
  0x2c   :  { %v231_v58 = vsel %vm156_vm1, %v77_v57, %v76_v56  ;;  %v464_v56 = vcombine.high %v462_v45, %v462_v45 }
  0x2d   :  { %771 = vmatmul.mubr.f32.vlgmr.msra.gmra.mxu1 %v231_v58 }
  0xe6   :  { %v225_v60 = vpop.f32.mrf.mxu0 }
  0xe8   :  { %v737_v61 = vpop.f32.mrf.mxu0 }
  0xed   :  { %v299_v62 = vpop.f32.mrf.mxu1 }
  0xee   :  { %v300_v1 = vadd.f32 %v299_v62, %v225_v60 }
  0xef   :  { %v772_v2 = vpop.f32.mrf.mxu1 }
  0xf0   :  { %v310_v3 = vadd.f32 %v665_v63, %v300_v1 }
  0xf2   :  { %v311_v5 = vmax.f32 %v310_v3, 0.0 }
  0xf4   :  { %v319_v6 = vmul.f32 %v666_v4, %v311_v5 }
  0xf6   :  { %v321_v7 = vsel %vm320_vm2, %v319_v6, 0.0 }
  0xf7   :  { %322 = vadd.xlane.f32.xlu0 %v321_v7 }
 0x180   :  { %v323_v10 = vpop.xlane.xlu0 %322 }
 0x181   :  { %v331_v11 = vadd.f32 %v667_v9, %v323_v10 }
 0x183   :  { %v668_v12 = vmul.f32 -1.442695, %v331_v11 }
 0x185   :  { %784 = vpow2.f32 %v668_v12 }
 0x192   :  { %v785_v13 = vpop.eup %784 }
 0x193   :  { %v335_v14 = vadd.f32 1.0, %v785_v13 }
 0x195   :  { %786 = vrcp.f32 %v335_v14 }
 0x1a2   :  { %v787_v15 = vpop.eup %786 }
 0x1a3   :  { %339 = vst.msk [vmem:[%s1166_s9] sm:$0x3] %vm338_vm3, %v787_v15  ;;  %354 = vperm.xlu0 %777, %v787_v15  }
 0x21e   :  { %v355_v57 = vpop.permute.xlu0 %354 }
 0x21f   :  { %v489_v58 = vmul.f32 %v370_v34, %v355_v57  ;;  %v490_v59 = vmul.f32 %v378_v46, %v355_v57  ;;  %v491_v60 = vmul.f32 %v377_v35, %v355_v57  ;;  %v492_v61 = vmul.f32 %v379_v47, %v355_v57 }
 0x220   :  { %v493_v62 = vmul.f32 %v387_v36, %v355_v57  ;;  %v494_v63 = vmul.f32 %v395_v48, %v355_v57  ;;  %v495_v1 = vmul.f32 %v394_v37, %v355_v57  ;;  %v496_v2 = vmul.f32 %v396_v49, %v355_v57 }
 0x221   :  { %v497_v3 = vmul.f32 %v404_v38, %v355_v57  ;;  %v498_v4 = vmul.f32 %v412_v50, %v355_v57  ;;  %v499_v5 = vmul.f32 %v411_v39, %v355_v57  ;;  %v500_v6 = vmul.f32 %v413_v51, %v355_v57  ;;  %v342_v38 = vld [vmem:[%s1168_s6 + $0x10] sm:$0xff]  ;;  %v343_v39 = vld [vmem:[%s1168_s6 + $0x18] sm:$0xff] }
 0x222   :  { %v501_v7 = vmul.f32 %v421_v40, %v355_v57  ;;  %v502_v8 = vmul.f32 %v429_v52, %v355_v57  ;;  %v503_v9 = vmul.f32 %v428_v41, %v355_v57  ;;  %v504_v10 = vmul.f32 %v430_v0, %v355_v57  ;;  %v344_v52 = vld [vmem:[%s1168_s6 + $0x20] sm:$0xff] }
 0x223   :  { %v505_v11 = vmul.f32 %v438_v42, %v355_v57  ;;  %v506_v12 = vmul.f32 %v446_v53, %v355_v57  ;;  %v507_v13 = vmul.f32 %v445_v43, %v355_v57  ;;  %v508_v14 = vmul.f32 %v447_v54, %v355_v57 }
 0x224   :  { %v509_v15 = vmul.f32 %v455_v44, %v355_v57  ;;  %v510_v16 = vmul.f32 %v463_v55, %v355_v57  ;;  %v511_v17 = vmul.f32 %v462_v45, %v355_v57  ;;  %v512_v18 = vmul.f32 %v464_v56, %v355_v57  ;;  %v345_v56 = vld [vmem:[%s1168_s6 + $0x28] sm:$0xff] }
 0x225   :  { %v537_v19 = vcombine.low %v489_v58, %v490_v59  ;;  %v538_v20 = vcombine.low %v491_v60, %v492_v61  ;;  %v554_v21 = vcombine.low %v493_v62, %v494_v63  ;;  %v555_v22 = vcombine.low %v495_v1, %v496_v2 }
 0x226   :  { %v571_v23 = vcombine.low %v497_v3, %v498_v4  ;;  %v572_v24 = vcombine.low %v499_v5, %v500_v6  ;;  %v588_v25 = vcombine.low %v501_v7, %v502_v8  ;;  %v589_v26 = vcombine.low %v503_v9, %v504_v10 }
 0x227   :  { %v545_v27 = vrot.slane %v537_v19, %v1098_v28  ;;  %v552_v29 = vrot.slane %v538_v20, %v1098_v28  ;;  %v562_v30 = vrot.slane %v554_v21, %v1098_v28  ;;  %v569_v31 = vrot.slane %v555_v22, %v1098_v28 }
 0x228   :  { %v579_v34 = vrot.slane %v571_v23, %v1098_v28  ;;  %v586_v35 = vrot.slane %v572_v24, %v1098_v28  ;;  %v596_v36 = vrot.slane %v588_v25, %v1098_v28  ;;  %v603_v37 = vrot.slane %v589_v26, %v1098_v28 }
 0x229   :  { %v553_v40 = vcombine.low %v545_v27, %v552_v29  ;;  %v570_v41 = vcombine.low %v562_v30, %v569_v31  ;;  %v605_v42 = vcombine.low %v505_v11, %v506_v12  ;;  %v606_v43 = vcombine.low %v507_v13, %v508_v14 }
 0x22a   :  { %v587_v44 = vcombine.low %v579_v34, %v586_v35  ;;  %v604_v45 = vcombine.low %v596_v36, %v603_v37  ;;  %v622_v46 = vcombine.low %v509_v15, %v510_v16  ;;  %v623_v47 = vcombine.low %v511_v17, %v512_v18 }
 0x22b   :  { %v613_v48 = vrot.slane %v605_v42, %v1098_v28  ;;  %v620_v49 = vrot.slane %v606_v43, %v1098_v28  ;;  %v645_v50 = vadd.f32 %v553_v40, %v340_v32  ;;  %v646_v51 = vadd.f32 %v570_v41, %v341_v33 }
 0x22c   :  { %v630_v0 = vrot.slane %v622_v46, %v1098_v28  ;;  %v637_v53 = vrot.slane %v623_v47, %v1098_v28  ;;  %v647_v54 = vadd.f32 %v587_v44, %v342_v38  ;;  %v648_v55 = vadd.f32 %v604_v45, %v343_v39 }
 0x22d   :  { %v621_v57 = vcombine.low %v613_v48, %v620_v49  ;;  %651 = vst [vmem:[%s1169_s8] sm:$0xff] %v645_v50  ;;  %652 = vst [vmem:[%s1169_s8 + $0x8] sm:$0xff] %v646_v51 }
 0x22e   :  { %v638_v58 = vcombine.low %v630_v0, %v637_v53  ;;  %653 = vst [vmem:[%s1169_s8 + $0x10] sm:$0xff] %v647_v54  ;;  %654 = vst [vmem:[%s1169_s8 + $0x18] sm:$0xff] %v648_v55 }
 0x22f   :  { %v649_v28 = vadd.f32 %v621_v57, %v344_v52 }
 0x230   :  { %v650_v59 = vadd.f32 %v638_v58, %v345_v56 }
 0x231   :  { %655 = vst [vmem:[%s1169_s8 + $0x20] sm:$0xff] %v649_v28 }
 0x232   :  { %656 = vst [vmem:[%s1169_s8 + $0x28] sm:$0xff] %v650_v59 }

// kernel: mul.47
= control target key start
LH: loop header
LB: loop body
LE: loop exit
PB: predicated region body
PF: predicated region fallthrough
CT: control target
= control target key end

     0   :  { %vm8_vm0 = vcmask 31744   ;;  %s40_s8 = smov 4   ;;  %s41_s9 = smov 8   ;;  %vm14_vm1 = vcmask 130144   ;;  %vm20_vm2 = vcmask 97344   ;;  %vm26_vm3 = vcmask 64544   ;;  %s58_s0 = inlined_call_operand.vmem [shape: f32[4,4], index: 0, kind: input, shape index: {}]   ;;  %s59_s1 = inlined_call_operand.vmem [shape: f32[16], index: 1, kind: output, shape index: {}]  }
   0x1   :  { %v5_v0 = vld [vmem:[%s58_s0] sm:$0xf]  ;;  %s39_s0 = smov 12  }
   0x2   :  { %6 = vst [vmem:[#allocation1] sm:$0xf] %v5_v0 }
   0x9   :  { %v11_v1 = vld [vmem:[#allocation1 + $0x3] sm:$0x1]   ;;  %v23_v2 = vld [vmem:[#allocation1 + $0x1] sm:$0x1]   ;;  %v7_v3 = vld [vmem:[#allocation1] sm:$0x1]  }
   0xa   :  { %12 = vrot.lane.b32.xlu0 %v11_v1, %s39_s0  ;;  %24 = vrot.lane.b32.xlu1 %v23_v2, %s40_s8  ;;  %v17_v4 = vld [vmem:[#allocation1 + $0x2] sm:$0x1]   ;;  %9 = vst.msk [vmem:[#allocation0] sm:$0x1] %vm8_vm0, %v7_v3  }
   0xe   :  { %18 = vrot.lane.b32.xlu0 %v17_v4, %s41_s9 }
  0x7c   :  { %v13_v5 = vpop.permute.xlu0 %12   ;;  %v25_v6 = vpop.permute.xlu1 %24  }
  0x7d   :  { %15 = vst.msk [vmem:[#allocation0] sm:$0x1] %vm14_vm1, %v13_v5  }
  0x80   :  { %v19_v7 = vpop.permute.xlu0 %18  }
  0x81   :  { %21 = vst.msk [vmem:[#allocation0] sm:$0x1] %vm20_vm2, %v19_v7  }
  0x82   :  { %27 = vst.msk [vmem:[#allocation0] sm:$0x1] %vm26_vm3, %v25_v6  }
  0x89   :  { %v32_v8 = vld [vmem:[#allocation0] sm:$0x1] }
  0x8a   :  { %35 = vst [vmem:[%s59_s1] sm:$0x1] %v32_v8 }

// kernel: hcat_forward.13
= control target key start
LH: loop header
LB: loop body
LE: loop exit
PB: predicated region body
PF: predicated region fallthrough
CT: control target
= control target key end

     0   :  { %v405_v3 = vmov 0.0   ;;  %vm406_vm0 = vmmov 0   ;;  %s658_s1 = inlined_call_operand.vmem [shape: f32[256,128], index: 1, kind: input, shape index: {}]   ;;  %s659_s0 = inlined_call_operand.vmem [shape: f32[40,256], index: 0, kind: input, shape index: {}]   ;;  %s660_s3 = inlined_call_operand.vmem [shape: f32[128,128], index: 3, kind: input, shape index: {}]   ;;  %s661_s2 = inlined_call_operand.vmem [shape: f32[1,128], index: 2, kind: input, shape index: {}]   ;;  %s662_s4 = inlined_call_operand.vmem [shape: f32[1,128], index: 4, kind: input, shape index: {}]   ;;  %s663_s5 = inlined_call_operand.vmem [shape: f32[40,128], index: 5, kind: output, shape index: {}]  }
   0x1   :  { %v61_v0 = vld [vmem:[%s658_s1 + $0xf8] sm:$0xff]  ;;  %v60_v2 = vld [vmem:[%s658_s1 + $0xf0] sm:$0xff]  ;;  %356 = vmatprep.subr.mxu1 %v405_v3  ;;  %v59_v5 = vld [vmem:[%s658_s1 + $0xe8] sm:$0xff]  ;;  %388 = vmatprep.mubr.msk.f32.mxu1 %vm406_vm0, %v405_v3 }
   0x2   :  { %v45_v1 = vld [vmem:[%s658_s1 + $0x78] sm:$0xff]  ;;  %288 = vmatprep.subr.mxu0 %v61_v0  ;;  %v44_v4 = vld [vmem:[%s658_s1 + $0x70] sm:$0xff]  ;;  %v43_v6 = vld [vmem:[%s658_s1 + $0x68] sm:$0xff] }
   0x3   :  { %289 = vmatpush3.msra.mxu0 %v45_v1  ;;  %v58_v7 = vld [vmem:[%s658_s1 + $0xe0] sm:$0xff]  ;;  %v57_v9 = vld [vmem:[%s658_s1 + $0xd8] sm:$0xff]  ;;  %v56_v11 = vld [vmem:[%s658_s1 + $0xd0] sm:$0xff] }
   0x4   :  { %290 = vmatprep.subr.mxu0 %v60_v2  ;;  %v42_v8 = vld [vmem:[%s658_s1 + $0x60] sm:$0xff]  ;;  %v41_v10 = vld [vmem:[%s658_s1 + $0x58] sm:$0xff]  ;;  %v40_v12 = vld [vmem:[%s658_s1 + $0x50] sm:$0xff] }
   0x5   :  { %291 = vmatpush3.msra.mxu0 %v44_v4  ;;  %v55_v13 = vld [vmem:[%s658_s1 + $0xc8] sm:$0xff]  ;;  %v54_v16 = vld [vmem:[%s658_s1 + $0xc0] sm:$0xff]  ;;  %v53_v18 = vld [vmem:[%s658_s1 + $0xb8] sm:$0xff] }
   0x6   :  { %292 = vmatprep.subr.mxu0 %v59_v5  ;;  %v21_v14 = vld [vmem:[%s659_s0 + $0x8] sm:$0xff]  ;;  %v38_v17 = vld [vmem:[%s658_s1 + $0x40] sm:$0xff]  ;;  %v179_v19 = vld [vmem:[%s660_s3 + $0x78] sm:$0xff] }
   0x7   :  { %293 = vmatpush3.msra.mxu0 %v43_v6  ;;  %v39_v15 = vld [vmem:[%s658_s1 + $0x48] sm:$0xff]  ;;  %133 = vmatprep.mubr.f32.mxu0 %v21_v14  ;;  %v178_v20 = vld [vmem:[%s660_s3 + $0x70] sm:$0xff]  ;;  %v37_v21 = vld [vmem:[%s658_s1 + $0x38] sm:$0xff] }
   0x8   :  { %294 = vmatprep.subr.mxu0 %v58_v7  ;;  %357 = vmatpush3.msra.mxu1 %v179_v19  ;;  %v52_v22 = vld [vmem:[%s658_s1 + $0xb0] sm:$0xff]  ;;  %v177_v23 = vld [vmem:[%s660_s3 + $0x68] sm:$0xff]  ;;  %v176_v26 = vld [vmem:[%s660_s3 + $0x60] sm:$0xff] }
   0x9   :  { %295 = vmatpush3.msra.mxu0 %v42_v8  ;;  %358 = vmatprep.subr.mxu1 %v405_v3  ;;  %v36_v24 = vld [vmem:[%s658_s1 + $0x30] sm:$0xff]  ;;  %v51_v25 = vld [vmem:[%s658_s1 + $0xa8] sm:$0xff]  ;;  %v50_v28 = vld [vmem:[%s658_s1 + $0xa0] sm:$0xff] }
   0xa   :  { %296 = vmatprep.subr.mxu0 %v57_v9  ;;  %359 = vmatpush3.msra.mxu1 %v178_v20  ;;  %v35_v27 = vld [vmem:[%s658_s1 + $0x28] sm:$0xff]  ;;  %v175_v29 = vld [vmem:[%s660_s3 + $0x58] sm:$0xff]  ;;  %v34_v30 = vld [vmem:[%s658_s1 + $0x20] sm:$0xff] }
   0xb   :  { %297 = vmatpush3.msra.mxu0 %v41_v10  ;;  %360 = vmatprep.subr.mxu1 %v405_v3  ;;  %v49_v31 = vld [vmem:[%s658_s1 + $0x98] sm:$0xff]  ;;  %v174_v32 = vld [vmem:[%s660_s3 + $0x50] sm:$0xff]  ;;  %v173_v35 = vld [vmem:[%s660_s3 + $0x48] sm:$0xff] }
   0xc   :  { %298 = vmatprep.subr.mxu0 %v56_v11  ;;  %361 = vmatpush3.msra.mxu1 %v177_v23  ;;  %v33_v33 = vld [vmem:[%s658_s1 + $0x18] sm:$0xff]  ;;  %v48_v34 = vld [vmem:[%s658_s1 + $0x90] sm:$0xff]  ;;  %v47_v37 = vld [vmem:[%s658_s1 + $0x88] sm:$0xff] }
   0xd   :  { %299 = vmatpush3.msra.mxu0 %v40_v12  ;;  %362 = vmatprep.subr.mxu1 %v405_v3  ;;  %v32_v36 = vld [vmem:[%s658_s1 + $0x10] sm:$0xff]  ;;  %v172_v38 = vld [vmem:[%s660_s3 + $0x40] sm:$0xff]  ;;  %v31_v39 = vld [vmem:[%s658_s1 + $0x8] sm:$0xff] }
   0xe   :  { %300 = vmatprep.subr.mxu0 %v55_v13  ;;  %363 = vmatpush3.msra.mxu1 %v176_v26  ;;  %v46_v40 = vld [vmem:[%s658_s1 + $0x80] sm:$0xff]  ;;  %v171_v41 = vld [vmem:[%s660_s3 + $0x38] sm:$0xff]  ;;  %v170_v44 = vld [vmem:[%s660_s3 + $0x30] sm:$0xff] }
   0xf   :  { %301 = vmatpush3.msra.mxu0 %v39_v15  ;;  %364 = vmatprep.subr.mxu1 %v405_v3  ;;  %v30_v42 = vld [vmem:[%s658_s1] sm:$0xff]  ;;  %v23_v45 = vld [vmem:[%s659_s0 + $0x18] sm:$0xff]  ;;  %v169_v46 = vld [vmem:[%s660_s3 + $0x28] sm:$0xff] }
  0x10   :  { %302 = vmatprep.subr.mxu0 %v54_v16  ;;  %365 = vmatpush3.msra.mxu1 %v175_v29  ;;  %v20_v43 = vld [vmem:[%s659_s0] sm:$0xff]  ;;  %v22_v47 = vld [vmem:[%s659_s0 + $0x10] sm:$0xff]  ;;  %v25_v48 = vld [vmem:[%s659_s0 + $0x28] sm:$0xff] }
  0x11   :  { %303 = vmatpush3.msra.mxu0 %v38_v17  ;;  %366 = vmatprep.subr.mxu1 %v405_v3  ;;  %v24_v49 = vld [vmem:[%s659_s0 + $0x20] sm:$0xff]  ;;  %v27_v50 = vld [vmem:[%s659_s0 + $0x38] sm:$0xff]  ;;  %v26_v51 = vld [vmem:[%s659_s0 + $0x30] sm:$0xff] }
  0x12   :  { %304 = vmatprep.subr.mxu0 %v53_v18  ;;  %367 = vmatpush3.msra.mxu1 %v174_v32  ;;  %v29_v52 = vld [vmem:[%s659_s0 + $0x48] sm:$0xff]  ;;  %v28_v53 = vld [vmem:[%s659_s0 + $0x40] sm:$0xff]  ;;  %v167_v55 = vld [vmem:[%s660_s3 + $0x18] sm:$0xff] }
  0x13   :  { %305 = vmatpush3.msra.mxu0 %v37_v21  ;;  %368 = vmatprep.subr.mxu1 %v405_v3  ;;  %v168_v54 = vld [vmem:[%s660_s3 + $0x20] sm:$0xff]  ;;  %v166_v56 = vld [vmem:[%s660_s3 + $0x10] sm:$0xff]  ;;  %v165_v57 = vld [vmem:[%s660_s3 + $0x8] sm:$0xff] }
  0x14   :  { %306 = vmatprep.subr.mxu0 %v52_v22  ;;  %369 = vmatpush3.msra.mxu1 %v173_v35  ;;  %v164_v58 = vld [vmem:[%s660_s3] sm:$0xff] }
  0x15   :  { %307 = vmatpush3.msra.mxu0 %v36_v24  ;;  %370 = vmatprep.subr.mxu1 %v405_v3  ;;  %v286_v60 = vld [vmem:[%s661_s2] ss:$0 sm:$0xff] }
  0x16   :  { %308 = vmatprep.subr.mxu0 %v51_v25  ;;  %371 = vmatpush3.msra.mxu1 %v172_v38  ;;  %v287_v22 = vld [vmem:[%s662_s4] ss:$0 sm:$0xff] }
  0x17   :  { %309 = vmatpush3.msra.mxu0 %v35_v27  ;;  %372 = vmatprep.subr.mxu1 %v405_v3 }
  0x18   :  { %310 = vmatprep.subr.mxu0 %v50_v28  ;;  %373 = vmatpush3.msra.mxu1 %v171_v41 }
  0x19   :  { %311 = vmatpush3.msra.mxu0 %v34_v30  ;;  %374 = vmatprep.subr.mxu1 %v405_v3 }
  0x1a   :  { %312 = vmatprep.subr.mxu0 %v49_v31  ;;  %375 = vmatpush3.msra.mxu1 %v170_v44 }
  0x1b   :  { %313 = vmatpush3.msra.mxu0 %v33_v33  ;;  %376 = vmatprep.subr.mxu1 %v405_v3 }
  0x1c   :  { %314 = vmatprep.subr.mxu0 %v48_v34  ;;  %377 = vmatpush3.msra.mxu1 %v169_v46 }
  0x1d   :  { %315 = vmatpush3.msra.mxu0 %v32_v36  ;;  %378 = vmatprep.subr.mxu1 %v405_v3 }
  0x1e   :  { %316 = vmatprep.subr.mxu0 %v47_v37  ;;  %379 = vmatpush3.msra.mxu1 %v168_v54 }
  0x1f   :  { %317 = vmatpush3.msra.mxu0 %v31_v39  ;;  %380 = vmatprep.subr.mxu1 %v405_v3 }
  0x20   :  { %318 = vmatprep.subr.mxu0 %v46_v40  ;;  %381 = vmatpush3.msra.mxu1 %v167_v55 }
  0x21   :  { %319 = vmatpush3.msra.mxu0 %v30_v42  ;;  %382 = vmatprep.subr.mxu1 %v405_v3 }
  0x22   :  { %134 = vmatmul.mubr.f32.vlgmr.msra.gmra.mxu0 %v20_v43  ;;  %383 = vmatpush3.msra.mxu1 %v166_v56 }
  0x23   :  { %138 = vmatprep.mubr.f32.mxu0 %v23_v45  ;;  %384 = vmatprep.subr.mxu1 %v405_v3 }
  0x24   :  { %385 = vmatpush3.msra.mxu1 %v165_v57 }
  0x25   :  { %386 = vmatprep.subr.mxu1 %v405_v3 }
  0x26   :  { %139 = vmatmul.mubr.f32.gmra.mxu0 %v22_v47  ;;  %387 = vmatpush3.msra.mxu1 %v164_v58 }
  0x27   :  { %143 = vmatprep.mubr.f32.mxu0 %v25_v48 }
  0x2a   :  { %144 = vmatmul.mubr.f32.gmra.mxu0 %v24_v49 }
  0x2b   :  { %148 = vmatprep.mubr.f32.mxu0 %v27_v50 }
  0x2e   :  { %149 = vmatmul.mubr.f32.gmra.mxu0 %v26_v51 }
  0x2f   :  { %153 = vmatprep.mubr.f32.mxu0 %v29_v52 }
  0x32   :  { %154 = vmatmul.mubr.f32.gmra.mxu0 %v28_v53 }
  0xe2   :  { %v320_v59 = vpop.f32.mrf.mxu0 }
  0xe4   :  { %v321_v61 = vpop.f32.mrf.mxu0 }
  0xe5   :  { %v322_v62 = vadd.f32 %v321_v61, %v320_v59 }
  0xe6   :  { %v323_v63 = vpop.f32.mrf.mxu0 }
  0xe7   :  { %v136_v0 = vadd.f32 %v322_v62, %v286_v60 }
  0xe8   :  { %v324_v1 = vpop.f32.mrf.mxu0 }
  0xe9   :  { %v159_v2 = vmax.f32 %v136_v0, 0.0  ;;  %v325_v4 = vadd.f32 %v324_v1, %v323_v63 }
  0xea   :  { %v326_v5 = vpop.f32.mrf.mxu0 }
  0xeb   :  { %v141_v6 = vadd.f32 %v325_v4, %v286_v60  ;;  %389 = vmatmul.mubr.f32.vlgmr.msra.gmra.mxu1 %v159_v2 }
  0xec   :  { %v327_v7 = vpop.f32.mrf.mxu0  ;;  %391 = vmatprep.mubr.msk.f32.mxu1 %vm406_vm0, %v405_v3 }
  0xed   :  { %v160_v8 = vmax.f32 %v141_v6, 0.0  ;;  %v328_v9 = vadd.f32 %v327_v7, %v326_v5 }
  0xee   :  { %v329_v10 = vpop.f32.mrf.mxu0 }
  0xef   :  { %v146_v11 = vadd.f32 %v328_v9, %v286_v60  ;;  %392 = vmatmul.mubr.f32.gmra.mxu1 %v160_v8 }
  0xf0   :  { %v330_v12 = vpop.f32.mrf.mxu0  ;;  %394 = vmatprep.mubr.msk.f32.mxu1 %vm406_vm0, %v405_v3 }
  0xf1   :  { %v161_v13 = vmax.f32 %v146_v11, 0.0  ;;  %v331_v14 = vadd.f32 %v330_v12, %v329_v10 }
  0xf2   :  { %v332_v15 = vpop.f32.mrf.mxu0 }
  0xf3   :  { %v151_v16 = vadd.f32 %v331_v14, %v286_v60  ;;  %395 = vmatmul.mubr.f32.gmra.mxu1 %v161_v13 }
  0xf4   :  { %v333_v17 = vpop.f32.mrf.mxu0  ;;  %397 = vmatprep.mubr.msk.f32.mxu1 %vm406_vm0, %v405_v3 }
  0xf5   :  { %v162_v18 = vmax.f32 %v151_v16, 0.0  ;;  %v334_v19 = vadd.f32 %v333_v17, %v332_v15 }
  0xf7   :  { %v156_v20 = vadd.f32 %v334_v19, %v286_v60  ;;  %398 = vmatmul.mubr.f32.gmra.mxu1 %v162_v18 }
  0xf8   :  { %400 = vmatprep.mubr.msk.f32.mxu1 %vm406_vm0, %v405_v3 }
  0xf9   :  { %v163_v21 = vmax.f32 %v156_v20, 0.0 }
  0xfb   :  { %401 = vmatmul.mubr.f32.gmra.mxu1 %v163_v21 }
 0x1ab   :  { %v253_v23 = vpop.f32.mrf.mxu1 }
 0x1ac   :  { %v254_v24 = vadd.f32 %v287_v22, %v253_v23 }
 0x1ad   :  { %v390_v25 = vpop.f32.mrf.mxu1 }
 0x1ae   :  { %277 = vst [vmem:[%s663_s5] sm:$0xff] %v254_v24 }
 0x1af   :  { %v258_v26 = vpop.f32.mrf.mxu1 }
 0x1b0   :  { %v259_v27 = vadd.f32 %v287_v22, %v258_v26 }
 0x1b1   :  { %v393_v28 = vpop.f32.mrf.mxu1 }
 0x1b2   :  { %278 = vst [vmem:[%s663_s5 + $0x8] sm:$0xff] %v259_v27 }
 0x1b3   :  { %v263_v3 = vpop.f32.mrf.mxu1 }
 0x1b4   :  { %v264_v29 = vadd.f32 %v287_v22, %v263_v3 }
 0x1b5   :  { %v396_v30 = vpop.f32.mrf.mxu1 }
 0x1b6   :  { %279 = vst [vmem:[%s663_s5 + $0x10] sm:$0xff] %v264_v29 }
 0x1b7   :  { %v268_v31 = vpop.f32.mrf.mxu1 }
 0x1b8   :  { %v269_v32 = vadd.f32 %v287_v22, %v268_v31 }
 0x1b9   :  { %v399_v33 = vpop.f32.mrf.mxu1 }
 0x1ba   :  { %280 = vst [vmem:[%s663_s5 + $0x18] sm:$0xff] %v269_v32 }
 0x1bb   :  { %v273_v34 = vpop.f32.mrf.mxu1 }
 0x1bc   :  { %v274_v35 = vadd.f32 %v287_v22, %v273_v34 }
 0x1bd   :  { %v402_v36 = vpop.f32.mrf.mxu1 }
 0x1be   :  { %281 = vst [vmem:[%s663_s5 + $0x20] sm:$0xff] %v274_v35 }

// kernel: mul.32
= control target key start
LH: loop header
LB: loop body
LE: loop exit
PB: predicated region body
PF: predicated region fallthrough
CT: control target
= control target key end

     0   :  { %vm8_vm0 = vcmask 15360   ;;  %vm14_vm1 = vcmask 31760   ;;  %s42_s0 = inlined_call_operand.vmem [shape: f32[2,2], index: 0, kind: input, shape index: {}]   ;;  %s43_s1 = inlined_call_operand.vmem [shape: f32[4], index: 1, kind: output, shape index: {}]  }
   0x1   :  { %v5_v0 = vld [vmem:[%s42_s0] sm:$0x3]  ;;  %s25_s0 = smov 2  }
   0x2   :  { %6 = vst [vmem:[#allocation1] sm:$0x3] %v5_v0 }
   0x9   :  { %v11_v1 = vld [vmem:[#allocation1 + $0x1] sm:$0x1]   ;;  %v7_v2 = vld [vmem:[#allocation1] sm:$0x1]  }
   0xa   :  { %12 = vrot.lane.b32.xlu0 %v11_v1, %s25_s0  ;;  %9 = vst.msk [vmem:[#allocation0] sm:$0x1] %vm8_vm0, %v7_v2  }
  0x7c   :  { %v13_v3 = vpop.permute.xlu0 %12  }
  0x7d   :  { %15 = vst.msk [vmem:[#allocation0] sm:$0x1] %vm14_vm1, %v13_v3  }
  0x84   :  { %v20_v4 = vld [vmem:[#allocation0] sm:$0x1] }
  0x85   :  { %23 = vst [vmem:[%s43_s1] sm:$0x1] %v20_v4 }

// kernel: hcat_forward.14
= control target key start
LH: loop header
LB: loop body
LE: loop exit
PB: predicated region body
PF: predicated region fallthrough
CT: control target
= control target key end

     0   :  { %s544_s12 = smov 0   ;;  %s580_s0 = inlined_call_operand.vmem [shape: f32[16,128], index: 0, kind: input, shape index: {}]   ;;  %s581_s1 = inlined_call_operand.vmem [shape: f32[2,20,128], index: 1, kind: input, shape index: {}]   ;;  %s582_s2 = inlined_call_operand.vmem [shape: f32[2,20,128], index: 2, kind: input, shape index: {}]   ;;  %s583_s3 = inlined_call_operand.vmem [shape: f32[2,16,128], index: 3, kind: output, shape index: {}]  }
   0x1 LB: > { %s456_s13 = sadd.s32 4294967295, %s522_s12   ;;  %p460_p0 = scmp.ge.s32.totalorder %s522_s12, 1  ;;  %s522_s12 = sphi %s544_s12, %s13_s12  }
   0x2   : > { %p147_p1 = scmp.lt.s32.totalorder %s522_s12, 3 }
   0x4   : > { %p148_p2 = pnand %p460_p0, %p147_p1 }
   0x5   : > { %p176_p3 = scmp.lt.s32.totalorder (!%p148_p2), %s456_s13, 1 }
   0x6   : > { %151 = sbr.rel (%p148_p2) target bundleno = 740 (0x2e4), region = 32 }
   0xb   : > { %v191_v0 = vld [vmem:[%s580_s0] sm:$0xff]  ;;  %s585_s13 = smov (!%p176_p3, %s456_s13), 1  ;;  %v192_v10 = vld [vmem:[%s580_s0 + $0x8] sm:$0xff]  ;;  %vm279_vm0 = vcmask 162816   ;;  %vm308_vm1 = vcmask 1043456  }
   0xc   : > { %487 = vmatprep.mubr.f32.mxu0 %v191_v0  ;;  %s499_s16 = smul.u32 24, %s585_s13  ;;  %s470_s25 = sshll.u32 %s585_s13, 4 }
   0xd   : > { %s190_s28 = scalar_lea.vmem %s583_s3, %s470_s25 }
   0xe   : > { %s180_s19 = scalar_lea.vmem %s581_s1, %s499_s16  ;;  %s185_s22 = scalar_lea.vmem %s582_s2, %s499_s16 }
   0xf   : > { %v195_v1 = vld [vmem:[%s180_s19 + $0x10] sm:$0xf]  ;;  %v194_v3 = vld [vmem:[%s180_s19 + $0x8] sm:$0xff]  ;;  %v193_v7 = vld [vmem:[%s180_s19] sm:$0xff] }
  0x10   : > { %v198_v2 = vld [vmem:[%s185_s22 + $0x10] sm:$0xf]  ;;  %v197_v5 = vld [vmem:[%s185_s22 + $0x8] sm:$0xff]  ;;  %v196_v8 = vld [vmem:[%s185_s22] sm:$0xff]  ;;  %490 = vmatprep.subr.msk.mxu1 %vm308_vm1, %v195_v1 }
  0x11   : > { %v201_v4 = vadd.f32 %v198_v2, %v195_v1  ;;  %v200_v6 = vadd.f32 %v197_v5, %v194_v3  ;;  %v199_v9 = vadd.f32 %v196_v8, %v193_v7  ;;  %491 = vmatpush3.msk.msra.mxu1 %vm308_vm1, %v195_v1 }
  0x12   : > { %492 = vmatprep.subr.mxu1 %v194_v3 }
  0x13   : > { %481 = vmatprep.subr.mxu0 %v201_v4  ;;  %493 = vmatpush3.msra.mxu1 %v194_v3 }
  0x14   : > { %482 = vmatpush3.xpose.msra.mxu0 %v201_v4  ;;  %494 = vmatprep.subr.mxu1 %v193_v7 }
  0x15   : > { %483 = vmatprep.subr.mxu0 %v200_v6  ;;  %495 = vmatpush3.msra.mxu1 %v193_v7 }
  0x18   : > { %484 = vmatpush3.xpose.msra.mxu0 %v200_v6 }
  0x19   : > { %485 = vmatprep.subr.mxu0 %v199_v9 }
  0x1c   : > { %486 = vmatpush3.xpose.msra.mxu0 %v199_v9 }
  0x1f   : > { %488 = vmatmul.mubr.f32.vlgmr.msra.gmra.mxu0 %v192_v10 }
  0xdf   : > { %v489_v11 = vpop.f32.mrf.mxu0 }
  0xe0   : > { %v278_v14 = vmul.f32 0.088388346, %v489_v11 }
  0xe1   : > { %v268_v12 = vpop.f32.mrf.mxu0 }
  0xe2   : > { %v277_v13 = vmul.f32 0.088388346, %v268_v12  ;;  %v283_v16 = vsel %vm279_vm0, %v278_v14, -inf }
  0xe4   : > { %v280_v15 = vsel %vm279_vm0, %v277_v13, -inf }
  0xe5   : > { %281 = vmax.xlane.f32.xlu0 %v280_v15 }
  0xe9   : > { %284 = vmax.xlane.f32.xlu0 %v283_v16 }
 0x16e   : > { %v282_v17 = vpop.xlane.xlu0 %281 }
 0x16f   : > { %v286_v18 = vsub.f32 %v277_v13, %v282_v17 }
 0x171   : > { %v288_v19 = vmul.f32 1.442695, %v286_v18 }
 0x172   : > { %v285_v20 = vpop.xlane.xlu0 %284 }
 0x173   : > { %508 = vpow2.f32 %v288_v19  ;;  %v287_v21 = vsub.f32 %v278_v14, %v285_v20 }
 0x175   : > { %v290_v22 = vmul.f32 1.442695, %v287_v21 }
 0x177   : > { %510 = vpow2.f32 %v290_v22 }
 0x180   : > { %v509_v23 = vpop.eup %508 }
 0x181   : > { %v292_v24 = vsel %vm279_vm0, %v509_v23, 0.0 }
 0x182   : > { %293 = vadd.xlane.f32.xlu1 %v292_v24 }
 0x184   : > { %v511_v25 = vpop.eup %510 }
 0x185   : > { %v295_v26 = vsel %vm279_vm0, %v511_v25, 0.0 }
 0x186   : > { %296 = vadd.xlane.f32.xlu1 %v295_v26 }
 0x20b   : > { %v294_v27 = vpop.xlane.xlu1 %293 }
 0x20c   : > { %512 = vrcp.f32 %v294_v27 }
 0x20f   : > { %v297_v28 = vpop.xlane.xlu1 %296 }
 0x210   : > { %514 = vrcp.f32 %v297_v28 }
 0x219   : > { %v513_v29 = vpop.eup %512 }
 0x21a   : > { %v299_v30 = vmul.f32 %v513_v29, %v509_v23 }
 0x21c   : > { %496 = vmatprep.mubr.msk.f32.mxu1 %vm279_vm0, %v299_v30 }
 0x21d   : > { %v515_v31 = vpop.eup %514 }
 0x21e   : > { %v301_v32 = vmul.f32 %v515_v31, %v511_v25 }
 0x220   : > { %497 = vmatmul.mubr.msk.f32.vlgmr.msra.gmra.mxu1 %vm279_vm0, %v301_v32 }
 0x2e0   : > { %v498_v33 = vpop.f32.mrf.mxu1 }
 0x2e1   : > { %388 = vst [vmem:[%s190_s28 + $0x8] sm:$0xff] %v498_v33 }
 0x2e2   : > { %v378_v34 = vpop.f32.mrf.mxu1 }
 0x2e3   : > { %387 = vst [vmem:[%s190_s28] sm:$0xff] %v378_v34 }
 0x2e4 PF: > { %s13_s12 = sadd.s32 1, %s522_s12  }
 0x2e5   : > { %p10_p4 = scmp.ge.s32.totalorder %s13_s12, 4  }
 0x2e7   :  { %12 = sbr.rel (!%p10_p4) target bundleno = 1 (0x1), region = 65 }

// kernel: hcat_forward.15
= control target key start
LH: loop header
LB: loop body
LE: loop exit
PB: predicated region body
PF: predicated region fallthrough
CT: control target
= control target key end

     0   :  { %vm382_vm0 = vcmask 15360   ;;  %vm743_vm1 = vcmask 31744   ;;  %s1563_s1 = inlined_call_operand.vmem [shape: f32[128,128], index: 1, kind: input, shape index: {}]   ;;  %s1564_s0 = inlined_call_operand.vmem [shape: f32[32,128], index: 0, kind: input, shape index: {}]   ;;  %s1565_s3 = inlined_call_operand.vmem [shape: f32[128,128], index: 3, kind: input, shape index: {}]   ;;  %s1566_s7 = inlined_call_operand.vmem [shape: f32[128,128], index: 7, kind: input, shape index: {}]   ;;  %s1567_s5 = inlined_call_operand.vmem [shape: f32[128,2], index: 5, kind: input, shape index: {}]   ;;  %s1568_s2 = inlined_call_operand.vmem [shape: f32[1,128], index: 2, kind: input, shape index: {}]   ;;  %s1569_s9 = inlined_call_operand.vmem [shape: f32[128,128], index: 9, kind: input, shape index: {}]   ;;  %s1570_s4 = inlined_call_operand.vmem [shape: f32[1,128], index: 4, kind: input, shape index: {}]   ;;  %s1571_s8 = inlined_call_operand.vmem [shape: f32[1,128], index: 8, kind: input, shape index: {}]   ;;  %s1572_s11 = inlined_call_operand.vmem [shape: f32[128,4], index: 11, kind: input, shape index: {}]   ;;  %s1573_s6 = inlined_call_operand.vmem [shape: f32[1,2], index: 6, kind: input, shape index: {}]   ;;  %s1574_s13 = inlined_call_operand.vmem [shape: f32[32,2], index: 13, kind: output, shape index: {0}]   ;;  %s1575_s10 = inlined_call_operand.vmem [shape: f32[1,128], index: 10, kind: input, shape index: {}]   ;;  %s1576_s12 = inlined_call_operand.vmem [shape: f32[1,4], index: 12, kind: input, shape index: {}]   ;;  %s1577_s14 = inlined_call_operand.vmem [shape: f32[32,4], index: 14, kind: output, shape index: {1}]  }
   0x1   :  { %v65_v0 = vld [vmem:[%s1563_s1 + $0x78] sm:$0xff]  ;;  %v64_v1 = vld [vmem:[%s1563_s1 + $0x70] sm:$0xff]  ;;  %v63_v2 = vld [vmem:[%s1563_s1 + $0x68] sm:$0xff] }
   0x2   :  { %886 = vmatprep.subr.mxu0 %v65_v0  ;;  %v62_v3 = vld [vmem:[%s1563_s1 + $0x60] sm:$0xff]  ;;  %v61_v5 = vld [vmem:[%s1563_s1 + $0x58] sm:$0xff]  ;;  %v176_v7 = vld [vmem:[%s1565_s3 + $0x70] sm:$0xff] }
   0x3   :  { %887 = vmatpush3.msra.mxu0 %v65_v0  ;;  %v1220_v4 = vld [vmem:[%s1564_s0] sm:$0xff]  ;;  %v177_v6 = vld [vmem:[%s1565_s3 + $0x78] sm:$0xff]  ;;  %v60_v8 = vld [vmem:[%s1563_s1 + $0x50] sm:$0xff] }
   0x4   :  { %888 = vmatprep.subr.mxu0 %v64_v1  ;;  %918 = vmatprep.mubr.f32.mxu0 %v1220_v4  ;;  %v175_v9 = vld [vmem:[%s1565_s3 + $0x68] sm:$0xff]  ;;  %v174_v11 = vld [vmem:[%s1565_s3 + $0x60] sm:$0xff]  ;;  %v173_v13 = vld [vmem:[%s1565_s3 + $0x58] sm:$0xff] }
   0x5   :  { %889 = vmatpush3.msra.mxu0 %v64_v1  ;;  %924 = vmatprep.subr.mxu1 %v177_v6  ;;  %v59_v10 = vld [vmem:[%s1563_s1 + $0x48] sm:$0xff]  ;;  %v58_v12 = vld [vmem:[%s1563_s1 + $0x40] sm:$0xff]  ;;  %v57_v14 = vld [vmem:[%s1563_s1 + $0x38] sm:$0xff] }
   0x6   :  { %890 = vmatprep.subr.mxu0 %v63_v2  ;;  %925 = vmatpush3.msra.mxu1 %v177_v6  ;;  %v172_v15 = vld [vmem:[%s1565_s3 + $0x50] sm:$0xff]  ;;  %v171_v17 = vld [vmem:[%s1565_s3 + $0x48] sm:$0xff]  ;;  %v170_v19 = vld [vmem:[%s1565_s3 + $0x40] sm:$0xff] }
   0x7   :  { %891 = vmatpush3.msra.mxu0 %v63_v2  ;;  %926 = vmatprep.subr.mxu1 %v176_v7  ;;  %v56_v16 = vld [vmem:[%s1563_s1 + $0x30] sm:$0xff]  ;;  %v55_v18 = vld [vmem:[%s1563_s1 + $0x28] sm:$0xff]  ;;  %v54_v20 = vld [vmem:[%s1563_s1 + $0x20] sm:$0xff] }
   0x8   :  { %892 = vmatprep.subr.mxu0 %v62_v3  ;;  %927 = vmatpush3.msra.mxu1 %v176_v7  ;;  %v169_v21 = vld [vmem:[%s1565_s3 + $0x38] sm:$0xff]  ;;  %v168_v23 = vld [vmem:[%s1565_s3 + $0x30] sm:$0xff]  ;;  %v167_v25 = vld [vmem:[%s1565_s3 + $0x28] sm:$0xff] }
   0x9   :  { %893 = vmatpush3.msra.mxu0 %v62_v3  ;;  %928 = vmatprep.subr.mxu1 %v175_v9  ;;  %v53_v22 = vld [vmem:[%s1563_s1 + $0x18] sm:$0xff]  ;;  %v52_v24 = vld [vmem:[%s1563_s1 + $0x10] sm:$0xff]  ;;  %v51_v26 = vld [vmem:[%s1563_s1 + $0x8] sm:$0xff] }
   0xa   :  { %894 = vmatprep.subr.mxu0 %v61_v5  ;;  %929 = vmatpush3.msra.mxu1 %v175_v9  ;;  %v166_v27 = vld [vmem:[%s1565_s3 + $0x20] sm:$0xff]  ;;  %v165_v29 = vld [vmem:[%s1565_s3 + $0x18] sm:$0xff]  ;;  %v1301_v30 = vld [vmem:[%s1564_s0 + $0x8] sm:$0xff] }
   0xb   :  { %895 = vmatpush3.msra.mxu0 %v61_v5  ;;  %930 = vmatprep.subr.mxu1 %v174_v11  ;;  %v50_v28 = vld [vmem:[%s1563_s1] sm:$0xff]  ;;  %v1306_v31 = vld [vmem:[%s1564_s0 + $0x10] sm:$0xff]  ;;  %v1313_v32 = vld [vmem:[%s1564_s0 + $0x18] sm:$0xff] }
   0xc   :  { %896 = vmatprep.subr.mxu0 %v60_v8  ;;  %931 = vmatpush3.msra.mxu1 %v174_v11  ;;  %v164_v33 = vld [vmem:[%s1565_s3 + $0x10] sm:$0xff]  ;;  %v163_v34 = vld [vmem:[%s1565_s3 + $0x8] sm:$0xff]  ;;  %v162_v35 = vld [vmem:[%s1565_s3] sm:$0xff] }
   0xd   :  { %897 = vmatpush3.msra.mxu0 %v60_v8  ;;  %932 = vmatprep.subr.mxu1 %v173_v13  ;;  %v402_v36 = vld [vmem:[%s1566_s7 + $0x78] sm:$0xff]  ;;  %v288_v38 = vld [vmem:[%s1567_s5 + $0x70] sm:$0xff]  ;;  %v287_v39 = vld [vmem:[%s1567_s5 + $0x68] sm:$0xff] }
   0xe   :  { %898 = vmatprep.subr.mxu0 %v59_v10  ;;  %933 = vmatpush3.msra.mxu1 %v173_v13  ;;  %v289_v37 = vld [vmem:[%s1567_s5 + $0x78] sm:$0xff]  ;;  %v286_v40 = vld [vmem:[%s1567_s5 + $0x60] sm:$0xff]  ;;  %v284_v42 = vld [vmem:[%s1567_s5 + $0x50] sm:$0xff] }
   0xf   :  { %899 = vmatpush3.msra.mxu0 %v59_v10  ;;  %934 = vmatprep.subr.mxu1 %v172_v15  ;;  %v285_v41 = vld [vmem:[%s1567_s5 + $0x58] sm:$0xff]  ;;  %v283_v43 = vld [vmem:[%s1567_s5 + $0x48] sm:$0xff]  ;;  %v282_v44 = vld [vmem:[%s1567_s5 + $0x40] sm:$0xff] }
  0x10   :  { %900 = vmatprep.subr.mxu0 %v58_v12  ;;  %935 = vmatpush3.msra.mxu1 %v172_v15  ;;  %v281_v45 = vld [vmem:[%s1567_s5 + $0x38] sm:$0xff]  ;;  %v280_v46 = vld [vmem:[%s1567_s5 + $0x30] sm:$0xff]  ;;  %v279_v47 = vld [vmem:[%s1567_s5 + $0x28] sm:$0xff] }
  0x11   :  { %901 = vmatpush3.msra.mxu0 %v58_v12  ;;  %936 = vmatprep.subr.mxu1 %v171_v17  ;;  %v278_v48 = vld [vmem:[%s1567_s5 + $0x20] sm:$0xff]  ;;  %v277_v49 = vld [vmem:[%s1567_s5 + $0x18] sm:$0xff]  ;;  %v401_v60 = vld [vmem:[%s1566_s7 + $0x70] sm:$0xff] }
  0x12   :  { %902 = vmatprep.subr.mxu0 %v57_v14  ;;  %937 = vmatpush3.msra.mxu1 %v171_v17  ;;  %v756_v50 = vld [vmem:[%s1568_s2] ss:$0 sm:$0xff]  ;;  %v400_v63 = vld [vmem:[%s1566_s7 + $0x68] sm:$0xff]  ;;  %v398_v2 = vld [vmem:[%s1566_s7 + $0x58] sm:$0xff] }
  0x13   :  { %903 = vmatpush3.msra.mxu0 %v57_v14  ;;  %938 = vmatprep.subr.mxu1 %v170_v19  ;;  %v399_v1 = vld [vmem:[%s1566_s7 + $0x60] sm:$0xff]  ;;  %v397_v3 = vld [vmem:[%s1566_s7 + $0x50] sm:$0xff]  ;;  %v396_v5 = vld [vmem:[%s1566_s7 + $0x48] sm:$0xff] }
  0x14   :  { %904 = vmatprep.subr.mxu0 %v56_v16  ;;  %939 = vmatpush3.msra.mxu1 %v170_v19  ;;  %v395_v6 = vld [vmem:[%s1566_s7 + $0x40] sm:$0xff]  ;;  %v393_v7 = vld [vmem:[%s1566_s7 + $0x30] sm:$0xff]  ;;  %v392_v8 = vld [vmem:[%s1566_s7 + $0x28] sm:$0xff] }
  0x15   :  { %905 = vmatpush3.msra.mxu0 %v56_v16  ;;  %940 = vmatprep.subr.mxu1 %v169_v21  ;;  %v391_v9 = vld [vmem:[%s1566_s7 + $0x20] sm:$0xff]  ;;  %v390_v10 = vld [vmem:[%s1566_s7 + $0x18] sm:$0xff]  ;;  %v389_v11 = vld [vmem:[%s1566_s7 + $0x10] sm:$0xff] }
  0x16   :  { %906 = vmatprep.subr.mxu0 %v55_v18  ;;  %941 = vmatpush3.msra.mxu1 %v169_v21  ;;  %v388_v12 = vld [vmem:[%s1566_s7 + $0x8] sm:$0xff]  ;;  %v387_v13 = vld [vmem:[%s1566_s7] sm:$0xff]  ;;  %v276_v14 = vld [vmem:[%s1567_s5 + $0x10] sm:$0xff] }
  0x17   :  { %907 = vmatpush3.msra.mxu0 %v55_v18  ;;  %942 = vmatprep.subr.mxu1 %v168_v23  ;;  %v275_v15 = vld [vmem:[%s1567_s5 + $0x8] sm:$0xff]  ;;  %v274_v16 = vld [vmem:[%s1567_s5] sm:$0xff]  ;;  %v514_v17 = vld [vmem:[%s1569_s9 + $0x78] sm:$0xff] }
  0x18   :  { %908 = vmatprep.subr.mxu0 %v54_v20  ;;  %943 = vmatpush3.msra.mxu1 %v168_v23  ;;  %v757_v18 = vld [vmem:[%s1570_s4] ss:$0 sm:$0xff] }
  0x19   :  { %909 = vmatpush3.msra.mxu0 %v54_v20  ;;  %944 = vmatprep.subr.mxu1 %v167_v25 }
  0x1a   :  { %910 = vmatprep.subr.mxu0 %v53_v22  ;;  %945 = vmatpush3.msra.mxu1 %v167_v25 }
  0x1b   :  { %911 = vmatpush3.msra.mxu0 %v53_v22  ;;  %946 = vmatprep.subr.mxu1 %v166_v27 }
  0x1c   :  { %912 = vmatprep.subr.mxu0 %v52_v24  ;;  %947 = vmatpush3.msra.mxu1 %v166_v27 }
  0x1d   :  { %913 = vmatpush3.msra.mxu0 %v52_v24  ;;  %948 = vmatprep.subr.mxu1 %v165_v29 }
  0x1e   :  { %914 = vmatprep.subr.mxu0 %v51_v26  ;;  %949 = vmatpush3.msra.mxu1 %v165_v29 }
  0x1f   :  { %915 = vmatpush3.msra.mxu0 %v51_v26  ;;  %950 = vmatprep.subr.mxu1 %v164_v33 }
  0x20   :  { %916 = vmatprep.subr.mxu0 %v50_v28  ;;  %951 = vmatpush3.msra.mxu1 %v164_v33  ;;  %v511_v33 = vld [vmem:[%s1569_s9 + $0x60] sm:$0xff] }
  0x21   :  { %917 = vmatpush3.msra.mxu0 %v50_v28  ;;  %952 = vmatprep.subr.mxu1 %v163_v34  ;;  %v513_v28 = vld [vmem:[%s1569_s9 + $0x70] sm:$0xff] }
  0x22   :  { %919 = vmatmul.mubr.f32.vlgmr.msra.gmra.mxu0 %v1301_v30  ;;  %953 = vmatpush3.msra.mxu1 %v163_v34  ;;  %v510_v34 = vld [vmem:[%s1569_s9 + $0x58] sm:$0xff] }
  0x23   :  { %921 = vmatprep.mubr.f32.mxu0 %v1306_v31  ;;  %954 = vmatprep.subr.mxu1 %v162_v35 }
  0x24   :  { %955 = vmatpush3.msra.mxu1 %v162_v35  ;;  %962 = vmatprep.subr.mxu0 %v289_v37  ;;  %v509_v35 = vld [vmem:[%s1569_s9 + $0x50] sm:$0xff] }
  0x25   :  { %1000 = vmatprep.subr.mxu1 %v402_v36  ;;  %963 = vmatpush3.msra.mxu0 %v289_v37  ;;  %v507_v37 = vld [vmem:[%s1569_s9 + $0x40] sm:$0xff] }
  0x26   :  { %922 = vmatmul.mubr.f32.gmra.mxu0 %v1313_v32  ;;  %964 = vmatprep.subr.mxu0 %v288_v38 }
  0x27   :  { %965 = vmatpush3.msra.mxu0 %v288_v38  ;;  %v506_v38 = vld [vmem:[%s1569_s9 + $0x38] sm:$0xff] }
  0x28   :  { %966 = vmatprep.subr.mxu0 %v287_v39 }
  0x29   :  { %967 = vmatpush3.msra.mxu0 %v287_v39  ;;  %v505_v39 = vld [vmem:[%s1569_s9 + $0x30] sm:$0xff] }
  0x2a   :  { %968 = vmatprep.subr.mxu0 %v286_v40 }
  0x2b   :  { %969 = vmatpush3.msra.mxu0 %v286_v40  ;;  %v504_v40 = vld [vmem:[%s1569_s9 + $0x28] sm:$0xff] }
  0x2c   :  { %970 = vmatprep.subr.mxu0 %v285_v41 }
  0x2d   :  { %971 = vmatpush3.msra.mxu0 %v285_v41  ;;  %v503_v41 = vld [vmem:[%s1569_s9 + $0x20] sm:$0xff] }
  0x2e   :  { %972 = vmatprep.subr.mxu0 %v284_v42 }
  0x2f   :  { %973 = vmatpush3.msra.mxu0 %v284_v42  ;;  %v502_v42 = vld [vmem:[%s1569_s9 + $0x18] sm:$0xff] }
  0x30   :  { %974 = vmatprep.subr.mxu0 %v283_v43 }
  0x31   :  { %975 = vmatpush3.msra.mxu0 %v283_v43  ;;  %v759_v43 = vld [vmem:[%s1571_s8] ss:$0 sm:$0xff] }
  0x32   :  { %976 = vmatprep.subr.mxu0 %v282_v44 }
  0x33   :  { %977 = vmatpush3.msra.mxu0 %v282_v44  ;;  %v501_v44 = vld [vmem:[%s1569_s9 + $0x10] sm:$0xff] }
  0x34   :  { %978 = vmatprep.subr.mxu0 %v281_v45 }
  0x35   :  { %979 = vmatpush3.msra.mxu0 %v281_v45 }
  0x36   :  { %980 = vmatprep.subr.mxu0 %v280_v46 }
  0x37   :  { %981 = vmatpush3.msra.mxu0 %v280_v46  ;;  %v500_v46 = vld [vmem:[%s1569_s9 + $0x8] sm:$0xff] }
  0x38   :  { %982 = vmatprep.subr.mxu0 %v279_v47 }
  0x39   :  { %983 = vmatpush3.msra.mxu0 %v279_v47 }
  0x3a   :  { %984 = vmatprep.subr.mxu0 %v278_v48 }
  0x3b   :  { %985 = vmatpush3.msra.mxu0 %v278_v48 }
  0x3c   :  { %986 = vmatprep.subr.mxu0 %v277_v49 }
  0x3d   :  { %987 = vmatpush3.msra.mxu0 %v277_v49 }
  0x3e   :  { %988 = vmatprep.subr.mxu0 %v276_v14 }
  0x3f   :  { %989 = vmatpush3.msra.mxu0 %v276_v14 }
  0x40   :  { %990 = vmatprep.subr.mxu0 %v275_v15 }
  0x41   :  { %991 = vmatpush3.msra.mxu0 %v275_v15 }
  0x42   :  { %992 = vmatprep.subr.mxu0 %v274_v16 }
  0x43   :  { %993 = vmatpush3.msra.mxu0 %v274_v16 }
  0x44   :  { %1038 = vmatprep.subr.mxu0 %v514_v17 }
  0xe2   :  { %v920_v51 = vpop.f32.mrf.mxu0 }
  0xe3   :  { %v145_v52 = vadd.f32 %v920_v51, %v756_v50 }
  0xe4   :  { %v139_v53 = vpop.f32.mrf.mxu0 }
  0xe5   :  { %v140_v54 = vadd.f32 %v756_v50, %v139_v53  ;;  %v159_v58 = vmax.f32 %v145_v52, 0.0 }
  0xe6   :  { %v923_v55 = vpop.f32.mrf.mxu0 }
  0xe7   :  { %v158_v56 = vmax.f32 %v140_v54, 0.0  ;;  %v155_v57 = vadd.f32 %v923_v55, %v756_v50 }
  0xe8   :  { %v149_v59 = vpop.f32.mrf.mxu0 }
  0xe9   :  { %956 = vmatprep.mubr.f32.mxu1 %v158_v56  ;;  %v150_v61 = vadd.f32 %v756_v50, %v149_v59  ;;  %v161_v62 = vmax.f32 %v155_v57, 0.0  ;;  %v499_v50 = vld [vmem:[%s1569_s9] sm:$0xff]  ;;  %v626_v59 = vld [vmem:[%s1572_s11 + $0x78] sm:$0xff] }
  0xea   :  { %957 = vmatmul.mubr.f32.vlgmr.msra.gmra.mxu1 %v159_v58 }
  0xeb   :  { %1001 = vmatpush3.msra.mxu1 %v402_v36  ;;  %v160_v0 = vmax.f32 %v150_v61, 0.0  ;;  %v508_v36 = vld [vmem:[%s1569_s9 + $0x48] sm:$0xff] }
  0xec   :  { %1002 = vmatprep.subr.mxu1 %v401_v60  ;;  %v624_v61 = vld [vmem:[%s1572_s11 + $0x68] sm:$0xff] }
  0xed   :  { %1003 = vmatpush3.msra.mxu1 %v401_v60  ;;  %959 = vmatprep.mubr.f32.mxu1 %v160_v0  ;;  %v625_v60 = vld [vmem:[%s1572_s11 + $0x70] sm:$0xff] }
  0xee   :  { %1004 = vmatprep.subr.mxu1 %v400_v63  ;;  %960 = vmatmul.mubr.f32.gmra.mxu1 %v161_v62  ;;  %v623_v62 = vld [vmem:[%s1572_s11 + $0x60] sm:$0xff]  ;;  %v621_v0 = vld [vmem:[%s1572_s11 + $0x50] sm:$0xff] }
  0xef   :  { %1005 = vmatpush3.msra.mxu1 %v400_v63  ;;  %1032 = vmatprep.mubr.f32.mxu1 %v1220_v4  ;;  %v394_v4 = vld [vmem:[%s1566_s7 + $0x38] sm:$0xff] }
  0xf0   :  { %1006 = vmatprep.subr.mxu1 %v399_v1  ;;  %v622_v63 = vld [vmem:[%s1572_s11 + $0x58] sm:$0xff] }
  0xf1   :  { %1007 = vmatpush3.msra.mxu1 %v399_v1  ;;  %v620_v1 = vld [vmem:[%s1572_s11 + $0x48] sm:$0xff] }
  0xf2   :  { %1008 = vmatprep.subr.mxu1 %v398_v2 }
  0xf3   :  { %1009 = vmatpush3.msra.mxu1 %v398_v2  ;;  %v619_v2 = vld [vmem:[%s1572_s11 + $0x40] sm:$0xff] }
  0xf4   :  { %1010 = vmatprep.subr.mxu1 %v397_v3 }
  0xf5   :  { %1011 = vmatpush3.msra.mxu1 %v397_v3  ;;  %v618_v3 = vld [vmem:[%s1572_s11 + $0x38] sm:$0xff] }
  0xf6   :  { %1012 = vmatprep.subr.mxu1 %v396_v5 }
  0xf7   :  { %1013 = vmatpush3.msra.mxu1 %v396_v5  ;;  %v617_v5 = vld [vmem:[%s1572_s11 + $0x30] sm:$0xff] }
  0xf8   :  { %1014 = vmatprep.subr.mxu1 %v395_v6 }
  0xf9   :  { %1015 = vmatpush3.msra.mxu1 %v395_v6  ;;  %v616_v6 = vld [vmem:[%s1572_s11 + $0x28] sm:$0xff] }
  0xfa   :  { %1016 = vmatprep.subr.mxu1 %v394_v4 }
  0xfb   :  { %1017 = vmatpush3.msra.mxu1 %v394_v4  ;;  %v615_v4 = vld [vmem:[%s1572_s11 + $0x20] sm:$0xff] }
  0xfc   :  { %1018 = vmatprep.subr.mxu1 %v393_v7 }
  0xfd   :  { %1019 = vmatpush3.msra.mxu1 %v393_v7  ;;  %v614_v7 = vld [vmem:[%s1572_s11 + $0x18] sm:$0xff] }
  0xfe   :  { %1020 = vmatprep.subr.mxu1 %v392_v8 }
  0xff   :  { %1021 = vmatpush3.msra.mxu1 %v392_v8  ;;  %v613_v8 = vld [vmem:[%s1572_s11 + $0x10] sm:$0xff] }
 0x100   :  { %1022 = vmatprep.subr.mxu1 %v391_v9 }
 0x101   :  { %1023 = vmatpush3.msra.mxu1 %v391_v9  ;;  %v612_v9 = vld [vmem:[%s1572_s11 + $0x8] sm:$0xff] }
 0x102   :  { %1024 = vmatprep.subr.mxu1 %v390_v10 }
 0x103   :  { %1025 = vmatpush3.msra.mxu1 %v390_v10  ;;  %v611_v10 = vld [vmem:[%s1572_s11] sm:$0xff] }
 0x104   :  { %1026 = vmatprep.subr.mxu1 %v389_v11 }
 0x105   :  { %1027 = vmatpush3.msra.mxu1 %v389_v11  ;;  %v758_v11 = vld [vmem:[%s1573_s6] ss:$0 sm:$0xff] }
 0x106   :  { %1028 = vmatprep.subr.mxu1 %v388_v12 }
 0x107   :  { %1029 = vmatpush3.msra.mxu1 %v388_v12 }
 0x108   :  { %1030 = vmatprep.subr.mxu1 %v387_v13 }
 0x109   :  { %1031 = vmatpush3.msra.mxu1 %v387_v13 }
 0x10a   :  { %1033 = vmatmul.mubr.f32.vlgmr.msra.gmra.mxu1 %v1301_v30  ;;  %1076 = vmatprep.subr.mxu1 %v626_v59 }
 0x10b   :  { %1035 = vmatprep.mubr.f32.mxu1 %v1306_v31  ;;  %v512_v31 = vld [vmem:[%s1569_s9 + $0x68] sm:$0xff]  ;;  %1077 = vmatpush3.msra.mxu1 %v626_v59 }
 0x10c   :  { %1078 = vmatprep.subr.mxu1 %v625_v60 }
 0x10d   :  { %1079 = vmatpush3.msra.mxu1 %v625_v60 }
 0x10e   :  { %1036 = vmatmul.mubr.f32.gmra.mxu1 %v1313_v32  ;;  %1080 = vmatprep.subr.mxu1 %v624_v61 }
 0x10f   :  { %1081 = vmatpush3.msra.mxu1 %v624_v61 }
 0x110   :  { %1082 = vmatprep.subr.mxu1 %v623_v62 }
 0x111   :  { %1083 = vmatpush3.msra.mxu1 %v623_v62 }
 0x112   :  { %1084 = vmatprep.subr.mxu1 %v622_v63 }
 0x113   :  { %1085 = vmatpush3.msra.mxu1 %v622_v63 }
 0x114   :  { %1086 = vmatprep.subr.mxu1 %v621_v0 }
 0x115   :  { %1087 = vmatpush3.msra.mxu1 %v621_v0 }
 0x116   :  { %1088 = vmatprep.subr.mxu1 %v620_v1 }
 0x117   :  { %1089 = vmatpush3.msra.mxu1 %v620_v1 }
 0x118   :  { %1090 = vmatprep.subr.mxu1 %v619_v2 }
 0x119   :  { %1091 = vmatpush3.msra.mxu1 %v619_v2 }
 0x11a   :  { %1092 = vmatprep.subr.mxu1 %v618_v3 }
 0x11b   :  { %1093 = vmatpush3.msra.mxu1 %v618_v3 }
 0x11c   :  { %1094 = vmatprep.subr.mxu1 %v617_v5 }
 0x11d   :  { %1095 = vmatpush3.msra.mxu1 %v617_v5 }
 0x11e   :  { %1096 = vmatprep.subr.mxu1 %v616_v6 }
 0x11f   :  { %1097 = vmatpush3.msra.mxu1 %v616_v6 }
 0x120   :  { %1098 = vmatprep.subr.mxu1 %v615_v4 }
 0x121   :  { %1099 = vmatpush3.msra.mxu1 %v615_v4 }
 0x122   :  { %1100 = vmatprep.subr.mxu1 %v614_v7 }
 0x123   :  { %1101 = vmatpush3.msra.mxu1 %v614_v7 }
 0x124   :  { %1102 = vmatprep.subr.mxu1 %v613_v8 }
 0x125   :  { %1103 = vmatpush3.msra.mxu1 %v613_v8 }
 0x126   :  { %1104 = vmatprep.subr.mxu1 %v612_v9 }
 0x127   :  { %1105 = vmatpush3.msra.mxu1 %v612_v9 }
 0x128   :  { %1106 = vmatprep.subr.mxu1 %v611_v10 }
 0x129   :  { %1107 = vmatpush3.msra.mxu1 %v611_v10 }
 0x1aa   :  { %v958_v19 = vpop.f32.mrf.mxu1 }
 0x1ab   :  { %v257_v20 = vadd.f32 %v958_v19, %v757_v18 }
 0x1ac   :  { %v251_v21 = vpop.f32.mrf.mxu1 }
 0x1ad   :  { %v252_v22 = vadd.f32 %v757_v18, %v251_v21  ;;  %v271_v26 = vmax.f32 %v257_v20, 0.0  ;;  %v760_v20 = vld [vmem:[%s1575_s10] ss:$0 sm:$0xff] }
 0x1ae   :  { %v961_v23 = vpop.f32.mrf.mxu1 }
 0x1af   :  { %v270_v24 = vmax.f32 %v252_v22, 0.0  ;;  %v267_v25 = vadd.f32 %v961_v23, %v757_v18 }
 0x1b0   :  { %v261_v27 = vpop.f32.mrf.mxu1 }
 0x1b1   :  { %994 = vmatprep.mubr.f32.mxu0 %v270_v24  ;;  %v262_v29 = vadd.f32 %v757_v18, %v261_v27  ;;  %v273_v30 = vmax.f32 %v267_v25, 0.0 }
 0x1b2   :  { %995 = vmatmul.mubr.f32.vlgmr.msra.gmra.mxu0 %v271_v26 }
 0x1b3   :  { %1039 = vmatpush3.msra.mxu0 %v514_v17  ;;  %v272_v32 = vmax.f32 %v262_v29, 0.0 }
 0x1b4   :  { %1040 = vmatprep.subr.mxu0 %v513_v28 }
 0x1b5   :  { %1041 = vmatpush3.msra.mxu0 %v513_v28  ;;  %997 = vmatprep.mubr.f32.mxu0 %v272_v32 }
 0x1b6   :  { %1042 = vmatprep.subr.mxu0 %v512_v31  ;;  %998 = vmatmul.mubr.f32.gmra.mxu0 %v273_v30 }
 0x1b7   :  { %1043 = vmatpush3.msra.mxu0 %v512_v31 }
 0x1b8   :  { %1044 = vmatprep.subr.mxu0 %v511_v33 }
 0x1b9   :  { %1045 = vmatpush3.msra.mxu0 %v511_v33  ;;  %v761_v33 = vld [vmem:[%s1576_s12] ss:$0 sm:$0xff] }
 0x1ba   :  { %1046 = vmatprep.subr.mxu0 %v510_v34 }
 0x1bb   :  { %1047 = vmatpush3.msra.mxu0 %v510_v34 }
 0x1bc   :  { %1048 = vmatprep.subr.mxu0 %v509_v35 }
 0x1bd   :  { %1049 = vmatpush3.msra.mxu0 %v509_v35 }
 0x1be   :  { %1050 = vmatprep.subr.mxu0 %v508_v36 }
 0x1bf   :  { %1051 = vmatpush3.msra.mxu0 %v508_v36 }
 0x1c0   :  { %1052 = vmatprep.subr.mxu0 %v507_v37 }
 0x1c1   :  { %1053 = vmatpush3.msra.mxu0 %v507_v37 }
 0x1c2   :  { %1054 = vmatprep.subr.mxu0 %v506_v38 }
 0x1c3   :  { %1055 = vmatpush3.msra.mxu0 %v506_v38 }
 0x1c4   :  { %1056 = vmatprep.subr.mxu0 %v505_v39 }
 0x1c5   :  { %1057 = vmatpush3.msra.mxu0 %v505_v39 }
 0x1c6   :  { %1058 = vmatprep.subr.mxu0 %v504_v40 }
 0x1c7   :  { %1059 = vmatpush3.msra.mxu0 %v504_v40 }
 0x1c8   :  { %1060 = vmatprep.subr.mxu0 %v503_v41 }
 0x1c9   :  { %1061 = vmatpush3.msra.mxu0 %v503_v41 }
 0x1ca   :  { %v1034_v45 = vpop.f32.mrf.mxu1  ;;  %1062 = vmatprep.subr.mxu0 %v502_v42 }
 0x1cb   :  { %1063 = vmatpush3.msra.mxu0 %v502_v42  ;;  %v482_v47 = vadd.f32 %v1034_v45, %v759_v43 }
 0x1cc   :  { %v476_v48 = vpop.f32.mrf.mxu1  ;;  %1064 = vmatprep.subr.mxu0 %v501_v44 }
 0x1cd   :  { %v477_v49 = vadd.f32 %v759_v43, %v476_v48  ;;  %1065 = vmatpush3.msra.mxu0 %v501_v44  ;;  %v496_v53 = vmax.f32 %v482_v47, 0.0 }
 0x1ce   :  { %v1037_v51 = vpop.f32.mrf.mxu1  ;;  %1066 = vmatprep.subr.mxu0 %v500_v46 }
 0x1cf   :  { %v495_v52 = vmax.f32 %v477_v49, 0.0  ;;  %1067 = vmatpush3.msra.mxu0 %v500_v46  ;;  %v492_v54 = vadd.f32 %v1037_v51, %v759_v43 }
 0x1d0   :  { %v486_v55 = vpop.f32.mrf.mxu1  ;;  %1068 = vmatprep.subr.mxu0 %v499_v50 }
 0x1d1   :  { %v487_v56 = vadd.f32 %v759_v43, %v486_v55  ;;  %1069 = vmatpush3.msra.mxu0 %v499_v50  ;;  %1070 = vmatprep.mubr.f32.mxu0 %v495_v52  ;;  %v498_v58 = vmax.f32 %v492_v54, 0.0 }
 0x1d2   :  { %1071 = vmatmul.mubr.f32.vlgmr.msra.gmra.mxu0 %v496_v53 }
 0x1d3   :  { %v497_v57 = vmax.f32 %v487_v56, 0.0 }
 0x1d5   :  { %1073 = vmatprep.mubr.f32.mxu0 %v497_v57 }
 0x1d6   :  { %1074 = vmatmul.mubr.f32.gmra.mxu0 %v498_v58 }
 0x272   :  { %v996_v12 = vpop.f32.mrf.mxu0 }
 0x273   :  { %v369_v13 = vadd.f32 %v996_v12, %v758_v11 }
 0x274   :  { %v363_v14 = vpop.f32.mrf.mxu0 }
 0x275   :  { %384 = vst.msk [vmem:[%s1574_s13 + $0x8] sm:$0xff] %vm382_vm0, %v369_v13  ;;  %v364_v15 = vadd.f32 %v758_v11, %v363_v14 }
 0x276   :  { %v999_v16 = vpop.f32.mrf.mxu0 }
 0x277   :  { %383 = vst.msk [vmem:[%s1574_s13] sm:$0xff] %vm382_vm0, %v364_v15  ;;  %v379_v17 = vadd.f32 %v999_v16, %v758_v11 }
 0x278   :  { %v373_v18 = vpop.f32.mrf.mxu0 }
 0x279   :  { %386 = vst.msk [vmem:[%s1574_s13 + $0x18] sm:$0xff] %vm382_vm0, %v379_v17  ;;  %v374_v19 = vadd.f32 %v758_v11, %v373_v18 }
 0x27b   :  { %385 = vst.msk [vmem:[%s1574_s13 + $0x10] sm:$0xff] %vm382_vm0, %v374_v19 }
 0x292   :  { %v1072_v21 = vpop.f32.mrf.mxu0 }
 0x293   :  { %v594_v22 = vadd.f32 %v1072_v21, %v760_v20 }
 0x294   :  { %v588_v23 = vpop.f32.mrf.mxu0 }
 0x295   :  { %v589_v24 = vadd.f32 %v760_v20, %v588_v23  ;;  %v608_v27 = vmax.f32 %v594_v22, 0.0 }
 0x296   :  { %v1075_v25 = vpop.f32.mrf.mxu0 }
 0x297   :  { %v607_v26 = vmax.f32 %v589_v24, 0.0  ;;  %v604_v28 = vadd.f32 %v1075_v25, %v760_v20 }
 0x298   :  { %v598_v29 = vpop.f32.mrf.mxu0 }
 0x299   :  { %v599_v30 = vadd.f32 %v760_v20, %v598_v29  ;;  %1108 = vmatprep.mubr.f32.mxu1 %v607_v26  ;;  %v610_v32 = vmax.f32 %v604_v28, 0.0 }
 0x29a   :  { %1109 = vmatmul.mubr.f32.vlgmr.msra.gmra.mxu1 %v608_v27 }
 0x29b   :  { %v609_v31 = vmax.f32 %v599_v30, 0.0 }
 0x29d   :  { %1111 = vmatprep.mubr.f32.mxu1 %v609_v31 }
 0x29e   :  { %1112 = vmatmul.mubr.f32.gmra.mxu1 %v610_v32 }
 0x35a   :  { %v1110_v34 = vpop.f32.mrf.mxu1 }
 0x35b   :  { %v706_v35 = vadd.f32 %v1110_v34, %v761_v33 }
 0x35c   :  { %v700_v36 = vpop.f32.mrf.mxu1 }
 0x35d   :  { %v763_v37 = vmul.f32 -1.442695, %v706_v35  ;;  %v701_v38 = vadd.f32 %v761_v33, %v700_v36 }
 0x35e   :  { %v1113_v39 = vpop.f32.mrf.mxu1 }
 0x35f   :  { %1114 = vpow2.f32 %v763_v37  ;;  %v762_v40 = vmul.f32 -1.442695, %v701_v38  ;;  %v716_v41 = vadd.f32 %v1113_v39, %v761_v33 }
 0x360   :  { %v710_v42 = vpop.f32.mrf.mxu1 }
 0x361   :  { %1116 = vpow2.f32 %v762_v40  ;;  %v765_v43 = vmul.f32 -1.442695, %v716_v41  ;;  %v711_v44 = vadd.f32 %v761_v33, %v710_v42 }
 0x363   :  { %1118 = vpow2.f32 %v765_v43  ;;  %v764_v45 = vmul.f32 -1.442695, %v711_v44 }
 0x365   :  { %1120 = vpow2.f32 %v764_v45 }
 0x36c   :  { %v1115_v46 = vpop.eup %1114 }
 0x36d   :  { %v732_v47 = vadd.f32 1.0, %v1115_v46 }
 0x36e   :  { %v1117_v48 = vpop.eup %1116 }
 0x36f   :  { %1122 = vrcp.f32 %v732_v47  ;;  %v731_v49 = vadd.f32 1.0, %v1117_v48 }
 0x370   :  { %v1119_v50 = vpop.eup %1118 }
 0x371   :  { %1124 = vrcp.f32 %v731_v49  ;;  %v734_v51 = vadd.f32 1.0, %v1119_v50 }
 0x372   :  { %v1121_v52 = vpop.eup %1120 }
 0x373   :  { %1126 = vrcp.f32 %v734_v51  ;;  %v733_v53 = vadd.f32 1.0, %v1121_v52 }
 0x375   :  { %1128 = vrcp.f32 %v733_v53 }
 0x37c   :  { %v1123_v54 = vpop.eup %1122 }
 0x37d   :  { %745 = vst.msk [vmem:[%s1577_s14 + $0x8] sm:$0xff] %vm743_vm1, %v1123_v54 }
 0x37e   :  { %v1125_v55 = vpop.eup %1124 }
 0x37f   :  { %744 = vst.msk [vmem:[%s1577_s14] sm:$0xff] %vm743_vm1, %v1125_v55 }
 0x380   :  { %v1127_v56 = vpop.eup %1126 }
 0x381   :  { %747 = vst.msk [vmem:[%s1577_s14 + $0x18] sm:$0xff] %vm743_vm1, %v1127_v56 }
 0x382   :  { %v1129_v57 = vpop.eup %1128 }
 0x383   :  { %746 = vst.msk [vmem:[%s1577_s14 + $0x10] sm:$0xff] %vm743_vm1, %v1129_v57 }

</bundles_post_ra>
